<compile_context>
chip_gen: v6e
topology: v6e:2x2x1
jax: 0.10.0
libtpu: 0.0.40
codegen_flags: <defaults>
</compile_context>

<pallas_src>
import functools

import jax
import jax.numpy as jnp
import numpy as np
from jax.experimental import pallas as pl
from jax.experimental.pallas import tpu as pltpu

_BN_EPS = 1e-5
_CP = 128        # lane-dense channel padding (last dim)
_TM2D = 512      # row tile for the 2D (flat-rows) kernels


def _round_up(x, m):
    return (x + m - 1) // m * m


def _pick_vmem_limit():
    # Per-generation scoped-VMEM request: ~3/4 of physical, capped at 96 MiB
    # (=> ~48 MiB on v7x's 64 MiB, 96 MiB on v5e/v6e's 128 MiB).
    try:
        cap = int(pltpu.get_tpu_info().vmem_capacity_bytes)
        if cap <= 0:
            raise ValueError(cap)
    except Exception:  # conservative fallback if the query is unavailable
        cap = 64 * 1024 * 1024
    return int(min(cap * 3 // 4, 96 * 1024 * 1024))


_VMEM_LIMIT = _pick_vmem_limit()


# ------------------------------ Pallas kernels ------------------------------ #
def _conv3x3_s1_kernel(*refs, pre_act, ho, wo, cpi, cpo):
    """3x3 / stride-1 / pad-1 conv with in-kernel im2col (tap accumulation).

    One grid step == one image.  Optionally applies a per-channel affine +
    ReLU (the previous stage's BatchNorm, fused) to the input block before
    the taps are formed; the zero-padding ring is written *after* the
    activation, so boundary semantics match conv(relu(bn(x))) exactly.
    Also emits per-image partial BN statistics from the f32 accumulator.
    """
    if pre_act:
        x_ref, w_ref, s_ref, b_ref, o_ref, st_ref, xpad_ref = refs
    else:
        x_ref, w_ref, o_ref, st_ref, xpad_ref = refs

    xv = x_ref[0]                                         # (ho, wo, cpi) bf16
    if pre_act:
        scale = s_ref[...].reshape(1, 1, cpi)
        shift = b_ref[...].reshape(1, 1, cpi)
        xv = jnp.maximum(xv.astype(jnp.float32) * scale + shift, 0.0)
        xv = xv.astype(jnp.bfloat16)

    # Zero-padded (post-activation) image lives in VMEM scratch.
    xpad_ref[...] = jnp.zeros_like(xpad_ref)
    xpad_ref[1:ho + 1, 1:wo + 1, :] = xv

    acc = None                                            # (ho*wo, cpo) f32
    for kh in range(3):
        for kw in range(3):
            t = kh * 3 + kw
            tap = xpad_ref[kh:kh + ho, kw:kw + wo, :].reshape(ho * wo, cpi)
            part = jnp.dot(tap, w_ref[t * cpi:(t + 1) * cpi, :],
                           preferred_element_type=jnp.float32)
            acc = part if acc is None else acc + part

    o_ref[0] = acc.reshape(ho, wo, cpo).astype(o_ref.dtype)
    st_ref[0] = jnp.concatenate(
        [jnp.sum(acc, axis=0, keepdims=True),
         jnp.sum(acc * acc, axis=0, keepdims=True)], axis=0)


def _matmul_stats_kernel(p_ref, w_ref, o_ref, st_ref):
    """Flat-rows matmul (weight VMEM-resident, no K grid axis) + BN partials."""
    acc = jnp.dot(p_ref[...], w_ref[...], preferred_element_type=jnp.float32)
    o_ref[...] = acc.astype(o_ref.dtype)
    st_ref[0] = jnp.concatenate(
        [jnp.sum(acc, axis=0, keepdims=True),
         jnp.sum(acc * acc, axis=0, keepdims=True)], axis=0)


def _bn_add_relu_kernel(x_ref, s_ref, b_ref, k_ref, ks_ref, kb_ref, o_ref):
    """out = relu(x*scale + shift + skip*skip_scale + skip_shift)."""
    y = x_ref[...].astype(jnp.float32) * s_ref[...] + b_ref[...]
    y = y + k_ref[...].astype(jnp.float32) * ks_ref[...] + kb_ref[...]
    o_ref[...] = jnp.maximum(y, 0.0).astype(o_ref.dtype)


# ------------------------------ kernel wrappers ----------------------------- #
def _conv3x3_s1(x_nhwc, w_mat, pre_scale=None, pre_shift=None):
    n, h, w, cpi = x_nhwc.shape
    cpo = w_mat.shape[1]
    pre = pre_scale is not None
    kernel = functools.partial(_conv3x3_s1_kernel, pre_act=pre,
                               ho=h, wo=w, cpi=cpi, cpo=cpo)
    in_specs = [pl.BlockSpec((1, h, w, cpi), lambda b: (b, 0, 0, 0)),
                # whole weight, constant index -> DMA'd once, stays in VMEM
                pl.BlockSpec((9 * cpi, cpo), lambda b: (0, 0))]
    args = [x_nhwc, w_mat]
    if pre:
        vec = pl.BlockSpec((1, cpi), lambda b: (0, 0))
        in_specs += [vec, vec]
        args += [pre_scale.reshape(1, cpi), pre_shift.reshape(1, cpi)]
    return pl.pallas_call(
        kernel,
        out_shape=(jax.ShapeDtypeStruct((n, h, w, cpo), jnp.bfloat16),
                   jax.ShapeDtypeStruct((n, 2, cpo), jnp.float32)),
        grid_spec=pltpu.PrefetchScalarGridSpec(
            num_scalar_prefetch=0,
            grid=(n,),
            in_specs=in_specs,
            out_specs=[pl.BlockSpec((1, h, w, cpo), lambda b: (b, 0, 0, 0)),
                       pl.BlockSpec((1, 2, cpo), lambda b: (b, 0, 0))],
            scratch_shapes=[pltpu.VMEM((h + 2, w + 2, cpi), jnp.bfloat16)]),
        compiler_params=pltpu.CompilerParams(
            dimension_semantics=("parallel",),
            vmem_limit_bytes=_VMEM_LIMIT),
    )(*args)


def _matmul_stats(p_bf16, w_bf16):
    rp, kp = p_bf16.shape
    cpo = w_bf16.shape[1]
    tm = min(_TM2D, rp)
    nr = rp // tm
    return pl.pallas_call(
        _matmul_stats_kernel,
        out_shape=(jax.ShapeDtypeStruct((rp, cpo), jnp.bfloat16),
                   jax.ShapeDtypeStruct((nr, 2, cpo), jnp.float32)),
        grid_spec=pltpu.PrefetchScalarGridSpec(
            num_scalar_prefetch=0,
            grid=(nr,),
            in_specs=[pl.BlockSpec((tm, kp), lambda i: (i, 0)),
                      pl.BlockSpec((kp, cpo), lambda i: (0, 0))],
            out_specs=[pl.BlockSpec((tm, cpo), lambda i: (i, 0)),
                       pl.BlockSpec((1, 2, cpo), lambda i: (i, 0, 0))]),
        compiler_params=pltpu.CompilerParams(
            dimension_semantics=("parallel",),
            vmem_limit_bytes=_VMEM_LIMIT),
    )(p_bf16, w_bf16)


def _bn_add_relu(x2d, scale, shift, skip2d, skip_scale, skip_shift):
    rp, cp = x2d.shape
    tm = min(_TM2D, rp)
    row = pl.BlockSpec((tm, cp), lambda i: (i, 0))
    vec = pl.BlockSpec((1, cp), lambda i: (0, 0))
    return pl.pallas_call(
        _bn_add_relu_kernel,
        out_shape=jax.ShapeDtypeStruct((rp, cp), jnp.float32),
        grid_spec=pltpu.PrefetchScalarGridSpec(
            num_scalar_prefetch=0,
            grid=(rp // tm,),
            in_specs=[row, vec, vec, row, vec, vec],
            out_specs=row),
        compiler_params=pltpu.CompilerParams(
            dimension_semantics=("parallel",),
            vmem_limit_bytes=_VMEM_LIMIT),
    )(x2d, scale.reshape(1, cp), shift.reshape(1, cp),
      skip2d, skip_scale.reshape(1, cp), skip_shift.reshape(1, cp))


# --------------------------------- JAX glue --------------------------------- #
def _im2col_3x3(x_nhwc, stride):
    """3x3, padding=1 im2col (tap-major columns). Input is already bf16."""
    n, h, w, c = x_nhwc.shape
    ho = (h - 1) // stride + 1
    wo = (w - 1) // stride + 1
    xp = jnp.pad(x_nhwc, ((0, 0), (1, 1), (1, 1), (0, 0)))
    cols = []
    for kh in range(3):
        for kw in range(3):
            sl = xp[:, kh:kh + stride * (ho - 1) + 1:stride,
                    kw:kw + stride * (wo - 1) + 1:stride, :]
            cols.append(sl.reshape(n * ho * wo, c))
    return jnp.concatenate(cols, axis=-1)


def _pad2d(a, rows, cols):
    return jnp.pad(a, ((0, rows - a.shape[0]), (0, cols - a.shape[1])))


def _pad_vec(v, cp):
    return jnp.pad(v.astype(jnp.float32), (0, cp - v.shape[0]))


def _w3x3_to_mat(w_oihw, cpi, cpo):
    """(Co,Ci,3,3) -> (9*cpi, cpo), tap-major rows (matches the tap slicing)."""
    co, ci = w_oihw.shape[0], w_oihw.shape[1]
    wt = jnp.transpose(w_oihw, (2, 3, 1, 0))              # (3,3,ci,co)
    wt = jnp.pad(wt, ((0, 0), (0, 0), (0, cpi - ci), (0, cpo - co)))
    return wt.reshape(9 * cpi, cpo)


def _scale_shift(stats, count, gamma_p, beta_p):
    """Reduce per-step (sum, sumsq) partials -> per-channel BN scale/shift.

    NOTE: one-pass E[x^2] - mean^2 (clamped >= 0); adequate at these
    activation scales, switch to a centered/Welford reduction if needed.
    """
    s = jnp.sum(stats[:, 0, :], axis=0)
    ss = jnp.sum(stats[:, 1, :], axis=0)
    mean = s / count
    var = jnp.maximum(ss / count - mean * mean, 0.0)
    scale = gamma_p * jax.lax.rsqrt(var + _BN_EPS)
    shift = beta_p - mean * scale
    return scale, shift


def building_block_forward(x_nchw, params, stride):
    n, ci, h, w = x_nchw.shape
    co = params["w1"].shape[0]
    cpi = _round_up(ci, _CP)
    cpo = _round_up(co, _CP)
    ho = (h - 1) // stride + 1
    wo = (w - 1) // stride + 1
    rows = n * ho * wo
    rp = _round_up(rows, _TM2D)

    # NHWC, channel-padded, cast to bf16 up front: every HBM-side operand the
    # kernels touch is bf16 (accumulators / stats stay f32 inside kernels).
    x_nhwc = jnp.transpose(x_nchw, (0, 2, 3, 1)).astype(jnp.float32)
    x_bf = jnp.pad(x_nhwc, ((0, 0), (0, 0), (0, 0), (0, cpi - ci))
                   ).astype(jnp.bfloat16)

    g1, be1 = _pad_vec(params["g1"], cpo), _pad_vec(params["be1"], cpo)
    g2, be2 = _pad_vec(params["g2"], cpo), _pad_vec(params["be2"], cpo)

    # conv1 (3x3, stride, pad 1).  Conv biases are dropped on the kernel path:
    # a per-channel constant ahead of train-mode BN is cancelled exactly by
    # the batch-mean subtraction (the f32 reference keeps them).
    if stride == 1:
        w1m = _w3x3_to_mat(params["w1"], cpi, cpo).astype(jnp.bfloat16)
        c1_nhwc, st1 = _conv3x3_s1(x_bf, w1m)
    else:
        # TODO(synk): stride-2 conv1 still uses an XLA-built bf16 patch slab.
        k2d = _round_up(9 * cpi, 256)        # 256-aligned K for v6e/v7x MXU
        p1 = _pad2d(_im2col_3x3(x_bf, stride), rp, k2d)
        w1m = _pad2d(_w3x3_to_mat(params["w1"], cpi, cpo), k2d, cpo
                     ).astype(jnp.bfloat16)
        c1_2d, st1 = _matmul_stats(p1, w1m)
        c1_nhwc = c1_2d[:rows].reshape(n, ho, wo, cpo)
    s1, b1 = _scale_shift(st1, rows, g1, be1)

    # conv2 (3x3, stride 1, pad 1) with BN1 + ReLU fused into its prologue.
    w2m = _w3x3_to_mat(params["w2"], cpo, cpo).astype(jnp.bfloat16)
    c2, st2 = _conv3x3_s1(c1_nhwc, w2m, pre_scale=s1, pre_shift=b1)
    s2, b2 = _scale_shift(st2, rows, g2, be2)

    # shortcut: identity, or 1x1 projection (stride) + its BN scale/shift.
    if (co, ho, wo) == (ci, h, w):
        skip = _pad2d(x_bf.reshape(rows, cpi), rp, cpo)
        ss = jnp.ones((cpo,), jnp.float32)
        bs = jnp.zeros((cpo,), jnp.float32)
    else:
        ws2d = jnp.pad(jnp.transpose(params["ws"][:, :, 0, 0]),
                       ((0, cpi - ci), (0, cpo - co))).astype(jnp.bfloat16)
        xs = x_bf[:, ::stride, ::stride, :][:, :ho, :wo, :]
        skip, sts = _matmul_stats(_pad2d(xs.reshape(rows, cpi), rp, cpi), ws2d)
        ss, bs = _scale_shift(sts, rows, _pad_vec(params["gs"], cpo),
                              _pad_vec(params["bes"], cpo))

    # BN2 + shortcut BN + residual add + ReLU in one fused tiled pass.
    c2_2d = _pad2d(c2.reshape(rows, cpo), rp, cpo)
    out = _bn_add_relu(c2_2d, s2, b2, skip, ss, bs)
    out = out[:rows, :co].reshape(n, ho, wo, co)
    return jnp.transpose(out, (0, 3, 1, 2))                        # NCHW


# ------------------------------ parameter init ------------------------------ #
def init_params(key, ci, co, needs_proj):
    ks = jax.random.split(key, 6)
    r = jnp.arange(co, dtype=jnp.float32) / max(co, 1)
    p = {
        "w1": 0.1 * jax.random.normal(ks[0], (co, ci, 3, 3), jnp.float32),
        "b1": 0.1 * jax.random.normal(ks[1], (co,), jnp.float32),
        "g1": 1.0 + 0.1 * r,
        "be1": 0.05 * r,
        "w2": 0.1 * jax.random.normal(ks[2], (co, co, 3, 3), jnp.float32),
        "b2": 0.1 * jax.random.normal(ks[3], (co,), jnp.float32),
        "g2": 1.0 - 0.1 * r,
        "be2": -0.03 * r,
    }
    if needs_proj:
        p["ws"] = 0.1 * jax.random.normal(ks[4], (co, ci, 1, 1), jnp.float32)
        p["bs"] = 0.1 * jax.random.normal(ks[5], (co,), jnp.float32)
        p["gs"] = 1.0 + 0.2 * r
        p["bes"] = 0.02 * r
    return p


# -------------------------- pure-JAX reference check ------------------------ #
def _bn_train(y_nhwc, gamma, beta):
    mean = jnp.mean(y_nhwc, axis=(0, 1, 2), keepdims=True)
    var = jnp.mean((y_nhwc - mean) ** 2, axis=(0, 1, 2), keepdims=True)
    return (y_nhwc - mean) * jax.lax.rsqrt(var + _BN_EPS) * gamma + beta


def _conv_nhwc(x, w_oihw, bias, stride, padding):
    wt = jnp.transpose(w_oihw, (2, 3, 1, 0))  # HWIO
    y = jax.lax.conv_general_dilated(
        x, wt, (stride, stride), padding,
        dimension_numbers=("NHWC", "HWIO", "NHWC"))
    return y + bias[None, None, None, :]


def reference_forward(x_nchw, params, stride):
    n, ci, h, w = x_nchw.shape
    co = params["w1"].shape[0]
    x = jnp.transpose(x_nchw, (0, 2, 3, 1))
    y = _conv_nhwc(x, params["w1"], params["b1"], stride, ((1, 1), (1, 1)))
    y = jnp.maximum(_bn_train(y, params["g1"], params["be1"]), 0.0)
    y = _conv_nhwc(y, params["w2"], params["b2"], 1, ((1, 1), (1, 1)))
    y = _bn_train(y, params["g2"], params["be2"])
    if co == ci and y.shape[1:3] == x.shape[1:3]:
        skip = x
    else:
        skip = _conv_nhwc(x, params["ws"], params["bs"], stride, "VALID")
        skip = _bn_train(skip, params["gs"], params["bes"])
    out = jnp.maximum(y + skip, 0.0)
    return jnp.transpose(out, (0, 3, 1, 2))


# ----------------------------------- main ----------------------------------- #
if __name__ == "__main__":
    key = jax.random.PRNGKey(0)
    kx, kp1, kp2 = jax.random.split(key, 3)
    x = jax.random.normal(kx, (2, 4, 16, 16), jnp.float32)   # NCHW

    fwd = jax.jit(building_block_forward, static_argnums=(2,))
    ref = jax.jit(reference_forward, static_argnums=(2,))

    # Tolerances allow bf16 storage of intermediates (c1/c2/skip) and bf16
    # MXU inputs, vs the pure-f32 reference.
    # Case 1: identity shortcut (in_ch == out_ch, stride 1)
    params1 = init_params(kp1, 4, 4, needs_proj=False)
    out1 = jax.block_until_ready(fwd(x, params1, 1))
    ref1 = jax.block_until_ready(ref(x, params1, 1))
    np.testing.assert_allclose(np.asarray(out1), np.asarray(ref1),
                               rtol=4e-2, atol=4e-2)
    assert out1.shape == (2, 4, 16, 16)

    # Case 2: projected shortcut (channel expansion, stride 2)
    params2 = init_params(kp2, 4, 8, needs_proj=True)
    out2 = jax.block_until_ready(fwd(x, params2, 2))
    ref2 = jax.block_until_ready(ref(x, params2, 2))
    np.testing.assert_allclose(np.asarray(out2), np.asarray(ref2),
                               rtol=4e-2, atol=4e-2)
    assert out2.shape == (2, 8, 8, 8)

    print("KERNEL_OK")
</pallas_src>

<mosaic_0001>
module attributes {stable_mosaic.version = 11 : i64} {
  func.func @_conv3x3_s1_kernel(%arg0: i32, %arg1: memref<1x16x16x128xbf16, #tpu.memory_space<vmem>>, %arg2: memref<1152x128xbf16, #tpu.memory_space<vmem>>, %arg3: memref<1x16x16x128xbf16, #tpu.memory_space<vmem>>, %arg4: memref<1x2x128xf32, #tpu.memory_space<vmem>>, %arg5: memref<18x18x128xbf16, #tpu.memory_space<vmem>>) attributes {dimension_semantics = [#tpu.dimension_semantics<parallel>], iteration_bounds = array<i64: 2>, scalar_prefetch = 0 : i64, scratch_operands = 1 : i64, tpu.core_type = #tpu.core_type<tc>, window_params = [{transform_indices = @transform_0, window_bounds = array<i64: 1, 16, 16, 128>}, {pipeline_mode = #tpu.pipeline_mode<synchronous>, transform_indices = @transform_1, window_bounds = array<i64: 1152, 128>}, {transform_indices = @transform_2, window_bounds = array<i64: 1, 16, 16, 128>}, {transform_indices = @transform_3, window_bounds = array<i64: 1, 2, 128>}]} {
    %c0 = arith.constant 0 : index
    %c0_0 = arith.constant 0 : index
    %c0_1 = arith.constant 0 : index
    %c0_2 = arith.constant 0 : index
    %0 = vector.load %arg1[%c0, %c0_0, %c0_1, %c0_2] : memref<1x16x16x128xbf16, #tpu.memory_space<vmem>>, vector<1x16x16x128xbf16>
    %1 = vector.shape_cast %0 : vector<1x16x16x128xbf16> to vector<16x16x128xbf16>
    %cst = arith.constant 0.000000e+00 : bf16
    %2 = vector.broadcast %cst : bf16 to vector<18x18x128xbf16>
    %c0_3 = arith.constant 0 : index
    %c0_4 = arith.constant 0 : index
    %c0_5 = arith.constant 0 : index
    %3 = vector.load %arg5[%c0_3, %c0_4, %c0_5] : memref<18x18x128xbf16, #tpu.memory_space<vmem>>, vector<18x18x128xbf16>
    tpu.vector_store %arg5[%c0_3, %c0_4, %c0_5], %2 {strides = array<i32>} : memref<18x18x128xbf16, #tpu.memory_space<vmem>>, vector<18x18x128xbf16>,
    %c1 = arith.constant 1 : index
    %c1_6 = arith.constant 1 : index
    %c0_7 = arith.constant 0 : index
    %4 = vector.load %arg5[%c1, %c1_6, %c0_7] : memref<18x18x128xbf16, #tpu.memory_space<vmem>>, vector<16x16x128xbf16>
    tpu.vector_store %arg5[%c1, %c1_6, %c0_7], %1 {strides = array<i32>} : memref<18x18x128xbf16, #tpu.memory_space<vmem>>, vector<16x16x128xbf16>,
    %c0_8 = arith.constant 0 : index
    %c0_9 = arith.constant 0 : index
    %c0_10 = arith.constant 0 : index
    %5 = vector.load %arg5[%c0_8, %c0_9, %c0_10] : memref<18x18x128xbf16, #tpu.memory_space<vmem>>, vector<16x16x128xbf16>
    %6 = vector.shape_cast %5 : vector<16x16x128xbf16> to vector<256x128xbf16>
    %c0_11 = arith.constant 0 : index
    %c0_12 = arith.constant 0 : index
    %7 = vector.load %arg2[%c0_11, %c0_12] : memref<1152x128xbf16, #tpu.memory_space<vmem>>, vector<128x128xbf16>
    %cst_13 = arith.constant dense<0.000000e+00> : vector<256x128xf32>
    %8 = tpu.matmul %6, %7, %cst_13 {dimension_numbers = #tpu.dot_dimension_numbers<[1], [0], [0], [1], [0, 0, 1, 1], [], []>} : vector<256x128xbf16>, vector<128x128xbf16>, vector<256x128xf32> -> vector<256x128xf32>
    %c0_14 = arith.constant 0 : index
    %c1_15 = arith.constant 1 : index
    %c0_16 = arith.constant 0 : index
    %9 = vector.load %arg5[%c0_14, %c1_15, %c0_16] : memref<18x18x128xbf16, #tpu.memory_space<vmem>>, vector<16x16x128xbf16>
    %10 = vector.shape_cast %9 : vector<16x16x128xbf16> to vector<256x128xbf16>
    %c128 = arith.constant 128 : index
    %c0_17 = arith.constant 0 : index
    %11 = vector.load %arg2[%c128, %c0_17] : memref<1152x128xbf16, #tpu.memory_space<vmem>>, vector<128x128xbf16>
    %cst_18 = arith.constant dense<0.000000e+00> : vector<256x128xf32>
    %12 = tpu.matmul %10, %11, %cst_18 {dimension_numbers = #tpu.dot_dimension_numbers<[1], [0], [0], [1], [0, 0, 1, 1], [], []>} : vector<256x128xbf16>, vector<128x128xbf16>, vector<256x128xf32> -> vector<256x128xf32>
    %13 = arith.addf %8, %12 : vector<256x128xf32>
    %c0_19 = arith.constant 0 : index
    %c2 = arith.constant 2 : index
    %c0_20 = arith.constant 0 : index
    %14 = vector.load %arg5[%c0_19, %c2, %c0_20] : memref<18x18x128xbf16, #tpu.memory_space<vmem>>, vector<16x16x128xbf16>
    %15 = vector.shape_cast %14 : vector<16x16x128xbf16> to vector<256x128xbf16>
    %c256 = arith.constant 256 : index
    %c0_21 = arith.constant 0 : index
    %16 = vector.load %arg2[%c256, %c0_21] : memref<1152x128xbf16, #tpu.memory_space<vmem>>, vector<128x128xbf16>
    %cst_22 = arith.constant dense<0.000000e+00> : vector<256x128xf32>
    %17 = tpu.matmul %15, %16, %cst_22 {dimension_numbers = #tpu.dot_dimension_numbers<[1], [0], [0], [1], [0, 0, 1, 1], [], []>} : vector<256x128xbf16>, vector<128x128xbf16>, vector<256x128xf32> -> vector<256x128xf32>
    %18 = arith.addf %13, %17 : vector<256x128xf32>
    %c1_23 = arith.constant 1 : index
    %c0_24 = arith.constant 0 : index
    %c0_25 = arith.constant 0 : index
    %19 = vector.load %arg5[%c1_23, %c0_24, %c0_25] : memref<18x18x128xbf16, #tpu.memory_space<vmem>>, vector<16x16x128xbf16>
    %20 = vector.shape_cast %19 : vector<16x16x128xbf16> to vector<256x128xbf16>
    %c384 = arith.constant 384 : index
    %c0_26 = arith.constant 0 : index
    %21 = vector.load %arg2[%c384, %c0_26] : memref<1152x128xbf16, #tpu.memory_space<vmem>>, vector<128x128xbf16>
    %cst_27 = arith.constant dense<0.000000e+00> : vector<256x128xf32>
    %22 = tpu.matmul %20, %21, %cst_27 {dimension_numbers = #tpu.dot_dimension_numbers<[1], [0], [0], [1], [0, 0, 1, 1], [], []>} : vector<256x128xbf16>, vector<128x128xbf16>, vector<256x128xf32> -> vector<256x128xf32>
    %23 = arith.addf %18, %22 : vector<256x128xf32>
    %c1_28 = arith.constant 1 : index
    %c1_29 = arith.constant 1 : index
    %c0_30 = arith.constant 0 : index
    %24 = vector.load %arg5[%c1_28, %c1_29, %c0_30] : memref<18x18x128xbf16, #tpu.memory_space<vmem>>, vector<16x16x128xbf16>
    %25 = vector.shape_cast %24 : vector<16x16x128xbf16> to vector<256x128xbf16>
    %c512 = arith.constant 512 : index
    %c0_31 = arith.constant 0 : index
    %26 = vector.load %arg2[%c512, %c0_31] : memref<1152x128xbf16, #tpu.memory_space<vmem>>, vector<128x128xbf16>
    %cst_32 = arith.constant dense<0.000000e+00> : vector<256x128xf32>
    %27 = tpu.matmul %25, %26, %cst_32 {dimension_numbers = #tpu.dot_dimension_numbers<[1], [0], [0], [1], [0, 0, 1, 1], [], []>} : vector<256x128xbf16>, vector<128x128xbf16>, vector<256x128xf32> -> vector<256x128xf32>
    %28 = arith.addf %23, %27 : vector<256x128xf32>
    %c1_33 = arith.constant 1 : index
    %c2_34 = arith.constant 2 : index
    %c0_35 = arith.constant 0 : index
    %29 = vector.load %arg5[%c1_33, %c2_34, %c0_35] : memref<18x18x128xbf16, #tpu.memory_space<vmem>>, vector<16x16x128xbf16>
    %30 = vector.shape_cast %29 : vector<16x16x128xbf16> to vector<256x128xbf16>
    %c640 = arith.constant 640 : index
    %c0_36 = arith.constant 0 : index
    %31 = vector.load %arg2[%c640, %c0_36] : memref<1152x128xbf16, #tpu.memory_space<vmem>>, vector<128x128xbf16>
    %cst_37 = arith.constant dense<0.000000e+00> : vector<256x128xf32>
    %32 = tpu.matmul %30, %31, %cst_37 {dimension_numbers = #tpu.dot_dimension_numbers<[1], [0], [0], [1], [0, 0, 1, 1], [], []>} : vector<256x128xbf16>, vector<128x128xbf16>, vector<256x128xf32> -> vector<256x128xf32>
    %33 = arith.addf %28, %32 : vector<256x128xf32>
    %c2_38 = arith.constant 2 : index
    %c0_39 = arith.constant 0 : index
    %c0_40 = arith.constant 0 : index
    %34 = vector.load %arg5[%c2_38, %c0_39, %c0_40] : memref<18x18x128xbf16, #tpu.memory_space<vmem>>, vector<16x16x128xbf16>
    %35 = vector.shape_cast %34 : vector<16x16x128xbf16> to vector<256x128xbf16>
    %c768 = arith.constant 768 : index
    %c0_41 = arith.constant 0 : index
    %36 = vector.load %arg2[%c768, %c0_41] : memref<1152x128xbf16, #tpu.memory_space<vmem>>, vector<128x128xbf16>
    %cst_42 = arith.constant dense<0.000000e+00> : vector<256x128xf32>
    %37 = tpu.matmul %35, %36, %cst_42 {dimension_numbers = #tpu.dot_dimension_numbers<[1], [0], [0], [1], [0, 0, 1, 1], [], []>} : vector<256x128xbf16>, vector<128x128xbf16>, vector<256x128xf32> -> vector<256x128xf32>
    %38 = arith.addf %33, %37 : vector<256x128xf32>
    %c2_43 = arith.constant 2 : index
    %c1_44 = arith.constant 1 : index
    %c0_45 = arith.constant 0 : index
    %39 = vector.load %arg5[%c2_43, %c1_44, %c0_45] : memref<18x18x128xbf16, #tpu.memory_space<vmem>>, vector<16x16x128xbf16>
    %40 = vector.shape_cast %39 : vector<16x16x128xbf16> to vector<256x128xbf16>
    %c896 = arith.constant 896 : index
    %c0_46 = arith.constant 0 : index
    %41 = vector.load %arg2[%c896, %c0_46] : memref<1152x128xbf16, #tpu.memory_space<vmem>>, vector<128x128xbf16>
    %cst_47 = arith.constant dense<0.000000e+00> : vector<256x128xf32>
    %42 = tpu.matmul %40, %41, %cst_47 {dimension_numbers = #tpu.dot_dimension_numbers<[1], [0], [0], [1], [0, 0, 1, 1], [], []>} : vector<256x128xbf16>, vector<128x128xbf16>, vector<256x128xf32> -> vector<256x128xf32>
    %43 = arith.addf %38, %42 : vector<256x128xf32>
    %c2_48 = arith.constant 2 : index
    %c2_49 = arith.constant 2 : index
    %c0_50 = arith.constant 0 : index
    %44 = vector.load %arg5[%c2_48, %c2_49, %c0_50] : memref<18x18x128xbf16, #tpu.memory_space<vmem>>, vector<16x16x128xbf16>
    %45 = vector.shape_cast %44 : vector<16x16x128xbf16> to vector<256x128xbf16>
    %c1024 = arith.constant 1024 : index
    %c0_51 = arith.constant 0 : index
    %46 = vector.load %arg2[%c1024, %c0_51] : memref<1152x128xbf16, #tpu.memory_space<vmem>>, vector<128x128xbf16>
    %cst_52 = arith.constant dense<0.000000e+00> : vector<256x128xf32>
    %47 = tpu.matmul %45, %46, %cst_52 {dimension_numbers = #tpu.dot_dimension_numbers<[1], [0], [0], [1], [0, 0, 1, 1], [], []>} : vector<256x128xbf16>, vector<128x128xbf16>, vector<256x128xf32> -> vector<256x128xf32>
    %48 = arith.addf %43, %47 : vector<256x128xf32>
    %49 = vector.shape_cast %48 : vector<256x128xf32> to vector<16x16x128xf32>
    %50 = arith.truncf %49 : vector<16x16x128xf32> to vector<16x16x128xbf16>
    %c0_53 = arith.constant 0 : index
    %c0_54 = arith.constant 0 : index
    %c0_55 = arith.constant 0 : index
    %c0_56 = arith.constant 0 : index
    %51 = vector.load %arg3[%c0_53, %c0_54, %c0_55, %c0_56] : memref<1x16x16x128xbf16, #tpu.memory_space<vmem>>, vector<1x16x16x128xbf16>
    %52 = vector.shape_cast %51 : vector<1x16x16x128xbf16> to vector<16x16x128xbf16>
    %53 = vector.shape_cast %50 : vector<16x16x128xbf16> to vector<1x16x16x128xbf16>
    tpu.vector_store %arg3[%c0_53, %c0_54, %c0_55, %c0_56], %53 {strides = array<i32>} : memref<1x16x16x128xbf16, #tpu.memory_space<vmem>>, vector<1x16x16x128xbf16>,
    %cst_57 = arith.constant dense<0.000000e+00> : vector<128xf32>
    %54 = vector.multi_reduction <add>, %48, %cst_57 [0] : vector<256x128xf32> to vector<128xf32>
    %55 = vector.shape_cast %54 : vector<128xf32> to vector<1x128xf32>
    %56 = arith.mulf %48, %48 : vector<256x128xf32>
    %cst_58 = arith.constant dense<0.000000e+00> : vector<128xf32>
    %57 = vector.multi_reduction <add>, %56, %cst_58 [0] : vector<256x128xf32> to vector<128xf32>
    %58 = vector.shape_cast %57 : vector<128xf32> to vector<1x128xf32>
    %59 = tpu.concatenate %55, %58 in 0 : vector<1x128xf32>, vector<1x128xf32> -> vector<2x128xf32>
    %c0_59 = arith.constant 0 : index
    %c0_60 = arith.constant 0 : index
    %c0_61 = arith.constant 0 : index
    %60 = vector.load %arg4[%c0_59, %c0_60, %c0_61] : memref<1x2x128xf32, #tpu.memory_space<vmem>>, vector<1x2x128xf32>
    %61 = vector.shape_cast %60 : vector<1x2x128xf32> to vector<2x128xf32>
    %62 = vector.shape_cast %59 : vector<2x128xf32> to vector<1x2x128xf32>
    tpu.vector_store %arg4[%c0_59, %c0_60, %c0_61], %62 {strides = array<i32>} : memref<1x2x128xf32, #tpu.memory_space<vmem>>, vector<1x2x128xf32>,
    return
  }
  func.func @transform_0(%arg0: i32) -> (i32, i32, i32, i32) {
    %c0_i32 = arith.constant 0 : i32
    %c0_i32_0 = arith.constant 0 : i32
    %c0_i32_1 = arith.constant 0 : i32
    %c0_i32_2 = arith.constant 0 : i32
    return %arg0, %c0_i32, %c0_i32_0, %c0_i32_1 : i32, i32, i32, i32
  }
  func.func @transform_1(%arg0: i32) -> (i32, i32) {
    %c0_i32 = arith.constant 0 : i32
    %c0_i32_0 = arith.constant 0 : i32
    %c0_i32_1 = arith.constant 0 : i32
    return %c0_i32, %c0_i32_0 : i32, i32
  }
  func.func @transform_2(%arg0: i32) -> (i32, i32, i32, i32) {
    %c0_i32 = arith.constant 0 : i32
    %c0_i32_0 = arith.constant 0 : i32
    %c0_i32_1 = arith.constant 0 : i32
    %c0_i32_2 = arith.constant 0 : i32
    return %arg0, %c0_i32, %c0_i32_0, %c0_i32_1 : i32, i32, i32, i32
  }
  func.func @transform_3(%arg0: i32) -> (i32, i32, i32) {
    %c0_i32 = arith.constant 0 : i32
    %c0_i32_0 = arith.constant 0 : i32
    %c0_i32_1 = arith.constant 0 : i32
    return %arg0, %c0_i32, %c0_i32_0 : i32, i32, i32
  }
}

module attributes {stable_mosaic.version = 11 : i64} {
  func.func @_bn_add_relu_kernel(%arg0: i32, %arg1: memref<512x128xbf16, #tpu.memory_space<vmem>>, %arg2: memref<1x128xf32, #tpu.memory_space<vmem>>, %arg3: memref<1x128xf32, #tpu.memory_space<vmem>>, %arg4: memref<512x128xbf16, #tpu.memory_space<vmem>>, %arg5: memref<1x128xf32, #tpu.memory_space<vmem>>, %arg6: memref<1x128xf32, #tpu.memory_space<vmem>>, %arg7: memref<512x128xf32, #tpu.memory_space<vmem>>) attributes {dimension_semantics = [#tpu.dimension_semantics<parallel>], iteration_bounds = array<i64: 1>, scalar_prefetch = 0 : i64, scratch_operands = 0 : i64, tpu.core_type = #tpu.core_type<tc>, window_params = [{transform_indices = @transform_0, window_bounds = array<i64: 512, 128>}, {pipeline_mode = #tpu.pipeline_mode<synchronous>, transform_indices = @transform_1, window_bounds = array<i64: 1, 128>}, {pipeline_mode = #tpu.pipeline_mode<synchronous>, transform_indices = @transform_2, window_bounds = array<i64: 1, 128>}, {transform_indices = @transform_3, window_bounds = array<i64: 512, 128>}, {pipeline_mode = #tpu.pipeline_mode<synchronous>, transform_indices = @transform_4, window_bounds = array<i64: 1, 128>}, {pipeline_mode = #tpu.pipeline_mode<synchronous>, transform_indices = @transform_5, window_bounds = array<i64: 1, 128>}, {transform_indices = @transform_6, window_bounds = array<i64: 512, 128>}]} {
    %c0 = arith.constant 0 : index
    %c0_0 = arith.constant 0 : index
    %0 = vector.load %arg1[%c0, %c0_0] : memref<512x128xbf16, #tpu.memory_space<vmem>>, vector<512x128xbf16>
    %1 = arith.extf %0 : vector<512x128xbf16> to vector<512x128xf32>
    %c0_1 = arith.constant 0 : index
    %c0_2 = arith.constant 0 : index
    %2 = vector.load %arg2[%c0_1, %c0_2] : memref<1x128xf32, #tpu.memory_space<vmem>>, vector<1x128xf32>
    %3 = vector.broadcast %2 : vector<1x128xf32> to vector<512x128xf32>
    %4 = arith.mulf %1, %3 : vector<512x128xf32>
    %c0_3 = arith.constant 0 : index
    %c0_4 = arith.constant 0 : index
    %5 = vector.load %arg3[%c0_3, %c0_4] : memref<1x128xf32, #tpu.memory_space<vmem>>, vector<1x128xf32>
    %6 = vector.broadcast %5 : vector<1x128xf32> to vector<512x128xf32>
    %7 = arith.addf %4, %6 : vector<512x128xf32>
    %c0_5 = arith.constant 0 : index
    %c0_6 = arith.constant 0 : index
    %8 = vector.load %arg4[%c0_5, %c0_6] : memref<512x128xbf16, #tpu.memory_space<vmem>>, vector<512x128xbf16>
    %9 = arith.extf %8 : vector<512x128xbf16> to vector<512x128xf32>
    %c0_7 = arith.constant 0 : index
    %c0_8 = arith.constant 0 : index
    %10 = vector.load %arg5[%c0_7, %c0_8] : memref<1x128xf32, #tpu.memory_space<vmem>>, vector<1x128xf32>
    %11 = vector.broadcast %10 : vector<1x128xf32> to vector<512x128xf32>
    %12 = arith.mulf %9, %11 : vector<512x128xf32>
    %13 = arith.addf %7, %12 : vector<512x128xf32>
    %c0_9 = arith.constant 0 : index
    %c0_10 = arith.constant 0 : index
    %14 = vector.load %arg6[%c0_9, %c0_10] : memref<1x128xf32, #tpu.memory_space<vmem>>, vector<1x128xf32>
    %15 = vector.broadcast %14 : vector<1x128xf32> to vector<512x128xf32>
    %16 = arith.addf %13, %15 : vector<512x128xf32>
    %cst = arith.constant 0.000000e+00 : f32
    %17 = vector.broadcast %cst : f32 to vector<512x128xf32>
    %18 = arith.maximumf %16, %17 : vector<512x128xf32>
    %c0_11 = arith.constant 0 : index
    %c0_12 = arith.constant 0 : index
    %19 = vector.load %arg7[%c0_11, %c0_12] : memref<512x128xf32, #tpu.memory_space<vmem>>, vector<512x128xf32>
    tpu.vector_store %arg7[%c0_11, %c0_12], %18 {strides = array<i32>} : memref<512x128xf32, #tpu.memory_space<vmem>>, vector<512x128xf32>,
    return
  }
  func.func @transform_0(%arg0: i32) -> (i32, i32) {
    %c0_i32 = arith.constant 0 : i32
    %c0_i32_0 = arith.constant 0 : i32
    return %arg0, %c0_i32 : i32, i32
  }
  func.func @transform_1(%arg0: i32) -> (i32, i32) {
    %c0_i32 = arith.constant 0 : i32
    %c0_i32_0 = arith.constant 0 : i32
    %c0_i32_1 = arith.constant 0 : i32
    return %c0_i32, %c0_i32_0 : i32, i32
  }
  func.func @transform_2(%arg0: i32) -> (i32, i32) {
    %c0_i32 = arith.constant 0 : i32
    %c0_i32_0 = arith.constant 0 : i32
    %c0_i32_1 = arith.constant 0 : i32
    return %c0_i32, %c0_i32_0 : i32, i32
  }
  func.func @transform_3(%arg0: i32) -> (i32, i32) {
    %c0_i32 = arith.constant 0 : i32
    %c0_i32_0 = arith.constant 0 : i32
    return %arg0, %c0_i32 : i32, i32
  }
  func.func @transform_4(%arg0: i32) -> (i32, i32) {
    %c0_i32 = arith.constant 0 : i32
    %c0_i32_0 = arith.constant 0 : i32
    %c0_i32_1 = arith.constant 0 : i32
    return %c0_i32, %c0_i32_0 : i32, i32
  }
  func.func @transform_5(%arg0: i32) -> (i32, i32) {
    %c0_i32 = arith.constant 0 : i32
    %c0_i32_0 = arith.constant 0 : i32
    %c0_i32_1 = arith.constant 0 : i32
    return %c0_i32, %c0_i32_0 : i32, i32
  }
  func.func @transform_6(%arg0: i32) -> (i32, i32) {
    %c0_i32 = arith.constant 0 : i32
    %c0_i32_0 = arith.constant 0 : i32
    return %arg0, %c0_i32 : i32, i32
  }
}

module attributes {stable_mosaic.version = 11 : i64} {
  func.func @_conv3x3_s1_kernel(%arg0: i32, %arg1: memref<1x16x16x128xbf16, #tpu.memory_space<vmem>>, %arg2: memref<1152x128xbf16, #tpu.memory_space<vmem>>, %arg3: memref<1x128xf32, #tpu.memory_space<vmem>>, %arg4: memref<1x128xf32, #tpu.memory_space<vmem>>, %arg5: memref<1x16x16x128xbf16, #tpu.memory_space<vmem>>, %arg6: memref<1x2x128xf32, #tpu.memory_space<vmem>>, %arg7: memref<18x18x128xbf16, #tpu.memory_space<vmem>>) attributes {dimension_semantics = [#tpu.dimension_semantics<parallel>], iteration_bounds = array<i64: 2>, scalar_prefetch = 0 : i64, scratch_operands = 1 : i64, tpu.core_type = #tpu.core_type<tc>, window_params = [{transform_indices = @transform_0, window_bounds = array<i64: 1, 16, 16, 128>}, {pipeline_mode = #tpu.pipeline_mode<synchronous>, transform_indices = @transform_1, window_bounds = array<i64: 1152, 128>}, {pipeline_mode = #tpu.pipeline_mode<synchronous>, transform_indices = @transform_2, window_bounds = array<i64: 1, 128>}, {pipeline_mode = #tpu.pipeline_mode<synchronous>, transform_indices = @transform_3, window_bounds = array<i64: 1, 128>}, {transform_indices = @transform_4, window_bounds = array<i64: 1, 16, 16, 128>}, {transform_indices = @transform_5, window_bounds = array<i64: 1, 2, 128>}]} {
    %c0 = arith.constant 0 : index
    %c0_0 = arith.constant 0 : index
    %c0_1 = arith.constant 0 : index
    %c0_2 = arith.constant 0 : index
    %0 = vector.load %arg1[%c0, %c0_0, %c0_1, %c0_2] : memref<1x16x16x128xbf16, #tpu.memory_space<vmem>>, vector<1x16x16x128xbf16>
    %1 = vector.shape_cast %0 : vector<1x16x16x128xbf16> to vector<16x16x128xbf16>
    %c0_3 = arith.constant 0 : index
    %c0_4 = arith.constant 0 : index
    %2 = vector.load %arg3[%c0_3, %c0_4] : memref<1x128xf32, #tpu.memory_space<vmem>>, vector<1x128xf32>
    %3 = vector.shape_cast %2 : vector<1x128xf32> to vector<1x1x128xf32>
    %c0_5 = arith.constant 0 : index
    %c0_6 = arith.constant 0 : index
    %4 = vector.load %arg4[%c0_5, %c0_6] : memref<1x128xf32, #tpu.memory_space<vmem>>, vector<1x128xf32>
    %5 = vector.shape_cast %4 : vector<1x128xf32> to vector<1x1x128xf32>
    %6 = arith.extf %1 : vector<16x16x128xbf16> to vector<16x16x128xf32>
    %7 = vector.broadcast %3 : vector<1x1x128xf32> to vector<16x16x128xf32>
    %8 = arith.mulf %6, %7 : vector<16x16x128xf32>
    %9 = vector.broadcast %5 : vector<1x1x128xf32> to vector<16x16x128xf32>
    %10 = arith.addf %8, %9 : vector<16x16x128xf32>
    %cst = arith.constant 0.000000e+00 : f32
    %11 = vector.broadcast %cst : f32 to vector<16x16x128xf32>
    %12 = arith.maximumf %10, %11 : vector<16x16x128xf32>
    %13 = arith.truncf %12 : vector<16x16x128xf32> to vector<16x16x128xbf16>
    %cst_7 = arith.constant 0.000000e+00 : bf16
    %14 = vector.broadcast %cst_7 : bf16 to vector<18x18x128xbf16>
    %c0_8 = arith.constant 0 : index
    %c0_9 = arith.constant 0 : index
    %c0_10 = arith.constant 0 : index
    %15 = vector.load %arg7[%c0_8, %c0_9, %c0_10] : memref<18x18x128xbf16, #tpu.memory_space<vmem>>, vector<18x18x128xbf16>
    tpu.vector_store %arg7[%c0_8, %c0_9, %c0_10], %14 {strides = array<i32>} : memref<18x18x128xbf16, #tpu.memory_space<vmem>>, vector<18x18x128xbf16>,
    %c1 = arith.constant 1 : index
    %c1_11 = arith.constant 1 : index
    %c0_12 = arith.constant 0 : index
    %16 = vector.load %arg7[%c1, %c1_11, %c0_12] : memref<18x18x128xbf16, #tpu.memory_space<vmem>>, vector<16x16x128xbf16>
    tpu.vector_store %arg7[%c1, %c1_11, %c0_12], %13 {strides = array<i32>} : memref<18x18x128xbf16, #tpu.memory_space<vmem>>, vector<16x16x128xbf16>,
    %c0_13 = arith.constant 0 : index
    %c0_14 = arith.constant 0 : index
    %c0_15 = arith.constant 0 : index
    %17 = vector.load %arg7[%c0_13, %c0_14, %c0_15] : memref<18x18x128xbf16, #tpu.memory_space<vmem>>, vector<16x16x128xbf16>
    %18 = vector.shape_cast %17 : vector<16x16x128xbf16> to vector<256x128xbf16>
    %c0_16 = arith.constant 0 : index
    %c0_17 = arith.constant 0 : index
    %19 = vector.load %arg2[%c0_16, %c0_17] : memref<1152x128xbf16, #tpu.memory_space<vmem>>, vector<128x128xbf16>
    %cst_18 = arith.constant dense<0.000000e+00> : vector<256x128xf32>
    %20 = tpu.matmul %18, %19, %cst_18 {dimension_numbers = #tpu.dot_dimension_numbers<[1], [0], [0], [1], [0, 0, 1, 1], [], []>} : vector<256x128xbf16>, vector<128x128xbf16>, vector<256x128xf32> -> vector<256x128xf32>
    %c0_19 = arith.constant 0 : index
    %c1_20 = arith.constant 1 : index
    %c0_21 = arith.constant 0 : index
    %21 = vector.load %arg7[%c0_19, %c1_20, %c0_21] : memref<18x18x128xbf16, #tpu.memory_space<vmem>>, vector<16x16x128xbf16>
    %22 = vector.shape_cast %21 : vector<16x16x128xbf16> to vector<256x128xbf16>
    %c128 = arith.constant 128 : index
    %c0_22 = arith.constant 0 : index
    %23 = vector.load %arg2[%c128, %c0_22] : memref<1152x128xbf16, #tpu.memory_space<vmem>>, vector<128x128xbf16>
    %cst_23 = arith.constant dense<0.000000e+00> : vector<256x128xf32>
    %24 = tpu.matmul %22, %23, %cst_23 {dimension_numbers = #tpu.dot_dimension_numbers<[1], [0], [0], [1], [0, 0, 1, 1], [], []>} : vector<256x128xbf16>, vector<128x128xbf16>, vector<256x128xf32> -> vector<256x128xf32>
    %25 = arith.addf %20, %24 : vector<256x128xf32>
    %c0_24 = arith.constant 0 : index
    %c2 = arith.constant 2 : index
    %c0_25 = arith.constant 0 : index
    %26 = vector.load %arg7[%c0_24, %c2, %c0_25] : memref<18x18x128xbf16, #tpu.memory_space<vmem>>, vector<16x16x128xbf16>
    %27 = vector.shape_cast %26 : vector<16x16x128xbf16> to vector<256x128xbf16>
    %c256 = arith.constant 256 : index
    %c0_26 = arith.constant 0 : index
    %28 = vector.load %arg2[%c256, %c0_26] : memref<1152x128xbf16, #tpu.memory_space<vmem>>, vector<128x128xbf16>
    %cst_27 = arith.constant dense<0.000000e+00> : vector<256x128xf32>
    %29 = tpu.matmul %27, %28, %cst_27 {dimension_numbers = #tpu.dot_dimension_numbers<[1], [0], [0], [1], [0, 0, 1, 1], [], []>} : vector<256x128xbf16>, vector<128x128xbf16>, vector<256x128xf32> -> vector<256x128xf32>
    %30 = arith.addf %25, %29 : vector<256x128xf32>
    %c1_28 = arith.constant 1 : index
    %c0_29 = arith.constant 0 : index
    %c0_30 = arith.constant 0 : index
    %31 = vector.load %arg7[%c1_28, %c0_29, %c0_30] : memref<18x18x128xbf16, #tpu.memory_space<vmem>>, vector<16x16x128xbf16>
    %32 = vector.shape_cast %31 : vector<16x16x128xbf16> to vector<256x128xbf16>
    %c384 = arith.constant 384 : index
    %c0_31 = arith.constant 0 : index
    %33 = vector.load %arg2[%c384, %c0_31] : memref<1152x128xbf16, #tpu.memory_space<vmem>>, vector<128x128xbf16>
    %cst_32 = arith.constant dense<0.000000e+00> : vector<256x128xf32>
    %34 = tpu.matmul %32, %33, %cst_32 {dimension_numbers = #tpu.dot_dimension_numbers<[1], [0], [0], [1], [0, 0, 1, 1], [], []>} : vector<256x128xbf16>, vector<128x128xbf16>, vector<256x128xf32> -> vector<256x128xf32>
    %35 = arith.addf %30, %34 : vector<256x128xf32>
    %c1_33 = arith.constant 1 : index
    %c1_34 = arith.constant 1 : index
    %c0_35 = arith.constant 0 : index
    %36 = vector.load %arg7[%c1_33, %c1_34, %c0_35] : memref<18x18x128xbf16, #tpu.memory_space<vmem>>, vector<16x16x128xbf16>
    %37 = vector.shape_cast %36 : vector<16x16x128xbf16> to vector<256x128xbf16>
    %c512 = arith.constant 512 : index
    %c0_36 = arith.constant 0 : index
    %38 = vector.load %arg2[%c512, %c0_36] : memref<1152x128xbf16, #tpu.memory_space<vmem>>, vector<128x128xbf16>
    %cst_37 = arith.constant dense<0.000000e+00> : vector<256x128xf32>
    %39 = tpu.matmul %37, %38, %cst_37 {dimension_numbers = #tpu.dot_dimension_numbers<[1], [0], [0], [1], [0, 0, 1, 1], [], []>} : vector<256x128xbf16>, vector<128x128xbf16>, vector<256x128xf32> -> vector<256x128xf32>
    %40 = arith.addf %35, %39 : vector<256x128xf32>
    %c1_38 = arith.constant 1 : index
    %c2_39 = arith.constant 2 : index
    %c0_40 = arith.constant 0 : index
    %41 = vector.load %arg7[%c1_38, %c2_39, %c0_40] : memref<18x18x128xbf16, #tpu.memory_space<vmem>>, vector<16x16x128xbf16>
    %42 = vector.shape_cast %41 : vector<16x16x128xbf16> to vector<256x128xbf16>
    %c640 = arith.constant 640 : index
    %c0_41 = arith.constant 0 : index
    %43 = vector.load %arg2[%c640, %c0_41] : memref<1152x128xbf16, #tpu.memory_space<vmem>>, vector<128x128xbf16>
    %cst_42 = arith.constant dense<0.000000e+00> : vector<256x128xf32>
    %44 = tpu.matmul %42, %43, %cst_42 {dimension_numbers = #tpu.dot_dimension_numbers<[1], [0], [0], [1], [0, 0, 1, 1], [], []>} : vector<256x128xbf16>, vector<128x128xbf16>, vector<256x128xf32> -> vector<256x128xf32>
    %45 = arith.addf %40, %44 : vector<256x128xf32>
    %c2_43 = arith.constant 2 : index
    %c0_44 = arith.constant 0 : index
    %c0_45 = arith.constant 0 : index
    %46 = vector.load %arg7[%c2_43, %c0_44, %c0_45] : memref<18x18x128xbf16, #tpu.memory_space<vmem>>, vector<16x16x128xbf16>
    %47 = vector.shape_cast %46 : vector<16x16x128xbf16> to vector<256x128xbf16>
    %c768 = arith.constant 768 : index
    %c0_46 = arith.constant 0 : index
    %48 = vector.load %arg2[%c768, %c0_46] : memref<1152x128xbf16, #tpu.memory_space<vmem>>, vector<128x128xbf16>
    %cst_47 = arith.constant dense<0.000000e+00> : vector<256x128xf32>
    %49 = tpu.matmul %47, %48, %cst_47 {dimension_numbers = #tpu.dot_dimension_numbers<[1], [0], [0], [1], [0, 0, 1, 1], [], []>} : vector<256x128xbf16>, vector<128x128xbf16>, vector<256x128xf32> -> vector<256x128xf32>
    %50 = arith.addf %45, %49 : vector<256x128xf32>
    %c2_48 = arith.constant 2 : index
    %c1_49 = arith.constant 1 : index
    %c0_50 = arith.constant 0 : index
    %51 = vector.load %arg7[%c2_48, %c1_49, %c0_50] : memref<18x18x128xbf16, #tpu.memory_space<vmem>>, vector<16x16x128xbf16>
    %52 = vector.shape_cast %51 : vector<16x16x128xbf16> to vector<256x128xbf16>
    %c896 = arith.constant 896 : index
    %c0_51 = arith.constant 0 : index
    %53 = vector.load %arg2[%c896, %c0_51] : memref<1152x128xbf16, #tpu.memory_space<vmem>>, vector<128x128xbf16>
    %cst_52 = arith.constant dense<0.000000e+00> : vector<256x128xf32>
    %54 = tpu.matmul %52, %53, %cst_52 {dimension_numbers = #tpu.dot_dimension_numbers<[1], [0], [0], [1], [0, 0, 1, 1], [], []>} : vector<256x128xbf16>, vector<128x128xbf16>, vector<256x128xf32> -> vector<256x128xf32>
    %55 = arith.addf %50, %54 : vector<256x128xf32>
    %c2_53 = arith.constant 2 : index
    %c2_54 = arith.constant 2 : index
    %c0_55 = arith.constant 0 : index
    %56 = vector.load %arg7[%c2_53, %c2_54, %c0_55] : memref<18x18x128xbf16, #tpu.memory_space<vmem>>, vector<16x16x128xbf16>
    %57 = vector.shape_cast %56 : vector<16x16x128xbf16> to vector<256x128xbf16>
    %c1024 = arith.constant 1024 : index
    %c0_56 = arith.constant 0 : index
    %58 = vector.load %arg2[%c1024, %c0_56] : memref<1152x128xbf16, #tpu.memory_space<vmem>>, vector<128x128xbf16>
    %cst_57 = arith.constant dense<0.000000e+00> : vector<256x128xf32>
    %59 = tpu.matmul %57, %58, %cst_57 {dimension_numbers = #tpu.dot_dimension_numbers<[1], [0], [0], [1], [0, 0, 1, 1], [], []>} : vector<256x128xbf16>, vector<128x128xbf16>, vector<256x128xf32> -> vector<256x128xf32>
    %60 = arith.addf %55, %59 : vector<256x128xf32>
    %61 = vector.shape_cast %60 : vector<256x128xf32> to vector<16x16x128xf32>
    %62 = arith.truncf %61 : vector<16x16x128xf32> to vector<16x16x128xbf16>
    %c0_58 = arith.constant 0 : index
    %c0_59 = arith.constant 0 : index
    %c0_60 = arith.constant 0 : index
    %c0_61 = arith.constant 0 : index
    %63 = vector.load %arg5[%c0_58, %c0_59, %c0_60, %c0_61] : memref<1x16x16x128xbf16, #tpu.memory_space<vmem>>, vector<1x16x16x128xbf16>
    %64 = vector.shape_cast %63 : vector<1x16x16x128xbf16> to vector<16x16x128xbf16>
    %65 = vector.shape_cast %62 : vector<16x16x128xbf16> to vector<1x16x16x128xbf16>
    tpu.vector_store %arg5[%c0_58, %c0_59, %c0_60, %c0_61], %65 {strides = array<i32>} : memref<1x16x16x128xbf16, #tpu.memory_space<vmem>>, vector<1x16x16x128xbf16>,
    %cst_62 = arith.constant dense<0.000000e+00> : vector<128xf32>
    %66 = vector.multi_reduction <add>, %60, %cst_62 [0] : vector<256x128xf32> to vector<128xf32>
    %67 = vector.shape_cast %66 : vector<128xf32> to vector<1x128xf32>
    %68 = arith.mulf %60, %60 : vector<256x128xf32>
    %cst_63 = arith.constant dense<0.000000e+00> : vector<128xf32>
    %69 = vector.multi_reduction <add>, %68, %cst_63 [0] : vector<256x128xf32> to vector<128xf32>
    %70 = vector.shape_cast %69 : vector<128xf32> to vector<1x128xf32>
    %71 = tpu.concatenate %67, %70 in 0 : vector<1x128xf32>, vector<1x128xf32> -> vector<2x128xf32>
    %c0_64 = arith.constant 0 : index
    %c0_65 = arith.constant 0 : index
    %c0_66 = arith.constant 0 : index
    %72 = vector.load %arg6[%c0_64, %c0_65, %c0_66] : memref<1x2x128xf32, #tpu.memory_space<vmem>>, vector<1x2x128xf32>
    %73 = vector.shape_cast %72 : vector<1x2x128xf32> to vector<2x128xf32>
    %74 = vector.shape_cast %71 : vector<2x128xf32> to vector<1x2x128xf32>
    tpu.vector_store %arg6[%c0_64, %c0_65, %c0_66], %74 {strides = array<i32>} : memref<1x2x128xf32, #tpu.memory_space<vmem>>, vector<1x2x128xf32>,
    return
  }
  func.func @transform_0(%arg0: i32) -> (i32, i32, i32, i32) {
    %c0_i32 = arith.constant 0 : i32
    %c0_i32_0 = arith.constant 0 : i32
    %c0_i32_1 = arith.constant 0 : i32
    %c0_i32_2 = arith.constant 0 : i32
    return %arg0, %c0_i32, %c0_i32_0, %c0_i32_1 : i32, i32, i32, i32
  }
  func.func @transform_1(%arg0: i32) -> (i32, i32) {
    %c0_i32 = arith.constant 0 : i32
    %c0_i32_0 = arith.constant 0 : i32
    %c0_i32_1 = arith.constant 0 : i32
    return %c0_i32, %c0_i32_0 : i32, i32
  }
  func.func @transform_2(%arg0: i32) -> (i32, i32) {
    %c0_i32 = arith.constant 0 : i32
    %c0_i32_0 = arith.constant 0 : i32
    %c0_i32_1 = arith.constant 0 : i32
    return %c0_i32, %c0_i32_0 : i32, i32
  }
  func.func @transform_3(%arg0: i32) -> (i32, i32) {
    %c0_i32 = arith.constant 0 : i32
    %c0_i32_0 = arith.constant 0 : i32
    %c0_i32_1 = arith.constant 0 : i32
    return %c0_i32, %c0_i32_0 : i32, i32
  }
  func.func @transform_4(%arg0: i32) -> (i32, i32, i32, i32) {
    %c0_i32 = arith.constant 0 : i32
    %c0_i32_0 = arith.constant 0 : i32
    %c0_i32_1 = arith.constant 0 : i32
    %c0_i32_2 = arith.constant 0 : i32
    return %arg0, %c0_i32, %c0_i32_0, %c0_i32_1 : i32, i32, i32, i32
  }
  func.func @transform_5(%arg0: i32) -> (i32, i32, i32) {
    %c0_i32 = arith.constant 0 : i32
    %c0_i32_0 = arith.constant 0 : i32
    %c0_i32_1 = arith.constant 0 : i32
    return %arg0, %c0_i32, %c0_i32_0 : i32, i32, i32
  }
}

</mosaic_0001>

<bundles_post_ra>
// kernel: building_block_forward.5
= control target key start
LH: loop header
LB: loop body
LE: loop exit
PB: predicated region body
PF: predicated region fallthrough
CT: control target
= control target key end

     0   :  { %s1800_s0 = inlined_call_operand.vmem [shape: bf16[512,128], index: 0, kind: input, shape index: {}]   ;;  %s1801_s1 = inlined_call_operand.vmem [shape: f32[1,128], index: 1, kind: input, shape index: {}]   ;;  %s1802_s2 = inlined_call_operand.vmem [shape: f32[1,128], index: 2, kind: input, shape index: {}]   ;;  %s1803_s3 = inlined_call_operand.vmem [shape: bf16[512,128], index: 3, kind: input, shape index: {}]   ;;  %s1804_s4 = inlined_call_operand.vmem [shape: f32[1,128], index: 4, kind: input, shape index: {}]   ;;  %s1805_s5 = inlined_call_operand.vmem [shape: f32[1,128], index: 5, kind: input, shape index: {}]   ;;  %s1806_s6 = inlined_call_operand.vmem [shape: f32[512,128], index: 6, kind: output, shape index: {}]  }
   0x1   :  { %v764_v0 = vld [vmem:[%s1800_s0] sm:$0xff]   ;;  %v1019_v9 = vld [vmem:[%s1800_s0 + $0x8] sm:$0xff]   ;;  %v1020_v15 = vld [vmem:[%s1800_s0 + $0x10] sm:$0xff]  }
   0x2   :  { %v1126_v1 = vld [vmem:[%s1801_s1] ss:$0 sm:$0xff]  ;;  %v765_v2 = vunpack.c.l.bf16 %v764_v0  ;;  %v766_v5 = vunpack.c.h.bf16 %v764_v0  ;;  %v1050_v10 = vld [vmem:[%s1803_s3 + $0x8] sm:$0xff]   ;;  %v769_v13 = vunpack.c.l.bf16 %v1019_v9  ;;  %v1051_v16 = vld [vmem:[%s1803_s3 + $0x10] sm:$0xff]   ;;  %v770_v19 = vunpack.c.h.bf16 %v1019_v9 }
   0x3   :  { %v892_v3 = vld [vmem:[%s1803_s3] sm:$0xff]   ;;  %v897_v14 = vunpack.c.l.bf16 %v1050_v10  ;;  %v898_v20 = vunpack.c.h.bf16 %v1050_v10  ;;  %v773_v28 = vunpack.c.l.bf16 %v1020_v15  ;;  %v901_v29 = vunpack.c.l.bf16 %v1051_v16  ;;  %v1021_v34 = vld [vmem:[%s1800_s0 + $0x18] sm:$0xff]   ;;  %v1023_v9 = vld [vmem:[%s1800_s0 + $0x28] sm:$0xff]  }
   0x4   :  { %v1134_v4 = vld [vmem:[%s1804_s4] ss:$0 sm:$0xff]  ;;  %v893_v7 = vunpack.c.l.bf16 %v892_v3  ;;  %v894_v8 = vunpack.c.h.bf16 %v892_v3  ;;  %v158_v11 = vmul.f32 %v765_v2, %v1126_v1  ;;  %v159_v12 = vmul.f32 %v766_v5, %v1126_v1  ;;  %v1052_v43 = vld [vmem:[%s1803_s3 + $0x18] sm:$0xff]  }
   0x5   :  { %v1139_v6 = vld [vmem:[%s1802_s2] ss:$0 sm:$0xff]  ;;  %v160_v23 = vmul.f32 %v769_v13, %v1126_v1  ;;  %v430_v24 = vmul.f32 %v897_v14, %v1134_v4  ;;  %v161_v26 = vmul.f32 %v770_v19, %v1126_v1  ;;  %v431_v27 = vmul.f32 %v898_v20, %v1134_v4  ;;  %v1054_v14 = vld [vmem:[%s1803_s3 + $0x28] sm:$0xff]  }
   0x6   :  { %v428_v17 = vmul.f32 %v893_v7, %v1134_v4  ;;  %v429_v18 = vmul.f32 %v894_v8, %v1134_v4  ;;  %v229_v21 = vadd.f32 %v1139_v6, %v158_v11  ;;  %v230_v22 = vadd.f32 %v1139_v6, %v159_v12  ;;  %v1164_v25 = vld [vmem:[%s1805_s5] ss:$0 sm:$0xff] }
   0x7   :  { %v231_v32 = vadd.f32 %v1139_v6, %v160_v23  ;;  %v774_v33 = vunpack.c.h.bf16 %v1020_v15  ;;  %v232_v35 = vadd.f32 %v1139_v6, %v161_v26  ;;  %v162_v36 = vmul.f32 %v773_v28, %v1126_v1  ;;  %v1022_v56 = vld [vmem:[%s1800_s0 + $0x20] sm:$0xff]   ;;  %v1024_v28 = vld [vmem:[%s1800_s0 + $0x30] sm:$0xff]  }
   0x8   :  { %v492_v30 = vadd.f32 %v428_v17, %v229_v21  ;;  %v493_v31 = vadd.f32 %v429_v18, %v230_v22  ;;  %v432_v37 = vmul.f32 %v901_v29, %v1134_v4  ;;  %v902_v38 = vunpack.c.h.bf16 %v1051_v16  ;;  %v1053_v61 = vld [vmem:[%s1803_s3 + $0x20] sm:$0xff]  }
   0x9   :  { %v494_v41 = vadd.f32 %v430_v24, %v231_v32  ;;  %v163_v42 = vmul.f32 %v774_v33, %v1126_v1  ;;  %v495_v44 = vadd.f32 %v431_v27, %v232_v35  ;;  %v233_v45 = vadd.f32 %v1139_v6, %v162_v36  ;;  %v1055_v33 = vld [vmem:[%s1803_s3 + $0x30] sm:$0xff]  }
   0xa   :  { %v563_v39 = vadd.f32 %v1164_v25, %v492_v30  ;;  %v564_v40 = vadd.f32 %v1164_v25, %v493_v31  ;;  %v433_v46 = vmul.f32 %v902_v38, %v1134_v4  ;;  %v777_v47 = vunpack.c.l.bf16 %v1021_v34 }
   0xb   :  { %v565_v50 = vadd.f32 %v1164_v25, %v494_v41  ;;  %v234_v51 = vadd.f32 %v1139_v6, %v163_v42  ;;  %v566_v52 = vadd.f32 %v1164_v25, %v495_v44  ;;  %v496_v53 = vadd.f32 %v432_v37, %v233_v45 }
   0xc   :  { %v627_v48 = vmax.f32 %v563_v39, 0.0  ;;  %v628_v49 = vmax.f32 %v564_v40, 0.0  ;;  %v164_v54 = vmul.f32 %v777_v47, %v1126_v1  ;;  %v905_v55 = vunpack.c.l.bf16 %v1052_v43 }
   0xd   :  { %v629_v57 = vmax.f32 %v565_v50, 0.0  ;;  %v497_v58 = vadd.f32 %v433_v46, %v234_v51  ;;  %v778_v59 = vunpack.c.h.bf16 %v1021_v34  ;;  %v906_v60 = vunpack.c.h.bf16 %v1052_v43  ;;  %v1025_v50 = vld [vmem:[%s1800_s0 + $0x38] sm:$0xff]  }
   0xe   :  { %691 = vst [vmem:[%s1806_s6] sm:$0xff] %v627_v48  ;;  %692 = vst [vmem:[%s1806_s6 + $0x8] sm:$0xff] %v628_v49  ;;  %v630_v62 = vmax.f32 %v566_v52, 0.0  ;;  %v567_v63 = vadd.f32 %v1164_v25, %v496_v53  ;;  %v235_v0 = vadd.f32 %v1139_v6, %v164_v54  ;;  %v434_v2 = vmul.f32 %v905_v55, %v1134_v4  ;;  %v1056_v51 = vld [vmem:[%s1803_s3 + $0x38] sm:$0xff]  }
   0xf   :  { %693 = vst [vmem:[%s1806_s6 + $0x10] sm:$0xff] %v629_v57  ;;  %v568_v3 = vadd.f32 %v1164_v25, %v497_v58  ;;  %v165_v5 = vmul.f32 %v778_v59, %v1126_v1  ;;  %v435_v7 = vmul.f32 %v906_v60, %v1134_v4  ;;  %v781_v8 = vunpack.c.l.bf16 %v1022_v56 }
  0x10   :  { %694 = vst [vmem:[%s1806_s6 + $0x18] sm:$0xff] %v630_v62  ;;  %v631_v10 = vmax.f32 %v567_v63, 0.0  ;;  %v498_v11 = vadd.f32 %v434_v2, %v235_v0  ;;  %v909_v12 = vunpack.c.l.bf16 %v1053_v61  ;;  %v782_v13 = vunpack.c.h.bf16 %v1022_v56  ;;  %v1026_v0 = vld [vmem:[%s1800_s0 + $0x40] sm:$0xff]  }
  0x11   :  { %v632_v15 = vmax.f32 %v568_v3, 0.0  ;;  %v236_v16 = vadd.f32 %v1139_v6, %v165_v5  ;;  %v166_v17 = vmul.f32 %v781_v8, %v1126_v1  ;;  %v910_v18 = vunpack.c.h.bf16 %v1053_v61  ;;  %v1057_v8 = vld [vmem:[%s1803_s3 + $0x40] sm:$0xff]  }
  0x12   :  { %695 = vst [vmem:[%s1806_s6 + $0x20] sm:$0xff] %v631_v10  ;;  %v569_v19 = vadd.f32 %v1164_v25, %v498_v11  ;;  %v436_v20 = vmul.f32 %v909_v12, %v1134_v4  ;;  %v167_v21 = vmul.f32 %v782_v13, %v1126_v1  ;;  %v785_v22 = vunpack.c.l.bf16 %v1023_v9 }
  0x13   :  { %696 = vst [vmem:[%s1806_s6 + $0x28] sm:$0xff] %v632_v15  ;;  %v499_v23 = vadd.f32 %v435_v7, %v236_v16  ;;  %v237_v24 = vadd.f32 %v1139_v6, %v166_v17  ;;  %v437_v26 = vmul.f32 %v910_v18, %v1134_v4  ;;  %v913_v27 = vunpack.c.l.bf16 %v1054_v14 }
  0x14   :  { %v633_v29 = vmax.f32 %v569_v19, 0.0  ;;  %v238_v30 = vadd.f32 %v1139_v6, %v167_v21  ;;  %v168_v31 = vmul.f32 %v785_v22, %v1126_v1  ;;  %v786_v32 = vunpack.c.h.bf16 %v1023_v9  ;;  %v1027_v21 = vld [vmem:[%s1800_s0 + $0x48] sm:$0xff]  }
  0x15   :  { %v570_v34 = vadd.f32 %v1164_v25, %v499_v23  ;;  %v500_v35 = vadd.f32 %v436_v20, %v237_v24  ;;  %v438_v36 = vmul.f32 %v913_v27, %v1134_v4  ;;  %v914_v37 = vunpack.c.h.bf16 %v1054_v14  ;;  %v1058_v27 = vld [vmem:[%s1803_s3 + $0x48] sm:$0xff]  }
  0x16   :  { %697 = vst [vmem:[%s1806_s6 + $0x30] sm:$0xff] %v633_v29  ;;  %v501_v38 = vadd.f32 %v437_v26, %v238_v30  ;;  %v239_v39 = vadd.f32 %v1139_v6, %v168_v31  ;;  %v169_v40 = vmul.f32 %v786_v32, %v1126_v1  ;;  %v789_v41 = vunpack.c.l.bf16 %v1024_v28 }
  0x17   :  { %v634_v42 = vmax.f32 %v570_v34, 0.0  ;;  %v571_v43 = vadd.f32 %v1164_v25, %v500_v35  ;;  %v439_v44 = vmul.f32 %v914_v37, %v1134_v4  ;;  %v917_v45 = vunpack.c.l.bf16 %v1055_v33 }
  0x18   :  { %v572_v46 = vadd.f32 %v1164_v25, %v501_v38  ;;  %v502_v47 = vadd.f32 %v438_v36, %v239_v39  ;;  %v240_v48 = vadd.f32 %v1139_v6, %v169_v40  ;;  %v170_v49 = vmul.f32 %v789_v41, %v1126_v1 }
  0x19   :  { %698 = vst [vmem:[%s1806_s6 + $0x38] sm:$0xff] %v634_v42  ;;  %v635_v52 = vmax.f32 %v571_v43, 0.0  ;;  %v440_v53 = vmul.f32 %v917_v45, %v1134_v4  ;;  %v790_v54 = vunpack.c.h.bf16 %v1024_v28  ;;  %v918_v55 = vunpack.c.h.bf16 %v1055_v33  ;;  %v1059_v45 = vld [vmem:[%s1803_s3 + $0x50] sm:$0xff]  }
  0x1a   :  { %v636_v56 = vmax.f32 %v572_v46, 0.0  ;;  %v573_v57 = vadd.f32 %v1164_v25, %v502_v47  ;;  %v503_v58 = vadd.f32 %v439_v44, %v240_v48  ;;  %v241_v59 = vadd.f32 %v1139_v6, %v170_v49  ;;  %v1028_v44 = vld [vmem:[%s1800_s0 + $0x50] sm:$0xff]  }
  0x1b   :  { %699 = vst [vmem:[%s1806_s6 + $0x40] sm:$0xff] %v635_v52  ;;  %v171_v60 = vmul.f32 %v790_v54, %v1126_v1  ;;  %v441_v61 = vmul.f32 %v918_v55, %v1134_v4  ;;  %v793_v62 = vunpack.c.l.bf16 %v1025_v50  ;;  %v921_v63 = vunpack.c.l.bf16 %v1056_v51 }
  0x1c   :  { %700 = vst [vmem:[%s1806_s6 + $0x48] sm:$0xff] %v636_v56  ;;  %v637_v2 = vmax.f32 %v573_v57, 0.0  ;;  %v574_v3 = vadd.f32 %v1164_v25, %v503_v58  ;;  %v504_v5 = vadd.f32 %v440_v53, %v241_v59  ;;  %v794_v7 = vunpack.c.h.bf16 %v1025_v50  ;;  %v1029_v58 = vld [vmem:[%s1800_s0 + $0x58] sm:$0xff]  }
  0x1d   :  { %v242_v9 = vadd.f32 %v1139_v6, %v171_v60  ;;  %v172_v10 = vmul.f32 %v793_v62, %v1126_v1  ;;  %v442_v11 = vmul.f32 %v921_v63, %v1134_v4  ;;  %v922_v12 = vunpack.c.h.bf16 %v1056_v51  ;;  %v1060_v63 = vld [vmem:[%s1803_s3 + $0x58] sm:$0xff]  }
  0x1e   :  { %701 = vst [vmem:[%s1806_s6 + $0x50] sm:$0xff] %v637_v2  ;;  %v638_v13 = vmax.f32 %v574_v3, 0.0  ;;  %v575_v14 = vadd.f32 %v1164_v25, %v504_v5  ;;  %v173_v15 = vmul.f32 %v794_v7, %v1126_v1  ;;  %v797_v16 = vunpack.c.l.bf16 %v1026_v0 }
  0x1f   :  { %v505_v17 = vadd.f32 %v441_v61, %v242_v9  ;;  %v243_v18 = vadd.f32 %v1139_v6, %v172_v10  ;;  %v443_v19 = vmul.f32 %v922_v12, %v1134_v4  ;;  %v925_v20 = vunpack.c.l.bf16 %v1057_v8 }
  0x20   :  { %702 = vst [vmem:[%s1806_s6 + $0x58] sm:$0xff] %v638_v13  ;;  %v639_v22 = vmax.f32 %v575_v14, 0.0  ;;  %v244_v23 = vadd.f32 %v1139_v6, %v173_v15  ;;  %v174_v24 = vmul.f32 %v797_v16, %v1126_v1  ;;  %v798_v26 = vunpack.c.h.bf16 %v1026_v0  ;;  %v1030_v15 = vld [vmem:[%s1800_s0 + $0x60] sm:$0xff]  }
  0x21   :  { %v576_v28 = vadd.f32 %v1164_v25, %v505_v17  ;;  %v506_v29 = vadd.f32 %v442_v11, %v243_v18  ;;  %v444_v30 = vmul.f32 %v925_v20, %v1134_v4  ;;  %v926_v31 = vunpack.c.h.bf16 %v1057_v8  ;;  %v1061_v20 = vld [vmem:[%s1803_s3 + $0x60] sm:$0xff]  }
  0x22   :  { %703 = vst [vmem:[%s1806_s6 + $0x60] sm:$0xff] %v639_v22  ;;  %v507_v32 = vadd.f32 %v443_v19, %v244_v23  ;;  %v245_v33 = vadd.f32 %v1139_v6, %v174_v24  ;;  %v175_v34 = vmul.f32 %v798_v26, %v1126_v1  ;;  %v801_v35 = vunpack.c.l.bf16 %v1027_v21 }
  0x23   :  { %v640_v36 = vmax.f32 %v576_v28, 0.0  ;;  %v577_v37 = vadd.f32 %v1164_v25, %v506_v29  ;;  %v445_v38 = vmul.f32 %v926_v31, %v1134_v4  ;;  %v929_v39 = vunpack.c.l.bf16 %v1058_v27 }
  0x24   :  { %v578_v40 = vadd.f32 %v1164_v25, %v507_v32  ;;  %v508_v41 = vadd.f32 %v444_v30, %v245_v33  ;;  %v246_v42 = vadd.f32 %v1139_v6, %v175_v34  ;;  %v176_v43 = vmul.f32 %v801_v35, %v1126_v1 }
  0x25   :  { %704 = vst [vmem:[%s1806_s6 + $0x68] sm:$0xff] %v640_v36  ;;  %v641_v46 = vmax.f32 %v577_v37, 0.0  ;;  %v446_v47 = vmul.f32 %v929_v39, %v1134_v4  ;;  %v802_v48 = vunpack.c.h.bf16 %v1027_v21  ;;  %v930_v49 = vunpack.c.h.bf16 %v1058_v27  ;;  %v1062_v39 = vld [vmem:[%s1803_s3 + $0x68] sm:$0xff]  }
  0x26   :  { %v642_v50 = vmax.f32 %v578_v40, 0.0  ;;  %v579_v51 = vadd.f32 %v1164_v25, %v508_v41  ;;  %v509_v52 = vadd.f32 %v445_v38, %v246_v42  ;;  %v247_v53 = vadd.f32 %v1139_v6, %v176_v43  ;;  %v1031_v38 = vld [vmem:[%s1800_s0 + $0x68] sm:$0xff]  }
  0x27   :  { %705 = vst [vmem:[%s1806_s6 + $0x70] sm:$0xff] %v641_v46  ;;  %v177_v54 = vmul.f32 %v802_v48, %v1126_v1  ;;  %v447_v55 = vmul.f32 %v930_v49, %v1134_v4  ;;  %v805_v56 = vunpack.c.l.bf16 %v1028_v44  ;;  %v933_v57 = vunpack.c.l.bf16 %v1059_v45 }
  0x28   :  { %706 = vst [vmem:[%s1806_s6 + $0x78] sm:$0xff] %v642_v50  ;;  %v643_v59 = vmax.f32 %v579_v51, 0.0  ;;  %v580_v60 = vadd.f32 %v1164_v25, %v509_v52  ;;  %v510_v61 = vadd.f32 %v446_v47, %v247_v53  ;;  %v806_v62 = vunpack.c.h.bf16 %v1028_v44  ;;  %v1032_v52 = vld [vmem:[%s1800_s0 + $0x70] sm:$0xff]  }
  0x29   :  { %v248_v0 = vadd.f32 %v1139_v6, %v177_v54  ;;  %v178_v2 = vmul.f32 %v805_v56, %v1126_v1  ;;  %v448_v3 = vmul.f32 %v933_v57, %v1134_v4  ;;  %v934_v5 = vunpack.c.h.bf16 %v1059_v45  ;;  %v1063_v57 = vld [vmem:[%s1803_s3 + $0x70] sm:$0xff]  }
  0x2a   :  { %707 = vst [vmem:[%s1806_s6 + $0x80] sm:$0xff] %v643_v59  ;;  %v644_v7 = vmax.f32 %v580_v60, 0.0  ;;  %v581_v8 = vadd.f32 %v1164_v25, %v510_v61  ;;  %v179_v9 = vmul.f32 %v806_v62, %v1126_v1  ;;  %v809_v10 = vunpack.c.l.bf16 %v1029_v58 }
  0x2b   :  { %v511_v11 = vadd.f32 %v447_v55, %v248_v0  ;;  %v249_v12 = vadd.f32 %v1139_v6, %v178_v2  ;;  %v449_v13 = vmul.f32 %v934_v5, %v1134_v4  ;;  %v937_v14 = vunpack.c.l.bf16 %v1060_v63 }
  0x2c   :  { %708 = vst [vmem:[%s1806_s6 + $0x88] sm:$0xff] %v644_v7  ;;  %v645_v16 = vmax.f32 %v581_v8, 0.0  ;;  %v250_v17 = vadd.f32 %v1139_v6, %v179_v9  ;;  %v180_v18 = vmul.f32 %v809_v10, %v1126_v1  ;;  %v810_v19 = vunpack.c.h.bf16 %v1029_v58  ;;  %v1033_v9 = vld [vmem:[%s1800_s0 + $0x78] sm:$0xff]  }
  0x2d   :  { %v582_v21 = vadd.f32 %v1164_v25, %v511_v11  ;;  %v512_v22 = vadd.f32 %v448_v3, %v249_v12  ;;  %v450_v23 = vmul.f32 %v937_v14, %v1134_v4  ;;  %v938_v24 = vunpack.c.h.bf16 %v1060_v63  ;;  %v1064_v14 = vld [vmem:[%s1803_s3 + $0x78] sm:$0xff]  }
  0x2e   :  { %709 = vst [vmem:[%s1806_s6 + $0x90] sm:$0xff] %v645_v16  ;;  %v513_v26 = vadd.f32 %v449_v13, %v250_v17  ;;  %v251_v27 = vadd.f32 %v1139_v6, %v180_v18  ;;  %v181_v28 = vmul.f32 %v810_v19, %v1126_v1  ;;  %v813_v29 = vunpack.c.l.bf16 %v1030_v15 }
  0x2f   :  { %v646_v30 = vmax.f32 %v582_v21, 0.0  ;;  %v583_v31 = vadd.f32 %v1164_v25, %v512_v22  ;;  %v451_v32 = vmul.f32 %v938_v24, %v1134_v4  ;;  %v941_v33 = vunpack.c.l.bf16 %v1061_v20 }
  0x30   :  { %v584_v34 = vadd.f32 %v1164_v25, %v513_v26  ;;  %v514_v35 = vadd.f32 %v450_v23, %v251_v27  ;;  %v252_v36 = vadd.f32 %v1139_v6, %v181_v28  ;;  %v182_v37 = vmul.f32 %v813_v29, %v1126_v1 }
  0x31   :  { %710 = vst [vmem:[%s1806_s6 + $0x98] sm:$0xff] %v646_v30  ;;  %v647_v40 = vmax.f32 %v583_v31, 0.0  ;;  %v452_v41 = vmul.f32 %v941_v33, %v1134_v4  ;;  %v814_v42 = vunpack.c.h.bf16 %v1030_v15  ;;  %v942_v43 = vunpack.c.h.bf16 %v1061_v20  ;;  %v1065_v33 = vld [vmem:[%s1803_s3 + $0x80] sm:$0xff]  }
  0x32   :  { %v648_v44 = vmax.f32 %v584_v34, 0.0  ;;  %v585_v45 = vadd.f32 %v1164_v25, %v514_v35  ;;  %v515_v46 = vadd.f32 %v451_v32, %v252_v36  ;;  %v253_v47 = vadd.f32 %v1139_v6, %v182_v37  ;;  %v1034_v32 = vld [vmem:[%s1800_s0 + $0x80] sm:$0xff]  }
  0x33   :  { %711 = vst [vmem:[%s1806_s6 + $0xa0] sm:$0xff] %v647_v40  ;;  %v183_v48 = vmul.f32 %v814_v42, %v1126_v1  ;;  %v453_v49 = vmul.f32 %v942_v43, %v1134_v4  ;;  %v817_v50 = vunpack.c.l.bf16 %v1031_v38  ;;  %v945_v51 = vunpack.c.l.bf16 %v1062_v39 }
  0x34   :  { %712 = vst [vmem:[%s1806_s6 + $0xa8] sm:$0xff] %v648_v44  ;;  %v649_v53 = vmax.f32 %v585_v45, 0.0  ;;  %v586_v54 = vadd.f32 %v1164_v25, %v515_v46  ;;  %v516_v55 = vadd.f32 %v452_v41, %v253_v47  ;;  %v818_v56 = vunpack.c.h.bf16 %v1031_v38  ;;  %v1035_v46 = vld [vmem:[%s1800_s0 + $0x88] sm:$0xff]  }
  0x35   :  { %v254_v58 = vadd.f32 %v1139_v6, %v183_v48  ;;  %v184_v59 = vmul.f32 %v817_v50, %v1126_v1  ;;  %v454_v60 = vmul.f32 %v945_v51, %v1134_v4  ;;  %v946_v61 = vunpack.c.h.bf16 %v1062_v39  ;;  %v1066_v51 = vld [vmem:[%s1803_s3 + $0x88] sm:$0xff]  }
  0x36   :  { %713 = vst [vmem:[%s1806_s6 + $0xb0] sm:$0xff] %v649_v53  ;;  %v650_v62 = vmax.f32 %v586_v54, 0.0  ;;  %v587_v63 = vadd.f32 %v1164_v25, %v516_v55  ;;  %v185_v0 = vmul.f32 %v818_v56, %v1126_v1  ;;  %v821_v2 = vunpack.c.l.bf16 %v1032_v52 }
  0x37   :  { %v517_v3 = vadd.f32 %v453_v49, %v254_v58  ;;  %v255_v5 = vadd.f32 %v1139_v6, %v184_v59  ;;  %v455_v7 = vmul.f32 %v946_v61, %v1134_v4  ;;  %v949_v8 = vunpack.c.l.bf16 %v1063_v57 }
  0x38   :  { %714 = vst [vmem:[%s1806_s6 + $0xb8] sm:$0xff] %v650_v62  ;;  %v651_v10 = vmax.f32 %v587_v63, 0.0  ;;  %v256_v11 = vadd.f32 %v1139_v6, %v185_v0  ;;  %v186_v12 = vmul.f32 %v821_v2, %v1126_v1  ;;  %v822_v13 = vunpack.c.h.bf16 %v1032_v52  ;;  %v1036_v0 = vld [vmem:[%s1800_s0 + $0x90] sm:$0xff]  }
  0x39   :  { %v588_v15 = vadd.f32 %v1164_v25, %v517_v3  ;;  %v518_v16 = vadd.f32 %v454_v60, %v255_v5  ;;  %v456_v17 = vmul.f32 %v949_v8, %v1134_v4  ;;  %v950_v18 = vunpack.c.h.bf16 %v1063_v57  ;;  %v1067_v8 = vld [vmem:[%s1803_s3 + $0x90] sm:$0xff]  }
  0x3a   :  { %715 = vst [vmem:[%s1806_s6 + $0xc0] sm:$0xff] %v651_v10  ;;  %v519_v19 = vadd.f32 %v455_v7, %v256_v11  ;;  %v257_v20 = vadd.f32 %v1139_v6, %v186_v12  ;;  %v187_v21 = vmul.f32 %v822_v13, %v1126_v1  ;;  %v825_v22 = vunpack.c.l.bf16 %v1033_v9 }
  0x3b   :  { %v652_v23 = vmax.f32 %v588_v15, 0.0  ;;  %v589_v24 = vadd.f32 %v1164_v25, %v518_v16  ;;  %v457_v26 = vmul.f32 %v950_v18, %v1134_v4  ;;  %v953_v27 = vunpack.c.l.bf16 %v1064_v14 }
  0x3c   :  { %v590_v28 = vadd.f32 %v1164_v25, %v519_v19  ;;  %v520_v29 = vadd.f32 %v456_v17, %v257_v20  ;;  %v258_v30 = vadd.f32 %v1139_v6, %v187_v21  ;;  %v188_v31 = vmul.f32 %v825_v22, %v1126_v1 }
  0x3d   :  { %716 = vst [vmem:[%s1806_s6 + $0xc8] sm:$0xff] %v652_v23  ;;  %v653_v34 = vmax.f32 %v589_v24, 0.0  ;;  %v458_v35 = vmul.f32 %v953_v27, %v1134_v4  ;;  %v826_v36 = vunpack.c.h.bf16 %v1033_v9  ;;  %v954_v37 = vunpack.c.h.bf16 %v1064_v14  ;;  %v1068_v27 = vld [vmem:[%s1803_s3 + $0x98] sm:$0xff]  }
  0x3e   :  { %v654_v38 = vmax.f32 %v590_v28, 0.0  ;;  %v591_v39 = vadd.f32 %v1164_v25, %v520_v29  ;;  %v521_v40 = vadd.f32 %v457_v26, %v258_v30  ;;  %v259_v41 = vadd.f32 %v1139_v6, %v188_v31  ;;  %v1037_v26 = vld [vmem:[%s1800_s0 + $0x98] sm:$0xff]  }
  0x3f   :  { %717 = vst [vmem:[%s1806_s6 + $0xd0] sm:$0xff] %v653_v34  ;;  %v189_v42 = vmul.f32 %v826_v36, %v1126_v1  ;;  %v459_v43 = vmul.f32 %v954_v37, %v1134_v4  ;;  %v829_v44 = vunpack.c.l.bf16 %v1034_v32  ;;  %v957_v45 = vunpack.c.l.bf16 %v1065_v33 }
  0x40   :  { %718 = vst [vmem:[%s1806_s6 + $0xd8] sm:$0xff] %v654_v38  ;;  %v655_v47 = vmax.f32 %v591_v39, 0.0  ;;  %v592_v48 = vadd.f32 %v1164_v25, %v521_v40  ;;  %v522_v49 = vadd.f32 %v458_v35, %v259_v41  ;;  %v830_v50 = vunpack.c.h.bf16 %v1034_v32  ;;  %v1038_v40 = vld [vmem:[%s1800_s0 + $0xa0] sm:$0xff]  }
  0x41   :  { %v260_v52 = vadd.f32 %v1139_v6, %v189_v42  ;;  %v190_v53 = vmul.f32 %v829_v44, %v1126_v1  ;;  %v460_v54 = vmul.f32 %v957_v45, %v1134_v4  ;;  %v958_v55 = vunpack.c.h.bf16 %v1065_v33  ;;  %v1069_v45 = vld [vmem:[%s1803_s3 + $0xa0] sm:$0xff]  }
  0x42   :  { %719 = vst [vmem:[%s1806_s6 + $0xe0] sm:$0xff] %v655_v47  ;;  %v656_v56 = vmax.f32 %v592_v48, 0.0  ;;  %v593_v57 = vadd.f32 %v1164_v25, %v522_v49  ;;  %v191_v58 = vmul.f32 %v830_v50, %v1126_v1  ;;  %v833_v59 = vunpack.c.l.bf16 %v1035_v46 }
  0x43   :  { %v523_v60 = vadd.f32 %v459_v43, %v260_v52  ;;  %v261_v61 = vadd.f32 %v1139_v6, %v190_v53  ;;  %v461_v62 = vmul.f32 %v958_v55, %v1134_v4  ;;  %v961_v63 = vunpack.c.l.bf16 %v1066_v51 }
  0x44   :  { %720 = vst [vmem:[%s1806_s6 + $0xe8] sm:$0xff] %v656_v56  ;;  %v657_v2 = vmax.f32 %v593_v57, 0.0  ;;  %v262_v3 = vadd.f32 %v1139_v6, %v191_v58  ;;  %v192_v5 = vmul.f32 %v833_v59, %v1126_v1  ;;  %v834_v7 = vunpack.c.h.bf16 %v1035_v46  ;;  %v1039_v58 = vld [vmem:[%s1800_s0 + $0xa8] sm:$0xff]  }
  0x45   :  { %v594_v9 = vadd.f32 %v1164_v25, %v523_v60  ;;  %v524_v10 = vadd.f32 %v460_v54, %v261_v61  ;;  %v462_v11 = vmul.f32 %v961_v63, %v1134_v4  ;;  %v962_v12 = vunpack.c.h.bf16 %v1066_v51  ;;  %v1070_v63 = vld [vmem:[%s1803_s3 + $0xa8] sm:$0xff]  }
  0x46   :  { %721 = vst [vmem:[%s1806_s6 + $0xf0] sm:$0xff] %v657_v2  ;;  %v525_v13 = vadd.f32 %v461_v62, %v262_v3  ;;  %v263_v14 = vadd.f32 %v1139_v6, %v192_v5  ;;  %v193_v15 = vmul.f32 %v834_v7, %v1126_v1  ;;  %v837_v16 = vunpack.c.l.bf16 %v1036_v0 }
  0x47   :  { %v658_v17 = vmax.f32 %v594_v9, 0.0  ;;  %v595_v18 = vadd.f32 %v1164_v25, %v524_v10  ;;  %v463_v19 = vmul.f32 %v962_v12, %v1134_v4  ;;  %v965_v20 = vunpack.c.l.bf16 %v1067_v8 }
  0x48   :  { %v596_v21 = vadd.f32 %v1164_v25, %v525_v13  ;;  %v526_v22 = vadd.f32 %v462_v11, %v263_v14  ;;  %v264_v23 = vadd.f32 %v1139_v6, %v193_v15  ;;  %v194_v24 = vmul.f32 %v837_v16, %v1126_v1 }
  0x49   :  { %722 = vst [vmem:[%s1806_s6 + $0xf8] sm:$0xff] %v658_v17  ;;  %v659_v28 = vmax.f32 %v595_v18, 0.0  ;;  %v464_v29 = vmul.f32 %v965_v20, %v1134_v4  ;;  %v838_v30 = vunpack.c.h.bf16 %v1036_v0  ;;  %v966_v31 = vunpack.c.h.bf16 %v1067_v8  ;;  %v1071_v20 = vld [vmem:[%s1803_s3 + $0xb0] sm:$0xff]  }
  0x4a   :  { %v660_v32 = vmax.f32 %v596_v21, 0.0  ;;  %v597_v33 = vadd.f32 %v1164_v25, %v526_v22  ;;  %v527_v34 = vadd.f32 %v463_v19, %v264_v23  ;;  %v265_v35 = vadd.f32 %v1139_v6, %v194_v24  ;;  %v1040_v19 = vld [vmem:[%s1800_s0 + $0xb0] sm:$0xff]  }
  0x4b   :  { %723 = vst [vmem:[%s1806_s6 + $0x100] sm:$0xff] %v659_v28  ;;  %v195_v36 = vmul.f32 %v838_v30, %v1126_v1  ;;  %v465_v37 = vmul.f32 %v966_v31, %v1134_v4  ;;  %v841_v38 = vunpack.c.l.bf16 %v1037_v26  ;;  %v969_v39 = vunpack.c.l.bf16 %v1068_v27 }
  0x4c   :  { %724 = vst [vmem:[%s1806_s6 + $0x108] sm:$0xff] %v660_v32  ;;  %v661_v41 = vmax.f32 %v597_v33, 0.0  ;;  %v598_v42 = vadd.f32 %v1164_v25, %v527_v34  ;;  %v528_v43 = vadd.f32 %v464_v29, %v265_v35  ;;  %v842_v44 = vunpack.c.h.bf16 %v1037_v26  ;;  %v1041_v34 = vld [vmem:[%s1800_s0 + $0xb8] sm:$0xff]  }
  0x4d   :  { %v266_v46 = vadd.f32 %v1139_v6, %v195_v36  ;;  %v196_v47 = vmul.f32 %v841_v38, %v1126_v1  ;;  %v466_v48 = vmul.f32 %v969_v39, %v1134_v4  ;;  %v970_v49 = vunpack.c.h.bf16 %v1068_v27  ;;  %v1072_v39 = vld [vmem:[%s1803_s3 + $0xb8] sm:$0xff]  }
  0x4e   :  { %725 = vst [vmem:[%s1806_s6 + $0x110] sm:$0xff] %v661_v41  ;;  %v662_v50 = vmax.f32 %v598_v42, 0.0  ;;  %v599_v51 = vadd.f32 %v1164_v25, %v528_v43  ;;  %v197_v52 = vmul.f32 %v842_v44, %v1126_v1  ;;  %v845_v53 = vunpack.c.l.bf16 %v1038_v40 }
  0x4f   :  { %v529_v54 = vadd.f32 %v465_v37, %v266_v46  ;;  %v267_v55 = vadd.f32 %v1139_v6, %v196_v47  ;;  %v467_v56 = vmul.f32 %v970_v49, %v1134_v4  ;;  %v973_v57 = vunpack.c.l.bf16 %v1069_v45 }
  0x50   :  { %726 = vst [vmem:[%s1806_s6 + $0x118] sm:$0xff] %v662_v50  ;;  %v663_v59 = vmax.f32 %v599_v51, 0.0  ;;  %v268_v60 = vadd.f32 %v1139_v6, %v197_v52  ;;  %v198_v61 = vmul.f32 %v845_v53, %v1126_v1  ;;  %v846_v62 = vunpack.c.h.bf16 %v1038_v40  ;;  %v1042_v52 = vld [vmem:[%s1800_s0 + $0xc0] sm:$0xff]  }
  0x51   :  { %v600_v0 = vadd.f32 %v1164_v25, %v529_v54  ;;  %v530_v2 = vadd.f32 %v466_v48, %v267_v55  ;;  %v468_v3 = vmul.f32 %v973_v57, %v1134_v4  ;;  %v974_v5 = vunpack.c.h.bf16 %v1069_v45  ;;  %v1073_v57 = vld [vmem:[%s1803_s3 + $0xc0] sm:$0xff]  }
  0x52   :  { %727 = vst [vmem:[%s1806_s6 + $0x120] sm:$0xff] %v663_v59  ;;  %v531_v7 = vadd.f32 %v467_v56, %v268_v60  ;;  %v269_v8 = vadd.f32 %v1139_v6, %v198_v61  ;;  %v199_v9 = vmul.f32 %v846_v62, %v1126_v1  ;;  %v849_v10 = vunpack.c.l.bf16 %v1039_v58 }
  0x53   :  { %v664_v11 = vmax.f32 %v600_v0, 0.0  ;;  %v601_v12 = vadd.f32 %v1164_v25, %v530_v2  ;;  %v469_v13 = vmul.f32 %v974_v5, %v1134_v4  ;;  %v977_v14 = vunpack.c.l.bf16 %v1070_v63 }
  0x54   :  { %v602_v15 = vadd.f32 %v1164_v25, %v531_v7  ;;  %v532_v16 = vadd.f32 %v468_v3, %v269_v8  ;;  %v270_v17 = vadd.f32 %v1139_v6, %v199_v9  ;;  %v200_v18 = vmul.f32 %v849_v10, %v1126_v1 }
  0x55   :  { %728 = vst [vmem:[%s1806_s6 + $0x128] sm:$0xff] %v664_v11  ;;  %v665_v21 = vmax.f32 %v601_v12, 0.0  ;;  %v470_v22 = vmul.f32 %v977_v14, %v1134_v4  ;;  %v850_v23 = vunpack.c.h.bf16 %v1039_v58  ;;  %v978_v24 = vunpack.c.h.bf16 %v1070_v63  ;;  %v1074_v14 = vld [vmem:[%s1803_s3 + $0xc8] sm:$0xff]  }
  0x56   :  { %v666_v26 = vmax.f32 %v602_v15, 0.0  ;;  %v603_v27 = vadd.f32 %v1164_v25, %v532_v16  ;;  %v533_v28 = vadd.f32 %v469_v13, %v270_v17  ;;  %v271_v29 = vadd.f32 %v1139_v6, %v200_v18  ;;  %v1043_v13 = vld [vmem:[%s1800_s0 + $0xc8] sm:$0xff]  }
  0x57   :  { %729 = vst [vmem:[%s1806_s6 + $0x130] sm:$0xff] %v665_v21  ;;  %v201_v30 = vmul.f32 %v850_v23, %v1126_v1  ;;  %v471_v31 = vmul.f32 %v978_v24, %v1134_v4  ;;  %v853_v32 = vunpack.c.l.bf16 %v1040_v19  ;;  %v981_v33 = vunpack.c.l.bf16 %v1071_v20 }
  0x58   :  { %730 = vst [vmem:[%s1806_s6 + $0x138] sm:$0xff] %v666_v26  ;;  %v667_v35 = vmax.f32 %v603_v27, 0.0  ;;  %v604_v36 = vadd.f32 %v1164_v25, %v533_v28  ;;  %v534_v37 = vadd.f32 %v470_v22, %v271_v29  ;;  %v854_v38 = vunpack.c.h.bf16 %v1040_v19  ;;  %v1044_v28 = vld [vmem:[%s1800_s0 + $0xd0] sm:$0xff]  }
  0x59   :  { %v272_v40 = vadd.f32 %v1139_v6, %v201_v30  ;;  %v202_v41 = vmul.f32 %v853_v32, %v1126_v1  ;;  %v472_v42 = vmul.f32 %v981_v33, %v1134_v4  ;;  %v982_v43 = vunpack.c.h.bf16 %v1071_v20  ;;  %v1075_v33 = vld [vmem:[%s1803_s3 + $0xd0] sm:$0xff]  }
  0x5a   :  { %731 = vst [vmem:[%s1806_s6 + $0x140] sm:$0xff] %v667_v35  ;;  %v668_v44 = vmax.f32 %v604_v36, 0.0  ;;  %v605_v45 = vadd.f32 %v1164_v25, %v534_v37  ;;  %v203_v46 = vmul.f32 %v854_v38, %v1126_v1  ;;  %v857_v47 = vunpack.c.l.bf16 %v1041_v34 }
  0x5b   :  { %v535_v48 = vadd.f32 %v471_v31, %v272_v40  ;;  %v273_v49 = vadd.f32 %v1139_v6, %v202_v41  ;;  %v473_v50 = vmul.f32 %v982_v43, %v1134_v4  ;;  %v985_v51 = vunpack.c.l.bf16 %v1072_v39 }
  0x5c   :  { %732 = vst [vmem:[%s1806_s6 + $0x148] sm:$0xff] %v668_v44  ;;  %v669_v53 = vmax.f32 %v605_v45, 0.0  ;;  %v274_v54 = vadd.f32 %v1139_v6, %v203_v46  ;;  %v204_v55 = vmul.f32 %v857_v47, %v1126_v1  ;;  %v858_v56 = vunpack.c.h.bf16 %v1041_v34  ;;  %v1045_v46 = vld [vmem:[%s1800_s0 + $0xd8] sm:$0xff]  }
  0x5d   :  { %v606_v58 = vadd.f32 %v1164_v25, %v535_v48  ;;  %v536_v59 = vadd.f32 %v472_v42, %v273_v49  ;;  %v474_v60 = vmul.f32 %v985_v51, %v1134_v4  ;;  %v986_v61 = vunpack.c.h.bf16 %v1072_v39 }
  0x5e   :  { %733 = vst [vmem:[%s1806_s6 + $0x150] sm:$0xff] %v669_v53  ;;  %v537_v62 = vadd.f32 %v473_v50, %v274_v54  ;;  %v275_v63 = vadd.f32 %v1139_v6, %v204_v55  ;;  %v205_v0 = vmul.f32 %v858_v56, %v1126_v1  ;;  %v861_v2 = vunpack.c.l.bf16 %v1042_v52  ;;  %v1076_v50 = vld [vmem:[%s1803_s3 + $0xd8] sm:$0xff]   ;;  %v1672_v53 = vld [vmem:[%s1804_s4] ss:$0 sm:$0xff] }
  0x5f   :  { %v670_v3 = vmax.f32 %v606_v58, 0.0  ;;  %v607_v5 = vadd.f32 %v1164_v25, %v536_v59  ;;  %v475_v7 = vmul.f32 %v986_v61, %v1134_v4  ;;  %v989_v8 = vunpack.c.l.bf16 %v1073_v57 }
  0x60   :  { %v608_v9 = vadd.f32 %v1164_v25, %v537_v62  ;;  %v538_v10 = vadd.f32 %v474_v60, %v275_v63  ;;  %v276_v11 = vadd.f32 %v1139_v6, %v205_v0  ;;  %v206_v12 = vmul.f32 %v861_v2, %v1126_v1 }
  0x61   :  { %734 = vst [vmem:[%s1806_s6 + $0x158] sm:$0xff] %v670_v3  ;;  %v671_v15 = vmax.f32 %v607_v5, 0.0  ;;  %v476_v16 = vmul.f32 %v989_v8, %v1134_v4  ;;  %v862_v17 = vunpack.c.h.bf16 %v1042_v52  ;;  %v990_v18 = vunpack.c.h.bf16 %v1073_v57  ;;  %v1077_v8 = vld [vmem:[%s1803_s3 + $0xe0] sm:$0xff]  }
  0x62   :  { %v672_v19 = vmax.f32 %v608_v9, 0.0  ;;  %v609_v20 = vadd.f32 %v1164_v25, %v538_v10  ;;  %v539_v21 = vadd.f32 %v475_v7, %v276_v11  ;;  %v277_v22 = vadd.f32 %v1139_v6, %v206_v12  ;;  %v1046_v7 = vld [vmem:[%s1800_s0 + $0xe0] sm:$0xff]  }
  0x63   :  { %735 = vst [vmem:[%s1806_s6 + $0x160] sm:$0xff] %v671_v15  ;;  %v207_v23 = vmul.f32 %v862_v17, %v1126_v1  ;;  %v477_v24 = vmul.f32 %v990_v18, %v1134_v4  ;;  %v865_v26 = vunpack.c.l.bf16 %v1043_v13  ;;  %v993_v27 = vunpack.c.l.bf16 %v1074_v14 }
  0x64   :  { %736 = vst [vmem:[%s1806_s6 + $0x168] sm:$0xff] %v672_v19  ;;  %v673_v29 = vmax.f32 %v609_v20, 0.0  ;;  %v610_v30 = vadd.f32 %v1164_v25, %v539_v21  ;;  %v540_v31 = vadd.f32 %v476_v16, %v277_v22  ;;  %v866_v32 = vunpack.c.h.bf16 %v1043_v13  ;;  %v1698_v13 = vld [vmem:[%s1805_s5] ss:$0 sm:$0xff]  ;;  %v1047_v21 = vld [vmem:[%s1800_s0 + $0xe8] sm:$0xff]  }
  0x65   :  { %v278_v34 = vadd.f32 %v1139_v6, %v207_v23  ;;  %v208_v35 = vmul.f32 %v865_v26, %v1126_v1  ;;  %v478_v36 = vmul.f32 %v993_v27, %v1134_v4  ;;  %v994_v37 = vunpack.c.h.bf16 %v1074_v14  ;;  %v1078_v27 = vld [vmem:[%s1803_s3 + $0xe8] sm:$0xff]  }
  0x66   :  { %737 = vst [vmem:[%s1806_s6 + $0x170] sm:$0xff] %v673_v29  ;;  %v674_v38 = vmax.f32 %v610_v30, 0.0  ;;  %v611_v39 = vadd.f32 %v1164_v25, %v540_v31  ;;  %v209_v40 = vmul.f32 %v866_v32, %v1126_v1  ;;  %v869_v41 = vunpack.c.l.bf16 %v1044_v28  ;;  %v1656_v1 = vld [vmem:[%s1802_s2] ss:$0 sm:$0xff] }
  0x67   :  { %v541_v42 = vadd.f32 %v477_v24, %v278_v34  ;;  %v279_v43 = vadd.f32 %v1139_v6, %v208_v35  ;;  %v479_v44 = vmul.f32 %v994_v37, %v1134_v4  ;;  %v997_v45 = vunpack.c.l.bf16 %v1075_v33  ;;  %v1662_v4 = vld [vmem:[%s1801_s1] ss:$0 sm:$0xff] }
  0x68   :  { %738 = vst [vmem:[%s1806_s6 + $0x178] sm:$0xff] %v674_v38  ;;  %v675_v47 = vmax.f32 %v611_v39, 0.0  ;;  %v280_v48 = vadd.f32 %v1656_v1, %v209_v40  ;;  %v210_v6 = vmul.f32 %v1662_v4, %v869_v41  ;;  %v870_v49 = vunpack.c.h.bf16 %v1044_v28  ;;  %v1048_v40 = vld [vmem:[%s1800_s0 + $0xf0] sm:$0xff]  }
  0x69   :  { %v612_v51 = vadd.f32 %v1164_v25, %v541_v42  ;;  %v542_v52 = vadd.f32 %v478_v36, %v279_v43  ;;  %v480_v54 = vmul.f32 %v1672_v53, %v997_v45  ;;  %v998_v55 = vunpack.c.h.bf16 %v1075_v33  ;;  %v1079_v45 = vld [vmem:[%s1803_s3 + $0xf0] sm:$0xff]  }
  0x6a   :  { %739 = vst [vmem:[%s1806_s6 + $0x180] sm:$0xff] %v675_v47  ;;  %v543_v56 = vadd.f32 %v479_v44, %v280_v48  ;;  %v281_v57 = vadd.f32 %v1656_v1, %v210_v6  ;;  %v211_v58 = vmul.f32 %v1662_v4, %v870_v49  ;;  %v873_v59 = vunpack.c.l.bf16 %v1045_v46 }
  0x6b   :  { %v676_v60 = vmax.f32 %v612_v51, 0.0  ;;  %v613_v61 = vadd.f32 %v1164_v25, %v542_v52  ;;  %v481_v62 = vmul.f32 %v1672_v53, %v998_v55  ;;  %v1001_v63 = vunpack.c.l.bf16 %v1076_v50 }
  0x6c   :  { %v614_v0 = vadd.f32 %v1164_v25, %v543_v56  ;;  %v544_v2 = vadd.f32 %v480_v54, %v281_v57  ;;  %v282_v3 = vadd.f32 %v1656_v1, %v211_v58  ;;  %v212_v5 = vmul.f32 %v1662_v4, %v873_v59 }
  0x6d   :  { %740 = vst [vmem:[%s1806_s6 + $0x188] sm:$0xff] %v676_v60  ;;  %v677_v9 = vmax.f32 %v613_v61, 0.0  ;;  %v482_v25 = vmul.f32 %v1672_v53, %v1001_v63  ;;  %v874_v10 = vunpack.c.h.bf16 %v1045_v46  ;;  %v1002_v11 = vunpack.c.h.bf16 %v1076_v50  ;;  %v1080_v63 = vld [vmem:[%s1803_s3 + $0xf8] sm:$0xff]  }
  0x6e   :  { %v678_v12 = vmax.f32 %v614_v0, 0.0  ;;  %v615_v14 = vadd.f32 %v1698_v13, %v544_v2  ;;  %v545_v15 = vadd.f32 %v481_v62, %v282_v3  ;;  %v283_v16 = vadd.f32 %v1656_v1, %v212_v5  ;;  %v1049_v62 = vld [vmem:[%s1800_s0 + $0xf8] sm:$0xff]  }
  0x6f   :  { %741 = vst [vmem:[%s1806_s6 + $0x190] sm:$0xff] %v677_v9  ;;  %v213_v17 = vmul.f32 %v1662_v4, %v874_v10  ;;  %v483_v18 = vmul.f32 %v1672_v53, %v1002_v11  ;;  %v877_v19 = vunpack.c.l.bf16 %v1046_v7  ;;  %v1005_v20 = vunpack.c.l.bf16 %v1077_v8 }
  0x70   :  { %742 = vst [vmem:[%s1806_s6 + $0x198] sm:$0xff] %v678_v12  ;;  %v679_v22 = vmax.f32 %v615_v14, 0.0  ;;  %v616_v23 = vadd.f32 %v1698_v13, %v545_v15  ;;  %v546_v24 = vadd.f32 %v482_v25, %v283_v16  ;;  %v878_v26 = vunpack.c.h.bf16 %v1046_v7 }
  0x71   :  { %v284_v28 = vadd.f32 %v1656_v1, %v213_v17  ;;  %v214_v29 = vmul.f32 %v1662_v4, %v877_v19  ;;  %v484_v30 = vmul.f32 %v1672_v53, %v1005_v20  ;;  %v1006_v31 = vunpack.c.h.bf16 %v1077_v8 }
  0x72   :  { %743 = vst [vmem:[%s1806_s6 + $0x1a0] sm:$0xff] %v679_v22  ;;  %v680_v32 = vmax.f32 %v616_v23, 0.0  ;;  %v617_v33 = vadd.f32 %v1698_v13, %v546_v24  ;;  %v215_v34 = vmul.f32 %v1662_v4, %v878_v26  ;;  %v881_v35 = vunpack.c.l.bf16 %v1047_v21 }
  0x73   :  { %v547_v36 = vadd.f32 %v483_v18, %v284_v28  ;;  %v285_v37 = vadd.f32 %v1656_v1, %v214_v29  ;;  %v485_v38 = vmul.f32 %v1672_v53, %v1006_v31  ;;  %v1009_v39 = vunpack.c.l.bf16 %v1078_v27 }
  0x74   :  { %744 = vst [vmem:[%s1806_s6 + $0x1a8] sm:$0xff] %v680_v32  ;;  %v681_v41 = vmax.f32 %v617_v33, 0.0  ;;  %v286_v42 = vadd.f32 %v1656_v1, %v215_v34  ;;  %v216_v43 = vmul.f32 %v1662_v4, %v881_v35  ;;  %v882_v44 = vunpack.c.h.bf16 %v1047_v21 }
  0x75   :  { %v618_v46 = vadd.f32 %v1698_v13, %v547_v36  ;;  %v548_v47 = vadd.f32 %v484_v30, %v285_v37  ;;  %v486_v48 = vmul.f32 %v1672_v53, %v1009_v39  ;;  %v1010_v6 = vunpack.c.h.bf16 %v1078_v27 }
  0x76   :  { %745 = vst [vmem:[%s1806_s6 + $0x1b0] sm:$0xff] %v681_v41  ;;  %v549_v49 = vadd.f32 %v485_v38, %v286_v42  ;;  %v287_v50 = vadd.f32 %v1656_v1, %v216_v43  ;;  %v217_v51 = vmul.f32 %v1662_v4, %v882_v44  ;;  %v885_v52 = vunpack.c.l.bf16 %v1048_v40 }
  0x77   :  { %v682_v54 = vmax.f32 %v618_v46, 0.0  ;;  %v619_v55 = vadd.f32 %v1698_v13, %v548_v47  ;;  %v487_v56 = vmul.f32 %v1672_v53, %v1010_v6  ;;  %v1013_v57 = vunpack.c.l.bf16 %v1079_v45 }
  0x78   :  { %v620_v58 = vadd.f32 %v1698_v13, %v549_v49  ;;  %v550_v59 = vadd.f32 %v486_v48, %v287_v50  ;;  %v288_v60 = vadd.f32 %v1656_v1, %v217_v51  ;;  %v218_v61 = vmul.f32 %v1662_v4, %v885_v52 }
  0x79   :  { %746 = vst [vmem:[%s1806_s6 + $0x1b8] sm:$0xff] %v682_v54  ;;  %v683_v0 = vmax.f32 %v619_v55, 0.0  ;;  %v488_v2 = vmul.f32 %v1672_v53, %v1013_v57  ;;  %v886_v3 = vunpack.c.h.bf16 %v1048_v40  ;;  %v1014_v5 = vunpack.c.h.bf16 %v1079_v45 }
  0x7a   :  { %v684_v7 = vmax.f32 %v620_v58, 0.0  ;;  %v621_v8 = vadd.f32 %v1698_v13, %v550_v59  ;;  %v551_v9 = vadd.f32 %v487_v56, %v288_v60  ;;  %v289_v25 = vadd.f32 %v1656_v1, %v218_v61 }
  0x7b   :  { %747 = vst [vmem:[%s1806_s6 + $0x1c0] sm:$0xff] %v683_v0  ;;  %v219_v10 = vmul.f32 %v1662_v4, %v886_v3  ;;  %v489_v11 = vmul.f32 %v1672_v53, %v1014_v5  ;;  %v889_v12 = vunpack.c.l.bf16 %v1049_v62  ;;  %v1017_v14 = vunpack.c.l.bf16 %v1080_v63 }
  0x7c   :  { %748 = vst [vmem:[%s1806_s6 + $0x1c8] sm:$0xff] %v684_v7  ;;  %v685_v15 = vmax.f32 %v621_v8, 0.0  ;;  %v622_v16 = vadd.f32 %v1698_v13, %v551_v9  ;;  %v552_v17 = vadd.f32 %v488_v2, %v289_v25  ;;  %v890_v18 = vunpack.c.h.bf16 %v1049_v62 }
  0x7d   :  { %v290_v19 = vadd.f32 %v1656_v1, %v219_v10  ;;  %v220_v20 = vmul.f32 %v1662_v4, %v889_v12  ;;  %v490_v21 = vmul.f32 %v1672_v53, %v1017_v14  ;;  %v1018_v22 = vunpack.c.h.bf16 %v1080_v63 }
  0x7e   :  { %749 = vst [vmem:[%s1806_s6 + $0x1d0] sm:$0xff] %v685_v15  ;;  %v686_v23 = vmax.f32 %v622_v16, 0.0  ;;  %v623_v24 = vadd.f32 %v1698_v13, %v552_v17  ;;  %v221_v26 = vmul.f32 %v1662_v4, %v890_v18 }
  0x7f   :  { %v553_v27 = vadd.f32 %v489_v11, %v290_v19  ;;  %v291_v28 = vadd.f32 %v1656_v1, %v220_v20  ;;  %v491_v29 = vmul.f32 %v1672_v53, %v1018_v22 }
  0x80   :  { %750 = vst [vmem:[%s1806_s6 + $0x1d8] sm:$0xff] %v686_v23  ;;  %v687_v30 = vmax.f32 %v623_v24, 0.0  ;;  %v292_v31 = vadd.f32 %v1656_v1, %v221_v26 }
  0x81   :  { %v624_v32 = vadd.f32 %v1698_v13, %v553_v27  ;;  %v554_v33 = vadd.f32 %v490_v21, %v291_v28 }
  0x82   :  { %751 = vst [vmem:[%s1806_s6 + $0x1e0] sm:$0xff] %v687_v30  ;;  %v555_v4 = vadd.f32 %v491_v29, %v292_v31 }
  0x83   :  { %v688_v34 = vmax.f32 %v624_v32, 0.0  ;;  %v625_v35 = vadd.f32 %v1698_v13, %v554_v33 }
  0x84   :  { %v626_v53 = vadd.f32 %v1698_v13, %v555_v4 }
  0x85   :  { %752 = vst [vmem:[%s1806_s6 + $0x1e8] sm:$0xff] %v688_v34  ;;  %v689_v36 = vmax.f32 %v625_v35, 0.0 }
  0x86   :  { %v690_v37 = vmax.f32 %v626_v53, 0.0 }
  0x87   :  { %753 = vst [vmem:[%s1806_s6 + $0x1f0] sm:$0xff] %v689_v36 }
  0x88   :  { %754 = vst [vmem:[%s1806_s6 + $0x1f8] sm:$0xff] %v690_v37 }

// kernel: building_block_forward.3
= control target key start
LH: loop header
LB: loop body
LE: loop exit
PB: predicated region body
PF: predicated region fallthrough
CT: control target
= control target key end

     0   :  { %s7153_s12 = smov 0   ;;  %s9820_s0 = inlined_call_operand.vmem [shape: bf16[2,16,16,128], index: 0, kind: input, shape index: {}]   ;;  %s9821_s1 = inlined_call_operand.vmem [shape: bf16[1152,128], index: 1, kind: input, shape index: {}]   ;;  %s9822_s2 = inlined_call_operand.vmem [shape: bf16[2,16,16,128], index: 2, kind: output, shape index: {0}]   ;;  %s9823_s3 = inlined_call_operand.vmem [shape: f32[2,2,128], index: 3, kind: output, shape index: {1}]  }
   0x1 LB: > { %s5865_s13 = sadd.s32 4294967295, %s7130_s12   ;;  %p5869_p0 = scmp.ge.s32.totalorder %s7130_s12, 1  ;;  %s7130_s12 = sphi %s7153_s12, %s14_s12  }
   0x2   : > { %p140_p1 = scmp.lt.s32.totalorder %s7130_s12, 3 }
   0x4   : > { %p141_p2 = pnand %p5869_p0, %p140_p1 }
   0x6   : > { %144 = sbr.rel (%p141_p2) target bundleno = 656 (0x290), region = 28 }
   0xb   : > { %v6975_v0 = vld [vmem:[%s9821_s1 + $0x78] sm:$0xff]   ;;  %v7167_v1 = vld [vmem:[%s9821_s1 + $0x70] sm:$0xff]   ;;  %v7132_v2 = vmov 0   ;;  %p168_p3 = scmp.lt.s32.totalorder %s5865_s13, 1  ;;  %v6977_v3 = vld [vmem:[%s9821_s1 + $0x68] sm:$0xff]   ;;  %vm593_vm1 = vcmask 1043456  }
   0xc   : > { %215 = vst [vmem:[#allocation2] sm:$0xf] %v7132_v2  ;;  %216 = vst [vmem:[#allocation2 + $0x4] sm:$0xf] %v7132_v2  ;;  %6518 = vmatprep.subr.bf16.mxu0 %v6975_v0  ;;  %6950 = vmatprep.subr.bf16.mxu1 %v6975_v0  ;;  %v6978_v4 = vld [vmem:[%s9821_s1 + $0x60] sm:$0xff]   ;;  %v6979_v10 = vld [vmem:[%s9821_s1 + $0x58] sm:$0xff]  }
   0xd   : > { %217 = vst [vmem:[#allocation2 + $0x8] sm:$0x1] %v7132_v2  ;;  %218 = vst [vmem:[#allocation2 + $0xc] sm:$0xf] %v7132_v2  ;;  %6519 = vmatpush3.bf16.msra.mxu0 %v6975_v0  ;;  %6958 = vmatpush3.bf16.msra.mxu1 %v6975_v0  ;;  %s10075_s13 = smov (!%p168_p3, %s5865_s13), 1  ;;  %vm600_vm2 = vcmask 1040384  }
   0xe   : > { %219 = vst [vmem:[#allocation2 + $0x10] sm:$0xf] %v7132_v2  ;;  %220 = vst [vmem:[#allocation2 + $0x14] sm:$0x1] %v7132_v2  ;;  %6520 = vmatprep.subr.bf16.mxu0 %v7167_v1  ;;  %6951 = vmatprep.subr.bf16.mxu1 %v7167_v1  ;;  %s6173_s20 = sshll.u32 %s10075_s13, 7  ;;  %v9849_v30 = vmov 0 }
   0xf   : > { %221 = vst [vmem:[#allocation2 + $0x18] sm:$0xf] %v7132_v2  ;;  %222 = vst [vmem:[#allocation2 + $0x1c] sm:$0xf] %v7132_v2  ;;  %s7191_s25 = scalar_lea.vmem %s9820_s0, %s6173_s20  ;;  %vm774_vm0 = vsmask.f32 3328 }
  0x10   : > { %223 = vst [vmem:[#allocation2 + $0x20] sm:$0x1] %v7132_v2  ;;  %224 = vst [vmem:[#allocation2 + $0x24] sm:$0xf] %v7132_v2  ;;  %v197_v14 = vld [vmem:[%s7191_s25 + $0x38] sm:$0xf] }
  0x11   : > { %225 = vst [vmem:[#allocation2 + $0x28] sm:$0xf] %v7132_v2  ;;  %226 = vst [vmem:[#allocation2 + $0x2c] sm:$0x1] %v7132_v2  ;;  %6521 = vmatpush3.bf16.msra.mxu0 %v7167_v1  ;;  %6959 = vmatpush3.bf16.msra.mxu1 %v7167_v1  ;;  %vm775_vm3 = vsmask.f32 7440 }
  0x12   : > { %227 = vst [vmem:[#allocation2 + $0x30] sm:$0xf] %v7132_v2  ;;  %228 = vst [vmem:[#allocation2 + $0x34] sm:$0xf] %v7132_v2  ;;  %6522 = vmatprep.subr.bf16.mxu0 %v6977_v3  ;;  %6952 = vmatprep.subr.bf16.mxu1 %v6977_v3  ;;  %v198_v17 = vld [vmem:[%s7191_s25 + $0x3c] sm:$0xf] }
  0x13   : > { %229 = vst [vmem:[#allocation2 + $0x38] sm:$0x1] %v7132_v2  ;;  %230 = vst [vmem:[#allocation2 + $0x3c] sm:$0xf] %v7132_v2  ;;  %v710_v5 = vld [vmem:[#allocation2] sm:$0xf] }
  0x14   : > { %231 = vst [vmem:[#allocation2 + $0x40] sm:$0xf] %v7132_v2  ;;  %232 = vst [vmem:[#allocation2 + $0x44] sm:$0x1] %v7132_v2  ;;  %v711_v6 = vld [vmem:[#allocation2 + $0x4] sm:$0xf] }
  0x15   : > { %233 = vst [vmem:[#allocation2 + $0x48] sm:$0xf] %v7132_v2  ;;  %234 = vst [vmem:[#allocation2 + $0x4c] sm:$0xf] %v7132_v2  ;;  %v758_v7 = vld [vmem:[#allocation2 + $0x8] sm:$0x1]  ;;  %6523 = vmatpush3.bf16.msra.mxu0 %v6977_v3  ;;  %6960 = vmatpush3.bf16.msra.mxu1 %v6977_v3 }
  0x16   : > { %235 = vst [vmem:[#allocation2 + $0x50] sm:$0x1] %v7132_v2  ;;  %236 = vst [vmem:[#allocation2 + $0x54] sm:$0xf] %v7132_v2  ;;  %v778_v8 = vshrl.u32 %v710_v5, 16  ;;  %v781_v9 = vshll.u32 %v710_v5, 16  ;;  %6524 = vmatprep.subr.bf16.mxu0 %v6978_v4  ;;  %6953 = vmatprep.subr.bf16.mxu1 %v6978_v4 }
  0x17   : > { %237 = vst [vmem:[#allocation2 + $0x58] sm:$0xf] %v7132_v2  ;;  %238 = vst [vmem:[#allocation2 + $0x5c] sm:$0x1] %v7132_v2  ;;  %v787_v11 = vshll.u32 %v711_v6, 16  ;;  %v791_v12 = vshrl.u32 %v711_v6, 16 }
  0x18   : > { %239 = vst [vmem:[#allocation2 + $0x60] sm:$0xf] %v7132_v2  ;;  %240 = vst [vmem:[#allocation2 + $0x64] sm:$0xf] %v7132_v2  ;;  %v797_v13 = vshll.u32 %v758_v7, 16  ;;  %v780_v15 = vrot.slane %v778_v8, 4 }
  0x19   : > { %241 = vst [vmem:[#allocation2 + $0x68] sm:$0x1] %v7132_v2  ;;  %242 = vst [vmem:[#allocation2 + $0x6c] sm:$0xf] %v7132_v2  ;;  %v783_v16 = vrot.slane %v781_v9, 5  ;;  %v789_v18 = vrot.slane %v787_v11, 5  ;;  %6525 = vmatpush3.bf16.msra.mxu0 %v6978_v4  ;;  %6961 = vmatpush3.bf16.msra.mxu1 %v6978_v4 }
  0x1a   : > { %243 = vst [vmem:[#allocation2 + $0x70] sm:$0xf] %v7132_v2  ;;  %244 = vst [vmem:[#allocation2 + $0x74] sm:$0x1] %v7132_v2  ;;  %v793_v19 = vrot.slane %v791_v12, 4  ;;  %v392_v21 = vshrl.u32 %v197_v14, 16  ;;  %6526 = vmatprep.subr.bf16.mxu0 %v6979_v10  ;;  %6954 = vmatprep.subr.bf16.mxu1 %v6979_v10 }
  0x1b   : > { %245 = vst [vmem:[#allocation2 + $0x78] sm:$0xf] %v7132_v2  ;;  %246 = vst [vmem:[#allocation2 + $0x7c] sm:$0xf] %v7132_v2  ;;  %vm269_vm4 = vsmask.f32 256  ;;  %v784_v20 = vor.u32 %v783_v16, %v780_v15 }
  0x1c   : > { %247 = vst [vmem:[#allocation2 + $0x80] sm:$0x1] %v7132_v2  ;;  %248 = vst [vmem:[#allocation2 + $0x84] sm:$0xf] %v7132_v2  ;;  %vm270_vm5 = vsmask.f32 4368  ;;  %v794_v25 = vor.u32 %v793_v19, %v789_v18 }
  0x1d   : > { %249 = vst [vmem:[#allocation2 + $0x88] sm:$0xf] %v7132_v2  ;;  %250 = vst [vmem:[#allocation2 + $0x8c] sm:$0x1] %v7132_v2  ;;  %v395_v22 = vshll.u32 %v197_v14, 16  ;;  %v400_v23 = vshrl.u32 %v198_v17, 16  ;;  %6527 = vmatpush3.bf16.msra.mxu0 %v6979_v10  ;;  %6962 = vmatpush3.bf16.msra.mxu1 %v6979_v10 }
  0x1e   : > { %251 = vst [vmem:[#allocation2 + $0x90] sm:$0xf] %v7132_v2  ;;  %252 = vst [vmem:[#allocation2 + $0x94] sm:$0xf] %v7132_v2  ;;  %v799_v26 = vrot.slane %v797_v13, 5  ;;  %v403_v27 = vshll.u32 %v198_v17, 16 }
  0x1f   : > { %253 = vst [vmem:[#allocation2 + $0x98] sm:$0x1] %v7132_v2  ;;  %254 = vst [vmem:[#allocation2 + $0x9c] sm:$0xf] %v7132_v2  ;;  %vm594_vm7 = vsmask.f32 7938 }
  0x20   : > { %255 = vst [vmem:[#allocation2 + $0xa0] sm:$0xf] %v7132_v2  ;;  %256 = vst [vmem:[#allocation2 + $0xa4] sm:$0x1] %v7132_v2  ;;  %v647_v28 = vld [vmem:[#allocation2 + $0x60] sm:$0xf] }
  0x21   : > { %257 = vst [vmem:[#allocation2 + $0xa8] sm:$0xf] %v7132_v2  ;;  %258 = vst [vmem:[#allocation2 + $0xac] sm:$0xf] %v7132_v2  ;;  %v785_v29 = vrot.slane %v784_v20, 4  ;;  %v394_v31 = vrot.slane %v392_v21, 7 }
  0x22   : > { %259 = vst [vmem:[#allocation2 + $0xb0] sm:$0x1] %v7132_v2  ;;  %260 = vst [vmem:[#allocation2 + $0xb4] sm:$0xf] %v7132_v2  ;;  %v402_v32 = vrot.slane %v400_v23, 7  ;;  %v6980_v34 = vld [vmem:[%s9821_s1 + $0x50] sm:$0xff]  }
  0x23   : > { %261 = vst [vmem:[#allocation2 + $0xb8] sm:$0xf] %v7132_v2  ;;  %262 = vst [vmem:[#allocation2 + $0xbc] sm:$0x1] %v7132_v2  ;;  %v183_v33 = vld [vmem:[%s7191_s25] sm:$0xf]  ;;  %v397_v41 = vor.u32 %v395_v22, %v394_v31  ;;  %6528 = vmatprep.subr.bf16.mxu0 %v6980_v34  ;;  %6955 = vmatprep.subr.bf16.mxu1 %v6980_v34 }
  0x24   : > { %263 = vst [vmem:[#allocation2 + $0xc0] sm:$0xf] %v7132_v2  ;;  %264 = vst [vmem:[#allocation2 + $0xc4] sm:$0xf] %v7132_v2  ;;  %v795_v35 = vrot.slane %v794_v25, 4  ;;  %v9852_v36 = vmov 0  ;;  %v405_v43 = vor.u32 %v403_v27, %v402_v32  ;;  %6529 = vmatpush3.bf16.msra.mxu0 %v6980_v34  ;;  %6963 = vmatpush3.bf16.msra.mxu1 %v6980_v34 }
  0x25   : > { %265 = vst [vmem:[#allocation2 + $0xc8] sm:$0x1] %v7132_v2  ;;  %266 = vst [vmem:[#allocation2 + $0xcc] sm:$0xf] %v7132_v2  ;;  %v184_v37 = vld [vmem:[%s7191_s25 + $0x4] sm:$0xf] }
  0x26   : > { %267 = vst [vmem:[#allocation2 + $0xd0] sm:$0xf] %v7132_v2  ;;  %268 = vst [vmem:[#allocation2 + $0xd4] sm:$0x1] %v7132_v2  ;;  %v273_v38 = vshrl.u32 %v183_v33, 16  ;;  %v276_v39 = vshll.u32 %v183_v33, 16 }
  0x27   : > { %vm7199_vm6 = vmor %vm774_vm0, %vm775_vm3  ;;  %v398_v42 = vrot.slane %v394_v31, 4  ;;  %v9855_v44 = vmov 0  ;;  %v651_v45 = vld [vmem:[#allocation2 + $0x68] sm:$0x1]  ;;  %v407_v47 = vrot.slane %v402_v32, 4  ;;  %v281_v49 = vshrl.u32 %v184_v37, 16 }
  0x28   : > { %vm7204_vm8 = vmor %vm269_vm4, %vm270_vm5  ;;  %v790_v40 = vsel %vm7199_vm6, %v785_v29, %v789_v18  ;;  %v800_v46 = vsel %vm7199_vm6, %v795_v35, %v799_v26  ;;  %v275_v48 = vrot.slane %v273_v38, 7  ;;  %v199_v50 = vld [vmem:[%s7191_s25 + $0x40] sm:$0xf]  ;;  %v6981_v51 = vld [vmem:[%s9821_s1 + $0x48] sm:$0xff]   ;;  %v284_v55 = vshll.u32 %v184_v37, 16 }
  0x29   : > { %v9850_v30 = vsel %vm7204_vm8, 4294967295, %v9849_v30  ;;  %vm7213_vm9 = vmand %vm593_vm1, %vm594_vm7  ;;  %v5875_v52 = vcombine.low %v790_v40, %v800_v46  ;;  %v406_v53 = vsel %vm7204_vm8, %v398_v42, %v405_v43  ;;  %v596_v56 = vld [vmem:[#allocation2 + $0xc] sm:$0xf]  ;;  %v200_v57 = vld [vmem:[%s7191_s25 + $0x44] sm:$0xf]  ;;  %v283_v61 = vrot.slane %v281_v49, 7  ;;  %6530 = vmatprep.subr.bf16.mxu0 %v6981_v51  ;;  %6956 = vmatprep.subr.bf16.mxu1 %v6981_v51 }
  0x2a   : > { %9851 = vst [vmem:[#allocation3_spill] sm:$0xff] %v9850_v30  ;;  %v9853_v36 = vsel %vm7213_vm9, 4294967295, %v9852_v36  ;;  %vm7222_vm10 = vmand %vm600_vm2, %vm269_vm4  ;;  %v648_v54 = vsel %vm7213_vm9, %v397_v41, %v647_v28  ;;  %v278_v59 = vor.u32 %v276_v39, %v275_v48  ;;  %v279_v60 = vrot.slane %v275_v48, 4  ;;  %v602_v62 = vld [vmem:[#allocation2 + $0x14] sm:$0x1]  ;;  %v6982_v3 = vld [vmem:[%s9821_s1 + $0x40] sm:$0xff]   ;;  %6531 = vmatpush3.bf16.msra.mxu0 %v6981_v51  ;;  %6964 = vmatpush3.bf16.msra.mxu1 %v6981_v51 }
  0x2b   : > { %9854 = vst [vmem:[#allocation4_spill] sm:$0xff] %v9853_v36  ;;  %v9856_v44 = vsel %vm7222_vm10, 4294967295, %v9855_v44  ;;  %649 = vst [vmem:[#allocation2 + $0x60] sm:$0xf] %v648_v54  ;;  %v652_v58 = vsel %vm7222_vm10, %v407_v47, %v651_v45  ;;  %6534 = vmatprep.mubr.bf16.mxu0 %v5875_v52  ;;  %v409_v63 = vshrl.u32 %v199_v50, 16  ;;  %v412_v0 = vshll.u32 %v199_v50, 16  ;;  %6532 = vmatprep.subr.bf16.mxu0 %v6982_v3 }
  0x2c   : > { %9857 = vst [vmem:[#allocation5_spill] sm:$0xff] %v9856_v44  ;;  %650 = vst [vmem:[#allocation2 + $0x64] sm:$0xf] %v406_v53  ;;  %v417_v1 = vshrl.u32 %v200_v57, 16  ;;  %v420_v2 = vshll.u32 %v200_v57, 16  ;;  %v286_v4 = vor.u32 %v284_v55, %v283_v61  ;;  %v288_v5 = vrot.slane %v283_v61, 4  ;;  %6957 = vmatprep.subr.bf16.mxu1 %v6982_v3 }
  0x2d   : > { %653 = vst [vmem:[#allocation2 + $0x68] sm:$0x1] %v652_v58  ;;  %v597_v6 = vsel %vm7213_vm9, %v278_v59, %v596_v56  ;;  %v654_v7 = vld [vmem:[#allocation2 + $0x6c] sm:$0xf]  ;;  %v658_v8 = vld [vmem:[#allocation2 + $0x74] sm:$0x1] }
  0x2e   : > { %598 = vst [vmem:[#allocation2 + $0xc] sm:$0xf] %v597_v6  ;;  %v411_v9 = vrot.slane %v409_v63, 7  ;;  %v419_v10 = vrot.slane %v417_v1, 7  ;;  %v287_v11 = vsel %vm7204_vm8, %v279_v60, %v286_v4  ;;  %v603_v12 = vsel %vm7222_vm10, %v288_v5, %v602_v62  ;;  %v185_v13 = vld [vmem:[%s7191_s25 + $0x8] sm:$0xf]  ;;  %6533 = vmatpush3.bf16.msra.mxu0 %v6982_v3  ;;  %6965 = vmatpush3.bf16.msra.mxu1 %v6982_v3 }
  0x2f   : > { %599 = vst [vmem:[#allocation2 + $0x10] sm:$0xf] %v287_v11  ;;  %604 = vst [vmem:[#allocation2 + $0x14] sm:$0x1] %v603_v12  ;;  %v186_v18 = vld [vmem:[%s7191_s25 + $0xc] sm:$0xf] }
  0x30   : > { %v414_v14 = vor.u32 %v412_v0, %v411_v9  ;;  %v415_v15 = vrot.slane %v411_v9, 4  ;;  %v422_v16 = vor.u32 %v420_v2, %v419_v10  ;;  %v424_v17 = vrot.slane %v419_v10, 4  ;;  %v7253_v19 = vld [vmem:[%s9821_s1 + $0x38] sm:$0xff]  }
  0x31   : > { %v290_v20 = vshrl.u32 %v185_v13, 16  ;;  %v298_v21 = vshrl.u32 %v186_v18, 16  ;;  %v7264_v28 = vld [vmem:[%s9821_s1 + $0xb8] sm:$0xff]   ;;  %v301_v29 = vshll.u32 %v186_v18, 16  ;;  %v293_v39 = vshll.u32 %v185_v13, 16  ;;  %6566 = vmatprep.subr.bf16.mxu1 %v7253_v19 }
  0x32   : > { %v726_v22 = vld [vmem:[#allocation2 + $0x60] sm:$0xf]  ;;  %v423_v25 = vsel %vm7204_vm8, %v415_v15, %v422_v16  ;;  %v655_v26 = vsel %vm7213_vm9, %v414_v14, %v654_v7  ;;  %v659_v27 = vsel %vm7222_vm10, %v424_v17, %v658_v8  ;;  %6614 = vmatprep.subr.bf16.mxu0 %v7264_v28  ;;  %v605_v15 = vld [vmem:[#allocation2 + $0x18] sm:$0xf]  ;;  %vm1803_vm11 = vcmask 1042432  }
  0x33   : > { %v727_v23 = vld [vmem:[#allocation2 + $0x64] sm:$0xf]  ;;  %v970_v32 = vshrl.u32 %v726_v22, 16  ;;  %v973_v33 = vshll.u32 %v726_v22, 16  ;;  %656 = vst [vmem:[#allocation2 + $0x6c] sm:$0xf] %v655_v26 }
  0x34   : > { %v766_v31 = vld [vmem:[#allocation2 + $0x68] sm:$0x1]  ;;  %v979_v34 = vshll.u32 %v727_v23, 16  ;;  %v983_v35 = vshrl.u32 %v727_v23, 16  ;;  %657 = vst [vmem:[#allocation2 + $0x70] sm:$0xf] %v423_v25 }
  0x35   : > { %660 = vst [vmem:[#allocation2 + $0x74] sm:$0x1] %v659_v27  ;;  %v989_v37 = vshll.u32 %v766_v31, 16  ;;  %v292_v38 = vrot.slane %v290_v20, 7  ;;  %v7266_v40 = vrot.slane %v298_v21, 7  ;;  %v972_v41 = vrot.slane %v970_v32, 4 }
  0x36   : > { %v975_v42 = vrot.slane %v973_v33, 5  ;;  %v981_v43 = vrot.slane %v979_v34, 5  ;;  %v985_v45 = vrot.slane %v983_v35, 4  ;;  %v712_v46 = vld [vmem:[#allocation2 + $0xc] sm:$0xf]  ;;  %vm1804_vm12 = vcmask 1046532  }
  0x37   : > { %v991_v47 = vrot.slane %v989_v37, 5  ;;  %v802_v48 = vshrl.u32 %v712_v46, 16  ;;  %v805_v49 = vshll.u32 %v712_v46, 16  ;;  %v713_v52 = vld [vmem:[#allocation2 + $0x10] sm:$0xf]  ;;  %v296_v54 = vrot.slane %v292_v38, 4  ;;  %vm7594_vm13 = vmor %vm1803_vm11, %vm1804_vm12 }
  0x38   : > { %v976_v50 = vor.u32 %v975_v42, %v972_v41  ;;  %v986_v51 = vor.u32 %v985_v45, %v981_v43  ;;  %v759_v53 = vld [vmem:[#allocation2 + $0x14] sm:$0x1]  ;;  %v303_v55 = vor.u32 %v301_v29, %v7266_v40  ;;  %v811_v58 = vshll.u32 %v713_v52, 16  ;;  %v609_v16 = vld [vmem:[#allocation2 + $0x20] sm:$0x1] }
  0x39   : > { %v804_v56 = vrot.slane %v802_v48, 4  ;;  %v807_v57 = vrot.slane %v805_v49, 5  ;;  %v815_v59 = vshrl.u32 %v713_v52, 16  ;;  %v821_v62 = vshll.u32 %v759_v53, 16  ;;  %v201_v22 = vld [vmem:[%s7191_s25 + $0x48] sm:$0xf] }
  0x3a   : > { %v977_v60 = vrot.slane %v976_v50, 4  ;;  %v987_v61 = vrot.slane %v986_v51, 4  ;;  %v295_v63 = vor.u32 %v293_v39, %v292_v38  ;;  %v813_v1 = vrot.slane %v811_v58, 5  ;;  %v728_v3 = vld [vmem:[#allocation2 + $0x6c] sm:$0xf]  ;;  %v6986_v39 = vld [vmem:[%s9821_s1 + $0xb0] sm:$0xff]  }
  0x3b   : > { %v808_v0 = vor.u32 %v807_v57, %v804_v56  ;;  %v817_v2 = vrot.slane %v815_v59, 4  ;;  %v729_v4 = vld [vmem:[#allocation2 + $0x70] sm:$0xf]  ;;  %v304_v5 = vsel %vm7204_vm8, %v296_v54, %v303_v55  ;;  %v823_v8 = vrot.slane %v821_v62, 5  ;;  %v202_v29 = vld [vmem:[%s7191_s25 + $0x4c] sm:$0xf] }
  0x3c   : > { %v982_v6 = vsel %vm7199_vm6, %v977_v60, %v981_v43  ;;  %v992_v7 = vsel %vm7199_vm6, %v987_v61, %v991_v47  ;;  %v767_v9 = vld [vmem:[#allocation2 + $0x74] sm:$0x1]  ;;  %v994_v10 = vshrl.u32 %v728_v3, 16  ;;  %608 = vst [vmem:[#allocation2 + $0x1c] sm:$0xf] %v304_v5  ;;  %v997_v14 = vshll.u32 %v728_v3, 16 }
  0x3d   : > { %v5883_v11 = vcombine.low %v982_v6, %v992_v7  ;;  %v809_v12 = vrot.slane %v808_v0, 4  ;;  %v818_v13 = vor.u32 %v817_v2, %v813_v1  ;;  %v1003_v18 = vshll.u32 %v729_v4, 16  ;;  %v187_v35 = vld [vmem:[%s7191_s25 + $0x10] sm:$0xf]  ;;  %v661_v47 = vld [vmem:[#allocation2 + $0x78] sm:$0xf] }
  0x3e   : > { %v996_v17 = vrot.slane %v994_v10, 4  ;;  %v1007_v20 = vshrl.u32 %v729_v4, 16  ;;  %v1013_v21 = vshll.u32 %v767_v9, 16  ;;  %v999_v26 = vrot.slane %v997_v14, 5  ;;  %v188_v52 = vld [vmem:[%s7191_s25 + $0x14] sm:$0xf] }
  0x3f   : > { %6550 = vmatprep.mubr.bf16.mxu1 %v5883_v11  ;;  %v814_v23 = vsel %vm7199_vm6, %v809_v12, %v813_v1  ;;  %v819_v25 = vrot.slane %v818_v13, 4  ;;  %v305_v27 = vrot.slane %v7266_v40, 4  ;;  %v1005_v31 = vrot.slane %v1003_v18, 5  ;;  %v665_v58 = vld [vmem:[#allocation2 + $0x80] sm:$0x1]  ;;  %v6988_v59 = vld [vmem:[%s9821_s1 + $0xa8] sm:$0xff]  }
  0x40   : > { %v1009_v32 = vrot.slane %v1007_v20, 4  ;;  %v1015_v33 = vrot.slane %v1013_v21, 5  ;;  %v606_v34 = vsel %vm7213_vm9, %v295_v63, %v605_v15  ;;  %v1000_v38 = vor.u32 %v999_v26, %v996_v17  ;;  %v6985_v5 = vld [vmem:[%s9821_s1 + $0x30] sm:$0xff]   ;;  %v6990_v15 = vld [vmem:[%s9821_s1 + $0xa0] sm:$0xff]  }
  0x41   : > { %v824_v37 = vsel %vm7199_vm6, %v819_v25, %v823_v8  ;;  %607 = vst [vmem:[#allocation2 + $0x18] sm:$0xf] %v606_v34  ;;  %v610_v40 = vsel %vm7222_vm10, %v305_v27, %v609_v16  ;;  %v426_v41 = vshrl.u32 %v201_v22, 16  ;;  %v429_v45 = vshll.u32 %v201_v22, 16  ;;  %v612_v8 = vld [vmem:[#allocation2 + $0x24] sm:$0xf] }
  0x42   : > { %v5876_v42 = vcombine.low %v814_v23, %v824_v37  ;;  %v1010_v43 = vor.u32 %v1009_v32, %v1005_v31  ;;  %611 = vst [vmem:[#allocation2 + $0x20] sm:$0x1] %v610_v40  ;;  %v434_v46 = vshrl.u32 %v202_v29, 16  ;;  %v1001_v48 = vrot.slane %v1000_v38, 4  ;;  %v203_v14 = vld [vmem:[%s7191_s25 + $0x50] sm:$0xf] }
  0x43   : > { %v715_v49 = vld [vmem:[#allocation2 + $0x1c] sm:$0xf]  ;;  %v428_v50 = vrot.slane %v426_v41, 7  ;;  %v437_v51 = vshll.u32 %v202_v29, 16  ;;  %v307_v53 = vshrl.u32 %v187_v35, 16  ;;  %v310_v7 = vshll.u32 %v187_v35, 16 }
  0x44   : > { %6535 = vmatmul.mubr.bf16.vlgmr.msra.gmra.mxu0 %v5876_v42  ;;  %v1011_v54 = vrot.slane %v1010_v43, 4  ;;  %v835_v55 = vshll.u32 %v715_v49, 16  ;;  %v839_v56 = vshrl.u32 %v715_v49, 16  ;;  %v436_v57 = vrot.slane %v434_v46, 7  ;;  %v616_v22 = vld [vmem:[#allocation2 + $0x2c] sm:$0x1] }
  0x45   : > { %v1006_v60 = vsel %vm7199_vm6, %v1001_v48, %v1005_v31  ;;  %6615 = vmatpush3.bf16.msra.mxu0 %v7264_v28  ;;  %v431_v61 = vor.u32 %v429_v45, %v428_v50  ;;  %v432_v62 = vrot.slane %v428_v50, 4  ;;  %v309_v63 = vrot.slane %v307_v53, 7  ;;  %v204_v29 = vld [vmem:[%s7191_s25 + $0x54] sm:$0xf]  ;;  %v6987_v35 = vld [vmem:[%s9821_s1 + $0x28] sm:$0xff]   ;;  %v6992_v50 = vld [vmem:[%s9821_s1 + $0x98] sm:$0xff]  }
  0x46   : > { %v1016_v0 = vsel %vm7199_vm6, %v1011_v54, %v1015_v33  ;;  %6616 = vmatprep.subr.bf16.mxu0 %v6986_v39  ;;  %v7301_v1 = vrot.slane %v835_v55, 5  ;;  %v841_v2 = vrot.slane %v839_v56, 4  ;;  %v439_v3 = vor.u32 %v437_v51, %v436_v57  ;;  %v7325_v37 = vld [vmem:[%s7191_s25 + $0x18] sm:$0xf]  ;;  %v6989_v56 = vld [vmem:[%s9821_s1 + $0x20] sm:$0xff]  }
  0x47   : > { %v5884_v4 = vcombine.low %v1006_v60, %v1016_v0  ;;  %v441_v6 = vrot.slane %v436_v57, 4  ;;  %v662_v28 = vsel %vm7213_vm9, %v431_v61, %v661_v47  ;;  %v313_v12 = vrot.slane %v309_v63, 4 }
  0x48   : > { %v714_v9 = vld [vmem:[#allocation2 + $0x18] sm:$0xf]  ;;  %v842_v10 = vor.u32 %v841_v2, %v7301_v1  ;;  %v440_v11 = vsel %vm7204_vm8, %v432_v62, %v439_v3  ;;  %663 = vst [vmem:[#allocation2 + $0x78] sm:$0xf] %v662_v28  ;;  %v315_v13 = vshrl.u32 %v188_v52, 16  ;;  %v312_v21 = vor.u32 %v310_v7, %v309_v63 }
  0x49   : > { %6551 = vmatmul.mubr.bf16.vlgmr.msra.gmra.mxu1 %v5884_v4  ;;  %6617 = vmatpush3.bf16.msra.mxu0 %v6986_v39  ;;  %v760_v16 = vld [vmem:[#allocation2 + $0x20] sm:$0x1]  ;;  %v826_v17 = vshrl.u32 %v714_v9, 16  ;;  %v829_v18 = vshll.u32 %v714_v9, 16  ;;  %664 = vst [vmem:[#allocation2 + $0x7c] sm:$0xf] %v440_v11  ;;  %v666_v20 = vsel %vm7222_vm10, %v441_v6, %v665_v58 }
  0x4a   : > { %6567 = vmatpush3.bf16.msra.mxu1 %v7253_v19  ;;  %v843_v23 = vrot.slane %v842_v10, 4  ;;  %v845_v25 = vshll.u32 %v760_v16, 16  ;;  %667 = vst [vmem:[#allocation2 + $0x80] sm:$0x1] %v666_v20  ;;  %v317_v26 = vrot.slane %v315_v13, 7  ;;  %v318_v27 = vshll.u32 %v188_v52, 16  ;;  %6618 = vmatprep.subr.bf16.mxu0 %v6988_v59 }
  0x4b   : > { %6568 = vmatprep.subr.bf16.mxu1 %v6985_v5  ;;  %v828_v31 = vrot.slane %v826_v17, 4  ;;  %v831_v32 = vrot.slane %v829_v18, 5  ;;  %v613_v33 = vsel %vm7213_vm9, %v312_v21, %v612_v8  ;;  %v443_v34 = vshrl.u32 %v203_v14, 16  ;;  %v668_v4 = vld [vmem:[#allocation2 + $0x84] sm:$0xf]  ;;  %v6994_v9 = vld [vmem:[%s9821_s1 + $0x90] sm:$0xff]  }
  0x4c   : > { %v847_v19 = vrot.slane %v845_v25, 5  ;;  %v320_v38 = vor.u32 %v318_v27, %v317_v26  ;;  %v322_v39 = vrot.slane %v317_v26, 4  ;;  %614 = vst [vmem:[#allocation2 + $0x24] sm:$0xf] %v613_v33  ;;  %v446_v40 = vshll.u32 %v203_v14, 16  ;;  %v6991_v14 = vld [vmem:[%s9821_s1 + $0x18] sm:$0xff]  }
  0x4d   : > { %v832_v41 = vor.u32 %v831_v32, %v828_v31  ;;  %v445_v42 = vrot.slane %v443_v34, 7  ;;  %v451_v43 = vshrl.u32 %v204_v29, 16  ;;  %v454_v45 = vshll.u32 %v204_v29, 16  ;;  %6619 = vmatpush3.bf16.msra.mxu0 %v6988_v59  ;;  %v672_v8 = vld [vmem:[#allocation2 + $0x8c] sm:$0x1]  ;;  %v6993_v25 = vld [vmem:[%s9821_s1 + $0x10] sm:$0xff]  }
  0x4e   : > { %6569 = vmatpush3.bf16.msra.mxu1 %v6985_v5  ;;  %v848_v46 = vsel %vm7199_vm6, %v843_v23, %v847_v19  ;;  %v321_v47 = vsel %vm7204_vm8, %v313_v12, %v320_v38  ;;  %v617_v48 = vsel %vm7222_vm10, %v322_v39, %v616_v22  ;;  %6620 = vmatprep.subr.bf16.mxu0 %v6990_v15  ;;  %v324_v49 = vshrl.u32 %v7325_v37, 16  ;;  %v190_v23 = vld [vmem:[%s7191_s25 + $0x1c] sm:$0xf]  ;;  %v6996_v26 = vld [vmem:[%s9821_s1 + $0x88] sm:$0xff]   ;;  %v619_v34 = vld [vmem:[#allocation2 + $0x30] sm:$0xf] }
  0x4f   : > { %v833_v51 = vrot.slane %v832_v41, 4  ;;  %v730_v52 = vld [vmem:[#allocation2 + $0x78] sm:$0xf]  ;;  %615 = vst [vmem:[#allocation2 + $0x28] sm:$0xf] %v321_v47  ;;  %v448_v53 = vor.u32 %v446_v40, %v445_v42  ;;  %v449_v54 = vrot.slane %v445_v42, 4  ;;  %6570 = vmatprep.subr.bf16.mxu1 %v6987_v35 }
  0x50   : > { %618 = vst [vmem:[#allocation2 + $0x2c] sm:$0x1] %v617_v48  ;;  %v453_v55 = vrot.slane %v451_v43, 7  ;;  %v731_v57 = vld [vmem:[#allocation2 + $0x7c] sm:$0xf]  ;;  %v1018_v58 = vshrl.u32 %v730_v52, 16 }
  0x51   : > { %v1021_v59 = vshll.u32 %v730_v52, 16  ;;  %v7340_v60 = vrot.slane %v324_v49, 7  ;;  %v327_v61 = vshll.u32 %v7325_v37, 16  ;;  %v838_v62 = vsel %vm7199_vm6, %v833_v51, %v7301_v1  ;;  %v768_v63 = vld [vmem:[#allocation2 + $0x80] sm:$0x1]  ;;  %6621 = vmatpush3.bf16.msra.mxu0 %v6990_v15  ;;  %v6995_v49 = vld [vmem:[%s9821_s1 + $0x8] sm:$0xff]  }
  0x52   : > { %v1027_v0 = vshll.u32 %v731_v57, 16  ;;  %v1031_v2 = vshrl.u32 %v731_v57, 16  ;;  %v456_v3 = vor.u32 %v454_v45, %v453_v55  ;;  %v5877_v5 = vcombine.low %v838_v62, %v848_v46  ;;  %6571 = vmatpush3.bf16.msra.mxu1 %v6987_v35  ;;  %6622 = vmatprep.subr.bf16.mxu0 %v6992_v50  ;;  %v7371_v35 = vld [vmem:[%s7191_s25 + $0x58] sm:$0xf] }
  0x53   : > { %v1020_v6 = vrot.slane %v1018_v58, 4  ;;  %v1023_v28 = vrot.slane %v1021_v59, 5  ;;  %v1037_v7 = vshll.u32 %v768_v63, 16  ;;  %v716_v11 = vld [vmem:[#allocation2 + $0x24] sm:$0xf]  ;;  %v458_v13 = vrot.slane %v453_v55, 4  ;;  %6572 = vmatprep.subr.bf16.mxu1 %v6989_v56 }
  0x54   : > { %v1029_v10 = vrot.slane %v1027_v0, 5  ;;  %v1033_v1 = vrot.slane %v1031_v2, 4  ;;  %v457_v12 = vsel %vm7204_vm8, %v449_v54, %v456_v3  ;;  %6538 = vmatprep.mubr.bf16.mxu0 %v5877_v5  ;;  %v850_v16 = vshrl.u32 %v716_v11, 16  ;;  %v623_v54 = vld [vmem:[#allocation2 + $0x38] sm:$0x1]  ;;  %v6998_v55 = vld [vmem:[%s9821_s1 + $0x80] sm:$0xff]  }
  0x55   : > { %v1024_v15 = vor.u32 %v1023_v28, %v1020_v6  ;;  %v853_v17 = vshll.u32 %v716_v11, 16  ;;  %671 = vst [vmem:[#allocation2 + $0x88] sm:$0xf] %v457_v12  ;;  %v1039_v20 = vrot.slane %v1037_v7, 5  ;;  %v669_v21 = vsel %vm7213_vm9, %v448_v53, %v668_v4  ;;  %6623 = vmatpush3.bf16.msra.mxu0 %v6992_v50  ;;  %v206_v2 = vld [vmem:[%s7191_s25 + $0x5c] sm:$0xf] }
  0x56   : > { %v1034_v18 = vor.u32 %v1033_v1, %v1029_v10  ;;  %v673_v22 = vsel %vm7222_vm10, %v458_v13, %v672_v8  ;;  %v7365_v29 = vld [vmem:[#allocation2 + $0x28] sm:$0xf]  ;;  %v852_v32 = vrot.slane %v850_v16, 4  ;;  %670 = vst [vmem:[#allocation2 + $0x84] sm:$0xf] %v669_v21  ;;  %6573 = vmatpush3.bf16.msra.mxu1 %v6989_v56  ;;  %v329_v33 = vor.u32 %v327_v61, %v7340_v60  ;;  %v7408_v16 = vld [vmem:[%s9821_s1 + $0x138] sm:$0xff]  }
  0x57   : > { %v1025_v27 = vrot.slane %v1024_v15, 4  ;;  %v7367_v31 = vld [vmem:[#allocation2 + $0x2c] sm:$0x1]  ;;  %674 = vst [vmem:[#allocation2 + $0x8c] sm:$0x1] %v673_v22  ;;  %6624 = vmatprep.subr.bf16.mxu0 %v6994_v9  ;;  %v855_v19 = vrot.slane %v853_v17, 5  ;;  %6574 = vmatprep.subr.bf16.mxu1 %v6991_v14 }
  0x58   : > { %v1035_v37 = vrot.slane %v1034_v18, 4  ;;  %v859_v38 = vshll.u32 %v7365_v29, 16  ;;  %v863_v39 = vshrl.u32 %v7365_v29, 16  ;;  %v869_v41 = vshll.u32 %v7367_v31, 16  ;;  %v6997_v15 = vld [vmem:[%s9821_s1] sm:$0xff]  }
  0x59   : > { %v1030_v40 = vsel %vm7199_vm6, %v1025_v27, %v1029_v10  ;;  %v330_v42 = vrot.slane %v7340_v60, 4  ;;  %v332_v43 = vshrl.u32 %v190_v23, 16  ;;  %v856_v46 = vor.u32 %v855_v19, %v852_v32  ;;  %6625 = vmatpush3.bf16.msra.mxu0 %v6994_v9  ;;  %v7411_v22 = vld [vmem:[%s7191_s25 + $0x24] sm:$0xf] }
  0x5a   : > { %v1040_v45 = vsel %vm7199_vm6, %v1035_v37, %v1039_v20  ;;  %v861_v47 = vrot.slane %v859_v38, 5  ;;  %v865_v48 = vrot.slane %v863_v39, 4  ;;  %v871_v51 = vrot.slane %v869_v41, 5  ;;  %6575 = vmatpush3.bf16.msra.mxu1 %v6991_v14  ;;  %6626 = vmatprep.subr.bf16.mxu0 %v6996_v26  ;;  %v191_v14 = vld [vmem:[%s7191_s25 + $0x20] sm:$0xf] }
  0x5b   : > { %v5885_v50 = vcombine.low %v1030_v40, %v1040_v45  ;;  %v334_v52 = vrot.slane %v332_v43, 7  ;;  %v335_v53 = vshll.u32 %v190_v23, 16  ;;  %v857_v56 = vrot.slane %v856_v46, 4  ;;  %6576 = vmatprep.subr.bf16.mxu1 %v6993_v25  ;;  %v675_v37 = vld [vmem:[#allocation2 + $0x90] sm:$0xf] }
  0x5c   : > { %v866_v57 = vor.u32 %v865_v48, %v861_v47  ;;  %v733_v58 = vld [vmem:[#allocation2 + $0x88] sm:$0xf]  ;;  %v620_v59 = vsel %vm7213_vm9, %v329_v33, %v619_v34  ;;  %v460_v60 = vshrl.u32 %v7371_v35, 16  ;;  %v468_v27 = vshrl.u32 %v206_v2, 16  ;;  %v679_v48 = vld [vmem:[#allocation2 + $0x98] sm:$0x1] }
  0x5d   : > { %6554 = vmatprep.mubr.bf16.mxu1 %v5885_v50  ;;  %v1051_v61 = vshll.u32 %v733_v58, 16  ;;  %v1055_v62 = vshrl.u32 %v733_v58, 16  ;;  %v337_v63 = vor.u32 %v335_v53, %v334_v52  ;;  %v339_v0 = vrot.slane %v334_v52, 4  ;;  %621 = vst [vmem:[#allocation2 + $0x30] sm:$0xf] %v620_v59  ;;  %6627 = vmatpush3.bf16.msra.mxu0 %v6996_v26 }
  0x5e   : > { %v862_v3 = vsel %vm7199_vm6, %v857_v56, %v861_v47  ;;  %v867_v4 = vrot.slane %v866_v57, 4  ;;  %v732_v5 = vld [vmem:[#allocation2 + $0x84] sm:$0xf]  ;;  %v769_v6 = vld [vmem:[#allocation2 + $0x8c] sm:$0x1]  ;;  %v7393_v28 = vrot.slane %v460_v60, 7  ;;  %6577 = vmatpush3.bf16.msra.mxu1 %v6993_v25  ;;  %6628 = vmatprep.subr.bf16.mxu0 %v6998_v55 }
  0x5f   : > { %v1042_v7 = vshrl.u32 %v732_v5, 16  ;;  %v1045_v8 = vshll.u32 %v732_v5, 16  ;;  %v1053_v9 = vrot.slane %v1051_v61, 5  ;;  %v1057_v10 = vrot.slane %v1055_v62, 4  ;;  %6578 = vmatprep.subr.bf16.mxu1 %v6995_v49  ;;  %v626_v57 = vld [vmem:[#allocation2 + $0x3c] sm:$0xf] }
  0x60   : > { %v872_v1 = vsel %vm7199_vm6, %v867_v4, %v871_v51  ;;  %v1061_v11 = vshll.u32 %v769_v6, 16  ;;  %v338_v12 = vsel %vm7204_vm8, %v330_v42, %v337_v63  ;;  %v624_v13 = vsel %vm7222_vm10, %v339_v0, %v623_v54  ;;  %v630_v0 = vld [vmem:[#allocation2 + $0x44] sm:$0x1]  ;;  %v207_v6 = vld [vmem:[%s7191_s25 + $0x60] sm:$0xf] }
  0x61   : > { %v5878_v17 = vcombine.low %v862_v3, %v872_v1  ;;  %v1044_v18 = vrot.slane %v1042_v7, 4  ;;  %v1047_v20 = vrot.slane %v1045_v8, 5  ;;  %v1058_v21 = vor.u32 %v1057_v10, %v1053_v9  ;;  %622 = vst [vmem:[#allocation2 + $0x34] sm:$0xf] %v338_v12  ;;  %625 = vst [vmem:[#allocation2 + $0x38] sm:$0x1] %v624_v13  ;;  %6629 = vmatpush3.bf16.msra.mxu0 %v6998_v55 }
  0x62   : > { %v1063_v23 = vrot.slane %v1061_v11, 5  ;;  %v463_v25 = vshll.u32 %v7371_v35, 16  ;;  %v466_v26 = vrot.slane %v7393_v28, 4  ;;  %v471_v34 = vshll.u32 %v206_v2, 16  ;;  %6579 = vmatpush3.bf16.msra.mxu1 %v6995_v49  ;;  %v7422_v35 = vld [vmem:[%s9821_s1 + $0xf8] sm:$0xff]   ;;  %6710 = vmatprep.subr.bf16.mxu0 %v7408_v16 }
  0x63   : > { %6539 = vmatmul.mubr.bf16.gmra.mxu0 %v5878_v17  ;;  %v1048_v32 = vor.u32 %v1047_v20, %v1044_v18  ;;  %v1059_v33 = vrot.slane %v1058_v21, 4  ;;  %v341_v19 = vshrl.u32 %v191_v14, 16  ;;  %v470_v40 = vrot.slane %v468_v27, 7  ;;  %6580 = vmatprep.subr.bf16.mxu1 %v6997_v15  ;;  %v208_v10 = vld [vmem:[%s7191_s25 + $0x64] sm:$0xf] }
  0x64   : > { %v7415_v38 = vld [vmem:[#allocation2 + $0x30] sm:$0xf]  ;;  %v465_v39 = vor.u32 %v463_v25, %v7393_v28  ;;  %v344_v41 = vshll.u32 %v191_v14, 16  ;;  %v349_v42 = vshrl.u32 %v7411_v22, 16  ;;  %v352_v7 = vshll.u32 %v7411_v22, 16 }
  0x65   : > { %v1049_v43 = vrot.slane %v1048_v32, 4  ;;  %v1064_v45 = vsel %vm7199_vm6, %v1059_v33, %v1063_v23  ;;  %v874_v46 = vshrl.u32 %v7415_v38, 16  ;;  %v877_v47 = vshll.u32 %v7415_v38, 16  ;;  %v193_v14 = vld [vmem:[%s7191_s25 + $0x28] sm:$0xf] }
  0x66   : > { %v473_v49 = vor.u32 %v471_v34, %v470_v40  ;;  %v475_v50 = vrot.slane %v470_v40, 4  ;;  %v676_v51 = vsel %vm7213_vm9, %v465_v39, %v675_v37  ;;  %v343_v52 = vrot.slane %v341_v19, 7  ;;  %6581 = vmatpush3.bf16.msra.mxu1 %v6997_v15  ;;  %v7852_v30 = vld [vmem:[#allocation2 + $0x24] sm:$0xf] }
  0x67   : > { %v1054_v53 = vsel %vm7199_vm6, %v1049_v43, %v1053_v9  ;;  %v876_v54 = vrot.slane %v874_v46, 4  ;;  %v879_v55 = vrot.slane %v877_v47, 5  ;;  %677 = vst [vmem:[#allocation2 + $0x90] sm:$0xf] %v676_v51  ;;  %v351_v56 = vrot.slane %v349_v42, 7  ;;  %6662 = vmatprep.subr.bf16.mxu1 %v7422_v35 }
  0x68   : > { %v5886_v58 = vcombine.low %v1054_v53, %v1064_v45  ;;  %v7433_v59 = vld [vmem:[#allocation2 + $0x34] sm:$0xf]  ;;  %v7435_v60 = vld [vmem:[#allocation2 + $0x38] sm:$0x1]  ;;  %v474_v61 = vsel %vm7204_vm8, %v466_v26, %v473_v49  ;;  %v680_v62 = vsel %vm7222_vm10, %v475_v50, %v679_v48  ;;  %v346_v63 = vor.u32 %v344_v41, %v343_v52  ;;  %v686_v53 = vld [vmem:[#allocation2 + $0xa4] sm:$0x1] }
  0x69   : > { %v880_v2 = vor.u32 %v879_v55, %v876_v54  ;;  %v883_v3 = vshll.u32 %v7433_v59, 16  ;;  %v887_v4 = vshrl.u32 %v7433_v59, 16  ;;  %v893_v5 = vshll.u32 %v7435_v60, 16  ;;  %678 = vst [vmem:[#allocation2 + $0x94] sm:$0xf] %v474_v61 }
  0x6a   : > { %681 = vst [vmem:[#allocation2 + $0x98] sm:$0x1] %v680_v62  ;;  %6555 = vmatmul.mubr.bf16.gmra.mxu1 %v5886_v58  ;;  %v347_v28 = vrot.slane %v343_v52, 4  ;;  %v356_v8 = vrot.slane %v351_v56, 4  ;;  %v627_v9 = vsel %vm7213_vm9, %v346_v63, %v626_v57  ;;  %v354_v15 = vor.u32 %v352_v7, %v351_v56  ;;  %v682_v52 = vld [vmem:[#allocation2 + $0x9c] sm:$0xf] }
  0x6b   : > { %v881_v1 = vrot.slane %v880_v2, 4  ;;  %v885_v11 = vrot.slane %v883_v3, 5  ;;  %v889_v12 = vrot.slane %v887_v4, 4  ;;  %v895_v13 = vrot.slane %v893_v5, 5  ;;  %628 = vst [vmem:[#allocation2 + $0x3c] sm:$0xf] %v627_v9 }
  0x6c   : > { %v631_v17 = vsel %vm7222_vm10, %v356_v8, %v630_v0  ;;  %v477_v18 = vshrl.u32 %v207_v6, 16  ;;  %v480_v20 = vshll.u32 %v207_v6, 16  ;;  %v485_v23 = vshrl.u32 %v208_v10, 16  ;;  %v194_v2 = vld [vmem:[%s7191_s25 + $0x2c] sm:$0xf] }
  0x6d   : > { %v886_v21 = vsel %vm7199_vm6, %v881_v1, %v885_v11  ;;  %v890_v22 = vor.u32 %v889_v12, %v885_v11  ;;  %632 = vst [vmem:[#allocation2 + $0x44] sm:$0x1] %v631_v17  ;;  %v488_v25 = vshll.u32 %v208_v10, 16  ;;  %v355_v27 = vsel %vm7204_vm8, %v347_v28, %v354_v15  ;;  %v633_v1 = vld [vmem:[#allocation2 + $0x48] sm:$0xf] }
  0x6e   : > { %v734_v26 = vld [vmem:[#allocation2 + $0x90] sm:$0xf]  ;;  %v479_v32 = vrot.slane %v477_v18, 7  ;;  %v358_v33 = vshrl.u32 %v193_v14, 16  ;;  %v361_v34 = vshll.u32 %v193_v14, 16  ;;  %v487_v40 = vrot.slane %v485_v23, 7 }
  0x6f   : > { %v891_v37 = vrot.slane %v890_v22, 4  ;;  %v1066_v19 = vshrl.u32 %v734_v26, 16  ;;  %v1069_v39 = vshll.u32 %v734_v26, 16  ;;  %629 = vst [vmem:[#allocation2 + $0x40] sm:$0xf] %v355_v27 }
  0x70   : > { %v7457_v41 = vld [vmem:[#allocation2 + $0x94] sm:$0xf]  ;;  %v482_v43 = vor.u32 %v480_v20, %v479_v32  ;;  %v483_v45 = vrot.slane %v479_v32, 4  ;;  %v7461_v46 = vrot.slane %v358_v33, 7  ;;  %v490_v58 = vor.u32 %v488_v25, %v487_v40  ;;  %v209_v17 = vld [vmem:[%s7191_s25 + $0x68] sm:$0xf] }
  0x71   : > { %v7459_v42 = vld [vmem:[#allocation2 + $0x98] sm:$0x1]  ;;  %v896_v48 = vsel %vm7199_vm6, %v891_v37, %v895_v13  ;;  %v1068_v49 = vrot.slane %v1066_v19, 4  ;;  %v1071_v50 = vrot.slane %v1069_v39, 5  ;;  %v1075_v51 = vshll.u32 %v7457_v41, 16 }
  0x72   : > { %v5879_v54 = vcombine.low %v886_v21, %v896_v48  ;;  %v1079_v55 = vshrl.u32 %v7457_v41, 16  ;;  %v1085_v56 = vshll.u32 %v7459_v42, 16  ;;  %v7470_v57 = vld [vmem:[#allocation2 + $0x3c] sm:$0xf]  ;;  %v491_v6 = vsel %vm7204_vm8, %v483_v45, %v490_v58  ;;  %v210_v23 = vld [vmem:[%s7191_s25 + $0x6c] sm:$0xf] }
  0x73   : > { %v1072_v61 = vor.u32 %v1071_v50, %v1068_v49  ;;  %v1077_v62 = vrot.slane %v1075_v51, 5  ;;  %v898_v63 = vshrl.u32 %v7470_v57, 16  ;;  %v901_v0 = vshll.u32 %v7470_v57, 16  ;;  %685 = vst [vmem:[#allocation2 + $0xa0] sm:$0xf] %v491_v6 }
  0x74   : > { %6542 = vmatprep.mubr.bf16.mxu0 %v5879_v54  ;;  %v1081_v3 = vrot.slane %v1079_v55, 4  ;;  %v1087_v4 = vrot.slane %v1085_v56, 5  ;;  %v7475_v5 = vld [vmem:[#allocation2 + $0x44] sm:$0x1]  ;;  %v492_v28 = vrot.slane %v487_v40, 4  ;;  %v683_v13 = vsel %vm7213_vm9, %v482_v43, %v682_v52 }
  0x75   : > { %v1073_v7 = vrot.slane %v1072_v61, 4  ;;  %v900_v8 = vrot.slane %v898_v63, 4  ;;  %v903_v9 = vrot.slane %v901_v0, 5  ;;  %v917_v10 = vshll.u32 %v7475_v5, 16  ;;  %684 = vst [vmem:[#allocation2 + $0x9c] sm:$0xf] %v683_v13 }
  0x76   : > { %v1082_v11 = vor.u32 %v1081_v3, %v1077_v62  ;;  %v7480_v12 = vld [vmem:[#allocation2 + $0x40] sm:$0xf]  ;;  %v687_v14 = vsel %vm7222_vm10, %v492_v28, %v686_v53  ;;  %v363_v15 = vor.u32 %v361_v34, %v7461_v46  ;;  %v364_v27 = vrot.slane %v7461_v46, 4  ;;  %v637_v46 = vld [vmem:[#allocation2 + $0x50] sm:$0x1] }
  0x77   : > { %v1078_v18 = vsel %vm7199_vm6, %v1073_v7, %v1077_v62  ;;  %v904_v20 = vor.u32 %v903_v9, %v900_v8  ;;  %v907_v21 = vshll.u32 %v7480_v12, 16  ;;  %v911_v22 = vshrl.u32 %v7480_v12, 16  ;;  %688 = vst [vmem:[#allocation2 + $0xa4] sm:$0x1] %v687_v14  ;;  %v689_v58 = vld [vmem:[#allocation2 + $0xa8] sm:$0xf] }
  0x78   : > { %v1083_v25 = vrot.slane %v1082_v11, 4  ;;  %v919_v26 = vrot.slane %v917_v10, 5  ;;  %v366_v32 = vshrl.u32 %v194_v2, 16  ;;  %v369_v19 = vshll.u32 %v194_v2, 16  ;;  %v195_v61 = vld [vmem:[%s7191_s25 + $0x30] sm:$0xf] }
  0x79   : > { %v905_v33 = vrot.slane %v904_v20, 4  ;;  %v909_v37 = vrot.slane %v907_v21, 5  ;;  %v913_v34 = vrot.slane %v911_v22, 4  ;;  %v634_v43 = vsel %vm7213_vm9, %v363_v15, %v633_v1  ;;  %v693_v22 = vld [vmem:[#allocation2 + $0xb0] sm:$0x1] }
  0x7a   : > { %v1088_v39 = vsel %vm7199_vm6, %v1083_v25, %v1087_v4  ;;  %v368_v40 = vrot.slane %v366_v32, 7  ;;  %v494_v45 = vshrl.u32 %v209_v17, 16  ;;  %635 = vst [vmem:[#allocation2 + $0x48] sm:$0xf] %v634_v43  ;;  %v497_v51 = vshll.u32 %v209_v17, 16 }
  0x7b   : > { %v5887_v48 = vcombine.low %v1078_v18, %v1088_v39  ;;  %v910_v49 = vsel %vm7199_vm6, %v905_v33, %v909_v37  ;;  %v914_v50 = vor.u32 %v913_v34, %v909_v37  ;;  %v7500_v52 = vld [vmem:[#allocation2 + $0xa0] sm:$0xf]  ;;  %v502_v56 = vshrl.u32 %v210_v23, 16  ;;  %v196_v37 = vld [vmem:[%s7191_s25 + $0x34] sm:$0xf] }
  0x7c   : > { %v371_v53 = vor.u32 %v369_v19, %v368_v40  ;;  %v373_v54 = vrot.slane %v368_v40, 4  ;;  %v496_v55 = vrot.slane %v494_v45, 7  ;;  %v1099_v63 = vshll.u32 %v7500_v52, 16  ;;  %v7505_v3 = vld [vmem:[#allocation2 + $0x9c] sm:$0xf] }
  0x7d   : > { %6558 = vmatprep.mubr.bf16.mxu1 %v5887_v48  ;;  %v915_v62 = vrot.slane %v914_v50, 4  ;;  %v1103_v0 = vshrl.u32 %v7500_v52, 16  ;;  %v505_v2 = vshll.u32 %v210_v23, 16  ;;  %v1090_v10 = vshrl.u32 %v7505_v3, 16  ;;  %v640_v43 = vld [vmem:[#allocation2 + $0x54] sm:$0xf] }
  0x7e   : > { %v7507_v4 = vld [vmem:[#allocation2 + $0xa4] sm:$0x1]  ;;  %v372_v6 = vsel %vm7204_vm8, %v364_v27, %v371_v53  ;;  %v638_v28 = vsel %vm7222_vm10, %v373_v54, %v637_v46  ;;  %v499_v7 = vor.u32 %v497_v51, %v496_v55  ;;  %v500_v8 = vrot.slane %v496_v55, 4  ;;  %v7530_v46 = vld [vmem:[%s7191_s25 + $0x70] sm:$0xf] }
  0x7f   : > { %v920_v9 = vsel %vm7199_vm6, %v915_v62, %v919_v26  ;;  %v1093_v1 = vshll.u32 %v7505_v3, 16  ;;  %v1101_v11 = vrot.slane %v1099_v63, 5  ;;  %636 = vst [vmem:[#allocation2 + $0x4c] sm:$0xf] %v372_v6  ;;  %639 = vst [vmem:[#allocation2 + $0x50] sm:$0x1] %v638_v28 }
  0x80   : > { %v5880_v13 = vcombine.low %v910_v49, %v920_v9  ;;  %v1105_v14 = vrot.slane %v1103_v0, 4  ;;  %v1109_v15 = vshll.u32 %v7507_v4, 16  ;;  %v504_v17 = vrot.slane %v502_v56, 7  ;;  %v7731_v47 = vld [vmem:[#allocation2 + $0x78] sm:$0xf] }
  0x81   : > { %v1092_v18 = vrot.slane %v1090_v10, 4  ;;  %v1095_v20 = vrot.slane %v1093_v1, 5  ;;  %v690_v21 = vsel %vm7213_vm9, %v499_v7, %v689_v58  ;;  %v375_v23 = vshrl.u32 %v195_v61, 16  ;;  %v7520_v27 = vld [vmem:[#allocation2 + $0x48] sm:$0xf] }
  0x82   : > { %6543 = vmatmul.mubr.bf16.gmra.mxu0 %v5880_v13  ;;  %v1106_v25 = vor.u32 %v1105_v14, %v1101_v11  ;;  %v1111_v26 = vrot.slane %v1109_v15, 5  ;;  %v507_v32 = vor.u32 %v505_v2, %v504_v17  ;;  %v509_v33 = vrot.slane %v504_v17, 4  ;;  %691 = vst [vmem:[#allocation2 + $0xa8] sm:$0xf] %v690_v21 }
  0x83   : > { %v1096_v34 = vor.u32 %v1095_v20, %v1092_v18  ;;  %v922_v19 = vshrl.u32 %v7520_v27, 16  ;;  %v925_v39 = vshll.u32 %v7520_v27, 16  ;;  %v377_v40 = vrot.slane %v375_v23, 7 }
  0x84   : > { %v1107_v45 = vrot.slane %v1106_v25, 4  ;;  %v508_v48 = vsel %vm7204_vm8, %v500_v8, %v507_v32  ;;  %v694_v49 = vsel %vm7222_vm10, %v509_v33, %v693_v22  ;;  %v378_v50 = vshll.u32 %v195_v61, 16  ;;  %v644_v32 = vld [vmem:[#allocation2 + $0x5c] sm:$0x1]  ;;  %v212_v33 = vld [vmem:[%s7191_s25 + $0x74] sm:$0xf] }
  0x85   : > { %v1097_v51 = vrot.slane %v1096_v34, 4  ;;  %v924_v53 = vrot.slane %v922_v19, 4  ;;  %v927_v54 = vrot.slane %v925_v39, 5  ;;  %692 = vst [vmem:[#allocation2 + $0xac] sm:$0xf] %v508_v48  ;;  %v381_v55 = vrot.slane %v377_v40, 4 }
  0x86   : > { %695 = vst [vmem:[#allocation2 + $0xb0] sm:$0x1] %v694_v49  ;;  %v1112_v56 = vsel %vm7199_vm6, %v1107_v45, %v1111_v26  ;;  %v7534_v58 = vld [vmem:[#allocation2 + $0x4c] sm:$0xf]  ;;  %v7536_v62 = vld [vmem:[#allocation2 + $0x50] sm:$0x1]  ;;  %v380_v63 = vor.u32 %v378_v50, %v377_v40 }
  0x87   : > { %v383_v0 = vshrl.u32 %v196_v37, 16  ;;  %v386_v2 = vshll.u32 %v196_v37, 16  ;;  %v1102_v61 = vsel %vm7199_vm6, %v1097_v51, %v1101_v11  ;;  %v928_v6 = vor.u32 %v927_v54, %v924_v53  ;;  %v696_v53 = vld [vmem:[#allocation2 + $0xb4] sm:$0xf] }
  0x88   : > { %v931_v28 = vshll.u32 %v7534_v58, 16  ;;  %v935_v7 = vshrl.u32 %v7534_v58, 16  ;;  %v5888_v8 = vcombine.low %v1102_v61, %v1112_v56  ;;  %v941_v9 = vshll.u32 %v7536_v62, 16 }
  0x89   : > { %v385_v10 = vrot.slane %v383_v0, 7  ;;  %v641_v1 = vsel %vm7213_vm9, %v380_v63, %v640_v43  ;;  %v929_v13 = vrot.slane %v928_v6, 4  ;;  %v7545_v17 = vld [vmem:[#allocation2 + $0xa8] sm:$0xf]  ;;  %v511_v11 = vshrl.u32 %v7530_v46, 16 }
  0x8a   : > { %v933_v14 = vrot.slane %v931_v28, 5  ;;  %v937_v15 = vrot.slane %v935_v7, 4  ;;  %642 = vst [vmem:[#allocation2 + $0x54] sm:$0xf] %v641_v1  ;;  %6559 = vmatmul.mubr.bf16.gmra.mxu1 %v5888_v8  ;;  %v943_v18 = vrot.slane %v941_v9, 5  ;;  %v1114_v20 = vshrl.u32 %v7545_v17, 16 }
  0x8b   : > { %v1117_v21 = vshll.u32 %v7545_v17, 16  ;;  %v388_v22 = vor.u32 %v386_v2, %v385_v10  ;;  %v390_v26 = vrot.slane %v385_v10, 4  ;;  %v513_v37 = vrot.slane %v511_v11, 7 }
  0x8c   : > { %v934_v23 = vsel %vm7199_vm6, %v929_v13, %v933_v14  ;;  %v938_v25 = vor.u32 %v937_v15, %v933_v14  ;;  %v7553_v34 = vld [vmem:[#allocation2 + $0xac] sm:$0xf]  ;;  %v1116_v39 = vrot.slane %v1114_v20, 4  ;;  %v514_v63 = vshll.u32 %v7530_v46, 16  ;;  %v1755_v15 = vld [vmem:[#allocation2] sm:$0xe] }
  0x8d   : > { %9858 = vst [vmem:[#allocation6_spill] sm:$0xff] %v7553_v34  ;;  %v7555_v19 = vld [vmem:[#allocation2 + $0xb0] sm:$0x1]  ;;  %v1119_v40 = vrot.slane %v1117_v21, 5  ;;  %v389_v43 = vsel %vm7204_vm8, %v381_v55, %v388_v22  ;;  %v1123_v49 = vshll.u32 %v7553_v34, 16  ;;  %v1127_v50 = vshrl.u32 %v7553_v34, 16 }
  0x8e   : > { %v939_v48 = vrot.slane %v938_v25, 4  ;;  %v1133_v51 = vshll.u32 %v7555_v19, 16  ;;  %643 = vst [vmem:[#allocation2 + $0x58] sm:$0xf] %v389_v43  ;;  %v645_v56 = vsel %vm7222_vm10, %v390_v26, %v644_v32  ;;  %v517_v0 = vrot.slane %v513_v37, 4 }
  0x8f   : > { %v1120_v54 = vor.u32 %v1119_v40, %v1116_v39  ;;  %v1125_v2 = vrot.slane %v1123_v49, 5  ;;  %v1129_v61 = vrot.slane %v1127_v50, 4  ;;  %646 = vst [vmem:[#allocation2 + $0x5c] sm:$0x1] %v645_v56  ;;  %v516_v9 = vor.u32 %v514_v63, %v513_v37  ;;  %v700_v21 = vld [vmem:[#allocation2 + $0xbc] sm:$0x1] }
  0x90   : > { %v944_v55 = vsel %vm7199_vm6, %v939_v48, %v943_v18  ;;  %v1135_v6 = vrot.slane %v1133_v51, 5  ;;  %v519_v10 = vshrl.u32 %v212_v33, 16  ;;  %v522_v46 = vshll.u32 %v212_v33, 16  ;;  %v7579_v39 = vld [vmem:[#allocation2 + $0x4] sm:$0xf] }
  0x91   : > { %v5881_v28 = vcombine.low %v934_v23, %v944_v55  ;;  %v1121_v7 = vrot.slane %v1120_v54, 4  ;;  %v7569_v8 = vld [vmem:[#allocation2 + $0x54] sm:$0xf]  ;;  %v1130_v1 = vor.u32 %v1129_v61, %v1125_v2  ;;  %v697_v20 = vsel %vm7213_vm9, %v516_v9, %v696_v53  ;;  %v1756_v51 = vld [vmem:[#allocation2 + $0xc] sm:$0xe] }
  0x92   : > { %v946_v13 = vshrl.u32 %v7569_v8, 16  ;;  %v949_v14 = vshll.u32 %v7569_v8, 16  ;;  %v521_v18 = vrot.slane %v519_v10, 7  ;;  %698 = vst [vmem:[#allocation2 + $0xb4] sm:$0xf] %v697_v20  ;;  %v5923_v37 = vrot.slane %v1755_v15, 9 }
  0x93   : > { %6546 = vmatprep.mubr.bf16.mxu0 %v5881_v28  ;;  %v1126_v11 = vsel %vm7199_vm6, %v1121_v7, %v1125_v2  ;;  %v1131_v22 = vrot.slane %v1130_v1, 4  ;;  %v1808_v40 = vrot.slane %v7579_v39, 5  ;;  %v7096_v53 = vld [vmem:[#allocation2 + $0x8] sm:$0x1]  ;;  %v9859_v61 = vmov 0 }
  0x94   : > { %v948_v23 = vrot.slane %v946_v13, 4  ;;  %v951_v25 = vrot.slane %v949_v14, 5  ;;  %v524_v32 = vor.u32 %v522_v46, %v521_v18  ;;  %v526_v33 = vrot.slane %v521_v18, 4  ;;  %v7097_v1 = vld [vmem:[#allocation2 + $0x14] sm:$0x1] }
  0x95   : > { %v7577_v26 = vld [vmem:[#allocation2 + $0x58] sm:$0xf]  ;;  %v1136_v43 = vsel %vm7199_vm6, %v1131_v22, %v1135_v6  ;;  %v1811_v54 = vrot.slane %v7096_v53, 5  ;;  %v9860_v61 = vsel %vm7594_vm13, 4294967295, %v9859_v61  ;;  %v1818_v13 = vrot.slane %v7097_v1, 5 }
  0x96   : > { %v952_v48 = vor.u32 %v951_v25, %v948_v23  ;;  %v955_v49 = vshll.u32 %v7577_v26, 16  ;;  %v959_v50 = vshrl.u32 %v7577_v26, 16  ;;  %v5889_v56 = vcombine.low %v1126_v11, %v1136_v43  ;;  %v7586_v63 = vld [vmem:[#allocation2 + $0x5c] sm:$0x1]  ;;  %9861 = vst [vmem:[#allocation7_spill] sm:$0xff] %v9860_v61 }
  0x97   : > { %v525_v55 = vsel %vm7204_vm8, %v517_v0, %v524_v32  ;;  %v701_v2 = vsel %vm7222_vm10, %v526_v33, %v700_v21  ;;  %v1757_v6 = vld [vmem:[#allocation2 + $0x18] sm:$0xe]  ;;  %v965_v10 = vshll.u32 %v7586_v63, 16  ;;  %v1810_v0 = vrot.slane %v1808_v40, 4  ;;  %v7599_v14 = vld [vmem:[#allocation2 + $0x10] sm:$0xf] }
  0x98   : > { %v953_v28 = vrot.slane %v952_v48, 4  ;;  %v957_v7 = vrot.slane %v955_v49, 5  ;;  %v961_v9 = vrot.slane %v959_v50, 4  ;;  %699 = vst [vmem:[#allocation2 + $0xb8] sm:$0xf] %v525_v55  ;;  %6562 = vmatprep.mubr.bf16.mxu1 %v5889_v56  ;;  %v1815_v46 = vrot.slane %v7599_v14, 5 }
  0x99   : > { %702 = vst [vmem:[#allocation2 + $0xbc] sm:$0x1] %v701_v2  ;;  %v967_v11 = vrot.slane %v965_v10, 5  ;;  %v1809_v18 = vsel %vm7594_vm13, %v5923_v37, %v1808_v40  ;;  %v7604_v20 = vld [vmem:[#allocation2 + $0x1c] sm:$0xf]  ;;  %v1812_v25 = vsel %vm7594_vm13, %v1810_v0, %v1811_v54  ;;  %v5924_v32 = vrot.slane %v1756_v51, 9 }
  0x9a   : > { %v962_v15 = vor.u32 %v961_v9, %v957_v7  ;;  %v1822_v21 = vrot.slane %v7604_v20, 5  ;;  %v958_v22 = vsel %vm7199_vm6, %v953_v28, %v957_v7  ;;  %v7609_v23 = vld [vmem:[#allocation2 + $0xb4] sm:$0xf]  ;;  %v5925_v33 = vrot.slane %v1757_v6, 9  ;;  %v7100_v50 = vld [vmem:[#allocation2 + $0x20] sm:$0x1] }
  0x9b   : > { %9862 = vst [vmem:[#allocation8_spill] sm:$0xff] %v7609_v23  ;;  %v1138_v48 = vshrl.u32 %v7609_v23, 16  ;;  %v1141_v49 = vshll.u32 %v7609_v23, 16  ;;  %v1817_v37 = vrot.slane %v1815_v46, 4  ;;  %v1825_v53 = vrot.slane %v7100_v50, 5 }
  0x9c   : > { %v963_v43 = vrot.slane %v962_v15, 4  ;;  %v1824_v40 = vrot.slane %v1822_v21, 4  ;;  %v5939_v28 = vcombine.low %v1809_v18, %v1812_v25  ;;  %v1758_v7 = vld [vmem:[#allocation2 + $0x24] sm:$0xe]  ;;  %v1829_v6 = vrot.slane %v7365_v29, 5 }
  0x9d   : > { %v1140_v55 = vrot.slane %v1138_v48, 4  ;;  %v1143_v2 = vrot.slane %v1141_v49, 5  ;;  %v1819_v18 = vsel %vm7594_vm13, %v1817_v37, %v1818_v13  ;;  %v1759_v49 = vld [vmem:[#allocation2 + $0x30] sm:$0xe]  ;;  %v5926_v50 = vrot.slane %v1758_v7, 9 }
  0x9e   : > { %v968_v56 = vsel %vm7199_vm6, %v963_v43, %v967_v11  ;;  %v1816_v11 = vsel %vm7594_vm13, %v5924_v32, %v1815_v46  ;;  %v1826_v48 = vsel %vm7594_vm13, %v1824_v40, %v1825_v53  ;;  %v1836_v46 = vrot.slane %v7433_v59, 5  ;;  %v1760_v32 = vld [vmem:[#allocation2 + $0x3c] sm:$0xe] }
  0x9f   : > { %v5882_v9 = vcombine.low %v958_v22, %v968_v56  ;;  %v7617_v54 = vld [vmem:[#allocation2 + $0xb8] sm:$0xf]  ;;  %v1144_v10 = vor.u32 %v1143_v2, %v1140_v55  ;;  %v1823_v22 = vsel %vm7594_vm13, %v5925_v33, %v1822_v21  ;;  %v1831_v56 = vrot.slane %v1829_v6, 4 }
  0xa0   : > { %9863 = vst [vmem:[#allocation9_spill] sm:$0xff] %v7617_v54  ;;  %v7619_v51 = vld [vmem:[#allocation2 + $0xbc] sm:$0x1]  ;;  %v1147_v1 = vshll.u32 %v7617_v54, 16  ;;  %v1151_v0 = vshrl.u32 %v7617_v54, 16  ;;  %v1832_v55 = vrot.slane %v7367_v31, 5  ;;  %v5940_v21 = vcombine.low %v1816_v11, %v1819_v18 }
  0xa1   : > { %v1157_v15 = vshll.u32 %v7619_v51, 16  ;;  %6547 = vmatmul.mubr.bf16.gmra.mxu0 %v5882_v9  ;;  %v1145_v25 = vrot.slane %v1144_v10, 4  ;;  %v1843_v37 = vrot.slane %v7480_v12, 5  ;;  %v5941_v33 = vcombine.low %v1823_v22, %v1826_v48  ;;  %v1761_v10 = vld [vmem:[#allocation2 + $0x48] sm:$0xe]  ;;  %v7006_v31 = vld [vmem:[%s9821_s1 + $0x130] sm:$0xff]  }
  0xa2   : > { %v1149_v43 = vrot.slane %v1147_v1, 5  ;;  %v1153_v29 = vrot.slane %v1151_v0, 4  ;;  %6630 = vmatprep.mubr.bf16.mxu0 %v5939_v28  ;;  %v5927_v9 = vrot.slane %v1759_v49, 9  ;;  %v1839_v28 = vrot.slane %v7435_v60, 5  ;;  %v1762_v18 = vld [vmem:[#allocation2 + $0x54] sm:$0xe] }
  0xa3   : > { %v1159_v13 = vrot.slane %v1157_v15, 5  ;;  %v1838_v7 = vrot.slane %v1836_v46, 4  ;;  %v5928_v1 = vrot.slane %v1760_v32, 9  ;;  %v1830_v0 = vsel %vm7594_vm13, %v5926_v50, %v1829_v6 }
  0xa4   : > { %v1154_v2 = vor.u32 %v1153_v29, %v1149_v43  ;;  %v1150_v40 = vsel %vm7199_vm6, %v1145_v25, %v1149_v43  ;;  %v1833_v15 = vsel %vm7594_vm13, %v1831_v56, %v1832_v55  ;;  %v1846_v11 = vrot.slane %v7475_v5, 5  ;;  %v7101_v25 = vld [vmem:[#allocation2] sm:$0xf]  ;;  %v7654_v55 = vld [vmem:[#allocation2 + $0x68] sm:$0x1] }
  0xa5   : > { %v1850_v60 = vrot.slane %v7534_v58, 5  ;;  %v5899_v43 = vcombine.low %v7101_v25, %v7579_v39  ;;  %v1845_v29 = vrot.slane %v1843_v37, 4  ;;  %v5929_v48 = vrot.slane %v1761_v10, 9  ;;  %v1763_v56 = vld [vmem:[#allocation2 + $0x60] sm:$0xe] }
  0xa6   : > { %v1155_v53 = vrot.slane %v1154_v2, 4  ;;  %v1853_v6 = vrot.slane %v7536_v62, 5  ;;  %v5942_v5 = vcombine.low %v1830_v0, %v1833_v15  ;;  %v1857_v50 = vrot.slane %v7577_v26, 5  ;;  %v7010_v62 = vld [vmem:[%s9821_s1 + $0x128] sm:$0xff]   ;;  %v7105_v15 = vld [vmem:[#allocation2 + $0x18] sm:$0xf] }
  0xa7   : > { %v1852_v32 = vrot.slane %v1850_v60, 4  ;;  %v1867_v2 = vrot.slane %v7654_v55, 5  ;;  %v1837_v39 = vsel %vm7594_vm13, %v5927_v9, %v1836_v46  ;;  %v7674_v46 = vsel %vm7594_vm13, %v5929_v48, %v1850_v60  ;;  %v7686_v60 = vld [vmem:[#allocation2 + $0x24] sm:$0xf]  ;;  %v7699_v48 = vld [vmem:[#allocation2 + $0x70] sm:$0xf] }
  0xa8   : > { %v1160_v22 = vsel %vm7199_vm6, %v1155_v53, %v1159_v13  ;;  %v1840_v13 = vsel %vm7594_vm13, %v1838_v7, %v1839_v28  ;;  %v5930_v9 = vrot.slane %v1762_v18, 9  ;;  %v1860_v28 = vrot.slane %v7586_v63, 5  ;;  %v7681_v53 = vld [vmem:[#allocation2 + $0x64] sm:$0xf]  ;;  %v7688_v18 = vld [vmem:[#allocation2 + $0x28] sm:$0xf] }
  0xa9   : > { %v5890_v49 = vcombine.low %v1150_v40, %v1160_v22  ;;  %6631 = vmatmul.mubr.bf16.vlgmr.msra.gmra.mxu0 %v5940_v21  ;;  %v1764_v21 = vld [vmem:[#allocation2 + $0x6c] sm:$0xe]  ;;  %v1859_v10 = vrot.slane %v1857_v50, 4  ;;  %v5931_v40 = vrot.slane %v1763_v56, 9  ;;  %v1864_v7 = vrot.slane %v7681_v53, 5  ;;  %v7014_v25 = vld [vmem:[%s9821_s1 + $0x120] sm:$0xff]  }
  0xaa   : > { %6711 = vmatpush3.bf16.msra.mxu0 %v7408_v16  ;;  %6634 = vmatprep.mubr.bf16.mxu0 %v5941_v33  ;;  %v7663_v16 = vsel %vm7594_vm13, %v5928_v1, %v1843_v37  ;;  %v7670_v33 = vsel %vm7594_vm13, %v1845_v29, %v1846_v11  ;;  %v7679_v37 = vsel %vm7594_vm13, %v1852_v32, %v1853_v6  ;;  %v7104_v1 = vld [vmem:[#allocation2 + $0xc] sm:$0xf]  ;;  %v5932_v29 = vrot.slane %v1764_v21, 9  ;;  %v7706_v6 = vld [vmem:[#allocation2 + $0x60] sm:$0xf] }
  0xab   : > { %6563 = vmatmul.mubr.bf16.gmra.mxu1 %v5890_v49  ;;  %6712 = vmatprep.subr.bf16.mxu0 %v7006_v31  ;;  %v5900_v0 = vcombine.low %v7104_v1, %v7599_v14  ;;  %v5901_v11 = vcombine.low %v7105_v15, %v7604_v20  ;;  %v5943_v22 = vcombine.low %v1837_v39, %v1840_v13  ;;  %v1871_v49 = vrot.slane %v7699_v48, 5  ;;  %v7710_v39 = vld [vmem:[#allocation2 + $0x6c] sm:$0xf]  ;;  %v7714_v21 = vld [vmem:[#allocation2 + $0x78] sm:$0xe]  ;;  %v7005_v1 = vld [vmem:[%s9821_s1 + $0xf0] sm:$0xff]  }
  0xac   : > { %6582 = vmatprep.mubr.bf16.mxu1 %v5899_v43  ;;  %v1767_v43 = vld [vmem:[#allocation2 + $0x90] sm:$0xe]  ;;  %v7721_v15 = vsel %vm7594_vm13, %v5930_v9, %v1857_v50  ;;  %v7725_v20 = vsel %vm7594_vm13, %v1859_v10, %v1860_v28  ;;  %v7729_v56 = vsel %vm7594_vm13, %v5931_v40, %v1864_v7  ;;  %v1866_v13 = vrot.slane %v1864_v7, 4  ;;  %v1768_v14 = vld [vmem:[#allocation2 + $0x9c] sm:$0xe] }
  0xad   : > { %v7733_v63 = vld [vmem:[#allocation2 + $0x7c] sm:$0xf]  ;;  %v5935_v9 = vrot.slane %v1767_v43, 9  ;;  %v1892_v28 = vrot.slane %v7457_v41, 5  ;;  %v1769_v10 = vld [vmem:[#allocation2 + $0xa8] sm:$0xe]  ;;  %v7740_v40 = vsel %vm7594_vm13, %v5932_v29, %v1871_v49 }
  0xae   : > { %6713 = vmatpush3.bf16.msra.mxu0 %v7006_v31  ;;  %v5944_v31 = vcombine.low %v7663_v16, %v7670_v33  ;;  %v7018_v7 = vld [vmem:[%s9821_s1 + $0x118] sm:$0xff]   ;;  %v7782_v41 = vld [vmem:[#allocation2 + $0x84] sm:$0xe]  ;;  %v7114_v55 = vld [vmem:[#allocation2 + $0x80] sm:$0x1]  ;;  %v1909_v29 = vrot.slane %v7555_v19, 5 }
  0xaf   : > { %6714 = vmatprep.subr.bf16.mxu0 %v7010_v62  ;;  %v1894_v43 = vrot.slane %v1892_v28, 4  ;;  %v7817_v33 = vld [vmem:[#allocation2 + $0x84] sm:$0xf]  ;;  %v9869_v36 = vrot.slane %v7714_v21, 9 }
  0xb1   : > { %6635 = vmatmul.mubr.bf16.gmra.mxu0 %v5942_v5  ;;  %v7111_v5 = vld [vmem:[#allocation2 + $0x74] sm:$0x1] }
  0xb2   : > { %6638 = vmatprep.mubr.bf16.mxu0 %v5943_v22  ;;  %6715 = vmatpush3.bf16.msra.mxu0 %v7010_v62  ;;  %v1874_v45 = vrot.slane %v7111_v5, 5  ;;  %v1873_v62 = vrot.slane %v1871_v49, 4  ;;  %v1895_v5 = vrot.slane %v7459_v42, 5  ;;  %v7009_v49 = vld [vmem:[%s9821_s1 + $0xe8] sm:$0xff]   ;;  %v7022_v42 = vld [vmem:[%s9821_s1 + $0x110] sm:$0xff]   ;;  %v1881_v22 = vrot.slane %v7114_v55, 5 }
  0xb3   : > { %6583 = vmatmul.mubr.bf16.vlgmr.msra.gmra.mxu1 %v5900_v0  ;;  %6716 = vmatprep.subr.bf16.mxu0 %v7014_v25  ;;  %v7752_v0 = vsel %vm7594_vm13, %v5935_v9, %v1892_v28  ;;  %v1899_v9 = vrot.slane %v7500_v52, 5  ;;  %v1902_v28 = vrot.slane %v7507_v4, 5  ;;  %v2625_v4 = vld [vmem:[#allocation2 + $0x10] sm:$0xf] }
  0xb4   : > { %6663 = vmatpush3.bf16.msra.mxu1 %v7422_v35  ;;  %6586 = vmatprep.mubr.bf16.mxu1 %v5901_v11  ;;  %v7763_v35 = vsel %vm7594_vm13, %v1866_v13, %v1867_v2  ;;  %v5936_v11 = vrot.slane %v1768_v14, 9  ;;  %v7773_v50 = vsel %vm7594_vm13, %v1894_v43, %v1895_v5  ;;  %v5937_v2 = vrot.slane %v1769_v10, 9  ;;  %v2624_v13 = vld [vmem:[#allocation2 + $0xc] sm:$0xf]  ;;  %v7780_v14 = vld [vmem:[%s9821_s1 + $0xe0] sm:$0xff]  }
  0xb5   : > { %6664 = vmatprep.subr.bf16.mxu1 %v7005_v1  ;;  %v1901_v5 = vrot.slane %v1899_v9, 4  ;;  %v1906_v43 = vrot.slane %v7553_v34, 5  ;;  %v7793_v10 = vsel %vm7594_vm13, %v1873_v62, %v1874_v45  ;;  %v5947_v16 = vcombine.low %v7729_v56, %v7763_v35  ;;  %v7878_v34 = vld [vmem:[#allocation2 + $0x30] sm:$0xf] }
  0xb6   : > { %6717 = vmatpush3.bf16.msra.mxu0 %v7014_v25  ;;  %v7788_v25 = vsel %vm7594_vm13, %v5936_v11, %v1899_v9  ;;  %v7801_v11 = vld [vmem:[#allocation2 + $0x88] sm:$0xf]  ;;  %v9864_v9 = vcombine.low %v7674_v46, %v7679_v37  ;;  %v2673_v55 = vshrl.u32 %v2624_v13, 16  ;;  %v7829_v46 = vld [vmem:[%s9821_s1 + $0xd8] sm:$0xff]   ;;  %v2682_v35 = vshll.u32 %v2625_v4, 16 }
  0xb7   : > { %6718 = vmatprep.subr.bf16.mxu0 %v7018_v7  ;;  %v7806_v45 = vsel %vm7594_vm13, %v1901_v5, %v1902_v28  ;;  %v7810_v19 = vsel %vm7594_vm13, %v5937_v2, %v1906_v43  ;;  %v1908_v62 = vrot.slane %v1906_v43, 4  ;;  %v2627_v2 = vld [vmem:[#allocation2 + $0x18] sm:$0xf]  ;;  %v9865_v5 = vcombine.low %v7686_v60, %v7688_v18  ;;  %v7026_v37 = vld [vmem:[%s9821_s1 + $0x108] sm:$0xff]  }
  0xb8   : > { %6665 = vmatpush3.bf16.msra.mxu1 %v7005_v1  ;;  %v1885_v1 = vrot.slane %v7801_v11, 5  ;;  %v2686_v43 = vshrl.u32 %v2625_v4, 16  ;;  %v9866_v60 = vcombine.low %v7415_v38, %v7433_v59  ;;  %v1913_v38 = vrot.slane %v7617_v54, 5  ;;  %v2626_v59 = vld [vmem:[#allocation2 + $0x14] sm:$0x1] }
  0xb9   : > { %6639 = vmatmul.mubr.bf16.gmra.mxu0 %v5944_v31  ;;  %6666 = vmatprep.subr.bf16.mxu1 %v7009_v49  ;;  %v7836_v56 = vsel %vm7594_vm13, %v1908_v62, %v1909_v29  ;;  %v5934_v31 = vrot.slane %v7782_v41, 9  ;;  %v7117_v62 = vld [vmem:[#allocation2 + $0x8c] sm:$0x1]  ;;  %v2700_v44 = vshll.u32 %v2627_v2, 16  ;;  %v9868_v29 = vrot.slane %v7733_v63, 5 }
  0xba   : > { %6642 = vmatprep.mubr.bf16.mxu0 %v9864_v9  ;;  %6719 = vmatpush3.bf16.msra.mxu0 %v7018_v7  ;;  %v2676_v7 = vshll.u32 %v2624_v13, 16  ;;  %v2628_v9 = vld [vmem:[#allocation2 + $0x1c] sm:$0xf]  ;;  %v1770_v13 = vld [vmem:[#allocation2 + $0xb4] sm:$0xe]  ;;  %v1887_v4 = vrot.slane %v1885_v1, 4 }
  0xbb   : > { %6587 = vmatmul.mubr.bf16.gmra.mxu1 %v9865_v5  ;;  %6720 = vmatprep.subr.bf16.mxu0 %v7022_v42  ;;  %v9867_v5 = vrot.slane %v7733_v63, 5  ;;  %v1888_v28 = vrot.slane %v7117_v62, 5  ;;  %v2706_v41 = vshll.u32 %v2628_v9, 16  ;;  %v7860_v62 = vsel %vm7594_vm13, %v9869_v36, %v9868_v29  ;;  %v7867_v54 = vld [vmem:[#allocation2 + $0x28] sm:$0xf] }
  0xbc   : > { %6590 = vmatprep.mubr.bf16.mxu1 %v9866_v60  ;;  %6667 = vmatpush3.bf16.msra.mxu1 %v7009_v49  ;;  %v2675_v49 = vrot.slane %v2673_v55, 4  ;;  %v7850_v60 = vld [vmem:[#allocation2 + $0x20] sm:$0x1]  ;;  %v2678_v18 = vrot.slane %v2676_v7, 5  ;;  %v2688_v7 = vrot.slane %v2686_v43, 4  ;;  %v7876_v36 = vsel %vm7594_vm13, %v5934_v31, %v1885_v1 }
  0xbd   : > { %v1880_v32 = vrot.slane %v9867_v5, 4  ;;  %6668 = vmatprep.subr.bf16.mxu1 %v7780_v14  ;;  %v2697_v5 = vshrl.u32 %v2627_v2, 16  ;;  %v7030_v55 = vld [vmem:[%s9821_s1 + $0x100] sm:$0xff]   ;;  %v2710_v2 = vshrl.u32 %v2628_v9, 16  ;;  %v2702_v23 = vrot.slane %v2700_v44, 5 }
  0xbe   : > { %6721 = vmatpush3.bf16.msra.mxu0 %v7022_v42  ;;  %v7865_v42 = vrot.slane %v2682_v35, 5  ;;  %v9870_v35 = vcombine.low %v7721_v15, %v7725_v20  ;;  %v1915_v1 = vrot.slane %v1913_v38, 4  ;;  %v1916_v44 = vrot.slane %v7619_v51, 5  ;;  %v7905_v51 = vld [vmem:[#allocation2 + $0x94] sm:$0xf] }
  0xbf   : > { %6722 = vmatprep.subr.bf16.mxu0 %v7026_v37  ;;  %v7872_v21 = vsel %vm7594_vm13, %v1880_v32, %v1881_v22  ;;  %v2699_v29 = vrot.slane %v2697_v5, 4  ;;  %v7021_v32 = vld [vmem:[%s9821_s1 + $0xd0] sm:$0xff]   ;;  %v5938_v22 = vrot.slane %v1770_v13, 9  ;;  %v2679_v31 = vor.u32 %v2678_v18, %v2675_v49 }
  0xc0   : > { %6669 = vmatpush3.bf16.msra.mxu1 %v7780_v14  ;;  %v7886_v14 = vsel %vm7594_vm13, %v1887_v4, %v1888_v28  ;;  %v2692_v43 = vshll.u32 %v2626_v59, 16  ;;  %v7892_v20 = vrot.slane %v2706_v41, 5  ;;  %v2716_v15 = vshll.u32 %v7850_v60, 16  ;;  %v7898_v28 = vld [vmem:[%s9821_s1 + $0x1b8] sm:$0xff]   ;;  %v7903_v13 = vld [vmem:[#allocation2 + $0x90] sm:$0xf] }
  0xc1   : > { %6643 = vmatmul.mubr.bf16.gmra.mxu0 %v9870_v35  ;;  %6670 = vmatprep.subr.bf16.mxu1 %v7829_v46  ;;  %v9871_v9 = vcombine.low %v7470_v57, %v7480_v12  ;;  %v2712_v18 = vrot.slane %v2710_v2, 4  ;;  %v2721_v4 = vshrl.u32 %v7852_v30, 16  ;;  %v9872_v59 = vcombine.low %v7520_v27, %v7534_v58  ;;  %v7025_v12 = vld [vmem:[%s9821_s1 + $0xc8] sm:$0xff]  }
  0xc2   : > { %6646 = vmatprep.mubr.bf16.mxu0 %v5947_v16  ;;  %6723 = vmatpush3.bf16.msra.mxu0 %v7026_v37  ;;  %v2689_v37 = vor.u32 %v2688_v7, %v7865_v42  ;;  %v5949_v57 = vcombine.low %v7860_v62, %v7872_v21  ;;  %v2703_v49 = vor.u32 %v2702_v23, %v2699_v29  ;;  %v2724_v60 = vshll.u32 %v7852_v30, 16  ;;  %v2636_v7 = vld [vmem:[#allocation2 + $0x3c] sm:$0xf]  ;;  %v7940_v21 = vld [vmem:[#allocation2 + $0x2c] sm:$0x1]  ;;  %v7029_v29 = vld [vmem:[%s9821_s1 + $0xc0] sm:$0xff]  }
  0xc3   : > { %6591 = vmatmul.mubr.bf16.gmra.mxu1 %v9871_v9  ;;  %6724 = vmatprep.subr.bf16.mxu0 %v7030_v55  ;;  %v2730_v5 = vshll.u32 %v7867_v54, 16  ;;  %v7926_v27 = vsel %vm7594_vm13, %v5938_v22, %v1913_v38  ;;  %v2734_v58 = vshrl.u32 %v7867_v54, 16  ;;  %v2745_v62 = vshrl.u32 %v7878_v34, 16  ;;  %9874 = vst [vmem:[#allocation11_spill] sm:$0xff] %v7940_v21  ;;  %v7983_v16 = vld [vmem:[#allocation2 + $0x44] sm:$0x1] }
  0xc4   : > { %6594 = vmatprep.mubr.bf16.mxu1 %v9872_v59  ;;  %6671 = vmatpush3.bf16.msra.mxu1 %v7829_v46  ;;  %v7929_v46 = vld [vmem:[#allocation2 + $0x34] sm:$0xf]  ;;  %v7934_v30 = vsel %vm7594_vm13, %v1915_v1, %v1916_v44  ;;  %v7936_v23 = vrot.slane %v2679_v31, 4  ;;  %v7938_v2 = vrot.slane %v2692_v43, 5  ;;  %v2748_v38 = vshll.u32 %v7878_v34, 16  ;;  %9878 = vst [vmem:[#allocation13_spill] sm:$0xff] %v7983_v16 }
  0xc5   : > { %6672 = vmatprep.subr.bf16.mxu1 %v7021_v32  ;;  %9873 = vst [vmem:[#allocation10_spill] sm:$0xff] %v7929_v46  ;;  %v7946_v35 = vrot.slane %v2689_v37, 4  ;;  %v2713_v22 = vor.u32 %v2712_v18, %v7892_v20  ;;  %v7949_v9 = vrot.slane %v2716_v15, 5  ;;  %v7952_v1 = vrot.slane %v2703_v49, 4  ;;  %v7957_v43 = vld [vmem:[#allocation2 + $0x40] sm:$0xf] }
  0xc6   : > { %6725 = vmatpush3.bf16.msra.mxu0 %v7030_v55  ;;  %v2723_v55 = vrot.slane %v2721_v4, 4  ;;  %v2726_v44 = vrot.slane %v2724_v60, 5  ;;  %v7954_v31 = vrot.slane %v2730_v5, 5  ;;  %v2754_v34 = vshll.u32 %v7929_v46, 16  ;;  %v7962_v18 = vld [vmem:[#allocation2 + $0x38] sm:$0x1] }
  0xc7   : > { %6806 = vmatprep.subr.bf16.mxu0 %v7898_v28  ;;  %v9875_v37 = vcombine.low %v7740_v40, %v7793_v10  ;;  %v2736_v15 = vrot.slane %v2734_v58, 4  ;;  %v2747_v59 = vrot.slane %v2745_v62, 4  ;;  %v2769_v4 = vshrl.u32 %v2636_v7, 16  ;;  %v2639_v49 = vld [vmem:[#allocation2 + $0x48] sm:$0xf] }
  0xc8   : > { %6673 = vmatpush3.bf16.msra.mxu1 %v7021_v32  ;;  %v2758_v32 = vshrl.u32 %v7929_v46, 16  ;;  %v2750_v40 = vrot.slane %v2748_v38, 5  ;;  %v2772_v10 = vshll.u32 %v2636_v7, 16  ;;  %v9877_v58 = vcombine.low %v7569_v8, %v7577_v26  ;;  %v2642_v5 = vld [vmem:[#allocation2 + $0x54] sm:$0xf] }
  0xc9   : > { %6647 = vmatmul.mubr.bf16.gmra.mxu0 %v9875_v37  ;;  %6674 = vmatprep.subr.bf16.mxu1 %v7025_v12  ;;  %v7971_v37 = vld [vmem:[#allocation2 + $0x4c] sm:$0xf]  ;;  %v7980_v62 = vrot.slane %v2713_v22, 4  ;;  %v2740_v60 = vshll.u32 %v7940_v21, 16  ;;  %v2778_v38 = vshll.u32 %v7957_v43, 16  ;;  %v9879_v7 = vcombine.low %v7706_v6, %v7681_v53 }
  0xca   : > { %6650 = vmatprep.mubr.bf16.mxu0 %v5949_v57  ;;  %9876 = vst [vmem:[#allocation12_spill] sm:$0xff] %v7971_v37  ;;  %v2727_v26 = vor.u32 %v2726_v44, %v2723_v55  ;;  %v2760_v22 = vrot.slane %v2758_v32, 4  ;;  %v7998_v57 = vld [vmem:[%s9821_s1 + $0x178] sm:$0xff]   ;;  %v2737_v53 = vor.u32 %v2736_v15, %v7954_v31  ;;  %v2771_v6 = vrot.slane %v2769_v4, 4 }
  0xcb   : > { %6595 = vmatmul.mubr.bf16.gmra.mxu1 %v9877_v58  ;;  %v7993_v58 = vrot.slane %v2754_v34, 5  ;;  %v2751_v41 = vor.u32 %v2750_v40, %v2747_v59  ;;  %v2764_v8 = vshll.u32 %v7962_v18, 16  ;;  %v2793_v55 = vshrl.u32 %v2639_v49, 16  ;;  %v8015_v40 = vld [vmem:[#allocation2 + $0x58] sm:$0xf] }
  0xcc   : > { %6598 = vmatprep.mubr.bf16.mxu1 %v9879_v7  ;;  %6675 = vmatpush3.bf16.msra.mxu1 %v7025_v12  ;;  %v2774_v12 = vrot.slane %v2772_v10, 5  ;;  %v2782_v7 = vshrl.u32 %v7957_v43, 16  ;;  %v2796_v44 = vshll.u32 %v2639_v49, 16  ;;  %v8003_v34 = vrot.slane %v2740_v60, 5  ;;  %v8012_v10 = vld [vmem:[#allocation2 + $0x50] sm:$0x1] }
  0xcd   : > { %6676 = vmatprep.subr.bf16.mxu1 %v7029_v29  ;;  %v8005_v32 = vrot.slane %v2778_v38, 5  ;;  %v2802_v46 = vshll.u32 %v7971_v37, 16  ;;  %v8008_v21 = vrot.slane %v2727_v26, 4  ;;  %v2761_v15 = vor.u32 %v2760_v22, %v7993_v58 }
  0xce   : > { %v2784_v61 = vrot.slane %v2782_v7, 4  ;;  %v2788_v4 = vshll.u32 %v7983_v16, 16  ;;  %v2806_v59 = vshrl.u32 %v7971_v37, 16  ;;  %v9880_v49 = vcombine.low %v7876_v36, %v7886_v14  ;;  %v2645_v16 = vld [vmem:[#allocation2 + $0x60] sm:$0xf] }
  0xcf   : > { %v8025_v60 = vrot.slane %v2737_v53, 4  ;;  %v2775_v38 = vor.u32 %v2774_v12, %v2771_v6  ;;  %v2817_v26 = vshrl.u32 %v2642_v5, 16  ;;  %v9881_v22 = vcombine.low %v7752_v0, %v7773_v50  ;;  %v8042_v0 = vld [vmem:[#allocation2 + $0x64] sm:$0xf] }
  0xd0   : > { %6677 = vmatpush3.bf16.msra.mxu1 %v7029_v29  ;;  %v8030_v7 = vrot.slane %v2751_v41, 4  ;;  %v8032_v37 = vrot.slane %v2764_v8, 5  ;;  %v2795_v36 = vrot.slane %v2793_v55, 4  ;;  %v2798_v14 = vrot.slane %v2796_v44, 5 }
  0xd1   : > { %6651 = vmatmul.mubr.bf16.gmra.mxu0 %v9880_v49  ;;  %6758 = vmatprep.subr.bf16.mxu1 %v7998_v57  ;;  %v8034_v49 = vld [vmem:[#allocation2 + $0x5c] sm:$0x1]  ;;  %v9882_v29 = vcombine.low %v7710_v39, %v7699_v48  ;;  %v2785_v53 = vor.u32 %v2784_v61, %v8005_v32  ;;  %v8040_v6 = vrot.slane %v2802_v46, 5  ;;  %v2808_v12 = vrot.slane %v2806_v59, 4 }
  0xd2   : > { %6654 = vmatprep.mubr.bf16.mxu0 %v9881_v22  ;;  %v2820_v50 = vshll.u32 %v2642_v5, 16  ;;  %v9883_v41 = vcombine.low %v7731_v47, %v7733_v63  ;;  %v2762_v8 = vrot.slane %v2761_v15, 4  ;;  %v2790_v55 = vrot.slane %v2788_v4, 5 }
  0xd3   : > { %6599 = vmatmul.mubr.bf16.gmra.mxu1 %v9882_v29  ;;  %v2826_v44 = vshll.u32 %v8015_v40, 16  ;;  %v2830_v22 = vshrl.u32 %v8015_v40, 16  ;;  %v2776_v48 = vrot.slane %v2775_v38, 4  ;;  %v2812_v39 = vshll.u32 %v8012_v10, 16 }
  0xd4   : > { %6602 = vmatprep.mubr.bf16.mxu1 %v9883_v41  ;;  %v2819_v61 = vrot.slane %v2817_v26, 4  ;;  %v2822_v46 = vrot.slane %v2820_v50, 5  ;;  %v2733_v5 = vsel %vm7199_vm6, %v8008_v21, %v7954_v31  ;;  %v2799_v59 = vor.u32 %v2798_v14, %v2795_v36 }
  0xd5   : > { %v8054_v29 = vrot.slane %v2826_v44, 5  ;;  %v2841_v47 = vshrl.u32 %v2645_v16, 16  ;;  %v2786_v63 = vrot.slane %v2785_v53, 4  ;;  %v2809_v15 = vor.u32 %v2808_v12, %v8040_v6  ;;  %v8081_v12 = vld [vmem:[#allocation2 + $0x68] sm:$0x1] }
  0xd6   : > { %v2832_v4 = vrot.slane %v2830_v22, 4  ;;  %v2836_v41 = vshll.u32 %v8034_v49, 16  ;;  %v2743_v38 = vsel %vm7199_vm6, %v8025_v60, %v8003_v34  ;;  %v2844_v26 = vshll.u32 %v2645_v16, 16  ;;  %v2648_v34 = vld [vmem:[#allocation2 + $0x6c] sm:$0xf] }
  0xd7   : > { %v2850_v50 = vshll.u32 %v8042_v0, 16  ;;  %v2854_v21 = vshrl.u32 %v8042_v0, 16  ;;  %v9884_v31 = vcombine.low %v7788_v25, %v7806_v45  ;;  %v2757_v36 = vsel %vm7199_vm6, %v8030_v7, %v7993_v58  ;;  %v8083_v44 = vld [vmem:[#allocation2 + $0x70] sm:$0xf] }
  0xd8   : > { %v2767_v14 = vsel %vm7199_vm6, %v2762_v8, %v8032_v37  ;;  %v2823_v53 = vor.u32 %v2822_v46, %v2819_v61  ;;  %v2833_v16 = vor.u32 %v2832_v4, %v8054_v29  ;;  %v9885_v60 = vcombine.low %v7810_v19, %v7836_v56 }
  0xd9   : > { %6655 = vmatmul.mubr.bf16.gmra.mxu0 %v9884_v31  ;;  %v2781_v25 = vsel %vm7199_vm6, %v2776_v48, %v8005_v32  ;;  %v2814_v45 = vrot.slane %v2812_v39, 5  ;;  %v2843_v58 = vrot.slane %v2841_v47, 4  ;;  %v2846_v7 = vrot.slane %v2844_v26, 5  ;;  %v2651_v26 = vld [vmem:[#allocation2 + $0x78] sm:$0xf] }
  0xda   : > { %6658 = vmatprep.mubr.bf16.mxu0 %v9885_v60  ;;  %v9886_v37 = vcombine.low %v7817_v33, %v7801_v11  ;;  %v2791_v8 = vsel %vm7199_vm6, %v2786_v63, %v2790_v55  ;;  %v2800_v19 = vrot.slane %v2799_v59, 4  ;;  %v2810_v56 = vrot.slane %v2809_v15, 4  ;;  %v8134_v31 = vld [vmem:[#allocation2 + $0x88] sm:$0xf] }
  0xdb   : > { %v2838_v22 = vrot.slane %v2836_v41, 5  ;;  %v9887_v32 = vcombine.low %v7903_v13, %v7905_v51  ;;  %v8093_v48 = vrot.slane %v2850_v50, 5  ;;  %v2856_v39 = vrot.slane %v2854_v21, 4  ;;  %v8121_v50 = vld [vmem:[#allocation2 + $0x7c] sm:$0xf]  ;;  %9892 = vst [vmem:[#allocation14_spill] sm:$0xff] %v8134_v31 }
  0xdc   : > { %6603 = vmatmul.mubr.bf16.gmra.mxu1 %v9886_v37  ;;  %v2865_v61 = vshrl.u32 %v2648_v34, 16  ;;  %v2868_v46 = vshll.u32 %v2648_v34, 16  ;;  %v2824_v47 = vrot.slane %v2823_v53, 4  ;;  %v2834_v4 = vrot.slane %v2833_v16, 4 }
  0xdd   : > { %6606 = vmatprep.mubr.bf16.mxu1 %v9887_v32  ;;  %v2874_v11 = vshll.u32 %v8083_v44, 16  ;;  %v2878_v33 = vshrl.u32 %v8083_v44, 16  ;;  %v9888_v55 = vsel %vm7199_vm6, %v7946_v35, %v7938_v2  ;;  %v9889_v13 = vsel %vm7199_vm6, %v7936_v23, %v7865_v42  ;;  %v8119_v35 = vld [vmem:[#allocation2 + $0x74] sm:$0x1]  ;;  %v2657_v32 = vld [vmem:[#allocation2 + $0x90] sm:$0xf] }
  0xde   : > { %v5987_v51 = vcombine.low %v9889_v13, %v9888_v55  ;;  %v9890_v59 = vsel %vm7199_vm6, %v7980_v62, %v7949_v9  ;;  %v9891_v63 = vsel %vm7199_vm6, %v7952_v1, %v7892_v20  ;;  %v8117_v41 = vcombine.low %v2733_v5, %v2743_v38  ;;  %v2654_v20 = vld [vmem:[#allocation2 + $0x84] sm:$0xf] }
  0xdf   : > { %v5988_v15 = vcombine.low %v9891_v63, %v9890_v59  ;;  %v2847_v2 = vor.u32 %v2846_v7, %v2843_v58  ;;  %v8123_v42 = vcombine.low %v2757_v36, %v2767_v14  ;;  %v8125_v23 = vcombine.low %v2781_v25, %v2791_v8  ;;  %v8156_v58 = vld [vmem:[#allocation2 + $0x80] sm:$0x1]  ;;  %v9896_v8 = vld [vmem:[#allocation6_spill] sm:$0xff] }
  0xe0   : > { %v2805_v9 = vsel %vm7199_vm6, %v2800_v19, %v8040_v6  ;;  %v2860_v62 = vshll.u32 %v8081_v12, 16  ;;  %v2815_v1 = vsel %vm7199_vm6, %v2810_v56, %v2814_v45  ;;  %v2857_v5 = vor.u32 %v2856_v39, %v8093_v48  ;;  %9895 = vst [vmem:[#allocation15_spill] sm:$0xff] %v8156_v58 }
  0xe1   : > { %v2867_v38 = vrot.slane %v2865_v61, 4  ;;  %v2870_v21 = vrot.slane %v2868_v46, 5  ;;  %v9893_v36 = vcombine.low %v7926_v27, %v7934_v30  ;;  %v2829_v6 = vsel %vm7199_vm6, %v2824_v47, %v8054_v29 }
  0xe2   : > { %v2839_v14 = vsel %vm7199_vm6, %v2834_v4, %v2838_v22  ;;  %v8144_v53 = vrot.slane %v2874_v11, 5  ;;  %v2880_v16 = vrot.slane %v2878_v33, 4  ;;  %v8146_v34 = vrot.slane %v2847_v2, 4  ;;  %v8170_v4 = vld [vmem:[#allocation2 + $0x94] sm:$0xf]  ;;  %v7031_v11 = vld [vmem:[#allocation2 + $0xc] sm:$0xff]  }
  0xe3   : > { %6659 = vmatmul.mubr.bf16.gmra.mxu0 %v9893_v36  ;;  %v2884_v60 = vshll.u32 %v8119_v35, 16  ;;  %v2889_v25 = vshrl.u32 %v2651_v26, 16  ;;  %v2892_v45 = vshll.u32 %v2651_v26, 16  ;;  %v9894_v27 = vcombine.low %v7505_v3, %v7500_v52  ;;  %9898 = vst [vmem:[#allocation6_spill] sm:$0xff] %v8170_v4 }
  0xe4   : > { %6726 = vmatprep.mubr.bf16.mxu0 %v5987_v51  ;;  %v8152_v30 = vcombine.low %v2805_v9, %v2815_v1  ;;  %v8154_v29 = vrot.slane %v2860_v62, 5  ;;  %v2898_v7 = vshll.u32 %v8121_v50, 16  ;;  %v2902_v37 = vshrl.u32 %v8121_v50, 16  ;;  %v2660_v9 = vld [vmem:[#allocation2 + $0x9c] sm:$0xf] }
  0xe5   : > { %6607 = vmatmul.mubr.bf16.gmra.mxu1 %v9894_v27  ;;  %v9897_v19 = vcombine.low %v7545_v17, %v9896_v8  ;;  %v8163_v56 = vcombine.low %v2829_v6, %v2839_v14  ;;  %v8165_v22 = vrot.slane %v2857_v5, 4  ;;  %v2913_v52 = vshrl.u32 %v2654_v20, 16  ;;  %v7038_v17 = vld [vmem:[%s9821_s1 + $0x1b0] sm:$0xff]   ;;  %v8184_v62 = vld [vmem:[#allocation2 + $0x8c] sm:$0x1] }
  0xe6   : > { %v2916_v3 = vshll.u32 %v2654_v20, 16  ;;  %v2871_v39 = vor.u32 %v2870_v21, %v2867_v38  ;;  %v2881_v61 = vor.u32 %v2880_v16, %v8144_v53  ;;  %v2922_v46 = vshll.u32 %v8134_v31, 16  ;;  %9899 = vst [vmem:[#allocation16_spill] sm:$0xff] %v8184_v62  ;;  %v8187_v21 = vld [vmem:[#allocation2 + $0xa0] sm:$0xf]  ;;  %v9903_v8 = vld [vmem:[#allocation9_spill] sm:$0xff] }
  0xe7   : > { %6610 = vmatprep.mubr.bf16.mxu1 %v9897_v19  ;;  %v2926_v47 = vshrl.u32 %v8134_v31, 16  ;;  %v2853_v33 = vsel %vm7199_vm6, %v8146_v34, %v8093_v48  ;;  %v8179_v55 = vrot.slane %v2884_v60, 5  ;;  %v2891_v13 = vrot.slane %v2889_v25, 4  ;;  %9900 = vst [vmem:[#allocation17_spill] sm:$0xff] %v8187_v21  ;;  %v8195_v60 = vld [vmem:[#allocation2 + $0x98] sm:$0x1] }
  0xe8   : > { %v2894_v51 = vrot.slane %v2892_v45, 5  ;;  %v8181_v59 = vrot.slane %v2898_v7, 5  ;;  %v2904_v63 = vrot.slane %v2902_v37, 4  ;;  %v2908_v2 = vshll.u32 %v8156_v58, 16  ;;  %9901 = vst [vmem:[#allocation18_spill] sm:$0xff] %v8195_v60  ;;  %v7042_v25 = vld [vmem:[%s9821_s1 + $0x1a8] sm:$0xff]  }
  0xe9   : > { %v2937_v26 = vshrl.u32 %v2657_v32, 16  ;;  %v2915_v20 = vrot.slane %v2913_v52, 4  ;;  %v2918_v1 = vrot.slane %v2916_v3, 5  ;;  %v2940_v5 = vshll.u32 %v2657_v32, 16  ;;  %v9902_v37 = vld [vmem:[#allocation8_spill] sm:$0xff]  ;;  %v7050_v34 = vld [vmem:[%s9821_s1 + $0x198] sm:$0xff]  }
  0xea   : > { %v2946_v38 = vshll.u32 %v8170_v4, 16  ;;  %v8189_v36 = vrot.slane %v2871_v39, 4  ;;  %v8191_v6 = vrot.slane %v2881_v61, 4  ;;  %v8193_v14 = vrot.slane %v2922_v46, 5 }
  0xeb   : > { %6727 = vmatmul.mubr.bf16.vlgmr.msra.gmra.mxu0 %v5988_v15  ;;  %v2928_v16 = vrot.slane %v2926_v47, 4  ;;  %v2895_v45 = vor.u32 %v2894_v51, %v2891_v13  ;;  %v2939_v27 = vrot.slane %v2937_v26, 4  ;;  %v2942_v15 = vrot.slane %v2940_v5, 5  ;;  %v2663_v47 = vld [vmem:[#allocation2 + $0xa8] sm:$0xf]  ;;  %v7032_v13 = vld [vmem:[#allocation2 + $0x18] sm:$0xff]  }
  0xec   : > { %6807 = vmatpush3.bf16.msra.mxu0 %v7898_v28  ;;  %6730 = vmatprep.mubr.bf16.mxu0 %v8117_v41  ;;  %v2950_v7 = vshrl.u32 %v8170_v4, 16  ;;  %v9904_v19 = vcombine.low %v9902_v37, %v9903_v8  ;;  %v2863_v28 = vsel %vm7199_vm6, %v8165_v22, %v8154_v29  ;;  %v2905_v41 = vor.u32 %v2904_v63, %v8181_v59  ;;  %v8217_v5 = vld [vmem:[#allocation2 + $0xa4] sm:$0x1] }
  0xed   : > { %6808 = vmatprep.subr.bf16.mxu0 %v7038_v17  ;;  %v8211_v52 = vrot.slane %v2908_v2, 5  ;;  %v8213_v3 = vrot.slane %v2946_v38, 5  ;;  %v2919_v32 = vor.u32 %v2918_v1, %v2915_v20  ;;  %v2961_v61 = vshrl.u32 %v2660_v9, 16  ;;  %9905 = vst [vmem:[#allocation8_spill] sm:$0xff] %v8217_v5  ;;  %v7035_v63 = vld [vmem:[#allocation2 + $0x24] sm:$0xff]   ;;  %v7037_v38 = vld [vmem:[%s9821_s1 + $0x170] sm:$0xff]  }
  0xee   : > { %6611 = vmatmul.mubr.bf16.gmra.mxu1 %v9904_v19  ;;  %v2952_v39 = vrot.slane %v2950_v7, 4  ;;  %v2964_v46 = vshll.u32 %v2660_v9, 16  ;;  %v2929_v51 = vor.u32 %v2928_v16, %v8193_v14  ;;  %v2932_v26 = vshll.u32 %v8184_v62, 16  ;;  %v8224_v1 = vld [vmem:[#allocation2 + $0xac] sm:$0xf]  ;;  %v7046_v16 = vld [vmem:[%s9821_s1 + $0x1a0] sm:$0xff]  }
  0xef   : > { %6678 = vmatprep.mubr.bf16.mxu1 %v7031_v11  ;;  %v2970_v29 = vshll.u32 %v8187_v21, 16  ;;  %v2974_v22 = vshrl.u32 %v8187_v21, 16  ;;  %v8221_v2 = vrot.slane %v2895_v45, 4  ;;  %v2943_v11 = vor.u32 %v2942_v15, %v2939_v27  ;;  %9906 = vst [vmem:[#allocation9_spill] sm:$0xff] %v8224_v1  ;;  %v707_v62 = vld [vmem:[#allocation2 + $0xc8] sm:$0x1] }
  0xf0   : > { %6809 = vmatpush3.bf16.msra.mxu0 %v7038_v17  ;;  %v2956_v20 = vshll.u32 %v8195_v60, 16  ;;  %v2963_v9 = vrot.slane %v2961_v61, 4  ;;  %v2953_v7 = vor.u32 %v2952_v39, %v8213_v3  ;;  %v2966_v17 = vrot.slane %v2964_v46, 5  ;;  %v8324_v60 = vld [vmem:[#allocation2 + $0xbc] sm:$0x1] }
  0xf1   : > { %6810 = vmatprep.subr.bf16.mxu0 %v7042_v25  ;;  %v8233_v45 = vrot.slane %v2970_v29, 5  ;;  %v2976_v27 = vrot.slane %v2974_v22, 4  ;;  %v8235_v15 = vrot.slane %v2905_v41, 4  ;;  %v8237_v37 = vrot.slane %v2919_v32, 4  ;;  %v2666_v41 = vld [vmem:[#allocation2 + $0xb4] sm:$0xf] }
  0xf2   : > { %v2985_v8 = vshrl.u32 %v2663_v47, 16  ;;  %v2988_v19 = vshll.u32 %v2663_v47, 16  ;;  %v8245_v61 = vcombine.low %v2853_v33, %v2863_v28  ;;  %v8247_v39 = vrot.slane %v2929_v51, 4  ;;  %9909 = vst [vmem:[#allocation21_spill] sm:$0xff] %v8324_v60 }
  0xf3   : > { %6731 = vmatmul.mubr.bf16.gmra.mxu0 %v8123_v42  ;;  %v8249_v46 = vrot.slane %v2932_v26, 5  ;;  %v2967_v29 = vor.u32 %v2966_v17, %v2963_v9  ;;  %v8256_v32 = vrot.slane %v2943_v11, 4  ;;  %v8258_v47 = vrot.slane %v2956_v20, 5  ;;  %v8281_v9 = vld [vmem:[#allocation2 + $0xb8] sm:$0xf]  ;;  %v7036_v17 = vld [vmem:[#allocation2 + $0x30] sm:$0xff]  }
  0xf4   : > { %6734 = vmatprep.mubr.bf16.mxu0 %v8125_v23  ;;  %6811 = vmatpush3.bf16.msra.mxu0 %v7042_v25  ;;  %v2980_v48 = vshll.u32 %v8217_v5, 16  ;;  %v8264_v23 = vrot.slane %v2953_v7, 4  ;;  %v2977_v33 = vor.u32 %v2976_v27, %v8233_v45  ;;  %v8267_v25 = vld [vmem:[#allocation2 + $0xb0] sm:$0x1]  ;;  %v2994_v28 = vshll.u32 %v8224_v1, 16  ;;  %9908 = vst [vmem:[#allocation20_spill] sm:$0xff] %v8281_v9 }
  0xf5   : > { %6812 = vmatprep.subr.bf16.mxu0 %v7046_v16  ;;  %9907 = vst [vmem:[#allocation19_spill] sm:$0xff] %v8267_v25  ;;  %v2998_v51 = vshrl.u32 %v8224_v1, 16  ;;  %v8279_v22 = vrot.slane %v2967_v29, 4  ;;  %v2987_v11 = vrot.slane %v2985_v8, 4  ;;  %v2990_v20 = vrot.slane %v2988_v19, 5  ;;  %v7039_v29 = vld [vmem:[#allocation2 + $0x3c] sm:$0xff]  }
  0xf6   : > { %6679 = vmatmul.mubr.bf16.vlgmr.msra.gmra.mxu1 %v7032_v13  ;;  %v7041_v13 = vld [vmem:[%s9821_s1 + $0x168] sm:$0xff]   ;;  %v213_v7 = vld [vmem:[%s7191_s25 + $0x78] sm:$0xf]  ;;  %v214_v19 = vld [vmem:[%s7191_s25 + $0x7c] sm:$0xf]  ;;  %v8305_v42 = vrot.slane %v2980_v48, 5  ;;  %v2959_v8 = vsel %vm7199_vm6, %v8264_v23, %v8258_v47  ;;  %v9917_v31 = vsel %vm7199_vm6, %v8247_v39, %v8249_v46  ;;  %s9705_s25 = scalar_lea.vmem %s9822_s2, %s6173_s20 }
  0xf7   : > { %6759 = vmatpush3.bf16.msra.mxu1 %v7998_v57  ;;  %6682 = vmatprep.mubr.bf16.mxu1 %v7035_v63  ;;  %v3009_v63 = vshrl.u32 %v2666_v41, 16  ;;  %v3012_v26 = vshll.u32 %v2666_v41, 16  ;;  %v7045_v27 = vld [vmem:[%s9821_s1 + $0x160] sm:$0xff]   ;;  %v2978_v1 = vrot.slane %v2977_v33, 4  ;;  %v8317_v57 = vrot.slane %v2994_v28, 5  ;;  %v7058_v23 = vld [vmem:[%s9821_s1 + $0x188] sm:$0xff]  }
  0xf8   : > { %6760 = vmatprep.subr.bf16.mxu1 %v7037_v38  ;;  %6813 = vmatpush3.bf16.msra.mxu0 %v7046_v16  ;;  %v7054_v16 = vld [vmem:[%s9821_s1 + $0x190] sm:$0xff]   ;;  %v3000_v48 = vrot.slane %v2998_v51, 4  ;;  %v2973_v41 = vsel %vm7199_vm6, %v8279_v22, %v8233_v45  ;;  %v2991_v5 = vor.u32 %v2990_v20, %v2987_v11  ;;  %v3004_v21 = vshll.u32 %v8267_v25, 16  ;;  %v703_v45 = vld [vmem:[#allocation2 + $0xc0] sm:$0xf]  ;;  %s5874_s20 = sshll.u32 %s10075_s13, 1 }
  0xf9   : > { %6814 = vmatprep.subr.bf16.mxu0 %v7050_v34  ;;  %v528_v47 = vshrl.u32 %v213_v7, 16  ;;  %v3022_v33 = vshrl.u32 %v8281_v9, 16  ;;  %v531_v28 = vshll.u32 %v213_v7, 16  ;;  %v536_v51 = vshrl.u32 %v214_v19, 16  ;;  %s181_s26 = scalar_lea.vmem %s9823_s3, %s5874_s20 }
  0xfa   : > { %v3011_v22 = vrot.slane %v3009_v63, 4  ;;  %v3014_v11 = vrot.slane %v3012_v26, 5  ;;  %v539_v25 = vshll.u32 %v214_v19, 16  ;;  %v3001_v4 = vor.u32 %v3000_v48, %v8317_v57  ;;  %v3379_v19 = vld [vmem:[#allocation2 + $0x24] sm:$0xe] }
  0xfb   : > { %6761 = vmatpush3.bf16.msra.mxu1 %v7037_v38  ;;  %6735 = vmatmul.mubr.bf16.gmra.mxu0 %v8152_v30  ;;  %v3018_v38 = vshll.u32 %v8281_v9, 16  ;;  %v530_v20 = vrot.slane %v528_v47, 7  ;;  %v2983_v30 = vsel %vm7199_vm6, %v2978_v1, %v8305_v42  ;;  %v3028_v9 = vshll.u32 %v8324_v60, 16  ;;  %v7040_v1 = vld [vmem:[#allocation2 + $0x48] sm:$0xff]  }
  0xfc   : > { %6762 = vmatprep.subr.bf16.mxu1 %v7041_v13  ;;  %6738 = vmatprep.mubr.bf16.mxu0 %v8163_v56  ;;  %v538_v7 = vrot.slane %v536_v51, 7  ;;  %v7049_v56 = vld [vmem:[%s9821_s1 + $0x158] sm:$0xff]   ;;  %v8343_v26 = vrot.slane %v3004_v21, 5  ;;  %v3024_v48 = vrot.slane %v3022_v33, 4  ;;  %v9910_v21 = vsel %vm7199_vm6, %v8191_v6, %v8179_v55 }
  0xfd   : > { %6815 = vmatpush3.bf16.msra.mxu0 %v7050_v34  ;;  %v8341_v34 = vrot.slane %v2991_v5, 4  ;;  %v534_v63 = vrot.slane %v530_v20, 4  ;;  %v8345_v42 = vrot.slane %v3018_v38, 5  ;;  %v9911_v5 = vsel %vm7199_vm6, %v8189_v36, %v8144_v53 }
  0xfe   : > { %6683 = vmatmul.mubr.bf16.gmra.mxu1 %v7036_v17  ;;  %6816 = vmatprep.subr.bf16.mxu0 %v7054_v16  ;;  %v533_v17 = vor.u32 %v531_v28, %v530_v20  ;;  %v541_v47 = vor.u32 %v539_v25, %v538_v7  ;;  %v543_v51 = vrot.slane %v538_v7, 4  ;;  %v5995_v38 = vcombine.low %v9911_v5, %v9910_v21  ;;  %v3380_v20 = vld [vmem:[#allocation2 + $0x30] sm:$0xe]  ;;  %v7044_v5 = vld [vmem:[#allocation2 + $0x60] sm:$0xff]  }
  0xff   : > { %6686 = vmatprep.mubr.bf16.mxu1 %v7039_v29  ;;  %6763 = vmatpush3.bf16.msra.mxu1 %v7041_v13  ;;  %v7062_v13 = vld [vmem:[%s9821_s1 + $0x180] sm:$0xff]   ;;  %v7043_v29 = vld [vmem:[#allocation2 + $0x54] sm:$0xff]   ;;  %v3015_v33 = vor.u32 %v3014_v11, %v3011_v22  ;;  %v8362_v7 = vrot.slane %v3001_v4, 4  ;;  %v8364_v60 = vrot.slane %v3028_v9, 5  ;;  %v9915_v53 = vsel %vm7199_vm6, %v8235_v15, %v8211_v52  ;;  %v3381_v15 = vld [vmem:[#allocation2 + $0x3c] sm:$0xe] }
 0x100   : > { %6764 = vmatprep.subr.bf16.mxu1 %v7045_v27  ;;  %v704_v28 = vsel %vm7213_vm9, %v533_v17, %v703_v45  ;;  %v542_v55 = vsel %vm7204_vm8, %v534_v63, %v541_v47  ;;  %v708_v58 = vsel %vm7222_vm10, %v543_v51, %v707_v62  ;;  %v9916_v4 = vsel %vm7199_vm6, %v8221_v2, %v8181_v59  ;;  %v7057_v45 = vld [vmem:[%s9821_s1 + $0x148] sm:$0xff]  }
 0x101   : > { %6817 = vmatpush3.bf16.msra.mxu0 %v7054_v16  ;;  %705 = vst [vmem:[#allocation2 + $0xc0] sm:$0xf] %v704_v28  ;;  %v8380_v36 = vcombine.low %v9916_v4, %v9915_v53  ;;  %v9918_v62 = vsel %vm7199_vm6, %v8237_v37, %v8193_v14  ;;  %v9919_v52 = vsel %vm7199_vm6, %v8256_v32, %v8213_v3  ;;  %706 = vst [vmem:[#allocation2 + $0xc4] sm:$0xf] %v542_v55  ;;  %v7053_v14 = vld [vmem:[%s9821_s1 + $0x150] sm:$0xff]   ;;  %v9920_v3 = vld [vmem:[#allocation11_spill] sm:$0xff] }
 0x102   : > { %6818 = vmatprep.subr.bf16.mxu0 %v7058_v23  ;;  %v8392_v9 = vcombine.low %v9918_v62, %v9917_v31  ;;  %v8399_v59 = vcombine.low %v9919_v52, %v2959_v8  ;;  %v8401_v2 = vcombine.low %v2973_v41, %v2983_v30  ;;  %709 = vst [vmem:[#allocation2 + $0xc8] sm:$0x1] %v708_v58  ;;  %v6013_v39 = vrot.slane %v3379_v19, 9  ;;  %v8412_v58 = vld [vmem:[#allocation2 + $0x10] sm:$0xf] }
 0x103   : > { %6765 = vmatpush3.bf16.msra.mxu1 %v7045_v27  ;;  %6739 = vmatmul.mubr.bf16.gmra.mxu0 %v8245_v61  ;;  %v3025_v37 = vor.u32 %v3024_v48, %v8345_v42  ;;  %v3457_v46 = vrot.slane %v7867_v54, 5  ;;  %v3460_v32 = vrot.slane %v9920_v3, 5  ;;  %v8410_v27 = vrot.slane %v3015_v33, 4  ;;  %v9921_v16 = vld [vmem:[#allocation10_spill] sm:$0xff]  ;;  %v8422_v54 = vld [vmem:[%s9821_s1 + $0x238] sm:$0xff]  }
 0x104   : > { %6766 = vmatprep.subr.bf16.mxu1 %v7049_v56  ;;  %6742 = vmatprep.mubr.bf16.mxu0 %v5995_v38  ;;  %v3443_v61 = vrot.slane %v8412_v58, 5  ;;  %v6014_v8 = vrot.slane %v3380_v20, 9  ;;  %v3464_v41 = vrot.slane %v9921_v16, 5  ;;  %v3467_v30 = vrot.slane %v7962_v18, 5  ;;  %v3382_v47 = vld [vmem:[#allocation2 + $0x48] sm:$0xe] }
 0x105   : > { %6819 = vmatpush3.bf16.msra.mxu0 %v7058_v23  ;;  %v8426_v22 = vsel %vm7594_vm13, %v6013_v39, %v3457_v46  ;;  %v3459_v11 = vrot.slane %v3457_v46, 4  ;;  %v6015_v17 = vrot.slane %v3381_v15, 9  ;;  %v2997_v63 = vsel %vm7199_vm6, %v8341_v34, %v8317_v57  ;;  %v3383_v20 = vld [vmem:[#allocation2 + $0x54] sm:$0xe]  ;;  %v7047_v31 = vld [vmem:[#allocation2 + $0x6c] sm:$0xff]  }
 0x106   : > { %6687 = vmatmul.mubr.bf16.gmra.mxu1 %v7040_v1  ;;  %6820 = vmatprep.subr.bf16.mxu0 %v7062_v13  ;;  %v8435_v19 = vsel %vm7594_vm13, %v6014_v8, %v3464_v41  ;;  %v3466_v1 = vrot.slane %v3464_v41, 4  ;;  %v3471_v48 = vrot.slane %v7957_v43, 5  ;;  %v3007_v18 = vsel %vm7199_vm6, %v8362_v7, %v8343_v26  ;;  %v3384_v39 = vld [vmem:[#allocation2 + $0x60] sm:$0xe]  ;;  %v7074_v58 = vld [vmem:[%s9821_s1 + $0x228] sm:$0xff]  }
 0x107   : > { %6690 = vmatprep.mubr.bf16.mxu1 %v7043_v29  ;;  %6767 = vmatpush3.bf16.msra.mxu1 %v7049_v56  ;;  %v8442_v56 = vrot.slane %v3025_v37, 4  ;;  %v8446_v51 = vsel %vm7594_vm13, %v3459_v11, %v3460_v32  ;;  %v9923_v29 = vld [vmem:[#allocation13_spill] sm:$0xff]  ;;  %v3021_v55 = vsel %vm7199_vm6, %v8410_v27, %v8345_v42  ;;  %v6016_v4 = vrot.slane %v3382_v47, 9  ;;  %v9924_v27 = vld [vmem:[#allocation12_spill] sm:$0xff] }
 0x108   : > { %6768 = vmatprep.subr.bf16.mxu1 %v7053_v14  ;;  %v3474_v21 = vrot.slane %v9923_v29, 5  ;;  %v2669_v38 = vld [vmem:[#allocation2 + $0xc0] sm:$0xf]  ;;  %v6029_v43 = vcombine.low %v8426_v22, %v8446_v51  ;;  %v8453_v33 = vsel %vm7594_vm13, %v3466_v1, %v3467_v30  ;;  %v8457_v25 = vsel %vm7594_vm13, %v6015_v17, %v3471_v48  ;;  %v8463_v6 = vld [vmem:[#allocation2 + $0xc4] sm:$0xf] }
 0x109   : > { %6821 = vmatpush3.bf16.msra.mxu0 %v7062_v13  ;;  %v3473_v28 = vrot.slane %v3471_v48, 4  ;;  %v3033_v13 = vshrl.u32 %v2669_v38, 16  ;;  %v6030_v53 = vcombine.low %v8435_v19, %v8453_v33  ;;  %v8468_v62 = vld [vmem:[#allocation2 + $0xc8] sm:$0x1]  ;;  %v3036_v52 = vshll.u32 %v2669_v38, 16 }
 0x10a   : > { %6902 = vmatprep.subr.bf16.mxu0 %v8422_v54  ;;  %v3042_v15 = vshll.u32 %v8463_v6, 16  ;;  %v3046_v37 = vshrl.u32 %v8463_v6, 16  ;;  %v3052_v3 = vshll.u32 %v8468_v62, 16  ;;  %v3478_v8 = vrot.slane %v9924_v27, 5  ;;  %v8717_v32 = vld [vmem:[#allocation2 + $0x2c] sm:$0x1] }
 0x10b   : > { %6769 = vmatpush3.bf16.msra.mxu1 %v7053_v14  ;;  %v8474_v42 = vsel %vm7594_vm13, %v3473_v28, %v3474_v21  ;;  %6743 = vmatmul.mubr.bf16.gmra.mxu0 %v8380_v36  ;;  %v3035_v46 = vrot.slane %v3033_v13, 4  ;;  %v7061_v14 = vld [vmem:[%s9821_s1 + $0x140] sm:$0xff]   ;;  %v3038_v16 = vrot.slane %v3036_v52, 5  ;;  %v3481_v36 = vrot.slane %v8012_v10, 5  ;;  %v3385_v21 = vld [vmem:[#allocation2 + $0x6c] sm:$0xe] }
 0x10c   : > { %6770 = vmatprep.subr.bf16.mxu1 %v7057_v45  ;;  %6746 = vmatprep.mubr.bf16.mxu0 %v8392_v9  ;;  %v8485_v41 = vrot.slane %v3042_v15, 5  ;;  %v3048_v11 = vrot.slane %v3046_v37, 4  ;;  %v3031_v30 = vsel %vm7199_vm6, %v8442_v56, %v8364_v60  ;;  %v8494_v17 = vsel %vm7594_vm13, %v6016_v4, %v3478_v8  ;;  %v8502_v60 = vld [vmem:[%s9821_s1 + $0x1f8] sm:$0xff]  }
 0x10d   : > { %v3480_v1 = vrot.slane %v3478_v8, 4  ;;  %v6017_v48 = vrot.slane %v3383_v20, 9  ;;  %v3039_v9 = vor.u32 %v3038_v16, %v3035_v46  ;;  %v3485_v29 = vrot.slane %v8015_v40, 5  ;;  %v3386_v4 = vld [vmem:[#allocation2 + $0x78] sm:$0xe]  ;;  %v9926_v16 = vld [vmem:[#allocation14_spill] sm:$0xff] }
 0x10e   : > { %6691 = vmatmul.mubr.bf16.gmra.mxu1 %v7044_v5  ;;  %v3049_v47 = vor.u32 %v3048_v11, %v8485_v41  ;;  %v3488_v10 = vrot.slane %v8034_v49, 5  ;;  %v7048_v5 = vld [vmem:[#allocation2 + $0x78] sm:$0xff]   ;;  %v3492_v38 = vrot.slane %v8042_v0, 5  ;;  %v3495_v28 = vrot.slane %v8081_v12, 5 }
 0x10f   : > { %6694 = vmatprep.mubr.bf16.mxu1 %v7047_v31  ;;  %6771 = vmatpush3.bf16.msra.mxu1 %v7057_v45  ;;  %v8506_v56 = vsel %vm7594_vm13, %v3480_v1, %v3481_v36  ;;  %v6018_v45 = vrot.slane %v3384_v39, 9  ;;  %v8510_v40 = vrot.slane %v3039_v9, 4  ;;  %v8512_v49 = vrot.slane %v3052_v3, 5  ;;  %v7051_v31 = vld [vmem:[#allocation2 + $0x84] sm:$0xff]   ;;  %v3388_v1 = vld [vmem:[#allocation2 + $0x90] sm:$0xe] }
 0x110   : > { %6772 = vmatprep.subr.bf16.mxu1 %v7061_v14  ;;  %v8518_v13 = vsel %vm7594_vm13, %v6017_v48, %v3485_v29  ;;  %v3487_v52 = vrot.slane %v3485_v29, 4  ;;  %v3494_v0 = vrot.slane %v3492_v38, 4  ;;  %v6019_v12 = vrot.slane %v3385_v21, 9  ;;  %v9927_v36 = vld [vmem:[#allocation16_spill] sm:$0xff]  ;;  %v9928_v48 = vld [vmem:[#allocation6_spill] sm:$0xff] }
 0x111   : > { %v8522_v15 = vsel %vm7594_vm13, %v6018_v45, %v3492_v38  ;;  %v6000_v37 = vcombine.low %v2997_v63, %v3007_v18  ;;  %v6001_v39 = vcombine.low %v3021_v55, %v3031_v30  ;;  %v3499_v46 = vrot.slane %v8083_v44, 5  ;;  %v3387_v63 = vld [vmem:[#allocation2 + $0x84] sm:$0xe]  ;;  %v9925_v55 = vld [vmem:[#allocation15_spill] sm:$0xff] }
 0x112   : > { %v3502_v3 = vrot.slane %v8119_v35, 5  ;;  %v3050_v27 = vrot.slane %v3049_v47, 4  ;;  %v8540_v26 = vsel %vm7594_vm13, %v3487_v52, %v3488_v10  ;;  %v8544_v7 = vsel %vm7594_vm13, %v3494_v0, %v3495_v28  ;;  %v9929_v47 = vld [vmem:[#allocation18_spill] sm:$0xff]  ;;  %v7055_v38 = vld [vmem:[#allocation2 + $0x9c] sm:$0xff]   ;;  %v9930_v52 = vld [vmem:[#allocation17_spill] sm:$0xff] }
 0x113   : > { %6773 = vmatpush3.bf16.msra.mxu1 %v7061_v14  ;;  %6747 = vmatmul.mubr.bf16.gmra.mxu0 %v8399_v59  ;;  %v6020_v57 = vrot.slane %v3386_v4, 9  ;;  %v8553_v34 = vsel %vm7594_vm13, %v6019_v12, %v3499_v46  ;;  %v3501_v59 = vrot.slane %v3499_v46, 4  ;;  %v3506_v18 = vrot.slane %v8121_v50, 5  ;;  %v7052_v10 = vld [vmem:[#allocation2 + $0x90] sm:$0xff]   ;;  %v8743_v33 = vld [vmem:[#allocation2 + $0x38] sm:$0x1] }
 0x114   : > { %6854 = vmatprep.subr.bf16.mxu1 %v8502_v60  ;;  %6750 = vmatprep.mubr.bf16.mxu0 %v8401_v2  ;;  %v3509_v14 = vrot.slane %v9925_v55, 5  ;;  %v6021_v8 = vrot.slane %v3387_v63, 9  ;;  %v3513_v2 = vrot.slane %v9926_v16, 5  ;;  %v3516_v30 = vrot.slane %v9927_v36, 5  ;;  %v9932_v36 = vld [vmem:[#allocation9_spill] sm:$0xff]  ;;  %v7086_v50 = vld [vmem:[%s9821_s1 + $0x210] sm:$0xff]  }
 0x115   : > { %v8560_v11 = vsel %vm7594_vm13, %v3501_v59, %v3502_v3  ;;  %v3520_v9 = vrot.slane %v9928_v48, 5  ;;  %v3523_v29 = vrot.slane %v9929_v47, 5  ;;  %v8569_v21 = vsel %vm7594_vm13, %v6020_v57, %v3506_v18 }
 0x116   : > { %6695 = vmatmul.mubr.bf16.gmra.mxu1 %v7048_v5  ;;  %v3508_v5 = vrot.slane %v3506_v18, 4  ;;  %v8573_v45 = vsel %vm7594_vm13, %v6021_v8, %v3513_v2  ;;  %v3515_v28 = vrot.slane %v3513_v2, 4  ;;  %v6022_v4 = vrot.slane %v3388_v1, 9  ;;  %v9931_v8 = vld [vmem:[#allocation8_spill] sm:$0xff]  ;;  %v9933_v1 = vld [vmem:[#allocation19_spill] sm:$0xff] }
 0x117   : > { %6698 = vmatprep.mubr.bf16.mxu1 %v7051_v31  ;;  %v3522_v31 = vrot.slane %v3520_v9, 4  ;;  %v3527_v0 = vrot.slane %v9930_v52, 5  ;;  %v3045_v12 = vsel %vm7199_vm6, %v8510_v40, %v8485_v41  ;;  %v3055_v46 = vsel %vm7199_vm6, %v3050_v27, %v8512_v49  ;;  %v3389_v40 = vld [vmem:[#allocation2 + $0x9c] sm:$0xe]  ;;  %v7075_v49 = vld [vmem:[#allocation2 + $0x60] sm:$0xff]  }
 0x118   : > { %v8585_v3 = vsel %vm7594_vm13, %v3508_v5, %v3509_v14  ;;  %v8591_v59 = vsel %vm7594_vm13, %v3515_v28, %v3516_v30  ;;  %v8595_v63 = vsel %vm7594_vm13, %v6022_v4, %v3520_v9  ;;  %v6023_v18 = vrot.slane %v3389_v40, 9  ;;  %v3390_v14 = vld [vmem:[#allocation2 + $0xa8] sm:$0xe]  ;;  %v3377_v9 = vld [vmem:[#allocation2 + $0xc] sm:$0xe]  ;;  %v9934_v28 = vld [vmem:[#allocation20_spill] sm:$0xff] }
 0x119   : > { %v8599_v41 = vsel %vm7594_vm13, %v3522_v31, %v3523_v29  ;;  %v3529_v55 = vrot.slane %v3527_v0, 4  ;;  %v3530_v16 = vrot.slane %v9931_v8, 5  ;;  %v6024_v2 = vrot.slane %v3390_v14, 9  ;;  %v3391_v5 = vld [vmem:[#allocation2 + $0xb4] sm:$0xe]  ;;  %v7056_v31 = vld [vmem:[#allocation2 + $0xa8] sm:$0xff]  }
 0x11a   : > { %v3534_v30 = vrot.slane %v9932_v36, 5  ;;  %v3537_v48 = vrot.slane %v9933_v1, 5  ;;  %v3541_v4 = vrot.slane %v9934_v28, 5  ;;  %v9935_v40 = vld [vmem:[#allocation21_spill] sm:$0xff]  ;;  %v3392_v8 = vld [vmem:[#allocation2 + $0xc0] sm:$0xe] }
 0x11b   : > { %6751 = vmatmul.mubr.bf16.gmra.mxu0 %v6000_v37  ;;  %v8610_v37 = vsel %vm7594_vm13, %v6023_v18, %v3527_v0  ;;  %v8614_v47 = vsel %vm7594_vm13, %v3529_v55, %v3530_v16  ;;  %v6025_v0 = vrot.slane %v3391_v5, 9  ;;  %v7063_v18 = vld [vmem:[#allocation2 + $0x18] sm:$0xff]   ;;  %v3548_v16 = vrot.slane %v8463_v6, 5 }
 0x11c   : > { %6754 = vmatprep.mubr.bf16.mxu0 %v6001_v39  ;;  %v8618_v39 = vsel %vm7594_vm13, %v6024_v2, %v3534_v30  ;;  %v3536_v29 = vrot.slane %v3534_v30, 4  ;;  %v3543_v14 = vrot.slane %v3541_v4, 4  ;;  %v3551_v2 = vrot.slane %v8468_v62, 5  ;;  %v7059_v36 = vld [vmem:[#allocation2 + $0xb4] sm:$0xff]  }
 0x11d   : > { %v6026_v30 = vrot.slane %v3392_v8, 9  ;;  %v6011_v1 = vrot.slane %v3377_v9, 9  ;;  %v3445_v6 = vrot.slane %v3443_v61, 4  ;;  %v7121_v62 = vld [vmem:[#allocation2 + $0x14] sm:$0x1]  ;;  %v7064_v8 = vld [vmem:[#allocation2 + $0x24] sm:$0xff]  }
 0x11e   : > { %6699 = vmatmul.mubr.bf16.gmra.mxu1 %v7052_v10  ;;  %v6002_v10 = vcombine.low %v3045_v12, %v3055_v46  ;;  %v8626_v55 = vsel %vm7594_vm13, %v3536_v29, %v3537_v48  ;;  %v8634_v46 = vsel %vm7594_vm13, %v6025_v0, %v3541_v4  ;;  %v3550_v29 = vrot.slane %v3548_v16, 4  ;;  %v7122_v0 = vld [vmem:[#allocation2 + $0x1c] sm:$0xf]  ;;  %v4262_v12 = vld [vmem:[#allocation2 + $0x20] sm:$0x1] }
 0x11f   : > { %6702 = vmatprep.mubr.bf16.mxu1 %v7055_v38  ;;  %v3544_v38 = vrot.slane %v9935_v40, 5  ;;  %v3446_v5 = vrot.slane %v7121_v62, 5  ;;  %v8646_v4 = vsel %vm7594_vm13, %v6026_v30, %v3548_v16  ;;  %v3450_v40 = vrot.slane %v7122_v0, 5  ;;  %v7067_v16 = vld [vmem:[#allocation2 + $0x30] sm:$0xff]   ;;  %v7123_v62 = vld [vmem:[#allocation2 + $0x20] sm:$0x1] }
 0x120   : > { %v8650_v9 = vsel %vm7594_vm13, %v3550_v29, %v3551_v2  ;;  %v7060_v2 = vld [vmem:[#allocation2 + $0xc0] sm:$0xff]   ;;  %v3453_v0 = vrot.slane %v7123_v62, 5  ;;  %v5013_v62 = vld [vmem:[#allocation2 + $0x18] sm:$0xe]  ;;  %v5082_v51 = vrot.slane %v4262_v12, 5 }
 0x121   : > { %v8638_v48 = vsel %vm7594_vm13, %v3543_v14, %v3544_v38  ;;  %v3444_v38 = vsel %vm7594_vm13, %v6011_v1, %v3443_v61  ;;  %v3447_v14 = vsel %vm7594_vm13, %v3445_v6, %v3446_v5  ;;  %v3452_v29 = vrot.slane %v3450_v40, 4  ;;  %v4260_v6 = vld [vmem:[#allocation2 + $0x18] sm:$0xf]  ;;  %v7068_v5 = vld [vmem:[#allocation2 + $0x3c] sm:$0xff]  }
 0x122   : > { %v6027_v30 = vcombine.low %v3444_v38, %v3447_v14  ;;  %v7071_v38 = vld [vmem:[#allocation2 + $0x48] sm:$0xff]   ;;  %v8671_v14 = vld [vmem:[#allocation2 + $0x1c] sm:$0xf] }
 0x123   : > { %6755 = vmatmul.mubr.bf16.gmra.mxu0 %v6002_v10  ;;  %v3454_v1 = vsel %vm7594_vm13, %v3452_v29, %v3453_v0  ;;  %v8683_v29 = vld [vmem:[#allocation2 + $0x28] sm:$0xf]  ;;  %v5079_v0 = vrot.slane %v8671_v14, 5 }
 0x124   : > { %6822 = vmatprep.mubr.bf16.mxu0 %v7063_v18  ;;  %v3378_v18 = vld [vmem:[#allocation2 + $0x18] sm:$0xe]  ;;  %v7073_v10 = vld [vmem:[%s9821_s1 + $0x1e8] sm:$0xff]   ;;  %v5086_v19 = vrot.slane %v8683_v29, 5 }
 0x125   : > { %v5081_v22 = vrot.slane %v5079_v0, 4 }
 0x126   : > { %6703 = vmatmul.mubr.bf16.gmra.mxu1 %v7056_v31  ;;  %v7070_v31 = vld [vmem:[%s9821_s1 + $0x230] sm:$0xff]  }
 0x127   : > { %6706 = vmatprep.mubr.bf16.mxu1 %v7059_v36  ;;  %v6012_v36 = vrot.slane %v3378_v18, 9  ;;  %v7078_v18 = vld [vmem:[%s9821_s1 + $0x220] sm:$0xff]  }
 0x129   : > { %v3451_v61 = vsel %vm7594_vm13, %v6012_v36, %v3450_v40  ;;  %v7069_v40 = vld [vmem:[%s9821_s1 + $0x1f0] sm:$0xff]   ;;  %v4322_v36 = vshrl.u32 %v8671_v14, 16 }
 0x12b   : > { %6823 = vmatmul.mubr.bf16.vlgmr.msra.gmra.mxu0 %v7064_v8  ;;  %v4309_v8 = vshrl.u32 %v4260_v6, 16 }
 0x12c   : > { %6903 = vmatpush3.bf16.msra.mxu0 %v8422_v54  ;;  %6826 = vmatprep.mubr.bf16.mxu0 %v7067_v16  ;;  %v6028_v54 = vcombine.low %v3451_v61, %v3454_v1  ;;  %v4263_v16 = vld [vmem:[#allocation2 + $0x24] sm:$0xf] }
 0x12d   : > { %6904 = vmatprep.subr.bf16.mxu0 %v7070_v31  ;;  %v4333_v61 = vshrl.u32 %v4263_v16, 16  ;;  %v4336_v1 = vshll.u32 %v4263_v16, 16  ;;  %v4311_v28 = vrot.slane %v4309_v8, 4  ;;  %v4324_v8 = vrot.slane %v4322_v36, 4 }
 0x12e   : > { %6707 = vmatmul.mubr.bf16.gmra.mxu1 %v7060_v2  ;;  %v8679_v2 = vpop.f32.mrf.mxu0 }
 0x12f   : > { %6774 = vmatprep.mubr.bf16.mxu1 %v6027_v30  ;;  %v4312_v30 = vshll.u32 %v4260_v6, 16  ;;  %v7082_v6 = vld [vmem:[%s9821_s1 + $0x218] sm:$0xff]   ;;  %v4338_v57 = vrot.slane %v4336_v1, 5 }
 0x130   : > { %6905 = vmatpush3.bf16.msra.mxu0 %v7070_v31  ;;  %v4318_v31 = vshll.u32 %v8671_v14, 16  ;;  %v4266_v14 = vld [vmem:[#allocation2 + $0x30] sm:$0xf]  ;;  %v8700_v16 = vpop.f32.mrf.mxu0 }
 0x131   : > { %6906 = vmatprep.subr.bf16.mxu0 %v7074_v58  ;;  %9936 = vst [vmem:[#allocation4_spill] sm:$0xff] %v8700_v16  ;;  %v4314_v52 = vrot.slane %v4312_v30, 5  ;;  %v4357_v35 = vshrl.u32 %v4266_v14, 16  ;;  %v4360_v44 = vshll.u32 %v4266_v14, 16  ;;  %v4328_v14 = vshll.u32 %v4262_v12, 16  ;;  %v8733_v12 = vpop.f32.mrf.mxu1 }
 0x132   : > { %v8702_v27 = vrot.slane %v4318_v31, 5  ;;  %9938 = vst [vmem:[#allocation5_spill] sm:$0xff] %v8733_v12  ;;  %v5089_v12 = vrot.slane %v8717_v32, 5 }
 0x133   : > { %6827 = vmatmul.mubr.bf16.gmra.mxu0 %v7068_v5  ;;  %v7072_v5 = vld [vmem:[#allocation2 + $0x54] sm:$0xff]  }
 0x134   : > { %6830 = vmatprep.mubr.bf16.mxu0 %v7071_v38  ;;  %6907 = vmatpush3.bf16.msra.mxu0 %v7074_v58  ;;  %v4342_v58 = vshll.u32 %v8683_v29, 16  ;;  %v4346_v38 = vshrl.u32 %v8683_v29, 16  ;;  %v4325_v1 = vor.u32 %v4324_v8, %v8702_v27 }
 0x135   : > { %6908 = vmatprep.subr.bf16.mxu0 %v7078_v18 }
 0x136   : > { %6775 = vmatmul.mubr.bf16.vlgmr.msra.gmra.mxu1 %v6028_v54  ;;  %v8698_v54 = vld [vmem:[#allocation2 + $0x34] sm:$0xf]  ;;  %v8709_v31 = vrot.slane %v4342_v58, 5  ;;  %v4348_v36 = vrot.slane %v4346_v38, 4  ;;  %v8728_v58 = vsel %vm7594_vm13, %v5081_v22, %v5082_v51 }
 0x137   : > { %6855 = vmatpush3.bf16.msra.mxu1 %v8502_v60  ;;  %6778 = vmatprep.mubr.bf16.mxu1 %v6029_v43  ;;  %v6099_v60 = vrot.slane %v5013_v62, 9  ;;  %v4335_v43 = vrot.slane %v4333_v61, 4  ;;  %v4366_v20 = vshll.u32 %v8698_v54, 16  ;;  %v4370_v30 = vshrl.u32 %v8698_v54, 16  ;;  %v8714_v62 = vpop.f32.mrf.mxu0 }
 0x138   : > { %6856 = vmatprep.subr.bf16.mxu1 %v7069_v40  ;;  %6909 = vmatpush3.bf16.msra.mxu0 %v7078_v18  ;;  %v7077_v18 = vld [vmem:[%s9821_s1 + $0x1e0] sm:$0xff]   ;;  %9937 = vst [vmem:[#allocation3_spill] sm:$0xff] %v8714_v62  ;;  %v4315_v61 = vor.u32 %v4314_v52, %v4311_v28  ;;  %v4359_v28 = vrot.slane %v4357_v35, 4  ;;  %v5093_v51 = vrot.slane %v8698_v54, 5  ;;  %v5088_v54 = vrot.slane %v5086_v19, 4 }
 0x139   : > { %6910 = vmatprep.subr.bf16.mxu0 %v7082_v6  ;;  %v4339_v52 = vor.u32 %v4338_v57, %v4335_v43  ;;  %v8735_v38 = vrot.slane %v4366_v20, 5  ;;  %v4372_v8 = vrot.slane %v4370_v30, 4  ;;  %v4349_v57 = vor.u32 %v4348_v36, %v8709_v31  ;;  %v7081_v20 = vld [vmem:[%s9821_s1 + $0x1d8] sm:$0xff]   ;;  %v8759_v30 = vpop.f32.mrf.mxu1  ;;  %v7094_v36 = vld [vmem:[%s9821_s1 + $0x200] sm:$0xff]  }
 0x13a   : > { %v8750_v35 = vrot.slane %v4315_v61, 4  ;;  %v4269_v43 = vld [vmem:[#allocation2 + $0x3c] sm:$0xf]  ;;  %9941 = vst [vmem:[#allocation10_spill] sm:$0xff] %v8759_v30 }
 0x13b   : > { %6857 = vmatpush3.bf16.msra.mxu1 %v7069_v40  ;;  %6831 = vmatmul.mubr.bf16.gmra.mxu0 %v7072_v5  ;;  %v7090_v40 = vld [vmem:[%s9821_s1 + $0x208] sm:$0xff]   ;;  %v8724_v5 = vsel %vm7594_vm13, %v6099_v60, %v5079_v0  ;;  %v9939_v0 = vcombine.low %v8457_v25, %v8474_v42  ;;  %v4352_v60 = vshll.u32 %v8717_v32, 16  ;;  %v8752_v25 = vrot.slane %v4325_v1, 4 }
 0x13c   : > { %6858 = vmatprep.subr.bf16.mxu1 %v7073_v10  ;;  %6834 = vmatprep.mubr.bf16.mxu0 %v7075_v49  ;;  %v5014_v49 = vld [vmem:[#allocation2 + $0x24] sm:$0xe]  ;;  %v8754_v42 = vrot.slane %v4328_v14, 5  ;;  %v8764_v61 = vrot.slane %v4339_v52, 4  ;;  %v4373_v14 = vor.u32 %v4372_v8, %v8735_v38  ;;  %v7085_v52 = vld [vmem:[%s9821_s1 + $0x1d0] sm:$0xff]   ;;  %v4381_v32 = vshrl.u32 %v4269_v43, 16 }
 0x13d   : > { %6911 = vmatpush3.bf16.msra.mxu0 %v7082_v6  ;;  %v4362_v6 = vrot.slane %v4360_v44, 5  ;;  %v8748_v44 = vpop.f32.mrf.mxu0  ;;  %v6100_v22 = vrot.slane %v5014_v49, 9  ;;  %v4350_v49 = vrot.slane %v4349_v57, 4  ;;  %v4354_v29 = vrot.slane %v4352_v60, 5 }
 0x13e   : > { %6779 = vmatmul.mubr.bf16.gmra.mxu1 %v6030_v53  ;;  %6912 = vmatprep.subr.bf16.mxu0 %v7086_v50  ;;  %v7076_v53 = vld [vmem:[#allocation2 + $0x6c] sm:$0xff]   ;;  %9940 = vst [vmem:[#allocation11_spill] sm:$0xff] %v8748_v44  ;;  %v4384_v8 = vshll.u32 %v4269_v43, 16  ;;  %v7080_v43 = vld [vmem:[#allocation2 + $0x84] sm:$0xff]  }
 0x13f   : > { %6782 = vmatprep.mubr.bf16.mxu1 %v9939_v0  ;;  %6859 = vmatpush3.bf16.msra.mxu1 %v7073_v10  ;;  %v7079_v10 = vld [vmem:[#allocation2 + $0x78] sm:$0xff]   ;;  %v4363_v1 = vor.u32 %v4362_v6, %v4359_v28  ;;  %v5015_v0 = vld [vmem:[#allocation2 + $0x30] sm:$0xe]  ;;  %v8769_v30 = vpop.f32.mrf.mxu0  ;;  %v4321_v28 = vsel %vm7199_vm6, %v8750_v35, %v8702_v27  ;;  %v8782_v6 = vld [vmem:[#allocation2 + $0x40] sm:$0xf]  ;;  %v8786_v57 = vsel %vm7594_vm13, %v6100_v22, %v5086_v19  ;;  %v4374_v19 = vrot.slane %v4373_v14, 4 }
 0x140   : > { %6860 = vmatprep.subr.bf16.mxu1 %v7077_v18  ;;  %9942 = vst [vmem:[#allocation7_spill] sm:$0xff] %v8769_v30  ;;  %v6101_v60 = vrot.slane %v5015_v0, 9  ;;  %v5096_v30 = vrot.slane %v8743_v33, 5  ;;  %v4272_v27 = vld [vmem:[#allocation2 + $0x48] sm:$0xf]  ;;  %v9943_v35 = vcombine.low %v8494_v17, %v8506_v56  ;;  %v4355_v56 = vsel %vm7199_vm6, %v4350_v49, %v4354_v29 }
 0x141   : > { %6913 = vmatpush3.bf16.msra.mxu0 %v7086_v50  ;;  %v4376_v50 = vshll.u32 %v8743_v33, 16  ;;  %v8798_v22 = vld [vmem:[#allocation2 + $0x4c] sm:$0xf]  ;;  %v9945_v33 = vcombine.low %v8518_v13, %v8540_v26  ;;  %v8814_v13 = vpop.f32.mrf.mxu0  ;;  %v8816_v26 = vld [vmem:[#allocation2 + $0x44] sm:$0x1]  ;;  %v4386_v14 = vrot.slane %v4384_v8, 5 }
 0x142   : > { %6914 = vmatprep.subr.bf16.mxu0 %v7090_v40  ;;  %v7089_v17 = vld [vmem:[%s9821_s1 + $0x1c8] sm:$0xff]   ;;  %9946 = vst [vmem:[#allocation12_spill] sm:$0xff] %v8814_v13  ;;  %v4408_v0 = vshll.u32 %v4272_v27, 16  ;;  %v8820_v29 = vsel %vm7594_vm13, %v6101_v60, %v5093_v51  ;;  %v4414_v49 = vshll.u32 %v8798_v22, 16  ;;  %v4275_v60 = vld [vmem:[#allocation2 + $0x54] sm:$0xf] }
 0x143   : > { %6861 = vmatpush3.bf16.msra.mxu1 %v7077_v18  ;;  %6835 = vmatmul.mubr.bf16.gmra.mxu0 %v7076_v53  ;;  %v4331_v18 = vsel %vm7199_vm6, %v8752_v25, %v8754_v42  ;;  %v5095_v53 = vrot.slane %v5093_v51, 4  ;;  %v8792_v25 = vpop.f32.mrf.mxu1  ;;  %v4364_v42 = vrot.slane %v4363_v1, 4  ;;  %v4394_v1 = vshrl.u32 %v8782_v6, 16  ;;  %v8846_v8 = vpop.f32.mrf.mxu0 }
 0x144   : > { %6862 = vmatprep.subr.bf16.mxu1 %v7081_v20  ;;  %6838 = vmatprep.mubr.bf16.mxu0 %v7079_v10  ;;  %9944 = vst [vmem:[#allocation13_spill] sm:$0xff] %v8792_v25  ;;  %v4378_v10 = vrot.slane %v4376_v50, 5  ;;  %v4405_v50 = vshrl.u32 %v4272_v27, 16  ;;  %9948 = vst [vmem:[#allocation14_spill] sm:$0xff] %v8846_v8  ;;  %v9949_v25 = vcombine.low %v8522_v15, %v8544_v7  ;;  %v4429_v13 = vshrl.u32 %v4275_v60, 16 }
 0x145   : > { %6915 = vmatpush3.bf16.msra.mxu0 %v7090_v40  ;;  %v4345_v40 = vsel %vm7199_vm6, %v8764_v61, %v8709_v31  ;;  %v8810_v31 = vsel %vm7594_vm13, %v5088_v54, %v5089_v12  ;;  %v4390_v61 = vshll.u32 %v8782_v6, 16  ;;  %v8824_v12 = vsel %vm7594_vm13, %v5095_v53, %v5096_v30  ;;  %v5016_v30 = vld [vmem:[#allocation2 + $0x3c] sm:$0xe] }
 0x146   : > { %6783 = vmatmul.mubr.bf16.gmra.mxu1 %v9943_v35  ;;  %6916 = vmatprep.subr.bf16.mxu0 %v7094_v36  ;;  %v7083_v35 = vld [vmem:[#allocation2 + $0x90] sm:$0xff]   ;;  %v4418_v54 = vshrl.u32 %v8798_v22, 16  ;;  %v4369_v51 = vsel %vm7199_vm6, %v4364_v42, %v8735_v38  ;;  %v8839_v53 = vcombine.low %v4345_v40, %v4355_v56  ;;  %v7093_v38 = vld [vmem:[%s9821_s1 + $0x1c0] sm:$0xff]   ;;  %v5100_v15 = vrot.slane %v8782_v6, 5 }
 0x147   : > { %6786 = vmatprep.mubr.bf16.mxu1 %v9945_v33  ;;  %6863 = vmatpush3.bf16.msra.mxu1 %v7081_v20  ;;  %v4383_v20 = vrot.slane %v4381_v32, 4  ;;  %v8828_v33 = vpop.f32.mrf.mxu1  ;;  %v8830_v32 = vcombine.low %v4321_v28, %v4331_v18  ;;  %v8841_v27 = vrot.slane %v4390_v61, 5  ;;  %v4400_v28 = vshll.u32 %v8816_v26, 16  ;;  %v8844_v18 = vld [vmem:[#allocation2 + $0x58] sm:$0xf] }
 0x148   : > { %6864 = vmatprep.subr.bf16.mxu1 %v7085_v52  ;;  %9947 = vst [vmem:[#allocation15_spill] sm:$0xff] %v8828_v33  ;;  %v4396_v33 = vrot.slane %v4394_v1, 4  ;;  %v8853_v42 = vld [vmem:[#allocation2 + $0x50] sm:$0x1]  ;;  %v6102_v61 = vrot.slane %v5016_v30, 9  ;;  %v4420_v1 = vrot.slane %v4418_v54, 4  ;;  %v8874_v54 = vpop.f32.mrf.mxu0 }
 0x149   : > { %6917 = vmatpush3.bf16.msra.mxu0 %v7094_v36  ;;  %v4379_v36 = vsel %vm7199_vm6, %v4374_v19, %v4378_v10  ;;  %v4387_v40 = vor.u32 %v4386_v14, %v4383_v20  ;;  %v4407_v19 = vrot.slane %v4405_v50, 4  ;;  %v4410_v10 = vrot.slane %v4408_v0, 5  ;;  %v8862_v8 = vpop.f32.mrf.mxu1  ;;  %v4278_v50 = vld [vmem:[#allocation2 + $0x60] sm:$0xf]  ;;  %9952 = vst [vmem:[#allocation6_spill] sm:$0xff] %v8874_v54 }
 0x14a   : > { %v8855_v56 = vcombine.low %v4369_v51, %v4379_v36  ;;  %9950 = vst [vmem:[#allocation16_spill] sm:$0xff] %v8862_v8  ;;  %v4438_v20 = vshll.u32 %v8844_v18, 16  ;;  %v4442_v14 = vshrl.u32 %v8844_v18, 16  ;;  %v9951_v0 = vcombine.low %v8553_v34, %v8560_v11  ;;  %v7087_v11 = vld [vmem:[#allocation2 + $0xa8] sm:$0xff]   ;;  %v8894_v62 = vpop.f32.mrf.mxu0 }
 0x14b   : > { %6865 = vmatpush3.bf16.msra.mxu1 %v7085_v52  ;;  %6839 = vmatmul.mubr.bf16.gmra.mxu0 %v7080_v43  ;;  %v8857_v43 = vrot.slane %v4414_v49, 5  ;;  %v4432_v52 = vshll.u32 %v4275_v60, 16  ;;  %v8870_v49 = vrot.slane %v4400_v28, 5  ;;  %v4424_v7 = vshll.u32 %v8853_v42, 16 }
 0x14c   : > { %6866 = vmatprep.subr.bf16.mxu1 %v7089_v17  ;;  %6842 = vmatprep.mubr.bf16.mxu0 %v7083_v35  ;;  %v4397_v35 = vor.u32 %v4396_v33, %v8841_v27  ;;  %v8876_v51 = vrot.slane %v4387_v40, 4  ;;  %v5103_v36 = vrot.slane %v8816_v26, 5  ;;  %v4411_v30 = vor.u32 %v4410_v10, %v4407_v19  ;;  %v5017_v33 = vld [vmem:[#allocation2 + $0x48] sm:$0xe]  ;;  %v8889_v19 = vld [vmem:[#allocation2 + $0x64] sm:$0xf] }
 0x14d   : > { %v5107_v34 = vrot.slane %v8798_v22, 5  ;;  %v4421_v6 = vor.u32 %v4420_v1, %v8857_v43  ;;  %v4453_v60 = vshrl.u32 %v4278_v50, 16  ;;  %v4456_v28 = vshll.u32 %v4278_v50, 16 }
 0x14e   : > { %6787 = vmatmul.mubr.bf16.gmra.mxu1 %v9949_v25  ;;  %v7084_v25 = vld [vmem:[#allocation2 + $0x9c] sm:$0xff]   ;;  %v4431_v8 = vrot.slane %v4429_v13, 4  ;;  %v4434_v40 = vrot.slane %v4432_v52, 5  ;;  %v8887_v54 = vrot.slane %v4438_v20, 5  ;;  %v4444_v26 = vrot.slane %v4442_v14, 4 }
 0x14f   : > { %6790 = vmatprep.mubr.bf16.mxu1 %v9951_v0  ;;  %6867 = vmatpush3.bf16.msra.mxu1 %v7089_v17  ;;  %v8882_v17 = vsel %vm7594_vm13, %v6102_v61, %v5100_v15  ;;  %v8885_v0 = vpop.f32.mrf.mxu1  ;;  %v4398_v22 = vrot.slane %v4397_v35, 4  ;;  %v5102_v10 = vrot.slane %v5100_v15, 4  ;;  %v8891_v44 = vrot.slane %v4424_v7, 5  ;;  %v4277_v61 = vld [vmem:[#allocation2 + $0x5c] sm:$0x1] }
 0x150   : > { %6868 = vmatprep.subr.bf16.mxu1 %v7093_v38  ;;  %9953 = vst [vmem:[#allocation18_spill] sm:$0xff] %v8885_v0  ;;  %v5114_v1 = vrot.slane %v8844_v18, 5  ;;  %v4412_v50 = vrot.slane %v4411_v30, 4  ;;  %v6103_v0 = vrot.slane %v5017_v33, 9  ;;  %v5109_v13 = vrot.slane %v5107_v34, 4 }
 0x151   : > { %v5110_v52 = vrot.slane %v8853_v42, 5  ;;  %v5018_v20 = vld [vmem:[#allocation2 + $0x54] sm:$0xe]  ;;  %v4455_v14 = vrot.slane %v4453_v60, 4  ;;  %v4458_v16 = vrot.slane %v4456_v28, 5  ;;  %v4466_v35 = vshrl.u32 %v8889_v19, 16  ;;  %v8902_v18 = vpop.f32.mrf.mxu1 }
 0x152   : > { %v9954_v15 = vcombine.low %v8569_v21, %v8585_v3  ;;  %9955 = vst [vmem:[#allocation17_spill] sm:$0xff] %v8902_v18  ;;  %v4422_v7 = vrot.slane %v4421_v6, 4  ;;  %v4445_v30 = vor.u32 %v4444_v26, %v8887_v54  ;;  %v4448_v33 = vshll.u32 %v4277_v61, 16  ;;  %v7088_v3 = vld [vmem:[#allocation2 + $0xb4] sm:$0xff]   ;;  %v7091_v6 = vld [vmem:[#allocation2 + $0xc0] sm:$0xff]  }
 0x153   : > { %6869 = vmatpush3.bf16.msra.mxu1 %v7093_v38  ;;  %6843 = vmatmul.mubr.bf16.gmra.mxu0 %v7084_v25  ;;  %v4462_v38 = vshll.u32 %v8889_v19, 16  ;;  %v4435_v25 = vor.u32 %v4434_v40, %v4431_v8  ;;  %v9956_v42 = vcombine.low %v8573_v45, %v8591_v59  ;;  %v6104_v60 = vrot.slane %v5018_v20, 9  ;;  %v8932_v26 = vld [vmem:[#allocation2 + $0x68] sm:$0x1] }
 0x154   : > { %6846 = vmatprep.mubr.bf16.mxu0 %v7087_v11  ;;  %v4393_v11 = vsel %vm7199_vm6, %v8876_v51, %v8841_v27  ;;  %v5116_v28 = vrot.slane %v5114_v1, 4  ;;  %v5117_v21 = vrot.slane %v4277_v61, 5  ;;  %v4403_v8 = vsel %vm7199_vm6, %v4398_v22, %v8870_v49  ;;  %v4281_v51 = vld [vmem:[#allocation2 + $0x6c] sm:$0xf]  ;;  %v8936_v61 = vpop.f32.mrf.mxu1 }
 0x155   : > { %v8919_v45 = vsel %vm7594_vm13, %v5102_v10, %v5103_v36  ;;  %v4417_v59 = vsel %vm7199_vm6, %v4412_v50, %v8857_v43  ;;  %v8926_v27 = vsel %vm7594_vm13, %v6103_v0, %v5107_v34  ;;  %v8930_v40 = vsel %vm7594_vm13, %v5109_v13, %v5110_v52  ;;  %v5019_v10 = vld [vmem:[#allocation2 + $0x60] sm:$0xe]  ;;  %9957 = vst [vmem:[#allocation8_spill] sm:$0xff] %v8936_v61 }
 0x156   : > { %6791 = vmatmul.mubr.bf16.gmra.mxu1 %v9954_v15  ;;  %v8912_v15 = vpop.f32.mrf.mxu0  ;;  %v4459_v49 = vor.u32 %v4458_v16, %v4455_v14  ;;  %v8934_v22 = vrot.slane %v4462_v38, 5  ;;  %v4468_v36 = vrot.slane %v4466_v35, 4  ;;  %v4427_v43 = vsel %vm7199_vm6, %v4422_v7, %v8891_v44 }
 0x157   : > { %6794 = vmatprep.mubr.bf16.mxu1 %v9956_v42  ;;  %v8941_v34 = vrot.slane %v4435_v25, 4  ;;  %v8943_v0 = vrot.slane %v4445_v30, 4  ;;  %v8945_v50 = vrot.slane %v4448_v33, 5  ;;  %v8949_v13 = vsel %vm7594_vm13, %v6104_v60, %v5114_v1  ;;  %v8961_v25 = vld [vmem:[#allocation2 + $0x70] sm:$0xf] }
 0x158   : > { %v8953_v16 = vsel %vm7594_vm13, %v5116_v28, %v5117_v21  ;;  %v4477_v52 = vshrl.u32 %v4281_v51, 16  ;;  %v4480_v20 = vshll.u32 %v4281_v51, 16  ;;  %v8955_v14 = vpop.f32.mrf.mxu0  ;;  %v4472_v38 = vshll.u32 %v8932_v26, 16  ;;  %v8973_v28 = vpop.f32.mrf.mxu1 }
 0x159   : > { %v6105_v35 = vrot.slane %v5019_v10, 9  ;;  %v5121_v7 = vrot.slane %v8889_v19, 5  ;;  %v8963_v1 = vcombine.low %v4393_v11, %v4403_v8  ;;  %v8967_v33 = vrot.slane %v4459_v49, 4  ;;  %9959 = vst [vmem:[#allocation9_spill] sm:$0xff] %v8973_v28  ;;  %v4287_v49 = vld [vmem:[#allocation2 + $0x84] sm:$0xf] }
 0x15a   : > { %v4469_v42 = vor.u32 %v4468_v36, %v8934_v22  ;;  %v9958_v60 = vcombine.low %v8595_v63, %v8599_v41  ;;  %v8975_v21 = vcombine.low %v4417_v59, %v4427_v43  ;;  %v4441_v19 = vsel %vm7199_vm6, %v8941_v34, %v8887_v54  ;;  %v8987_v63 = vld [vmem:[#allocation2 + $0x7c] sm:$0xf]  ;;  %v8994_v36 = vpop.f32.mrf.mxu0  ;;  %v7092_v10 = vld [vmem:[#allocation2 + $0xcc] sm:$0xff]  }
 0x15b   : > { %6847 = vmatmul.mubr.bf16.gmra.mxu0 %v7088_v3  ;;  %v4451_v11 = vsel %vm7199_vm6, %v8943_v0, %v8945_v50  ;;  %v9960_v41 = vcombine.low %v8610_v37, %v8614_v47  ;;  %v4479_v8 = vrot.slane %v4477_v52, 4  ;;  %v4482_v59 = vrot.slane %v4480_v20, 5  ;;  %9961 = vst [vmem:[#allocation19_spill] sm:$0xff] %v8994_v36  ;;  %v4283_v37 = vld [vmem:[#allocation2 + $0x74] sm:$0x1]  ;;  %v9007_v3 = vpop.f32.mrf.mxu1 }
 0x15c   : > { %6850 = vmatprep.mubr.bf16.mxu0 %v7091_v6  ;;  %v4284_v6 = vld [vmem:[#allocation2 + $0x78] sm:$0xf]  ;;  %v4486_v51 = vshll.u32 %v8961_v25, 16  ;;  %v4490_v54 = vshrl.u32 %v8961_v25, 16  ;;  %v4474_v43 = vrot.slane %v4472_v38, 5  ;;  %v8998_v34 = vsel %vm7594_vm13, %v6105_v35, %v5121_v7  ;;  %9962 = vst [vmem:[#allocation20_spill] sm:$0xff] %v9007_v3 }
 0x15d   : > { %v5123_v0 = vrot.slane %v5121_v7, 4  ;;  %v5124_v50 = vrot.slane %v8932_v26, 5  ;;  %v4465_v47 = vsel %vm7199_vm6, %v8967_v33, %v8934_v22  ;;  %v4470_v52 = vrot.slane %v4469_v42, 4  ;;  %v5020_v38 = vld [vmem:[#allocation2 + $0x6c] sm:$0xe] }
 0x15e   : > { %6795 = vmatmul.mubr.bf16.gmra.mxu1 %v9958_v60  ;;  %v4501_v20 = vshrl.u32 %v4284_v6, 16  ;;  %v4504_v60 = vshll.u32 %v4284_v6, 16  ;;  %v4510_v35 = vshll.u32 %v8987_v63, 16  ;;  %v4514_v7 = vshrl.u32 %v8987_v63, 16 }
 0x15f   : > { %6798 = vmatprep.mubr.bf16.mxu1 %v9960_v41  ;;  %v9005_v41 = vld [vmem:[#allocation2 + $0x88] sm:$0xf]  ;;  %v4525_v30 = vshrl.u32 %v4287_v49, 16  ;;  %v4528_v26 = vshll.u32 %v4287_v49, 16  ;;  %v4483_v44 = vor.u32 %v4482_v59, %v4479_v8  ;;  %v9011_v28 = vrot.slane %v4486_v51, 5 }
 0x160   : > { %v4492_v61 = vrot.slane %v4490_v54, 4  ;;  %v5128_v22 = vrot.slane %v8961_v25, 5  ;;  %v9018_v42 = vsel %vm7594_vm13, %v5123_v0, %v5124_v50  ;;  %v4496_v6 = vshll.u32 %v4283_v37, 16 }
 0x161   : > { %v9014_v33 = vpop.f32.mrf.mxu0  ;;  %v4534_v3 = vshll.u32 %v9005_v41, 16  ;;  %v4538_v18 = vshrl.u32 %v9005_v41, 16  ;;  %v9964_v8 = vcombine.low %v8724_v5, %v8728_v58  ;;  %v4475_v59 = vsel %vm7199_vm6, %v4470_v52, %v4474_v43 }
 0x162   : > { %9963 = vst [vmem:[#allocation21_spill] sm:$0xff] %v9014_v33  ;;  %v6106_v25 = vrot.slane %v5020_v38, 9  ;;  %v4503_v51 = vrot.slane %v4501_v20, 4  ;;  %v4506_v54 = vrot.slane %v4504_v60, 5  ;;  %v9965_v49 = vcombine.low %v8618_v39, %v8626_v55  ;;  %v4286_v55 = vld [vmem:[#allocation2 + $0x80] sm:$0x1] }
 0x163   : > { %6851 = vmatmul.mubr.bf16.gmra.mxu0 %v7092_v10  ;;  %v9030_v10 = vpop.f32.mrf.mxu1  ;;  %v9032_v0 = vpop.f32.mrf.mxu0  ;;  %v9034_v50 = vrot.slane %v4510_v35, 5  ;;  %v4516_v33 = vrot.slane %v4514_v7, 4  ;;  %v4527_v36 = vrot.slane %v4525_v30, 4  ;;  %v4530_v5 = vrot.slane %v4528_v26, 5 }
 0x164   : > { %6918 = vmatprep.mubr.bf16.mxu0 %v9964_v8  ;;  %v9966_v58 = vcombine.low %v8634_v46, %v8638_v48  ;;  %v9039_v43 = vrot.slane %v4483_v44, 4  ;;  %v4493_v52 = vor.u32 %v4492_v61, %v9011_v28  ;;  %v5130_v20 = vrot.slane %v5128_v22, 4  ;;  %v4289_v44 = vld [vmem:[#allocation2 + $0x8c] sm:$0x1] }
 0x165   : > { %v5131_v39 = vrot.slane %v4283_v37, 5  ;;  %v9042_v60 = vpop.f32.mrf.mxu0  ;;  %v9044_v38 = vcombine.low %v4441_v19, %v4451_v11  ;;  %v9048_v30 = vrot.slane %v4534_v3, 5  ;;  %v4540_v7 = vrot.slane %v4538_v18, 4  ;;  %v4290_v37 = vld [vmem:[#allocation2 + $0x90] sm:$0xf]  ;;  %v9055_v8 = vpop.f32.mrf.mxu1 }
 0x166   : > { %6799 = vmatmul.mubr.bf16.gmra.mxu1 %v9965_v49  ;;  %v9050_v26 = vcombine.low %v4465_v47, %v4475_v59  ;;  %v9052_v46 = vrot.slane %v4496_v6, 5  ;;  %v4507_v48 = vor.u32 %v4506_v54, %v4503_v51  ;;  %v5135_v61 = vrot.slane %v8987_v63, 5  ;;  %9967 = vst [vmem:[#allocation22_spill] sm:$0xff] %v9055_v8  ;;  %v5021_v3 = vld [vmem:[#allocation2 + $0x78] sm:$0xe] }
 0x167   : > { %6802 = vmatprep.mubr.bf16.mxu1 %v9966_v58  ;;  %v9057_v49 = vpop.f32.mrf.mxu0  ;;  %v9061_v19 = vsel %vm7594_vm13, %v6106_v25, %v5128_v22  ;;  %v4517_v11 = vor.u32 %v4516_v33, %v9034_v50  ;;  %v4520_v18 = vshll.u32 %v4286_v55, 16  ;;  %v4531_v47 = vor.u32 %v4530_v5, %v4527_v36  ;;  %v5022_v51 = vld [vmem:[#allocation2 + $0x84] sm:$0xe]  ;;  %v9089_v8 = vld [vmem:[#allocation2 + $0x94] sm:$0xf] }
 0x168   : > { %v4489_v63 = vsel %vm7199_vm6, %v9039_v43, %v9011_v28  ;;  %v4494_v6 = vrot.slane %v4493_v52, 4  ;;  %v9070_v59 = vsel %vm7594_vm13, %v5130_v20, %v5131_v39  ;;  %v5142_v54 = vrot.slane %v9005_v41, 5 }
 0x169   : > { %v9073_v22 = vpop.f32.mrf.mxu0  ;;  %v9968_v33 = vcombine.low %v8786_v57, %v8810_v31  ;;  %v4541_v36 = vor.u32 %v4540_v7, %v9048_v30  ;;  %v4544_v25 = vshll.u32 %v4289_v44, 16  ;;  %v4549_v5 = vshrl.u32 %v4290_v37, 16 }
 0x16a   : > { %v4552_v58 = vshll.u32 %v4290_v37, 16  ;;  %v9969_v28 = vcombine.low %v8820_v29, %v8824_v12  ;;  %v4508_v43 = vrot.slane %v4507_v48, 4  ;;  %v6107_v52 = vrot.slane %v5021_v3, 9 }
 0x16b   : > { %6919 = vmatmul.mubr.bf16.vlgmr.msra.gmra.mxu0 %v9968_v33  ;;  %v5137_v20 = vrot.slane %v5135_v61, 4  ;;  %v5138_v39 = vrot.slane %v4286_v55, 5  ;;  %v9082_v41 = vpop.f32.mrf.mxu1  ;;  %v9970_v35 = vcombine.low %v8646_v4, %v8650_v9  ;;  %v9087_v57 = vpop.f32.mrf.mxu0  ;;  %v4518_v31 = vrot.slane %v4517_v11, 4  ;;  %v9097_v9 = vld [vmem:[#allocation2 + $0x98] sm:$0x1] }
 0x16c   : > { %6922 = vmatprep.mubr.bf16.mxu0 %v9969_v28  ;;  %v4522_v7 = vrot.slane %v4520_v18, 5  ;;  %v4532_v33 = vrot.slane %v4531_v47, 4  ;;  %v6108_v37 = vrot.slane %v5022_v51, 9  ;;  %v4499_v29 = vsel %vm7199_vm6, %v4494_v6, %v9052_v46  ;;  %v9115_v28 = vld [vmem:[#allocation2 + $0xa0] sm:$0xf] }
 0x16d   : > { %v5144_v55 = vrot.slane %v5142_v54, 4  ;;  %v5145_v4 = vrot.slane %v4289_v44, 5  ;;  %v9101_v48 = vpop.f32.mrf.mxu0  ;;  %v4542_v11 = vrot.slane %v4541_v36, 4  ;;  %v4546_v18 = vrot.slane %v4544_v25, 5 }
 0x16e   : > { %6803 = vmatmul.mubr.bf16.gmra.mxu1 %v9970_v35  ;;  %v9099_v35 = vpop.f32.mrf.mxu1  ;;  %v4551_v3 = vrot.slane %v4549_v5, 4  ;;  %v4554_v47 = vrot.slane %v4552_v58, 5  ;;  %v4513_v46 = vsel %vm7199_vm6, %v4508_v43, %v9034_v50  ;;  %v9108_v6 = vsel %vm7594_vm13, %v6107_v52, %v5135_v61 }
 0x16f   : > { %6870 = vmatprep.mubr.bf16.mxu1 %v8830_v32  ;;  %9971 = vst [vmem:[#allocation23_spill] sm:$0xff] %v9099_v35  ;;  %v4293_v32 = vld [vmem:[#allocation2 + $0x9c] sm:$0xf]  ;;  %v9112_v44 = vsel %vm7594_vm13, %v5137_v20, %v5138_v39  ;;  %v4558_v51 = vshll.u32 %v9089_v8, 16  ;;  %v9119_v25 = vpop.f32.mrf.mxu0  ;;  %v4523_v5 = vsel %vm7199_vm6, %v4518_v31, %v4522_v7  ;;  %v4537_v50 = vsel %vm7199_vm6, %v4532_v33, %v9048_v30  ;;  %v5023_v20 = vld [vmem:[#allocation2 + $0x90] sm:$0xe] }
 0x170   : > { %v9117_v36 = vpop.f32.mrf.mxu1  ;;  %v9128_v61 = vsel %vm7594_vm13, %v6108_v37, %v5142_v54  ;;  %v4562_v58 = vshrl.u32 %v9089_v8, 16  ;;  %v9133_v43 = vsel %vm7594_vm13, %v5144_v55, %v5145_v4  ;;  %v4568_v52 = vshll.u32 %v9097_v9, 16 }
 0x171   : > { %9972 = vst [vmem:[#allocation24_spill] sm:$0xff] %v9117_v36  ;;  %v4573_v39 = vshrl.u32 %v4293_v32, 16  ;;  %v4576_v12 = vshll.u32 %v4293_v32, 16  ;;  %v9138_v7 = vpop.f32.mrf.mxu0  ;;  %v9974_v30 = vcombine.low %v8882_v17, %v8919_v45  ;;  %v4547_v54 = vsel %vm7199_vm6, %v4542_v11, %v4546_v18 }
 0x172   : > { %v9136_v31 = vpop.f32.mrf.mxu1  ;;  %v4555_v33 = vor.u32 %v4554_v47, %v4551_v3  ;;  %v4582_v37 = vshll.u32 %v9115_v28, 16  ;;  %v4586_v55 = vshrl.u32 %v9115_v28, 16  ;;  %v9975_v4 = vcombine.low %v8926_v27, %v8930_v40 }
 0x173   : > { %9973 = vst [vmem:[#allocation25_spill] sm:$0xff] %v9136_v31  ;;  %6923 = vmatmul.mubr.bf16.gmra.mxu0 %v9974_v30  ;;  %v9150_v32 = vcombine.low %v4489_v63, %v4499_v29  ;;  %v9152_v31 = vcombine.low %v4513_v46, %v4523_v5  ;;  %v9156_v45 = vrot.slane %v4558_v51, 5  ;;  %v9159_v11 = vpop.f32.mrf.mxu0  ;;  %v4564_v3 = vrot.slane %v4562_v58, 4  ;;  %v4296_v63 = vld [vmem:[#allocation2 + $0xa8] sm:$0xf] }
 0x174   : > { %6926 = vmatprep.mubr.bf16.mxu0 %v9975_v4  ;;  %v6584_v30 = vpop.f32.mrf.mxu1  ;;  %v6109_v27 = vrot.slane %v5023_v20, 9  ;;  %v5149_v40 = vrot.slane %v9089_v8, 5  ;;  %v9166_v47 = vcombine.low %v4537_v50, %v4547_v54  ;;  %v4575_v46 = vrot.slane %v4573_v39, 4  ;;  %v9180_v50 = vld [vmem:[#allocation2 + $0xac] sm:$0xf] }
 0x175   : > { %v1637_v29 = vadd.f32 %v6584_v30, %v8679_v2  ;;  %v4578_v51 = vrot.slane %v4576_v12, 5  ;;  %v9170_v4 = vrot.slane %v4555_v33, 4  ;;  %v9172_v17 = vrot.slane %v4568_v52, 5  ;;  %v9977_v2 = vld [vmem:[#allocation4_spill] sm:$0xff] }
 0x176   : > { %6871 = vmatmul.mubr.bf16.vlgmr.msra.gmra.mxu1 %v8839_v53  ;;  %v1628_v5 = vpop.f32.mrf.mxu1  ;;  %v9168_v53 = vpop.f32.mrf.mxu0  ;;  %v9174_v58 = vrot.slane %v4582_v37, 5  ;;  %v4588_v20 = vrot.slane %v4586_v55, 4  ;;  %v4597_v39 = vshrl.u32 %v4296_v63, 16  ;;  %v4600_v12 = vshll.u32 %v4296_v63, 16 }
 0x177   : > { %6874 = vmatprep.mubr.bf16.mxu1 %v8855_v56  ;;  %v9177_v8 = vadd.f32 %v9073_v22, %v1637_v29  ;;  %v1629_v30 = vadd.f32 %v1628_v5, %v9977_v2  ;;  %v4295_v56 = vld [vmem:[#allocation2 + $0xa4] sm:$0x1]  ;;  %v4565_v33 = vor.u32 %v4564_v3, %v9156_v45  ;;  %v9187_v52 = vsel %vm7594_vm13, %v6109_v27, %v5149_v40  ;;  %v9978_v29 = vld [vmem:[#allocation3_spill] sm:$0xff] }
 0x178   : > { %v6585_v54 = vpop.f32.mrf.mxu1  ;;  %v9182_v18 = vpop.f32.mrf.mxu0  ;;  %v5151_v37 = vrot.slane %v5149_v40, 4  ;;  %v5152_v22 = vrot.slane %v9097_v9, 5  ;;  %v4579_v2 = vor.u32 %v4578_v51, %v4575_v46  ;;  %v5156_v63 = vrot.slane %v9115_v28, 5  ;;  %v9981_v46 = vld [vmem:[#allocation11_spill] sm:$0xff] }
 0x179   : > { %9976 = vst [vmem:[#allocation26_spill] sm:$0xff] %v9177_v8  ;;  %v9191_v55 = vadd.f32 %v9087_v57, %v1629_v30  ;;  %v1640_v5 = vadd.f32 %v6585_v54, %v9978_v29  ;;  %v5024_v8 = vld [vmem:[#allocation2 + $0x9c] sm:$0xe]  ;;  %v9979_v3 = vcombine.low %v8949_v13, %v8953_v16  ;;  %v4589_v27 = vor.u32 %v4588_v20, %v9174_v58 }
 0x17a   : > { %v1631_v36 = vpop.f32.mrf.mxu1  ;;  %v9195_v35 = vpop.f32.mrf.mxu0  ;;  %v4592_v40 = vshll.u32 %v4295_v56, 16  ;;  %v4606_v9 = vshll.u32 %v9180_v50, 16  ;;  %v4610_v57 = vshrl.u32 %v9180_v50, 16  ;;  %v9982_v28 = vcombine.low %v8998_v34, %v9018_v42 }
 0x17b   : > { %6927 = vmatmul.mubr.bf16.gmra.mxu0 %v9979_v3  ;;  %v9204_v30 = vadd.f32 %v9101_v48, %v1640_v5  ;;  %v1632_v51 = vadd.f32 %v1631_v36, %v9981_v46  ;;  %v4599_v54 = vrot.slane %v4597_v39, 4  ;;  %v4602_v29 = vrot.slane %v4600_v12, 5  ;;  %v9983_v46 = vld [vmem:[#allocation7_spill] sm:$0xff] }
 0x17c   : > { %6930 = vmatprep.mubr.bf16.mxu0 %v9982_v28  ;;  %v6588_v13 = vpop.f32.mrf.mxu1  ;;  %v9211_v16 = vpop.f32.mrf.mxu0  ;;  %v4566_v20 = vrot.slane %v4565_v33, 4  ;;  %v9215_v3 = vsel %vm7594_vm13, %v5151_v37, %v5152_v22  ;;  %v6110_v48 = vrot.slane %v5024_v8, 9  ;;  %v5159_v5 = vrot.slane %v4295_v56, 5  ;;  %v9984_v56 = vld [vmem:[#allocation12_spill] sm:$0xff]  ;;  %v4298_v22 = vld [vmem:[#allocation2 + $0xb0] sm:$0x1] }
 0x17d   : > { %9980 = vst [vmem:[#allocation4_spill] sm:$0xff] %v9204_v30  ;;  %v9218_v36 = vadd.f32 %v9119_v25, %v1632_v51  ;;  %v1653_v34 = vadd.f32 %v6588_v13, %v9983_v46  ;;  %v4580_v42 = vrot.slane %v4579_v2, 4  ;;  %v5158_v39 = vrot.slane %v5156_v63, 4  ;;  %v5025_v51 = vld [vmem:[#allocation2 + $0xa8] sm:$0xe] }
 0x17e   : > { %6875 = vmatmul.mubr.bf16.gmra.mxu1 %v8963_v1  ;;  %v1644_v12 = vpop.f32.mrf.mxu1  ;;  %v9222_v1 = vpop.f32.mrf.mxu0  ;;  %v4590_v28 = vrot.slane %v4589_v27, 4  ;;  %v4594_v33 = vrot.slane %v4592_v40, 5  ;;  %v9224_v30 = vrot.slane %v4606_v9, 5  ;;  %v4612_v37 = vrot.slane %v4610_v57, 4 }
 0x17f   : > { %6878 = vmatprep.mubr.bf16.mxu1 %v8975_v21  ;;  %v9227_v8 = vadd.f32 %v9138_v7, %v1653_v34  ;;  %v1645_v25 = vadd.f32 %v1644_v12, %v9984_v56  ;;  %v4561_v21 = vsel %vm7199_vm6, %v9170_v4, %v9156_v45  ;;  %v4603_v2 = vor.u32 %v4602_v29, %v4599_v54  ;;  %v9985_v4 = vld [vmem:[#allocation14_spill] sm:$0xff] }
 0x180   : > { %v6589_v13 = vpop.f32.mrf.mxu1  ;;  %v9234_v46 = vpop.f32.mrf.mxu0  ;;  %v4571_v27 = vsel %vm7199_vm6, %v4566_v20, %v9172_v17  ;;  %v6125_v7 = vcombine.low %v9187_v52, %v9215_v3  ;;  %v9243_v40 = vsel %vm7594_vm13, %v6110_v48, %v5156_v63  ;;  %v5163_v9 = vrot.slane %v9180_v50, 5  ;;  %v4299_v29 = vld [vmem:[#allocation2 + $0xb4] sm:$0xf]  ;;  %v9257_v20 = vld [vmem:[#allocation2 + $0xb8] sm:$0xf] }
 0x181   : > { %v9247_v45 = vadd.f32 %v9159_v11, %v1645_v25  ;;  %v1656_v57 = vadd.f32 %v6589_v13, %v9985_v4  ;;  %v4585_v54 = vsel %vm7199_vm6, %v4580_v42, %v9174_v58  ;;  %v9255_v17 = vsel %vm7594_vm13, %v5158_v39, %v5159_v5  ;;  %v9987_v39 = vld [vmem:[#allocation6_spill] sm:$0xff] }
 0x182   : > { %v1647_v63 = vpop.f32.mrf.mxu1  ;;  %v9259_v48 = vpop.f32.mrf.mxu0  ;;  %v9986_v11 = vcombine.low %v9061_v19, %v9070_v59  ;;  %v4595_v50 = vsel %vm7199_vm6, %v4590_v28, %v4594_v33  ;;  %v4613_v34 = vor.u32 %v4612_v37, %v9224_v30  ;;  %v4616_v58 = vshll.u32 %v4298_v22, 16 }
 0x183   : > { %v6111_v42 = vrot.slane %v5025_v51, 9  ;;  %v9268_v5 = vadd.f32 %v9168_v53, %v1656_v57  ;;  %v1648_v12 = vadd.f32 %v1647_v63, %v9987_v39  ;;  %v9988_v56 = vcombine.low %v9108_v6, %v9112_v44 }
 0x184   : > { %6931 = vmatmul.mubr.bf16.gmra.mxu0 %v9986_v11  ;;  %v9274_v25 = vrot.slane %v4603_v2, 4  ;;  %v5166_v19 = vrot.slane %v4298_v22, 5  ;;  %v6592_v59 = vpop.f32.mrf.mxu1  ;;  %v9277_v28 = vpop.f32.mrf.mxu0  ;;  %v5165_v33 = vrot.slane %v5163_v9, 4  ;;  %v4621_v37 = vshrl.u32 %v4299_v29, 16 }
 0x185   : > { %6934 = vmatprep.mubr.bf16.mxu0 %v9988_v56  ;;  %v4624_v51 = vshll.u32 %v4299_v29, 16  ;;  %v4630_v53 = vshll.u32 %v9257_v20, 16  ;;  %v9281_v13 = vadd.f32 %v9182_v18, %v1648_v12  ;;  %v1669_v4 = vadd.f32 %v6592_v59, %v8894_v62  ;;  %v9294_v18 = vld [vmem:[#allocation2 + $0xbc] sm:$0x1]  ;;  %v4303_v56 = vld [vmem:[#allocation2 + $0xc4] sm:$0xf] }
 0x186   : > { %6879 = vmatmul.mubr.bf16.gmra.mxu1 %v9044_v38  ;;  %v9285_v6 = vcombine.low %v4561_v21, %v4571_v27  ;;  %v4634_v44 = vshrl.u32 %v9257_v20, 16  ;;  %v1660_v22 = vpop.f32.mrf.mxu1  ;;  %v9288_v38 = vpop.f32.mrf.mxu0  ;;  %v9290_v2 = vcombine.low %v4585_v54, %v4595_v50  ;;  %v6126_v57 = vcombine.low %v9243_v40, %v9255_v17  ;;  %v4302_v54 = vld [vmem:[#allocation2 + $0xc0] sm:$0xf]  ;;  %v5028_v17 = vld [vmem:[#allocation2 + $0xcc] sm:$0xe] }
 0x187   : > { %6882 = vmatprep.mubr.bf16.mxu1 %v9050_v26  ;;  %v4614_v29 = vrot.slane %v4613_v34, 4  ;;  %v4618_v63 = vrot.slane %v4616_v58, 5  ;;  %v9297_v62 = vadd.f32 %v9195_v35, %v1669_v4  ;;  %v1661_v26 = vadd.f32 %v1660_v22, %v8912_v15 }
 0x188   : > { %v4609_v21 = vsel %vm7199_vm6, %v9274_v25, %v9224_v30  ;;  %v9306_v27 = vsel %vm7594_vm13, %v6111_v42, %v5163_v9  ;;  %v6593_v11 = vpop.f32.mrf.mxu1  ;;  %v9308_v50 = vpop.f32.mrf.mxu0  ;;  %v9312_v34 = vsel %vm7594_vm13, %v5165_v33, %v5166_v19  ;;  %v4623_v35 = vrot.slane %v4621_v37, 4  ;;  %v5026_v42 = vld [vmem:[#allocation2 + $0xb4] sm:$0xe] }
 0x189   : > { %v4626_v58 = vrot.slane %v4624_v51, 5  ;;  %v9314_v15 = vrot.slane %v4630_v53, 5  ;;  %v9317_v39 = vadd.f32 %v9211_v16, %v1661_v26  ;;  %v1672_v30 = vadd.f32 %v6593_v11, %v8955_v14  ;;  %v9990_v53 = vld [vmem:[#allocation19_spill] sm:$0xff]  ;;  %v9991_v11 = vld [vmem:[#allocation21_spill] sm:$0xff] }
 0x18a   : > { %v4636_v12 = vrot.slane %v4634_v44, 4  ;;  %v4640_v9 = vshll.u32 %v9294_v18, 16  ;;  %v1663_v25 = vpop.f32.mrf.mxu1  ;;  %v9321_v59 = vpop.f32.mrf.mxu0  ;;  %v9989_v19 = vcombine.low %v9128_v61, %v9133_v43  ;;  %v4619_v33 = vsel %vm7199_vm6, %v4614_v29, %v4618_v63  ;;  %v5027_v43 = vld [vmem:[#allocation2 + $0xc0] sm:$0xe] }
 0x18b   : > { %v5170_v16 = vrot.slane %v9257_v20, 5  ;;  %v4645_v37 = vshrl.u32 %v4302_v54, 16  ;;  %v4648_v51 = vshll.u32 %v4302_v54, 16  ;;  %v9330_v14 = vadd.f32 %v9222_v1, %v1672_v30  ;;  %v4304_v30 = vld [vmem:[#allocation2 + $0xc8] sm:$0x1] }
 0x18c   : > { %6935 = vmatmul.mubr.bf16.gmra.mxu0 %v9989_v19  ;;  %v1664_v4 = vadd.f32 %v1663_v25, %v9990_v53  ;;  %v6127_v61 = vcombine.low %v9306_v27, %v9312_v34  ;;  %v5177_v44 = vrot.slane %v4303_v56, 5  ;;  %v6596_v22 = vpop.f32.mrf.mxu1  ;;  %v9339_v20 = vpop.f32.mrf.mxu0  ;;  %v4627_v29 = vor.u32 %v4626_v58, %v4623_v35 }
 0x18d   : > { %6938 = vmatprep.mubr.bf16.mxu0 %v6125_v7  ;;  %v6112_v63 = vrot.slane %v5026_v42, 9  ;;  %v4654_v1 = vshll.u32 %v4303_v56, 16  ;;  %v4658_v26 = vshrl.u32 %v4303_v56, 16  ;;  %v1685_v52 = vadd.f32 %v6596_v22, %v9991_v11 }
 0x18e   : > { %6883 = vmatmul.mubr.bf16.gmra.mxu1 %v9150_v32  ;;  %v9342_v54 = vadd.f32 %v9234_v46, %v1664_v4  ;;  %v4637_v3 = vor.u32 %v4636_v12, %v9314_v15  ;;  %v5173_v7 = vrot.slane %v9294_v18, 5  ;;  %v1676_v27 = vpop.f32.mrf.mxu1  ;;  %v9348_v34 = vpop.f32.mrf.mxu0  ;;  %v5172_v32 = vrot.slane %v5170_v16, 4 }
 0x18f   : > { %6886 = vmatprep.mubr.bf16.mxu1 %v9152_v31  ;;  %v4647_v35 = vrot.slane %v4645_v37, 4  ;;  %v4650_v58 = vrot.slane %v4648_v51, 5  ;;  %v6113_v42 = vrot.slane %v5027_v43, 9  ;;  %v9351_v56 = vadd.f32 %v9259_v48, %v1685_v52  ;;  %v4305_v43 = vld [vmem:[#allocation2 + $0xcc] sm:$0xf] }
 0x190   : > { %v1677_v46 = vadd.f32 %v1676_v27, %v9032_v0  ;;  %v5179_v25 = vrot.slane %v5177_v44, 4  ;;  %v5180_v19 = vrot.slane %v4304_v30, 5  ;;  %v6597_v31 = vpop.f32.mrf.mxu1  ;;  %v9354_v53 = vpop.f32.mrf.mxu0  ;;  %v9356_v12 = vcombine.low %v4609_v21, %v4619_v33  ;;  %v4306_v33 = vld [vmem:[#allocation2 + $0xd0] sm:$0xf]  ;;  %v9992_v27 = vld [vmem:[#allocation5_spill] sm:$0xff] }
 0x191   : > { %v9358_v18 = vrot.slane %v4640_v9, 5  ;;  %v9360_v4 = vrot.slane %v4654_v1, 5  ;;  %v4660_v22 = vrot.slane %v4658_v26, 4  ;;  %v1688_v48 = vadd.f32 %v6597_v31, %v9042_v60  ;;  %v9993_v31 = vld [vmem:[#allocation10_spill] sm:$0xff] }
 0x192   : > { %v9363_v37 = vadd.f32 %v9277_v28, %v1677_v46  ;;  %v9366_v51 = vrot.slane %v4627_v29, 4  ;;  %v5171_v0 = vsel %vm7594_vm13, %v6112_v63, %v5170_v16  ;;  %v1679_v11 = vpop.f32.mrf.mxu1  ;;  %v9370_v52 = vpop.f32.mrf.mxu0  ;;  %v9375_v21 = vrot.slane %v4637_v3, 4 }
 0x193   : > { %v5174_v28 = vsel %vm7594_vm13, %v5172_v32, %v5173_v7  ;;  %v4651_v9 = vor.u32 %v4650_v58, %v4647_v35  ;;  %v5178_v60 = vsel %vm7594_vm13, %v6113_v42, %v5177_v44  ;;  %v9382_v16 = vadd.f32 %v9288_v38, %v1688_v48 }
 0x194   : > { %6939 = vmatmul.mubr.bf16.gmra.mxu0 %v6126_v57  ;;  %v1680_v29 = vadd.f32 %v1679_v11, %v9057_v49  ;;  %v5181_v40 = vsel %vm7594_vm13, %v5179_v25, %v5180_v19  ;;  %v5184_v57 = vrot.slane %v4306_v33, 5  ;;  %v6600_v63 = vpop.f32.mrf.mxu1  ;;  %v2160_v1 = vpop.f32.mrf.mxu0  ;;  %v4661_v26 = vor.u32 %v4660_v22, %v9360_v4  ;;  %v4307_v25 = vld [vmem:[#allocation2 + $0xd4] sm:$0x1] }
 0x195   : > { %6942 = vmatprep.mubr.bf16.mxu0 %v6127_v61  ;;  %v4664_v3 = vshll.u32 %v4304_v30, 16  ;;  %v4669_v44 = vshrl.u32 %v4305_v43, 16  ;;  %v4672_v7 = vshll.u32 %v4305_v43, 16  ;;  %v1701_v49 = vadd.f32 %v6600_v63, %v9992_v27 }
 0x196   : > { %6887 = vmatmul.mubr.bf16.gmra.mxu1 %v9166_v47  ;;  %v9390_v38 = vadd.f32 %v9308_v50, %v1680_v29  ;;  %v4678_v61 = vshll.u32 %v4306_v33, 16  ;;  %v4682_v32 = vshrl.u32 %v4306_v33, 16  ;;  %v1692_v35 = vpop.f32.mrf.mxu1  ;;  %v6653_v58 = vpop.f32.mrf.mxu0  ;;  %v6128_v42 = vcombine.low %v5171_v0, %v5174_v28  ;;  %v9994_v0 = vld [vmem:[#allocation13_spill] sm:$0xff] }
 0x197   : > { %6890 = vmatprep.mubr.bf16.mxu1 %v9285_v6  ;;  %v4652_v46 = vrot.slane %v4651_v9, 4  ;;  %v6129_v47 = vcombine.low %v5178_v60, %v5181_v40  ;;  %v6114_v19 = vrot.slane %v5028_v17, 9  ;;  %v9395_v30 = vadd.f32 %v9321_v59, %v1701_v49 }
 0x198   : > { %v1693_v22 = vadd.f32 %v1692_v35, %v9993_v31  ;;  %v5186_v50 = vrot.slane %v5184_v57, 4  ;;  %v5187_v48 = vrot.slane %v4307_v25, 5  ;;  %v6601_v43 = vpop.f32.mrf.mxu1  ;;  %v2163_v11 = vpop.f32.mrf.mxu0  ;;  %v4662_v29 = vrot.slane %v4661_v26, 4 }
 0x199   : > { %v4666_v6 = vrot.slane %v4664_v3, 5  ;;  %v4671_v63 = vrot.slane %v4669_v44, 4  ;;  %v4674_v33 = vrot.slane %v4672_v7, 5  ;;  %v1704_v28 = vadd.f32 %v6601_v43, %v9994_v0  ;;  %v9995_v3 = vld [vmem:[#allocation15_spill] sm:$0xff]  ;;  %v9998_v43 = vld [vmem:[#allocation17_spill] sm:$0xff] }
 0x19a   : > { %v9399_v27 = vadd.f32 %v9339_v20, %v1693_v22  ;;  %v4680_v9 = vrot.slane %v4678_v61, 5  ;;  %v4684_v60 = vrot.slane %v4682_v32, 4  ;;  %v1695_v40 = vpop.f32.mrf.mxu1  ;;  %v6656_v59 = vpop.f32.mrf.mxu0  ;;  %v4633_v17 = vsel %vm7199_vm6, %v9366_v51, %v9314_v15  ;;  %v9996_v32 = vld [vmem:[#allocation16_spill] sm:$0xff] }
 0x19b   : > { %v9407_v26 = vadd.f32 %v9348_v34, %v1704_v28  ;;  %v1696_v44 = vadd.f32 %v1695_v40, %v9995_v3  ;;  %v5185_v20 = vsel %vm7594_vm13, %v6114_v19, %v5184_v57  ;;  %v5188_v7 = vsel %vm7594_vm13, %v5186_v50, %v5187_v48  ;;  %v10000_v3 = vld [vmem:[#allocation9_spill] sm:$0xff] }
 0x19c   : > { %6943 = vmatmul.mubr.bf16.gmra.mxu0 %v6128_v42  ;;  %v6604_v49 = vpop.f32.mrf.mxu1  ;;  %v4643_v15 = vsel %vm7199_vm6, %v9375_v21, %v9358_v18  ;;  %v2176_v51 = vpop.f32.mrf.mxu0  ;;  %v4657_v34 = vsel %vm7199_vm6, %v4652_v46, %v9360_v4  ;;  %v4667_v61 = vsel %vm7199_vm6, %v4662_v29, %v4666_v6  ;;  %v4688_v57 = vshll.u32 %v4307_v25, 16  ;;  %v9997_v4 = vld [vmem:[#allocation18_spill] sm:$0xff] }
 0x19d   : > { %6946 = vmatprep.mubr.bf16.mxu0 %v6129_v47  ;;  %v9425_v23 = vadd.f32 %v9354_v53, %v1696_v44  ;;  %v1717_v35 = vadd.f32 %v6604_v49, %v9996_v32  ;;  %v4685_v42 = vor.u32 %v4684_v60, %v4680_v9  ;;  %v6130_v21 = vcombine.low %v5185_v20, %v5188_v7 }
 0x19e   : > { %6891 = vmatmul.mubr.bf16.gmra.mxu1 %v9290_v2  ;;  %v4675_v2 = vor.u32 %v4674_v33, %v4671_v63  ;;  %v1708_v47 = vpop.f32.mrf.mxu1  ;;  %v6657_v18 = vpop.f32.mrf.mxu0  ;;  %v6088_v22 = vcombine.low %v4633_v17, %v4643_v15  ;;  %v6089_v50 = vcombine.low %v4657_v34, %v4667_v61  ;;  %v4690_v53 = vrot.slane %v4688_v57, 5  ;;  %v10001_v15 = vld [vmem:[#allocation20_spill] sm:$0xff] }
 0x19f   : > { %6894 = vmatprep.mubr.bf16.mxu1 %v9356_v12  ;;  %v9430_v19 = vadd.f32 %v9370_v52, %v1717_v35  ;;  %v1709_v46 = vadd.f32 %v1708_v47, %v9997_v4  ;;  %v4686_v6 = vrot.slane %v4685_v42, 4  ;;  %v9999_v52 = vld [vmem:[#allocation8_spill] sm:$0xff] }
 0x1a0   : > { %v6605_v31 = vpop.f32.mrf.mxu1  ;;  %v2179_v25 = vpop.f32.mrf.mxu0  ;;  %v4676_v12 = vrot.slane %v4675_v2, 4 }
 0x1a1   : > { %v9433_v48 = vadd.f32 %v2160_v1, %v1709_v46  ;;  %v1720_v29 = vadd.f32 %v6605_v31, %v9998_v43  ;;  %v4691_v20 = vsel %vm7199_vm6, %v4686_v6, %v4690_v53 }
 0x1a2   : > { %v1711_v63 = vpop.f32.mrf.mxu1  ;;  %v4681_v1 = vsel %vm7199_vm6, %v4676_v12, %v4680_v9  ;;  %v10002_v9 = vld [vmem:[#allocation22_spill] sm:$0xff] }
 0x1a3   : > { %v6660_v33 = vpop.f32.mrf.mxu0  ;;  %v9436_v0 = vadd.f32 %v6653_v58, %v1720_v29  ;;  %v1712_v28 = vadd.f32 %v1711_v63, %v9999_v52  ;;  %v6090_v57 = vcombine.low %v4681_v1, %v4691_v20 }
 0x1a4   : > { %6947 = vmatmul.mubr.bf16.gmra.mxu0 %v6130_v21 }
 0x1a5   : > { %v6608_v60 = vpop.f32.mrf.mxu1  ;;  %v2192_v40 = vpop.f32.mrf.mxu0  ;;  %v9439_v17 = vadd.f32 %v2163_v11, %v1712_v28 }
 0x1a6   : > { %6895 = vmatmul.mubr.bf16.gmra.mxu1 %v6088_v22  ;;  %v1733_v44 = vadd.f32 %v6608_v60, %v10000_v3 }
 0x1a7   : > { %6898 = vmatprep.mubr.bf16.mxu1 %v6089_v50  ;;  %v1724_v7 = vpop.f32.mrf.mxu1  ;;  %v6661_v49 = vpop.f32.mrf.mxu0 }
 0x1a8   : > { %v9446_v58 = vadd.f32 %v6656_v59, %v1733_v44  ;;  %v1725_v34 = vadd.f32 %v1724_v7, %v10001_v15 }
 0x1a9   : > { %v6609_v61 = vpop.f32.mrf.mxu1  ;;  %v2195_v32 = vpop.f32.mrf.mxu0 }
 0x1aa   : > { %v9449_v11 = vadd.f32 %v2176_v51, %v1725_v34  ;;  %v1736_v35 = vadd.f32 %v6609_v61, %v9030_v10  ;;  %v10003_v51 = vld [vmem:[#allocation23_spill] sm:$0xff] }
 0x1ab   : > { %v1727_v2 = vpop.f32.mrf.mxu1  ;;  %v6728_v42 = vpop.f32.mrf.mxu0 }
 0x1ac   : > { %v9452_v47 = vadd.f32 %v6657_v18, %v1736_v35  ;;  %v1728_v24 = vadd.f32 %v1727_v2, %v10002_v9  ;;  %v10004_v18 = vld [vmem:[#allocation24_spill] sm:$0xff] }
 0x1ad   : > { %v3218_v4 = vpop.f32.mrf.mxu0 }
 0x1ae   : > { %v6612_v21 = vpop.f32.mrf.mxu1  ;;  %6899 = vmatmul.mubr.bf16.gmra.mxu1 %v6090_v57  ;;  %v9455_v59 = vadd.f32 %v2179_v25, %v1728_v24  ;;  %v10005_v25 = vld [vmem:[#allocation25_spill] sm:$0xff] }
 0x1af   : > { %v1749_v46 = vadd.f32 %v6612_v21, %v9082_v41  ;;  %v6729_v22 = vpop.f32.mrf.mxu0 }
 0x1b0   : > { %v1740_v31 = vpop.f32.mrf.mxu1 }
 0x1b1   : > { %v9458_v50 = vadd.f32 %v6660_v33, %v1749_v46  ;;  %v1741_v53 = vadd.f32 %v1740_v31, %v10003_v51  ;;  %v3221_v43 = vpop.f32.mrf.mxu0  ;;  %v10006_v33 = vld [vmem:[#allocation26_spill] sm:$0xff] }
 0x1b2   : > { %v6613_v10 = vpop.f32.mrf.mxu1 }
 0x1b3   : > { %v9461_v29 = vadd.f32 %v2192_v40, %v1741_v53  ;;  %v1752_v12 = vadd.f32 %v6613_v10, %v10004_v18  ;;  %v6732_v63 = vpop.f32.mrf.mxu0 }
 0x1b4   : > { %v1743_v6 = vpop.f32.mrf.mxu1 }
 0x1b5   : > { %v9464_v52 = vadd.f32 %v6661_v49, %v1752_v12  ;;  %v1744_v28 = vadd.f32 %v1743_v6, %v10005_v25  ;;  %v3234_v41 = vpop.f32.mrf.mxu0  ;;  %v10007_v49 = vld [vmem:[#allocation4_spill] sm:$0xff] }
 0x1b6   : > { %v6680_v60 = vpop.f32.mrf.mxu1 }
 0x1b7   : > { %v9467_v3 = vadd.f32 %v2195_v32, %v1744_v28  ;;  %v2594_v44 = vadd.f32 %v6680_v60, %v10006_v33  ;;  %v6733_v20 = vpop.f32.mrf.mxu0 }
 0x1b8   : > { %v2465_v1 = vpop.f32.mrf.mxu1 }
 0x1b9   : > { %v9470_v7 = vadd.f32 %v6728_v42, %v2594_v44  ;;  %v2592_v40 = vadd.f32 %v2465_v1, %v9191_v55  ;;  %v3237_v34 = vpop.f32.mrf.mxu0 }
 0x1ba   : > { %v6681_v15 = vpop.f32.mrf.mxu1 }
 0x1bb   : > { %v9473_v61 = vadd.f32 %v3218_v4, %v2592_v40  ;;  %v2595_v57 = vadd.f32 %v6681_v15, %v10007_v49  ;;  %v6736_v2 = vpop.f32.mrf.mxu0 }
 0x1bc   : > { %v2468_v35 = vpop.f32.mrf.mxu1 }
 0x1bd   : > { %v9476_v9 = vadd.f32 %v6729_v22, %v2595_v57  ;;  %v2593_v32 = vadd.f32 %v2468_v35, %v9218_v36  ;;  %v3250_v21 = vpop.f32.mrf.mxu0 }
 0x1be   : > { %v6684_v24 = vpop.f32.mrf.mxu1 }
 0x1bf   : > { %v9479_v46 = vadd.f32 %v3221_v43, %v2593_v32  ;;  %v2598_v42 = vadd.f32 %v6684_v24, %v9227_v8  ;;  %v6737_v55 = vpop.f32.mrf.mxu0 }
 0x1c0   : > { %v2481_v31 = vpop.f32.mrf.mxu1 }
 0x1c1   : > { %v9482_v51 = vadd.f32 %v6732_v63, %v2598_v42  ;;  %v2596_v4 = vadd.f32 %v2481_v31, %v9247_v45  ;;  %v3253_v10 = vpop.f32.mrf.mxu0 }
 0x1c2   : > { %v6685_v53 = vpop.f32.mrf.mxu1 }
 0x1c3   : > { %v9485_v18 = vadd.f32 %v3234_v41, %v2596_v4  ;;  %v2599_v22 = vadd.f32 %v6685_v53, %v9268_v5  ;;  %v6740_v36 = vpop.f32.mrf.mxu0 }
 0x1c4   : > { %v2484_v12 = vpop.f32.mrf.mxu1 }
 0x1c5   : > { %v9488_v6 = vadd.f32 %v6733_v20, %v2599_v22  ;;  %v2597_v43 = vadd.f32 %v2484_v12, %v9281_v13  ;;  %v3266_v8 = vpop.f32.mrf.mxu0 }
 0x1c6   : > { %v6688_v25 = vpop.f32.mrf.mxu1 }
 0x1c7   : > { %v9491_v28 = vadd.f32 %v3237_v34, %v2597_v43  ;;  %v2602_v63 = vadd.f32 %v6688_v25, %v9297_v62  ;;  %v6741_v45 = vpop.f32.mrf.mxu0 }
 0x1c8   : > { %v2497_v60 = vpop.f32.mrf.mxu1 }
 0x1c9   : > { %v9494_v33 = vadd.f32 %v6736_v2, %v2602_v63  ;;  %v2600_v41 = vadd.f32 %v2497_v60, %v9317_v39  ;;  %v3269_v5 = vpop.f32.mrf.mxu0 }
 0x1ca   : > { %v6689_v44 = vpop.f32.mrf.mxu1 }
 0x1cb   : > { %v9497_v1 = vadd.f32 %v3250_v21, %v2600_v41  ;;  %v2603_v20 = vadd.f32 %v6689_v44, %v9330_v14  ;;  %v6744_v13 = vpop.f32.mrf.mxu0 }
 0x1cc   : > { %v2500_v40 = vpop.f32.mrf.mxu1 }
 0x1cd   : > { %v9500_v15 = vadd.f32 %v6737_v55, %v2603_v20  ;;  %v2601_v34 = vadd.f32 %v2500_v40, %v9342_v54  ;;  %v3282_v62 = vpop.f32.mrf.mxu0 }
 0x1ce   : > { %v6692_v49 = vpop.f32.mrf.mxu1 }
 0x1cf   : > { %v9503_v57 = vadd.f32 %v3253_v10, %v2601_v34  ;;  %v2606_v35 = vadd.f32 %v6692_v49, %v9351_v56  ;;  %v6745_v39 = vpop.f32.mrf.mxu0 }
 0x1d0   : > { %v2513_v2 = vpop.f32.mrf.mxu1 }
 0x1d1   : > { %v9506_v32 = vadd.f32 %v6740_v36, %v2606_v35  ;;  %v2604_v24 = vadd.f32 %v2513_v2, %v9363_v37  ;;  %v3285_v14 = vpop.f32.mrf.mxu0 }
 0x1d2   : > { %v6693_v21 = vpop.f32.mrf.mxu1 }
 0x1d3   : > { %v9509_v42 = vadd.f32 %v3266_v8, %v2604_v24  ;;  %v2607_v31 = vadd.f32 %v6693_v21, %v9382_v16  ;;  %v6748_v54 = vpop.f32.mrf.mxu0 }
 0x1d4   : > { %v2516_v55 = vpop.f32.mrf.mxu1 }
 0x1d5   : > { %v9512_v4 = vadd.f32 %v6741_v45, %v2607_v31  ;;  %v2605_v53 = vadd.f32 %v2516_v55, %v9390_v38  ;;  %v3298_v56 = vpop.f32.mrf.mxu0 }
 0x1d6   : > { %v6696_v10 = vpop.f32.mrf.mxu1 }
 0x1d7   : > { %v9515_v22 = vadd.f32 %v3269_v5, %v2605_v53  ;;  %v2610_v12 = vadd.f32 %v6696_v10, %v9395_v30  ;;  %v6749_v37 = vpop.f32.mrf.mxu0 }
 0x1d8   : > { %v2529_v36 = vpop.f32.mrf.mxu1 }
 0x1d9   : > { %v9518_v43 = vadd.f32 %v6744_v13, %v2610_v12  ;;  %v2608_v25 = vadd.f32 %v2529_v36, %v9399_v27  ;;  %v3301_v16 = vpop.f32.mrf.mxu0 }
 0x1da   : > { %v6697_v8 = vpop.f32.mrf.mxu1 }
 0x1db   : > { %v9521_v63 = vadd.f32 %v3282_v62, %v2608_v25  ;;  %v2611_v60 = vadd.f32 %v6697_v8, %v9407_v26  ;;  %v6752_v38 = vpop.f32.mrf.mxu0 }
 0x1dc   : > { %v2532_v45 = vpop.f32.mrf.mxu1 }
 0x1dd   : > { %v9524_v41 = vadd.f32 %v6745_v39, %v2611_v60  ;;  %v2609_v44 = vadd.f32 %v2532_v45, %v9425_v23  ;;  %v3314_v30 = vpop.f32.mrf.mxu0 }
 0x1de   : > { %v6700_v5 = vpop.f32.mrf.mxu1 }
 0x1df   : > { %v9527_v20 = vadd.f32 %v3285_v14, %v2609_v44  ;;  %v2614_v40 = vadd.f32 %v6700_v5, %v9430_v19  ;;  %v6753_v27 = vpop.f32.mrf.mxu0 }
 0x1e0   : > { %v2545_v13 = vpop.f32.mrf.mxu1 }
 0x1e1   : > { %v9530_v34 = vadd.f32 %v6748_v54, %v2614_v40  ;;  %v2612_v49 = vadd.f32 %v2545_v13, %v9433_v48  ;;  %v3317_v26 = vpop.f32.mrf.mxu0 }
 0x1e2   : > { %v6701_v62 = vpop.f32.mrf.mxu1 }
 0x1e3   : > { %v9533_v35 = vadd.f32 %v3298_v56, %v2612_v49  ;;  %v2615_v2 = vadd.f32 %v6701_v62, %v9436_v0  ;;  %v6756_v23 = vpop.f32.mrf.mxu0 }
 0x1e4   : > { %v2548_v39 = vpop.f32.mrf.mxu1 }
 0x1e5   : > { %10008 = vst [vmem:[#allocation3_spill] sm:$0xff] %v9533_v35  ;;  %v9536_v24 = vadd.f32 %v6749_v37, %v2615_v2  ;;  %v2613_v21 = vadd.f32 %v2548_v39, %v9439_v17  ;;  %v3330_v19 = vpop.f32.mrf.mxu0 }
 0x1e6   : > { %v6704_v14 = vpop.f32.mrf.mxu1 }
 0x1e7   : > { %10009 = vst [vmem:[#allocation11_spill] sm:$0xff] %v9536_v24  ;;  %v9539_v31 = vadd.f32 %v3301_v16, %v2613_v21  ;;  %v2618_v55 = vadd.f32 %v6704_v14, %v9446_v58  ;;  %v6757_v48 = vpop.f32.mrf.mxu0 }
 0x1e8   : > { %v2561_v54 = vpop.f32.mrf.mxu1 }
 0x1e9   : > { %10010 = vst [vmem:[#allocation7_spill] sm:$0xff] %v9539_v31  ;;  %v9542_v53 = vadd.f32 %v6752_v38, %v2618_v55  ;;  %v2616_v10 = vadd.f32 %v2561_v54, %v9449_v11  ;;  %v3333_v0 = vpop.f32.mrf.mxu0 }
 0x1ea   : > { %v6705_v56 = vpop.f32.mrf.mxu1 }
 0x1eb   : > { %v9545_v12 = vadd.f32 %v3314_v30, %v2616_v10  ;;  %v2619_v36 = vadd.f32 %v6705_v56, %v9452_v47  ;;  %v6824_v17 = vpop.f32.mrf.mxu0 }
 0x1ec   : > { %v2564_v37 = vpop.f32.mrf.mxu1 }
 0x1ed   : > { %10011 = vst [vmem:[#allocation12_spill] sm:$0xff] %v9545_v12  ;;  %v9548_v25 = vadd.f32 %v6753_v27, %v2619_v36  ;;  %v2617_v8 = vadd.f32 %v2564_v37, %v9455_v59  ;;  %v4101_v58 = vpop.f32.mrf.mxu0 }
 0x1ee   : > { %v6708_v16 = vpop.f32.mrf.mxu1 }
 0x1ef   : > { %10012 = vst [vmem:[#allocation14_spill] sm:$0xff] %v9548_v25  ;;  %v9551_v60 = vadd.f32 %v3317_v26, %v2617_v8  ;;  %v2622_v45 = vadd.f32 %v6708_v16, %v9458_v50  ;;  %v9554_v11 = vpop.f32.mrf.mxu0 }
 0x1f0   : > { %v2577_v38 = vpop.f32.mrf.mxu1 }
 0x1f1   : > { %10013 = vst [vmem:[#allocation6_spill] sm:$0xff] %v9551_v60  ;;  %v9556_v44 = vadd.f32 %v6756_v23, %v2622_v45  ;;  %v2620_v5 = vadd.f32 %v2577_v38, %v9461_v29  ;;  %v9559_v30 = vpop.f32.mrf.mxu0 }
 0x1f2   : > { %v6709_v47 = vpop.f32.mrf.mxu1 }
 0x1f3   : > { %v9561_v40 = vadd.f32 %v3330_v19, %v2620_v5  ;;  %v2623_v59 = vadd.f32 %v6709_v47, %v9464_v52  ;;  %v6828_v27 = vpop.f32.mrf.mxu0 }
 0x1f4   : > { %v2580_v13 = vpop.f32.mrf.mxu1 }
 0x1f5   : > { %10014 = vst [vmem:[#allocation19_spill] sm:$0xff] %v9561_v40  ;;  %v9564_v49 = vadd.f32 %v6757_v48, %v2623_v59  ;;  %v2621_v50 = vadd.f32 %v2580_v13, %v9467_v3  ;;  %v9567_v26 = vpop.f32.mrf.mxu0 }
 0x1f6   : > { %v6776_v62 = vpop.f32.mrf.mxu1 }
 0x1f7   : > { %10015 = vst [vmem:[#allocation21_spill] sm:$0xff] %v9564_v49  ;;  %v9569_v2 = vadd.f32 %v3333_v0, %v2621_v50  ;;  %v3844_v29 = vadd.f32 %v6776_v62, %v9470_v7  ;;  %v9572_v23 = vpop.f32.mrf.mxu0 }
 0x1f8   : > { %v3715_v39 = vpop.f32.mrf.mxu1 }
 0x1f9   : > { %10016 = vst [vmem:[#allocation5_spill] sm:$0xff] %v9569_v2  ;;  %v9574_v21 = vadd.f32 %v6824_v17, %v3844_v29  ;;  %v3842_v52 = vadd.f32 %v3715_v39, %v9473_v61  ;;  %v9579_v19 = vpop.f32.mrf.mxu0 }
 0x1fa   : > { %v9577_v14 = vpop.f32.mrf.mxu1 }
 0x1fb   : > { %v9581_v55 = vadd.f32 %v4101_v58, %v3842_v52  ;;  %v6832_v54 = vpop.f32.mrf.mxu0 }
 0x1fc   : > { %v9583_v3 = vpop.f32.mrf.mxu1 }
 0x1fd   : > { %v9585_v10 = vpop.f32.mrf.mxu0 }
 0x1fe   : > { %v6780_v48 = vpop.f32.mrf.mxu1 }
 0x1ff   : > { %v3848_v7 = vadd.f32 %v6780_v48, %v9482_v51  ;;  %v9590_v0 = vpop.f32.mrf.mxu0 }
 0x200   : > { %v9588_v56 = vpop.f32.mrf.mxu1 }
 0x201   : > { %v9592_v36 = vadd.f32 %v6828_v27, %v3848_v7  ;;  %v9596_v37 = vpop.f32.mrf.mxu0 }
 0x202   : > { %v9594_v61 = vpop.f32.mrf.mxu1 }
 0x203   : > { %v6836_v8 = vpop.f32.mrf.mxu0 }
 0x204   : > { %v9598_v17 = vpop.f32.mrf.mxu1 }
 0x205   : > { %v9600_v58 = vpop.f32.mrf.mxu0 }
 0x206   : > { %v6784_v16 = vpop.f32.mrf.mxu1 }
 0x207   : > { %v3852_v45 = vadd.f32 %v6784_v16, %v9494_v33  ;;  %v9605_v51 = vpop.f32.mrf.mxu0 }
 0x208   : > { %v9603_v38 = vpop.f32.mrf.mxu1 }
 0x209   : > { %v9607_v5 = vadd.f32 %v6832_v54, %v3852_v45  ;;  %v9611_v59 = vpop.f32.mrf.mxu0 }
 0x20a   : > { %v9609_v47 = vpop.f32.mrf.mxu1 }
 0x20b   : > { %v6840_v27 = vpop.f32.mrf.mxu0 }
 0x20c   : > { %v9613_v13 = vpop.f32.mrf.mxu1 }
 0x20d   : > { %v9615_v62 = vpop.f32.mrf.mxu0 }
 0x20e   : > { %v6788_v50 = vpop.f32.mrf.mxu1 }
 0x20f   : > { %v3856_v29 = vadd.f32 %v6788_v50, %v9506_v32  ;;  %v9620_v33 = vpop.f32.mrf.mxu0 }
 0x210   : > { %v9618_v39 = vpop.f32.mrf.mxu1  ;;  %10017 = vst [vmem:[#allocation10_spill] sm:$0xff] %v9620_v33 }
 0x211   : > { %v9622_v52 = vadd.f32 %v6836_v8, %v3856_v29  ;;  %v9626_v48 = vpop.f32.mrf.mxu0 }
 0x212   : > { %v9624_v54 = vpop.f32.mrf.mxu1  ;;  %10018 = vst [vmem:[#allocation13_spill] sm:$0xff] %v9626_v48 }
 0x213   : > { %v6844_v16 = vpop.f32.mrf.mxu0 }
 0x214   : > { %v9628_v7 = vpop.f32.mrf.mxu1 }
 0x215   : > { %v9630_v2 = vpop.f32.mrf.mxu0 }
 0x216   : > { %v6792_v45 = vpop.f32.mrf.mxu1  ;;  %10019 = vst [vmem:[#allocation15_spill] sm:$0xff] %v9630_v2 }
 0x217   : > { %v3860_v49 = vadd.f32 %v6792_v45, %v9518_v43  ;;  %v9635_v32 = vpop.f32.mrf.mxu0 }
 0x218   : > { %v9633_v40 = vpop.f32.mrf.mxu1  ;;  %10020 = vst [vmem:[#allocation16_spill] sm:$0xff] %v9635_v32 }
 0x219   : > { %v9637_v50 = vadd.f32 %v6840_v27, %v3860_v49  ;;  %v9641_v29 = vpop.f32.mrf.mxu0 }
 0x21a   : > { %v9639_v8 = vpop.f32.mrf.mxu1  ;;  %10022 = vst [vmem:[#allocation17_spill] sm:$0xff] %v9641_v29 }
 0x21b   : > { %10021 = vst [vmem:[#allocation18_spill] sm:$0xff] %v9637_v50  ;;  %v6848_v25 = vpop.f32.mrf.mxu0 }
 0x21c   : > { %v9643_v60 = vpop.f32.mrf.mxu1 }
 0x21d   : > { %v9645_v31 = vpop.f32.mrf.mxu0 }
 0x21e   : > { %v6796_v12 = vpop.f32.mrf.mxu1  ;;  %10023 = vst [vmem:[#allocation8_spill] sm:$0xff] %v9645_v31 }
 0x21f   : > { %v3864_v2 = vadd.f32 %v6796_v12, %v9530_v34  ;;  %v9650_v43 = vpop.f32.mrf.mxu0 }
 0x220   : > { %v9648_v24 = vpop.f32.mrf.mxu1  ;;  %10025 = vst [vmem:[#allocation20_spill] sm:$0xff] %v9650_v43 }
 0x221   : > { %10024 = vst [vmem:[#allocation9_spill] sm:$0xff] %v9648_v24  ;;  %v9652_v45 = vadd.f32 %v6844_v16, %v3864_v2  ;;  %v9656_v27 = vpop.f32.mrf.mxu0 }
 0x222   : > { %v9654_v49 = vpop.f32.mrf.mxu1  ;;  %10028 = vst [vmem:[#allocation24_spill] sm:$0xff] %v9656_v27 }
 0x223   : > { %10026 = vst [vmem:[#allocation22_spill] sm:$0xff] %v9652_v45  ;;  %10027 = vst [vmem:[#allocation23_spill] sm:$0xff] %v9654_v49  ;;  %v6852_v29 = vpop.f32.mrf.mxu0 }
 0x224   : > { %v9658_v32 = vpop.f32.mrf.mxu1 }
 0x225   : > { %10029 = vst [vmem:[#allocation25_spill] sm:$0xff] %v9658_v32  ;;  %v9660_v48 = vpop.f32.mrf.mxu0 }
 0x226   : > { %v6800_v35 = vpop.f32.mrf.mxu1  ;;  %10030 = vst [vmem:[#allocation26_spill] sm:$0xff] %v9660_v48 }
 0x227   : > { %v3868_v31 = vadd.f32 %v6800_v35, %v9542_v53  ;;  %v9665_v34 = vpop.f32.mrf.mxu0 }
 0x228   : > { %v9663_v50 = vpop.f32.mrf.mxu1  ;;  %10032 = vst [vmem:[#allocation27_spill] sm:$0xff] %v9665_v34 }
 0x229   : > { %10031 = vst [vmem:[#allocation4_spill] sm:$0xff] %v9663_v50  ;;  %v9667_v12 = vadd.f32 %v6848_v25, %v3868_v31  ;;  %v9671_v16 = vpop.f32.mrf.mxu0 }
 0x22a   : > { %v9669_v2 = vpop.f32.mrf.mxu1  ;;  %10035 = vst [vmem:[#allocation30_spill] sm:$0xff] %v9671_v16  ;;  %v3845_v16 = vadd.f32 %v9577_v14, %v9476_v9  ;;  %v3846_v9 = vadd.f32 %v9588_v56, %v9485_v18 }
 0x22b   : > { %10033 = vst [vmem:[#allocation28_spill] sm:$0xff] %v9667_v12  ;;  %10034 = vst [vmem:[#allocation29_spill] sm:$0xff] %v9669_v2  ;;  %v6920_v27 = vpop.f32.mrf.mxu0  ;;  %v3843_v2 = vadd.f32 %v9583_v3, %v9479_v46  ;;  %v3849_v46 = vadd.f32 %v9594_v61, %v9488_v6 }
 0x22c   : > { %v9673_v43 = vpop.f32.mrf.mxu1  ;;  %v4232_v61 = vadd.f32 %v9567_v26, %v3846_v9 }
 0x22d   : > { %10036 = vst [vmem:[#allocation31_spill] sm:$0xff] %v9673_v43  ;;  %v5351_v32 = vpop.f32.mrf.mxu0 }
 0x22e   : > { %v6804_v45 = vpop.f32.mrf.mxu1 }
 0x22f   : > { %v3872_v49 = vadd.f32 %v6804_v45, %v9556_v44  ;;  %v6921_v35 = vpop.f32.mrf.mxu0 }
 0x230   : > { %v9676_v48 = vpop.f32.mrf.mxu1 }
 0x231   : > { %10037 = vst [vmem:[#allocation32_spill] sm:$0xff] %v9676_v48  ;;  %v9678_v53 = vadd.f32 %v6852_v29, %v3872_v49  ;;  %v5354_v31 = vpop.f32.mrf.mxu0  ;;  %v4231_v48 = vadd.f32 %v9554_v11, %v3845_v16 }
 0x232   : > { %v9680_v50 = vpop.f32.mrf.mxu1 }
 0x233   : > { %10038 = vst [vmem:[#allocation33_spill] sm:$0xff] %v9678_v53  ;;  %10039 = vst [vmem:[#allocation34_spill] sm:$0xff] %v9680_v50  ;;  %v6924_v34 = vpop.f32.mrf.mxu0  ;;  %v4229_v50 = vadd.f32 %v9559_v30, %v3843_v2 }
 0x234   : > { %v9682_v25 = vpop.f32.mrf.mxu1 }
 0x235   : > { %10040 = vst [vmem:[#allocation35_spill] sm:$0xff] %v9682_v25  ;;  %v5367_v43 = vpop.f32.mrf.mxu0 }
 0x236   : > { %v6872_v12 = vpop.f32.mrf.mxu1 }
 0x237   : > { %v6925_v45 = vpop.f32.mrf.mxu0  ;;  %v4983_v29 = vadd.f32 %v6872_v12, %v9574_v21 }
 0x238   : > { %v4854_v44 = vpop.f32.mrf.mxu1 }
 0x239   : > { %v4981_v49 = vadd.f32 %v4854_v44, %v9581_v55  ;;  %v5370_v25 = vpop.f32.mrf.mxu0  ;;  %v5480_v11 = vadd.f32 %v6920_v27, %v4983_v29  ;;  %v3847_v55 = vadd.f32 %v9598_v17, %v9491_v28 }
 0x23a   : > { %v6873_v53 = vpop.f32.mrf.mxu1 }
 0x23b   : > { %v4984_v24 = vadd.f32 %v6873_v53, %v4231_v48  ;;  %v9696_v3 = vpop.f32.mrf.mxu0  ;;  %v5478_v16 = vadd.f32 %v5351_v32, %v4981_v49  ;;  %v4233_v2 = vadd.f32 %v9579_v19, %v3847_v55  ;;  %v5709_v44 = vmul.f32 %v5480_v11, %v5480_v11 }
 0x23c   : > { %v4857_v14 = vpop.f32.mrf.mxu1  ;;  %v3853_v49 = vadd.f32 %v9609_v47, %v9500_v15 }
 0x23d   : > { %v5481_v33 = vadd.f32 %v6921_v35, %v4984_v24  ;;  %v4982_v21 = vadd.f32 %v4857_v14, %v4229_v50  ;;  %v5383_v30 = vpop.f32.mrf.mxu0  ;;  %v4235_v24 = vadd.f32 %v9572_v23, %v3849_v46  ;;  %v5707_v17 = vmul.f32 %v5478_v16, %v5478_v16 }
 0x23e   : > { %v6876_v18 = vpop.f32.mrf.mxu1  ;;  %v3850_v35 = vadd.f32 %v9603_v38, %v9497_v1 }
 0x23f   : > { %v6215_v6 = vpack.c.bf16 %v5481_v33, %v5480_v11  ;;  %v5479_v56 = vadd.f32 %v5354_v31, %v4982_v21  ;;  %v4987_v48 = vadd.f32 %v6876_v18, %v9592_v36  ;;  %v6929_v28 = vpop.f32.mrf.mxu0  ;;  %v5710_v9 = vmul.f32 %v5481_v33, %v5481_v33 }
 0x240   : > { %v4870_v32 = vpop.f32.mrf.mxu1  ;;  %v4236_v18 = vadd.f32 %v9585_v10, %v3850_v35 }
 0x241   : > { %6287 = vst [vmem:[%s9705_s25 + $0x8] sm:$0xff] %v6215_v6   ;;  %v6210_v50 = vpack.c.bf16 %v5479_v56, %v5478_v16  ;;  %v5670_v27 = vadd.f32 %v5479_v56, %v5478_v16  ;;  %v5708_v12 = vmul.f32 %v5479_v56, %v5479_v56  ;;  %v4985_v53 = vadd.f32 %v4870_v32, %v4232_v61  ;;  %v5386_v26 = vpop.f32.mrf.mxu0 }
 0x242   : > { %v6877_v31 = vpop.f32.mrf.mxu1  ;;  %v5484_v46 = vadd.f32 %v6924_v34, %v4987_v48 }
 0x243   : > { %6211 = vst [vmem:[%s9705_s25] sm:$0xff] %v6210_v50   ;;  %v5671_v23 = vadd.f32 %v5670_v27, %v5480_v11  ;;  %v5739_v29 = vadd.f32 %v5708_v12, %v5707_v17  ;;  %v4988_v36 = vadd.f32 %v6877_v31, %v4235_v24  ;;  %v5482_v14 = vadd.f32 %v5367_v43, %v4985_v53 }
 0x244   : > { %v4873_v16 = vpop.f32.mrf.mxu1  ;;  %v9717_v21 = vpop.f32.mrf.mxu0  ;;  %v3851_v11 = vadd.f32 %v9613_v13, %v9503_v57 }
 0x245   : > { %v5740_v19 = vadd.f32 %v5739_v29, %v5709_v44  ;;  %v5672_v55 = vadd.f32 %v5671_v23, %v5481_v33  ;;  %v5485_v1 = vadd.f32 %v6925_v45, %v4988_v36  ;;  %v4986_v38 = vadd.f32 %v4873_v16, %v4233_v2 }
 0x246   : > { %v6880_v6 = vpop.f32.mrf.mxu1  ;;  %v9722_v56 = vpop.f32.mrf.mxu0  ;;  %v5711_v47 = vmul.f32 %v5482_v14, %v5482_v14  ;;  %v4239_v33 = vadd.f32 %v9590_v0, %v3853_v49  ;;  %v4237_v12 = vadd.f32 %v9596_v37, %v3851_v11  ;;  %v3857_v2 = vadd.f32 %v9624_v54, %v9512_v4 }
 0x247   : > { %v5673_v15 = vadd.f32 %v5672_v55, %v5482_v14  ;;  %v5741_v34 = vadd.f32 %v5740_v19, %v5710_v9  ;;  %v6225_v43 = vpack.c.bf16 %v5485_v1, %v5484_v46  ;;  %v5483_v61 = vadd.f32 %v5370_v25, %v4986_v38 }
 0x248   : > { %v4886_v24 = vpop.f32.mrf.mxu1  ;;  %v6933_v48 = vpop.f32.mrf.mxu0  ;;  %v4991_v10 = vadd.f32 %v6880_v6, %v9607_v5  ;;  %v3854_v25 = vadd.f32 %v9618_v39, %v9509_v42  ;;  %v5713_v0 = vmul.f32 %v5484_v46, %v5484_v46  ;;  %v5714_v37 = vmul.f32 %v5485_v1, %v5485_v1 }
 0x249   : > { %v5742_v45 = vadd.f32 %v5741_v34, %v5711_v47  ;;  %6289 = vst [vmem:[%s9705_s25 + $0x18] sm:$0xff] %v6225_v43   ;;  %v4989_v32 = vadd.f32 %v4886_v24, %v4236_v18  ;;  %v6220_v17 = vpack.c.bf16 %v5483_v61, %v5482_v14  ;;  %v5674_v57 = vadd.f32 %v5673_v15, %v5483_v61 }
 0x24a   : > { %v5712_v13 = vmul.f32 %v5483_v61, %v5483_v61  ;;  %v6881_v50 = vpop.f32.mrf.mxu1  ;;  %v5402_v27 = vpop.f32.mrf.mxu0  ;;  %v5488_v29 = vadd.f32 %v9696_v3, %v4991_v10  ;;  %v4240_v4 = vadd.f32 %v9600_v58, %v3854_v25  ;;  %v3855_v54 = vadd.f32 %v9628_v7, %v9515_v22 }
 0x24b   : > { %v4992_v35 = vadd.f32 %v6881_v50, %v4239_v33  ;;  %6288 = vst [vmem:[%s9705_s25 + $0x10] sm:$0xff] %v6220_v17   ;;  %v5675_v53 = vadd.f32 %v5674_v57, %v5484_v46  ;;  %v5486_v5 = vadd.f32 %v5383_v30, %v4989_v32  ;;  %v4243_v16 = vadd.f32 %v9605_v51, %v3857_v2 }
 0x24c   : > { %v5743_v31 = vadd.f32 %v5742_v45, %v5712_v13  ;;  %v4889_v44 = vpop.f32.mrf.mxu1  ;;  %v9733_v23 = vpop.f32.mrf.mxu0  ;;  %v4241_v7 = vadd.f32 %v9611_v59, %v3855_v54  ;;  %v3858_v51 = vadd.f32 %v9633_v40, %v9521_v63  ;;  %v5717_v43 = vmul.f32 %v5488_v29, %v5488_v29 }
 0x24d   : > { %v5489_v36 = vadd.f32 %v6929_v28, %v4992_v35  ;;  %v4990_v49 = vadd.f32 %v4889_v44, %v4237_v12  ;;  %v5676_v42 = vadd.f32 %v5675_v53, %v5485_v1  ;;  %v5715_v3 = vmul.f32 %v5486_v5, %v5486_v5  ;;  %v10041_v12 = vld [vmem:[#allocation10_spill] sm:$0xff] }
 0x24e   : > { %v5744_v9 = vadd.f32 %v5743_v31, %v5713_v0  ;;  %v6884_v39 = vpop.f32.mrf.mxu1  ;;  %v9736_v14 = vpop.f32.mrf.mxu0  ;;  %v3859_v13 = vadd.f32 %v9643_v60, %v9527_v20  ;;  %v10043_v60 = vld [vmem:[#allocation13_spill] sm:$0xff] }
 0x24f   : > { %v6235_v30 = vpack.c.bf16 %v5489_v36, %v5488_v29  ;;  %v5487_v46 = vadd.f32 %v5386_v26, %v4990_v49  ;;  %v5677_v19 = vadd.f32 %v5676_v42, %v5486_v5  ;;  %v4995_v11 = vadd.f32 %v6884_v39, %v9622_v52  ;;  %v10046_v39 = vld [vmem:[#allocation11_spill] sm:$0xff] }
 0x250   : > { %v5745_v28 = vadd.f32 %v5744_v9, %v5714_v37  ;;  %v4902_v55 = vpop.f32.mrf.mxu1  ;;  %v6937_v38 = vpop.f32.mrf.mxu0  ;;  %v3861_v26 = vadd.f32 %v9639_v8, %v9524_v41  ;;  %v5718_v17 = vmul.f32 %v5489_v36, %v5489_v36  ;;  %v4244_v8 = vadd.f32 %v9615_v62, %v3858_v51  ;;  %v10044_v37 = vld [vmem:[#allocation3_spill] sm:$0xff]  ;;  %v10045_v9 = vld [vmem:[#allocation9_spill] sm:$0xff] }
 0x251   : > { %6291 = vst [vmem:[%s9705_s25 + $0x28] sm:$0xff] %v6235_v30   ;;  %v6230_v1 = vpack.c.bf16 %v5487_v46, %v5486_v5  ;;  %v5716_v18 = vmul.f32 %v5487_v46, %v5487_v46  ;;  %v4993_v6 = vadd.f32 %v4902_v55, %v4240_v4  ;;  %v5678_v15 = vadd.f32 %v5677_v19, %v5487_v46  ;;  %v10042_v5 = vld [vmem:[#allocation18_spill] sm:$0xff]  ;;  %v10047_v4 = vld [vmem:[#allocation23_spill] sm:$0xff] }
 0x252   : > { %v5746_v58 = vadd.f32 %v5745_v28, %v5715_v3  ;;  %v6885_v47 = vpop.f32.mrf.mxu1  ;;  %v5418_v22 = vpop.f32.mrf.mxu0  ;;  %v5492_v10 = vadd.f32 %v9717_v21, %v4995_v11  ;;  %v4247_v25 = vadd.f32 %v10041_v12, %v3861_v26  ;;  %v3862_v42 = vadd.f32 %v10045_v9, %v10044_v37  ;;  %v10048_v51 = vld [vmem:[#allocation15_spill] sm:$0xff]  ;;  %v10053_v12 = vld [vmem:[#allocation17_spill] sm:$0xff] }
 0x253   : > { %6290 = vst [vmem:[%s9705_s25 + $0x20] sm:$0xff] %v6230_v1   ;;  %v4996_v34 = vadd.f32 %v6885_v47, %v4243_v16  ;;  %v5679_v61 = vadd.f32 %v5678_v15, %v5488_v29  ;;  %v5490_v52 = vadd.f32 %v9722_v56, %v4993_v6  ;;  %v3865_v54 = vadd.f32 %v10047_v4, %v10046_v39 }
 0x254   : > { %v5747_v24 = vadd.f32 %v5746_v58, %v5716_v18  ;;  %v4905_v33 = vpop.f32.mrf.mxu1  ;;  %v9751_v45 = vpop.f32.mrf.mxu0  ;;  %v5721_v46 = vmul.f32 %v5492_v10, %v5492_v10  ;;  %v4248_v26 = vadd.f32 %v10048_v51, %v3862_v42 }
 0x255   : > { %v5493_v32 = vadd.f32 %v6933_v48, %v4996_v34  ;;  %v4994_v59 = vadd.f32 %v4905_v33, %v4241_v7  ;;  %v5680_v40 = vadd.f32 %v5679_v61, %v5489_v36  ;;  %v5719_v21 = vmul.f32 %v5490_v52, %v5490_v52  ;;  %v10049_v34 = vld [vmem:[#allocation7_spill] sm:$0xff] }
 0x256   : > { %v5748_v63 = vadd.f32 %v5747_v24, %v5717_v43  ;;  %v6888_v57 = vpop.f32.mrf.mxu1  ;;  %v9754_v41 = vpop.f32.mrf.mxu0  ;;  %v10050_v43 = vld [vmem:[#allocation25_spill] sm:$0xff] }
 0x257   : > { %v6245_v56 = vpack.c.bf16 %v5493_v32, %v5492_v10  ;;  %v5491_v50 = vadd.f32 %v5402_v27, %v4994_v59  ;;  %v5681_v2 = vadd.f32 %v5680_v40, %v5490_v52  ;;  %v4999_v44 = vadd.f32 %v6888_v57, %v10042_v5 }
 0x258   : > { %v5749_v48 = vadd.f32 %v5748_v63, %v5718_v17  ;;  %v4918_v35 = vpop.f32.mrf.mxu1  ;;  %v6941_v0 = vpop.f32.mrf.mxu0  ;;  %v4245_v27 = vadd.f32 %v10043_v60, %v3859_v13  ;;  %v5722_v6 = vmul.f32 %v5493_v32, %v5493_v32  ;;  %v3863_v61 = vadd.f32 %v10050_v43, %v10049_v34  ;;  %v10052_v63 = vld [vmem:[#allocation22_spill] sm:$0xff] }
 0x259   : > { %6293 = vst [vmem:[%s9705_s25 + $0x38] sm:$0xff] %v6245_v56   ;;  %v6240_v53 = vpack.c.bf16 %v5491_v50, %v5490_v52  ;;  %v5720_v31 = vmul.f32 %v5491_v50, %v5491_v50  ;;  %v4997_v29 = vadd.f32 %v4918_v35, %v4244_v8  ;;  %v5682_v36 = vadd.f32 %v5681_v2, %v5491_v50  ;;  %v10051_v52 = vld [vmem:[#allocation16_spill] sm:$0xff]  ;;  %v10057_v35 = vld [vmem:[#allocation29_spill] sm:$0xff] }
 0x25a   : > { %v5750_v62 = vadd.f32 %v5749_v48, %v5719_v21  ;;  %v6889_v49 = vpop.f32.mrf.mxu1  ;;  %v5434_v20 = vpop.f32.mrf.mxu0  ;;  %v5496_v1 = vadd.f32 %v9733_v23, %v4999_v44  ;;  %v4251_v33 = vadd.f32 %v10051_v52, %v3865_v54  ;;  %v10055_v2 = vld [vmem:[#allocation4_spill] sm:$0xff]  ;;  %v10056_v48 = vld [vmem:[#allocation14_spill] sm:$0xff] }
 0x25b   : > { %6292 = vst [vmem:[%s9705_s25 + $0x30] sm:$0xff] %v6240_v53   ;;  %v5000_v30 = vadd.f32 %v6889_v49, %v4247_v25  ;;  %v5683_v16 = vadd.f32 %v5682_v36, %v5492_v10  ;;  %v5494_v3 = vadd.f32 %v9736_v14, %v4997_v29  ;;  %v4249_v25 = vadd.f32 %v10053_v12, %v3863_v61  ;;  %v10058_v54 = vld [vmem:[#allocation8_spill] sm:$0xff] }
 0x25c   : > { %v5751_v19 = vadd.f32 %v5750_v62, %v5720_v31  ;;  %v4921_v28 = vpop.f32.mrf.mxu1  ;;  %v9769_v55 = vpop.f32.mrf.mxu0  ;;  %v3869_v53 = vadd.f32 %v10057_v35, %v10056_v48  ;;  %v5725_v5 = vmul.f32 %v5496_v1, %v5496_v1  ;;  %v10065_v52 = vld [vmem:[#allocation32_spill] sm:$0xff]  ;;  %v10068_v48 = vld [vmem:[#allocation26_spill] sm:$0xff] }
 0x25d   : > { %v5497_v18 = vadd.f32 %v6937_v38, %v5000_v30  ;;  %v4998_v11 = vadd.f32 %v4921_v28, %v4245_v27  ;;  %v5684_v15 = vadd.f32 %v5683_v16, %v5493_v32  ;;  %v5723_v23 = vmul.f32 %v5494_v3, %v5494_v3  ;;  %v10060_v16 = vld [vmem:[#allocation31_spill] sm:$0xff] }
 0x25e   : > { %v5752_v58 = vadd.f32 %v5751_v19, %v5721_v46  ;;  %v6892_v47 = vpop.f32.mrf.mxu1  ;;  %v9772_v7 = vpop.f32.mrf.mxu0  ;;  %v10059_v46 = vld [vmem:[#allocation6_spill] sm:$0xff] }
 0x25f   : > { %v6255_v14 = vpack.c.bf16 %v5497_v18, %v5496_v1  ;;  %v5495_v24 = vadd.f32 %v5418_v22, %v4998_v11  ;;  %v5685_v10 = vadd.f32 %v5684_v15, %v5494_v3  ;;  %v5003_v40 = vadd.f32 %v6892_v47, %v10052_v63  ;;  %v10054_v22 = vld [vmem:[#allocation12_spill] sm:$0xff] }
 0x260   : > { %v5753_v38 = vadd.f32 %v5752_v58, %v5722_v6  ;;  %v4934_v59 = vpop.f32.mrf.mxu1  ;;  %v6945_v50 = vpop.f32.mrf.mxu0  ;;  %v3866_v21 = vadd.f32 %v10055_v2, %v10054_v22  ;;  %v5726_v37 = vmul.f32 %v5497_v18, %v5497_v18  ;;  %v3867_v19 = vadd.f32 %v10060_v16, %v10059_v46  ;;  %v10073_v16 = vld [vmem:[#allocation30_spill] sm:$0xff] }
 0x261   : > { %6295 = vst [vmem:[%s9705_s25 + $0x48] sm:$0xff] %v6255_v14   ;;  %v6250_v17 = vpack.c.bf16 %v5495_v24, %v5494_v3  ;;  %v5724_v32 = vmul.f32 %v5495_v24, %v5495_v24  ;;  %v5001_v57 = vadd.f32 %v4934_v59, %v4248_v26  ;;  %v5686_v13 = vadd.f32 %v5685_v10, %v5495_v24  ;;  %v10063_v14 = vld [vmem:[#allocation24_spill] sm:$0xff]  ;;  %v10066_v10 = vld [vmem:[#allocation21_spill] sm:$0xff] }
 0x262   : > { %v5754_v8 = vadd.f32 %v5753_v38, %v5723_v23  ;;  %v6893_v56 = vpop.f32.mrf.mxu1  ;;  %v5500_v49 = vadd.f32 %v9751_v45, %v5003_v40  ;;  %v5450_v4 = vpop.f32.mrf.mxu0  ;;  %v4252_v30 = vadd.f32 %v10058_v54, %v3866_v21  ;;  %v4253_v24 = vadd.f32 %v10063_v14, %v3867_v19  ;;  %v10067_v23 = vld [vmem:[#allocation34_spill] sm:$0xff] }
 0x263   : > { %6294 = vst [vmem:[%s9705_s25 + $0x40] sm:$0xff] %v6250_v17   ;;  %v5004_v31 = vadd.f32 %v6893_v56, %v4251_v33  ;;  %v5687_v44 = vadd.f32 %v5686_v13, %v5496_v1  ;;  %v5498_v62 = vadd.f32 %v9754_v41, %v5001_v57  ;;  %v10061_v1 = vld [vmem:[#allocation20_spill] sm:$0xff]  ;;  %v3873_v38 = vadd.f32 %v10067_v23, %v10066_v10 }
 0x264   : > { %v5755_v29 = vadd.f32 %v5754_v8, %v5724_v32  ;;  %v4937_v36 = vpop.f32.mrf.mxu1  ;;  %v4255_v41 = vadd.f32 %v10061_v1, %v3869_v53  ;;  %v6948_v61 = vpop.f32.mrf.mxu0  ;;  %v5729_v17 = vmul.f32 %v5500_v49, %v5500_v49  ;;  %v10069_v53 = vld [vmem:[#allocation5_spill] sm:$0xff] }
 0x265   : > { %v5501_v60 = vadd.f32 %v6941_v0, %v5004_v31  ;;  %v5002_v27 = vadd.f32 %v4937_v36, %v4249_v25  ;;  %v5688_v42 = vadd.f32 %v5687_v44, %v5497_v18  ;;  %v5727_v45 = vmul.f32 %v5498_v62, %v5498_v62  ;;  %v10062_v18 = vld [vmem:[#allocation28_spill] sm:$0xff]  ;;  %v10070_v31 = vld [vmem:[#allocation35_spill] sm:$0xff] }
 0x266   : > { %v5756_v9 = vadd.f32 %v5755_v29, %v5725_v5  ;;  %v6896_v39 = vpop.f32.mrf.mxu1  ;;  %v5463_v21 = vpop.f32.mrf.mxu0  ;;  %v3871_v5 = vadd.f32 %v10070_v31, %v10069_v53 }
 0x267   : > { %v6265_v3 = vpack.c.bf16 %v5501_v60, %v5500_v49  ;;  %v5499_v28 = vadd.f32 %v5434_v20, %v5002_v27  ;;  %v5689_v11 = vadd.f32 %v5688_v42, %v5498_v62  ;;  %v5007_v47 = vadd.f32 %v6896_v39, %v10062_v18  ;;  %v10064_v20 = vld [vmem:[#allocation19_spill] sm:$0xff] }
 0x268   : > { %v5757_v0 = vadd.f32 %v5756_v9, %v5726_v37  ;;  %v4950_v6 = vpop.f32.mrf.mxu1  ;;  %v3870_v33 = vadd.f32 %v10065_v52, %v10064_v20  ;;  %v5730_v12 = vmul.f32 %v5501_v60, %v5501_v60  ;;  %v6949_v46 = vpop.f32.mrf.mxu0  ;;  %v4257_v19 = vadd.f32 %v10073_v16, %v3871_v5 }
 0x269   : > { %6297 = vst [vmem:[%s9705_s25 + $0x58] sm:$0xff] %v6265_v3   ;;  %v6260_v58 = vpack.c.bf16 %v5499_v28, %v5498_v62  ;;  %v5728_v15 = vmul.f32 %v5499_v28, %v5499_v28  ;;  %v5005_v51 = vadd.f32 %v4950_v6, %v4252_v30  ;;  %v5690_v34 = vadd.f32 %v5689_v11, %v5499_v28  ;;  %v10071_v62 = vld [vmem:[#allocation27_spill] sm:$0xff] }
 0x26a   : > { %v5758_v26 = vadd.f32 %v5757_v0, %v5727_v45  ;;  %v6897_v43 = vpop.f32.mrf.mxu1  ;;  %v5504_v8 = vadd.f32 %v9769_v55, %v5007_v47  ;;  %v4256_v35 = vadd.f32 %v10068_v48, %v3870_v33  ;;  %v5466_v47 = vpop.f32.mrf.mxu0 }
 0x26b   : > { %6296 = vst [vmem:[%s9705_s25 + $0x50] sm:$0xff] %v6260_v58   ;;  %v5008_v59 = vadd.f32 %v6897_v43, %v4255_v41  ;;  %v5691_v32 = vadd.f32 %v5690_v34, %v5500_v49  ;;  %v5502_v40 = vadd.f32 %v9772_v7, %v5005_v51  ;;  %v4259_v7 = vadd.f32 %v10071_v62, %v3873_v38 }
 0x26c   : > { %v5759_v63 = vadd.f32 %v5758_v26, %v5728_v15  ;;  %v4953_v57 = vpop.f32.mrf.mxu1  ;;  %v5733_v3 = vmul.f32 %v5504_v8, %v5504_v8 }
 0x26d   : > { %v5505_v13 = vadd.f32 %v6945_v50, %v5008_v59  ;;  %v5006_v56 = vadd.f32 %v4953_v57, %v4253_v24  ;;  %v5692_v22 = vadd.f32 %v5691_v32, %v5501_v60  ;;  %v5731_v55 = vmul.f32 %v5502_v40, %v5502_v40  ;;  %v10072_v60 = vld [vmem:[#allocation33_spill] sm:$0xff] }
 0x26e   : > { %v5760_v25 = vadd.f32 %v5759_v63, %v5729_v17  ;;  %v6900_v2 = vpop.f32.mrf.mxu1 }
 0x26f   : > { %v6275_v44 = vpack.c.bf16 %v5505_v13, %v5504_v8  ;;  %v5503_v29 = vadd.f32 %v5450_v4, %v5006_v56  ;;  %v5693_v36 = vadd.f32 %v5692_v22, %v5502_v40  ;;  %v5011_v9 = vadd.f32 %v6900_v2, %v10072_v60 }
 0x270   : > { %v5761_v50 = vadd.f32 %v5760_v25, %v5730_v12  ;;  %v4966_v49 = vpop.f32.mrf.mxu1  ;;  %v5734_v58 = vmul.f32 %v5505_v13, %v5505_v13 }
 0x271   : > { %6299 = vst [vmem:[%s9705_s25 + $0x68] sm:$0xff] %v6275_v44   ;;  %v6270_v27 = vpack.c.bf16 %v5503_v29, %v5502_v40  ;;  %v5732_v37 = vmul.f32 %v5503_v29, %v5503_v29  ;;  %v5009_v42 = vadd.f32 %v4966_v49, %v4256_v35  ;;  %v5694_v54 = vadd.f32 %v5693_v36, %v5503_v29 }
 0x272   : > { %v5762_v39 = vadd.f32 %v5761_v50, %v5731_v55  ;;  %v6901_v30 = vpop.f32.mrf.mxu1  ;;  %v5508_v45 = vadd.f32 %v6948_v61, %v5011_v9 }
 0x273   : > { %6298 = vst [vmem:[%s9705_s25 + $0x60] sm:$0xff] %v6270_v27   ;;  %v5012_v4 = vadd.f32 %v6901_v30, %v4259_v7  ;;  %v5695_v28 = vadd.f32 %v5694_v54, %v5504_v8  ;;  %v5506_v41 = vadd.f32 %v5463_v21, %v5009_v42 }
 0x274   : > { %v5763_v1 = vadd.f32 %v5762_v39, %v5732_v37  ;;  %v4969_v11 = vpop.f32.mrf.mxu1  ;;  %v5737_v10 = vmul.f32 %v5508_v45, %v5508_v45 }
 0x275   : > { %v5509_v0 = vadd.f32 %v6949_v46, %v5012_v4  ;;  %v5010_v6 = vadd.f32 %v4969_v11, %v4257_v19  ;;  %v5696_v18 = vadd.f32 %v5695_v28, %v5505_v13  ;;  %v5735_v43 = vmul.f32 %v5506_v41, %v5506_v41 }
 0x276   : > { %v5764_v15 = vadd.f32 %v5763_v1, %v5733_v3 }
 0x277   : > { %v6285_v51 = vpack.c.bf16 %v5509_v0, %v5508_v45  ;;  %v5507_v26 = vadd.f32 %v5466_v47, %v5010_v6  ;;  %v5697_v34 = vadd.f32 %v5696_v18, %v5506_v41  ;;  %v5738_v38 = vmul.f32 %v5509_v0, %v5509_v0 }
 0x278   : > { %v5765_v14 = vadd.f32 %v5764_v15, %v5734_v58 }
 0x279   : > { %6301 = vst [vmem:[%s9705_s25 + $0x78] sm:$0xff] %v6285_v51   ;;  %v6280_v24 = vpack.c.bf16 %v5507_v26, %v5506_v41  ;;  %v5736_v20 = vmul.f32 %v5507_v26, %v5507_v26  ;;  %v5698_v33 = vadd.f32 %v5697_v34, %v5507_v26 }
 0x27a   : > { %v5766_v52 = vadd.f32 %v5765_v14, %v5735_v43 }
 0x27b   : > { %6300 = vst [vmem:[%s9705_s25 + $0x70] sm:$0xff] %v6280_v24   ;;  %v5699_v61 = vadd.f32 %v5698_v33, %v5508_v45 }
 0x27c   : > { %v5767_v23 = vadd.f32 %v5766_v52, %v5736_v20 }
 0x27d   : > { %v5700_v59 = vadd.f32 %v5699_v61, %v5509_v0 }
 0x27e   : > { %v5768_v17 = vadd.f32 %v5767_v23, %v5737_v10 }
 0x27f   : > { %v5701_v32 = vrot.slane %v5700_v59, 4 }
 0x280   : > { %v5769_v63 = vadd.f32 %v5768_v17, %v5738_v38 }
 0x281   : > { %v5702_v40 = vadd.f32 %v5701_v32, %v5700_v59 }
 0x282   : > { %v5770_v57 = vrot.slane %v5769_v63, 4 }
 0x283   : > { %v5703_v8 = vrot.slane %v5702_v40, 2 }
 0x284   : > { %v5771_v13 = vadd.f32 %v5770_v57, %v5769_v63 }
 0x285   : > { %v5704_v56 = vadd.f32 %v5703_v8, %v5702_v40 }
 0x286   : > { %v5772_v12 = vrot.slane %v5771_v13, 2 }
 0x287   : > { %v5705_v25 = vrot.slane %v5704_v56, 1 }
 0x288   : > { %v5773_v22 = vadd.f32 %v5772_v12, %v5771_v13 }
 0x289   : > { %v5706_v21 = vadd.f32 %v5705_v25, %v5704_v56 }
 0x28a   : > { %v5774_v2 = vrot.slane %v5773_v22, 1 }
 0x28c   : > { %v5775_v48 = vadd.f32 %v5774_v2, %v5773_v22 }
 0x28e   : > { %v5777_v35 = vsel %vm600_vm2, %v5706_v21, %v5775_v48 }
 0x28f   : > { %5778 = vst [vmem:[%s181_s26] sm:$0x3] %v5777_v35 }
 0x290 PF: > { %s14_s12 = sadd.s32 1, %s7130_s12  }
 0x291   : > { %p11_p4 = scmp.ge.s32.totalorder %s14_s12, 4  }
 0x293   :  { %13 = sbr.rel (!%p11_p4) target bundleno = 1 (0x1), region = 72 }

// kernel: building_block_forward.4
= control target key start
LH: loop header
LB: loop body
LE: loop exit
PB: predicated region body
PF: predicated region fallthrough
CT: control target
= control target key end

     0   :  { %s7600_s18 = smov 0   ;;  %s10213_s0 = inlined_call_operand.vmem [shape: bf16[2,16,16,128], index: 0, kind: input, shape index: {}]   ;;  %s10214_s1 = inlined_call_operand.vmem [shape: bf16[1152,128], index: 1, kind: input, shape index: {}]   ;;  %s10215_s2 = inlined_call_operand.vmem [shape: f32[1,128], index: 2, kind: input, shape index: {}]   ;;  %s10216_s3 = inlined_call_operand.vmem [shape: f32[1,128], index: 3, kind: input, shape index: {}]   ;;  %s10217_s4 = inlined_call_operand.vmem [shape: bf16[2,16,16,128], index: 4, kind: output, shape index: {0}]   ;;  %s10218_s5 = inlined_call_operand.vmem [shape: f32[2,2,128], index: 5, kind: output, shape index: {1}]  }
   0x1 LB: > { %s6157_s19 = sadd.s32 4294967295, %s7567_s18   ;;  %p6161_p0 = scmp.ge.s32.totalorder %s7567_s18, 1  ;;  %s7567_s18 = sphi %s7600_s18, %s16_s18  }
   0x2   : > { %p190_p1 = scmp.lt.s32.totalorder %s7567_s18, 3 }
   0x4   : > { %p191_p2 = pnand %p6161_p0, %p190_p1 }
   0x6   : > { %194 = sbr.rel (%p191_p2) target bundleno = 688 (0x2b0), region = 36 }
   0xb   : > { %v7412_v0 = vld [vmem:[%s10214_s1 + $0x78] sm:$0xff]   ;;  %v7614_v1 = vld [vmem:[%s10214_s1 + $0x70] sm:$0xff]   ;;  %v7569_v2 = vmov 0   ;;  %p222_p3 = scmp.lt.s32.totalorder %s6157_s19, 1  ;;  %v7414_v3 = vld [vmem:[%s10214_s1 + $0x68] sm:$0xff]   ;;  %vm885_vm2 = vcmask 1043456  }
   0xc   : > { %427 = vst [vmem:[#allocation2] sm:$0xf] %v7569_v2  ;;  %428 = vst [vmem:[#allocation2 + $0x4] sm:$0xf] %v7569_v2  ;;  %6955 = vmatprep.subr.bf16.mxu0 %v7412_v0  ;;  %7387 = vmatprep.subr.bf16.mxu1 %v7412_v0  ;;  %v7415_v4 = vld [vmem:[%s10214_s1 + $0x60] sm:$0xff]   ;;  %v7416_v20 = vld [vmem:[%s10214_s1 + $0x58] sm:$0xff]  }
   0xd   : > { %429 = vst [vmem:[#allocation2 + $0x8] sm:$0x1] %v7569_v2  ;;  %430 = vst [vmem:[#allocation2 + $0xc] sm:$0xf] %v7569_v2  ;;  %6956 = vmatpush3.bf16.msra.mxu0 %v7412_v0  ;;  %7395 = vmatpush3.bf16.msra.mxu1 %v7412_v0  ;;  %s10464_s19 = smov (!%p222_p3, %s6157_s19), 1  ;;  %vm892_vm5 = vcmask 1040384  }
   0xe   : > { %431 = vst [vmem:[#allocation2 + $0x10] sm:$0xf] %v7569_v2  ;;  %432 = vst [vmem:[#allocation2 + $0x14] sm:$0x1] %v7569_v2  ;;  %6957 = vmatprep.subr.bf16.mxu0 %v7614_v1  ;;  %7388 = vmatprep.subr.bf16.mxu1 %v7614_v1  ;;  %s6499_s26 = sshll.u32 %s10464_s19, 7  ;;  %v7417_v35 = vld [vmem:[%s10214_s1 + $0x50] sm:$0xff]  }
   0xf   : > { %433 = vst [vmem:[#allocation2 + $0x18] sm:$0xf] %v7569_v2  ;;  %434 = vst [vmem:[#allocation2 + $0x1c] sm:$0xf] %v7569_v2  ;;  %s7638_s6 = scalar_lea.vmem %s10213_s0, %s6499_s26  ;;  %vm1066_vm0 = vsmask.f32 3328  ;;  %s10076_s11 = scalar_lea.vmem %s10217_s4, %s6499_s26 }
  0x10   : > { %435 = vst [vmem:[#allocation2 + $0x20] sm:$0x1] %v7569_v2  ;;  %436 = vst [vmem:[#allocation2 + $0x24] sm:$0xf] %v7569_v2  ;;  %vm1067_vm1 = vsmask.f32 7440 }
  0x11   : > { %437 = vst [vmem:[#allocation2 + $0x28] sm:$0xf] %v7569_v2  ;;  %438 = vst [vmem:[#allocation2 + $0x2c] sm:$0x1] %v7569_v2  ;;  %6958 = vmatpush3.bf16.msra.mxu0 %v7614_v1  ;;  %7396 = vmatpush3.bf16.msra.mxu1 %v7614_v1  ;;  %v6566_v13 = vld [vmem:[%s7638_s6] sm:$0xff]   ;;  %v6715_v19 = vld [vmem:[%s7638_s6 + $0x38] sm:$0xff]  }
  0x12   : > { %439 = vst [vmem:[#allocation2 + $0x30] sm:$0xf] %v7569_v2  ;;  %440 = vst [vmem:[#allocation2 + $0x34] sm:$0xf] %v7569_v2  ;;  %6959 = vmatprep.subr.bf16.mxu0 %v7414_v3  ;;  %7389 = vmatprep.subr.bf16.mxu1 %v7414_v3  ;;  %v6567_v16 = vunpack.c.l.bf16 %v6566_v13  ;;  %v6568_v17 = vunpack.c.h.bf16 %v6566_v13  ;;  %v7647_v18 = vld [vmem:[%s10215_s2] ss:$0 sm:$0xff]  ;;  %v6595_v30 = vunpack.c.l.bf16 %v6715_v19  ;;  %v6596_v31 = vunpack.c.h.bf16 %v6715_v19 }
  0x13   : > { %441 = vst [vmem:[#allocation2 + $0x38] sm:$0x1] %v7569_v2  ;;  %442 = vst [vmem:[#allocation2 + $0x3c] sm:$0xf] %v7569_v2  ;;  %v1002_v5 = vld [vmem:[#allocation2] sm:$0xf] }
  0x14   : > { %443 = vst [vmem:[#allocation2 + $0x40] sm:$0xf] %v7569_v2  ;;  %444 = vst [vmem:[#allocation2 + $0x44] sm:$0x1] %v7569_v2  ;;  %v1003_v6 = vld [vmem:[#allocation2 + $0x4] sm:$0xf]  ;;  %v309_v26 = vmul.f32 %v6567_v16, %v7647_v18  ;;  %v310_v27 = vmul.f32 %v6568_v17, %v7647_v18  ;;  %v323_v37 = vmul.f32 %v6595_v30, %v7647_v18 }
  0x15   : > { %445 = vst [vmem:[#allocation2 + $0x48] sm:$0xf] %v7569_v2  ;;  %446 = vst [vmem:[#allocation2 + $0x4c] sm:$0xf] %v7569_v2  ;;  %v7640_v7 = vld [vmem:[#allocation2 + $0x8] sm:$0x1]  ;;  %6960 = vmatpush3.bf16.msra.mxu0 %v7414_v3  ;;  %7397 = vmatpush3.bf16.msra.mxu1 %v7414_v3  ;;  %v324_v38 = vmul.f32 %v6596_v31, %v7647_v18 }
  0x16   : > { %447 = vst [vmem:[#allocation2 + $0x50] sm:$0x1] %v7569_v2  ;;  %448 = vst [vmem:[#allocation2 + $0x54] sm:$0xf] %v7569_v2  ;;  %v1070_v8 = vshrl.u32 %v1002_v5, 16  ;;  %v1073_v9 = vshll.u32 %v1002_v5, 16  ;;  %6961 = vmatprep.subr.bf16.mxu0 %v7415_v4  ;;  %7390 = vmatprep.subr.bf16.mxu1 %v7415_v4 }
  0x17   : > { %449 = vst [vmem:[#allocation2 + $0x58] sm:$0xf] %v7569_v2  ;;  %450 = vst [vmem:[#allocation2 + $0x5c] sm:$0x1] %v7569_v2  ;;  %v1079_v10 = vshll.u32 %v1003_v6, 16  ;;  %v1083_v11 = vshrl.u32 %v1003_v6, 16 }
  0x18   : > { %451 = vst [vmem:[#allocation2 + $0x60] sm:$0xf] %v7569_v2  ;;  %452 = vst [vmem:[#allocation2 + $0x64] sm:$0xf] %v7569_v2  ;;  %v1089_v12 = vshll.u32 %v7640_v7, 16  ;;  %v1072_v14 = vrot.slane %v1070_v8, 4 }
  0x19   : > { %453 = vst [vmem:[#allocation2 + $0x68] sm:$0x1] %v7569_v2  ;;  %454 = vst [vmem:[#allocation2 + $0x6c] sm:$0xf] %v7569_v2  ;;  %v1075_v15 = vrot.slane %v1073_v9, 5  ;;  %v1081_v21 = vrot.slane %v1079_v10, 5  ;;  %6962 = vmatpush3.bf16.msra.mxu0 %v7415_v4  ;;  %7398 = vmatpush3.bf16.msra.mxu1 %v7415_v4 }
  0x1a   : > { %455 = vst [vmem:[#allocation2 + $0x70] sm:$0xf] %v7569_v2  ;;  %456 = vst [vmem:[#allocation2 + $0x74] sm:$0x1] %v7569_v2  ;;  %v1085_v22 = vrot.slane %v1083_v11, 4  ;;  %v1091_v25 = vrot.slane %v1089_v12, 5  ;;  %6963 = vmatprep.subr.bf16.mxu0 %v7416_v20  ;;  %7391 = vmatprep.subr.bf16.mxu1 %v7416_v20 }
  0x1b   : > { %457 = vst [vmem:[#allocation2 + $0x78] sm:$0xf] %v7569_v2  ;;  %458 = vst [vmem:[#allocation2 + $0x7c] sm:$0xf] %v7569_v2  ;;  %v7656_v23 = vld [vmem:[%s10216_s3] ss:$0 sm:$0xff]  ;;  %v1076_v24 = vor.u32 %v1075_v15, %v1072_v14 }
  0x1c   : > { %459 = vst [vmem:[#allocation2 + $0x80] sm:$0x1] %v7569_v2  ;;  %460 = vst [vmem:[#allocation2 + $0x84] sm:$0xf] %v7569_v2  ;;  %v1086_v29 = vor.u32 %v1085_v22, %v1081_v21  ;;  %vm561_vm4 = vsmask.f32 256  ;;  %v347_v33 = vadd.f32 %v7656_v23, %v309_v26  ;;  %v348_v34 = vadd.f32 %v7656_v23, %v310_v27 }
  0x1d   : > { %461 = vst [vmem:[#allocation2 + $0x88] sm:$0xf] %v7569_v2  ;;  %462 = vst [vmem:[#allocation2 + $0x8c] sm:$0x1] %v7569_v2  ;;  %v1077_v32 = vrot.slane %v1076_v24, 4  ;;  %v6716_v42 = vld [vmem:[%s7638_s6 + $0x40] sm:$0xff]   ;;  %v361_v44 = vadd.f32 %v7656_v23, %v323_v37  ;;  %v362_v45 = vadd.f32 %v7656_v23, %v324_v38  ;;  %6964 = vmatpush3.bf16.msra.mxu0 %v7416_v20  ;;  %7399 = vmatpush3.bf16.msra.mxu1 %v7416_v20 }
  0x1e   : > { %463 = vst [vmem:[#allocation2 + $0x90] sm:$0xf] %v7569_v2  ;;  %464 = vst [vmem:[#allocation2 + $0x94] sm:$0xf] %v7569_v2  ;;  %v1087_v36 = vrot.slane %v1086_v29, 4  ;;  %v379_v40 = vmax.f32 %v347_v33, 0.0  ;;  %v6599_v46 = vunpack.c.l.bf16 %v6716_v42  ;;  %v6600_v50 = vunpack.c.h.bf16 %v6716_v42  ;;  %6965 = vmatprep.subr.bf16.mxu0 %v7417_v35  ;;  %7392 = vmatprep.subr.bf16.mxu1 %v7417_v35 }
  0x1f   : > { %465 = vst [vmem:[#allocation2 + $0x98] sm:$0x1] %v7569_v2  ;;  %466 = vst [vmem:[#allocation2 + $0x9c] sm:$0xf] %v7569_v2  ;;  %v380_v41 = vmax.f32 %v348_v34, 0.0  ;;  %v7418_v51 = vld [vmem:[%s10214_s1 + $0x48] sm:$0xff]  }
  0x20   : > { %467 = vst [vmem:[#allocation2 + $0xa0] sm:$0xf] %v7569_v2  ;;  %468 = vst [vmem:[#allocation2 + $0xa4] sm:$0x1] %v7569_v2  ;;  %vm562_vm6 = vsmask.f32 4368  ;;  %v6501_v48 = vpack.c.bf16 %v379_v40, %v379_v40  ;;  %v325_v54 = vmul.f32 %v6599_v46, %v7647_v18  ;;  %v326_v1 = vmul.f32 %v6600_v50, %v7647_v18 }
  0x21   : > { %469 = vst [vmem:[#allocation2 + $0xa8] sm:$0xf] %v7569_v2  ;;  %470 = vst [vmem:[#allocation2 + $0xac] sm:$0xf] %v7569_v2  ;;  %v6502_v49 = vpack.c.bf16 %v380_v41, %v380_v41  ;;  %vm886_vm7 = vsmask.f32 7938  ;;  %6966 = vmatpush3.bf16.msra.mxu0 %v7417_v35  ;;  %7400 = vmatpush3.bf16.msra.mxu1 %v7417_v35 }
  0x22   : > { %471 = vst [vmem:[#allocation2 + $0xb0] sm:$0x1] %v7569_v2  ;;  %472 = vst [vmem:[#allocation2 + $0xb4] sm:$0xf] %v7569_v2  ;;  %v393_v52 = vmax.f32 %v361_v44, 0.0  ;;  %v394_v53 = vmax.f32 %v362_v45, 0.0  ;;  %6967 = vmatprep.subr.bf16.mxu0 %v7418_v51  ;;  %7393 = vmatprep.subr.bf16.mxu1 %v7418_v51  ;;  %v364_v26 = vadd.f32 %v7656_v23, %v326_v1 }
  0x23   : > { %473 = vst [vmem:[#allocation2 + $0xb8] sm:$0xf] %v7569_v2  ;;  %474 = vst [vmem:[#allocation2 + $0xbc] sm:$0x1] %v7569_v2  ;;  %v6709_v55 = vld [vmem:[%s7638_s6 + $0x8] sm:$0xff]   ;;  %v565_v56 = vshrl.u32 %v6501_v48, 16 }
  0x24   : > { %475 = vst [vmem:[#allocation2 + $0xc0] sm:$0xf] %v7569_v2  ;;  %476 = vst [vmem:[#allocation2 + $0xc4] sm:$0xf] %v7569_v2  ;;  %v568_v57 = vshll.u32 %v6501_v48, 16  ;;  %v573_v58 = vshrl.u32 %v6502_v49, 16  ;;  %v6515_v63 = vpack.c.bf16 %v393_v52, %v393_v52  ;;  %v6516_v0 = vpack.c.bf16 %v394_v53, %v394_v53 }
  0x25   : > { %477 = vst [vmem:[#allocation2 + $0xc8] sm:$0x1] %v7569_v2  ;;  %478 = vst [vmem:[#allocation2 + $0xcc] sm:$0xf] %v7569_v2  ;;  %v576_v59 = vshll.u32 %v6502_v49, 16  ;;  %v7419_v60 = vld [vmem:[%s10214_s1 + $0x40] sm:$0xff]   ;;  %v6571_v8 = vunpack.c.l.bf16 %v6709_v55  ;;  %v6572_v9 = vunpack.c.h.bf16 %v6709_v55  ;;  %6968 = vmatpush3.bf16.msra.mxu0 %v7418_v51  ;;  %7401 = vmatpush3.bf16.msra.mxu1 %v7418_v51 }
  0x26   : > { %479 = vst [vmem:[#allocation2 + $0xd0] sm:$0xf] %v7569_v2  ;;  %480 = vst [vmem:[#allocation2 + $0xd4] sm:$0x1] %v7569_v2  ;;  %v888_v61 = vld [vmem:[#allocation2 + $0xc] sm:$0xf]  ;;  %v363_v2 = vadd.f32 %v7656_v23, %v325_v54  ;;  %6969 = vmatprep.subr.bf16.mxu0 %v7419_v60  ;;  %7394 = vmatprep.subr.bf16.mxu1 %v7419_v60 }
  0x27   : > { %vm7662_vm3 = vmor %vm1066_vm0, %vm1067_vm1  ;;  %v10232_v62 = vmov 0  ;;  %v10235_v3 = vmov 0  ;;  %v567_v4 = vrot.slane %v565_v56, 7  ;;  %v575_v5 = vrot.slane %v573_v58, 7  ;;  %v894_v6 = vld [vmem:[#allocation2 + $0x14] sm:$0x1] }
  0x28   : > { %v1082_v39 = vsel %vm7662_vm3, %v1077_v32, %v1081_v21  ;;  %v1092_v43 = vsel %vm7662_vm3, %v1087_v36, %v1091_v25  ;;  %vm7690_vm8 = vmand %vm892_vm5, %vm561_vm4  ;;  %v6710_v10 = vld [vmem:[%s7638_s6 + $0x10] sm:$0xff]   ;;  %v10238_v11 = vmov 0  ;;  %v684_v12 = vshrl.u32 %v6515_v63, 16  ;;  %v939_v21 = vld [vmem:[#allocation2 + $0x60] sm:$0xf]  ;;  %s6166_s26 = sshll.u32 %s10464_s19, 1 }
  0x29   : > { %v6201_v47 = vcombine.low %v1082_v39, %v1092_v43  ;;  %v10233_v62 = vsel %vm7690_vm8, 4294967295, %v10232_v62  ;;  %vm7698_vm9 = vmor %vm561_vm4, %vm562_vm6  ;;  %v687_v13 = vshll.u32 %v6515_v63, 16  ;;  %v692_v14 = vshrl.u32 %v6516_v0, 16  ;;  %v7712_v25 = vld [vmem:[%s10214_s1 + $0x38] sm:$0xff]   ;;  %v943_v32 = vld [vmem:[#allocation2 + $0x68] sm:$0x1]  ;;  %6970 = vmatpush3.bf16.msra.mxu0 %v7419_v60  ;;  %7402 = vmatpush3.bf16.msra.mxu1 %v7419_v60  ;;  %s235_s14 = scalar_lea.vmem %s10218_s5, %s6166_s26 }
  0x2a   : > { %10234 = vst [vmem:[#allocation3_spill] sm:$0xff] %v10233_v62  ;;  %v10236_v3 = vsel %vm7698_vm9, 4294967295, %v10235_v3  ;;  %vm7705_vm10 = vmand %vm885_vm2, %vm886_vm7  ;;  %v695_v15 = vshll.u32 %v6516_v0, 16  ;;  %v570_v16 = vor.u32 %v568_v57, %v567_v4  ;;  %v571_v17 = vrot.slane %v567_v4, 4  ;;  %v7724_v33 = vld [vmem:[%s10214_s1 + $0xb8] sm:$0xff]   ;;  %7003 = vmatprep.subr.bf16.mxu1 %v7712_v25 }
  0x2b   : > { %6971 = vmatprep.mubr.bf16.mxu0 %v6201_v47  ;;  %10237 = vst [vmem:[#allocation4_spill] sm:$0xff] %v10236_v3  ;;  %v10239_v11 = vsel %vm7705_vm10, 4294967295, %v10238_v11  ;;  %v578_v19 = vor.u32 %v576_v59, %v575_v5  ;;  %v580_v20 = vrot.slane %v575_v5, 4  ;;  %v686_v22 = vrot.slane %v684_v12, 7  ;;  %v7735_v47 = vld [vmem:[%s7638_s6 + $0x48] sm:$0xff]   ;;  %7051 = vmatprep.subr.bf16.mxu0 %v7724_v33 }
  0x2c   : > { %10240 = vst [vmem:[#allocation5_spill] sm:$0xff] %v10239_v11  ;;  %v694_v24 = vrot.slane %v692_v14, 7  ;;  %v395_v27 = vmax.f32 %v363_v2, 0.0  ;;  %v889_v30 = vsel %vm7705_vm10, %v570_v16, %v888_v61  ;;  %v6575_v34 = vunpack.c.l.bf16 %v6710_v10  ;;  %v946_v61 = vld [vmem:[#allocation2 + $0x6c] sm:$0xf] }
  0x2d   : > { %v579_v29 = vsel %vm7698_vm9, %v571_v17, %v578_v19  ;;  %v895_v31 = vsel %vm7690_vm8, %v580_v20, %v894_v6  ;;  %890 = vst [vmem:[#allocation2 + $0xc] sm:$0xf] %v889_v30  ;;  %v689_v35 = vor.u32 %v687_v13, %v686_v22  ;;  %v690_v36 = vrot.slane %v686_v22, 4  ;;  %v7758_v20 = vld [vmem:[%s7638_s6 + $0x50] sm:$0xff]  }
  0x2e   : > { %891 = vst [vmem:[#allocation2 + $0x10] sm:$0xf] %v579_v29  ;;  %896 = vst [vmem:[#allocation2 + $0x14] sm:$0x1] %v895_v31  ;;  %v697_v37 = vor.u32 %v695_v15, %v694_v24  ;;  %v699_v38 = vrot.slane %v694_v24, 4  ;;  %v396_v39 = vmax.f32 %v364_v26, 0.0  ;;  %v6517_v40 = vpack.c.bf16 %v395_v27, %v395_v27 }
  0x2f   : > { %v311_v41 = vmul.f32 %v6571_v8, %v7647_v18  ;;  %v312_v42 = vmul.f32 %v6572_v9, %v7647_v18  ;;  %v940_v44 = vsel %vm7705_vm10, %v689_v35, %v939_v21  ;;  %v6576_v46 = vunpack.c.h.bf16 %v6710_v10 }
  0x30   : > { %v698_v43 = vsel %vm7698_vm9, %v690_v36, %v697_v37  ;;  %v944_v45 = vsel %vm7690_vm8, %v699_v38, %v943_v32  ;;  %941 = vst [vmem:[#allocation2 + $0x60] sm:$0xf] %v940_v44  ;;  %v6518_v48 = vpack.c.bf16 %v396_v39, %v396_v39  ;;  %v701_v49 = vshrl.u32 %v6517_v40, 16 }
  0x31   : > { %942 = vst [vmem:[#allocation2 + $0x64] sm:$0xf] %v698_v43  ;;  %945 = vst [vmem:[#allocation2 + $0x68] sm:$0x1] %v944_v45  ;;  %v704_v50 = vshll.u32 %v6517_v40, 16  ;;  %v349_v51 = vadd.f32 %v7656_v23, %v311_v41  ;;  %v2103_v52 = vrot.slane %v7640_v7, 5  ;;  %v350_v53 = vadd.f32 %v7656_v23, %v312_v42 }
  0x32   : > { %v313_v54 = vmul.f32 %v6575_v34, %v7647_v18  ;;  %v314_v55 = vmul.f32 %v6576_v46, %v7647_v18  ;;  %v703_v56 = vrot.slane %v701_v49, 7  ;;  %v709_v57 = vshrl.u32 %v6518_v48, 16  ;;  %v950_v43 = vld [vmem:[#allocation2 + $0x74] sm:$0x1] }
  0x33   : > { %v381_v58 = vmax.f32 %v349_v51, 0.0  ;;  %v6603_v59 = vunpack.c.l.bf16 %v7735_v47  ;;  %v712_v60 = vshll.u32 %v6518_v48, 16  ;;  %v382_v63 = vmax.f32 %v350_v53, 0.0 }
  0x34   : > { %v7746_v0 = vadd.f32 %v7656_v23, %v313_v54  ;;  %v1004_v1 = vld [vmem:[#allocation2 + $0xc] sm:$0xf]  ;;  %v706_v5 = vor.u32 %v704_v50, %v703_v56  ;;  %v7751_v8 = vadd.f32 %v7656_v23, %v314_v55  ;;  %v6604_v9 = vunpack.c.h.bf16 %v7735_v47 }
  0x35   : > { %v1005_v2 = vld [vmem:[#allocation2 + $0x10] sm:$0xf]  ;;  %v1051_v4 = vld [vmem:[#allocation2 + $0x14] sm:$0x1]  ;;  %v7748_v6 = vpack.c.bf16 %v381_v58, %v381_v58  ;;  %v1094_v10 = vshrl.u32 %v1004_v1, 16  ;;  %v1097_v12 = vshll.u32 %v1004_v1, 16  ;;  %v7755_v19 = vmul.f32 %v6603_v59, %v7647_v18 }
  0x36   : > { %v1103_v13 = vshll.u32 %v1005_v2, 16  ;;  %v1107_v14 = vshrl.u32 %v1005_v2, 16  ;;  %v1113_v15 = vshll.u32 %v1051_v4, 16  ;;  %v707_v16 = vrot.slane %v703_v56, 4  ;;  %v7423_v1 = vld [vmem:[%s10214_s1 + $0xb0] sm:$0xff]  }
  0x37   : > { %v711_v17 = vrot.slane %v709_v57, 7  ;;  %v1096_v21 = vrot.slane %v1094_v10, 4  ;;  %v1099_v22 = vrot.slane %v1097_v12, 5  ;;  %v1018_v27 = vld [vmem:[#allocation2 + $0x60] sm:$0xf]  ;;  %v947_v35 = vsel %vm7705_vm10, %v706_v5, %v946_v61 }
  0x38   : > { %v1105_v24 = vrot.slane %v1103_v13, 5  ;;  %v1109_v26 = vrot.slane %v1107_v14, 4  ;;  %v1115_v29 = vrot.slane %v1113_v15, 5  ;;  %v1019_v30 = vld [vmem:[#allocation2 + $0x64] sm:$0xf]  ;;  %v1262_v32 = vshrl.u32 %v1018_v27, 16 }
  0x39   : > { %v1058_v31 = vld [vmem:[#allocation2 + $0x68] sm:$0x1]  ;;  %v714_v34 = vor.u32 %v712_v60, %v711_v17  ;;  %v1100_v36 = vor.u32 %v1099_v22, %v1096_v21  ;;  %v1265_v38 = vshll.u32 %v1018_v27, 16  ;;  %v1271_v39 = vshll.u32 %v1019_v30, 16  ;;  %948 = vst [vmem:[#allocation2 + $0x6c] sm:$0xf] %v947_v35 }
  0x3a   : > { %v1110_v37 = vor.u32 %v1109_v26, %v1105_v24  ;;  %v1264_v40 = vrot.slane %v1262_v32, 4  ;;  %v1275_v41 = vshrl.u32 %v1019_v30, 16  ;;  %v1281_v42 = vshll.u32 %v1058_v31, 16  ;;  %v897_v26 = vld [vmem:[#allocation2 + $0x18] sm:$0xf] }
  0x3b   : > { %v6607_v44 = vunpack.c.l.bf16 %v7758_v20  ;;  %v1101_v45 = vrot.slane %v1100_v36, 4  ;;  %v1267_v48 = vrot.slane %v1265_v38, 5  ;;  %v1273_v49 = vrot.slane %v1271_v39, 5  ;;  %v901_v35 = vld [vmem:[#allocation2 + $0x20] sm:$0x1] }
  0x3c   : > { %v1111_v46 = vrot.slane %v1110_v37, 4  ;;  %v1277_v50 = vrot.slane %v1275_v41, 4  ;;  %v1283_v51 = vrot.slane %v1281_v42, 5  ;;  %v715_v53 = vsel %vm7698_vm9, %v707_v16, %v714_v34 }
  0x3d   : > { %v716_v54 = vrot.slane %v711_v17, 4  ;;  %v1106_v55 = vsel %vm7662_vm3, %v1101_v45, %v1105_v24  ;;  %v1268_v57 = vor.u32 %v1267_v48, %v1264_v40  ;;  %949 = vst [vmem:[#allocation2 + $0x70] sm:$0xf] %v715_v53  ;;  %v6504_v58 = vpack.c.bf16 %v382_v63, %v382_v63 }
  0x3e   : > { %v1116_v56 = vsel %vm7662_vm3, %v1111_v46, %v1115_v29  ;;  %v1278_v60 = vor.u32 %v1277_v50, %v1273_v49  ;;  %v582_v2 = vshrl.u32 %v7748_v6, 16  ;;  %v585_v5 = vshll.u32 %v7748_v6, 16 }
  0x3f   : > { %v6202_v59 = vcombine.low %v1106_v55, %v1116_v56  ;;  %v951_v61 = vsel %vm7690_vm8, %v716_v54, %v950_v43  ;;  %v1269_v4 = vrot.slane %v1268_v57, 4  ;;  %v590_v10 = vshrl.u32 %v6504_v58, 16  ;;  %v904_v57 = vld [vmem:[#allocation2 + $0x24] sm:$0xf] }
  0x40   : > { %952 = vst [vmem:[#allocation2 + $0x74] sm:$0x1] %v951_v61  ;;  %v593_v12 = vshll.u32 %v6504_v58, 16  ;;  %v1279_v13 = vrot.slane %v1278_v60, 4  ;;  %v1020_v63 = vld [vmem:[#allocation2 + $0x6c] sm:$0xf] }
  0x41   : > { %6972 = vmatmul.mubr.bf16.vlgmr.msra.gmra.mxu0 %v6202_v59  ;;  %v584_v14 = vrot.slane %v582_v2, 7  ;;  %v383_v15 = vmax.f32 %v7746_v0, 0.0  ;;  %v384_v16 = vmax.f32 %v7751_v8, 0.0  ;;  %v1274_v17 = vsel %vm7662_vm3, %v1269_v4, %v1273_v49  ;;  %v7425_v0 = vld [vmem:[%s10214_s1 + $0xa8] sm:$0xff]  }
  0x42   : > { %v1286_v21 = vshrl.u32 %v1020_v63, 16  ;;  %v1289_v22 = vshll.u32 %v1020_v63, 16  ;;  %7052 = vmatpush3.bf16.msra.mxu0 %v7724_v33  ;;  %v592_v24 = vrot.slane %v590_v10, 7  ;;  %v1284_v6 = vsel %vm7662_vm3, %v1279_v13, %v1283_v51  ;;  %v7427_v51 = vld [vmem:[%s10214_s1 + $0xa0] sm:$0xff]  }
  0x43   : > { %7053 = vmatprep.subr.bf16.mxu0 %v7423_v1  ;;  %v587_v27 = vor.u32 %v585_v5, %v584_v14  ;;  %v588_v29 = vrot.slane %v584_v14, 4  ;;  %v6505_v30 = vpack.c.bf16 %v383_v15, %v383_v15  ;;  %v6209_v8 = vcombine.low %v1274_v17, %v1284_v6 }
  0x44   : > { %v1288_v31 = vrot.slane %v1286_v21, 4  ;;  %v1291_v32 = vrot.slane %v1289_v22, 5  ;;  %v595_v34 = vor.u32 %v593_v12, %v592_v24  ;;  %v1021_v36 = vld [vmem:[#allocation2 + $0x70] sm:$0xf]  ;;  %v597_v33 = vrot.slane %v592_v24, 4  ;;  %v7801_v12 = vld [vmem:[%s7638_s6 + $0x18] sm:$0xff]  }
  0x45   : > { %v898_v37 = vsel %vm7705_vm10, %v587_v27, %v897_v26  ;;  %v6506_v38 = vpack.c.bf16 %v384_v16, %v384_v16  ;;  %v599_v39 = vshrl.u32 %v6505_v30, 16  ;;  %6987 = vmatprep.mubr.bf16.mxu1 %v6209_v8  ;;  %v1295_v41 = vshll.u32 %v1021_v36, 16  ;;  %v7429_v16 = vld [vmem:[%s10214_s1 + $0x98] sm:$0xff]   ;;  %v7422_v22 = vld [vmem:[%s10214_s1 + $0x30] sm:$0xff]  }
  0x46   : > { %v1292_v40 = vor.u32 %v1291_v32, %v1288_v31  ;;  %v1299_v42 = vshrl.u32 %v1021_v36, 16  ;;  %7054 = vmatpush3.bf16.msra.mxu0 %v7423_v1  ;;  %v596_v43 = vsel %vm7698_vm9, %v588_v29, %v595_v34  ;;  %899 = vst [vmem:[#allocation2 + $0x18] sm:$0xf] %v898_v37  ;;  %v902_v46 = vsel %vm7690_vm8, %v597_v33, %v901_v35  ;;  %v908_v1 = vld [vmem:[#allocation2 + $0x2c] sm:$0x1]  ;;  %v7431_v8 = vld [vmem:[%s10214_s1 + $0x90] sm:$0xff]  }
  0x47   : > { %v1059_v45 = vld [vmem:[#allocation2 + $0x74] sm:$0x1]  ;;  %900 = vst [vmem:[#allocation2 + $0x1c] sm:$0xf] %v596_v43  ;;  %v601_v48 = vrot.slane %v599_v39, 7  ;;  %v602_v49 = vshll.u32 %v6505_v30, 16  ;;  %7055 = vmatprep.subr.bf16.mxu0 %v7425_v0  ;;  %v328_v10 = vmul.f32 %v6604_v9, %v7647_v18  ;;  %v365_v15 = vadd.f32 %v7656_v23, %v7755_v19 }
  0x48   : > { %v607_v50 = vshrl.u32 %v6506_v38, 16  ;;  %v1293_v53 = vrot.slane %v1292_v40, 4  ;;  %v1297_v54 = vrot.slane %v1295_v41, 5  ;;  %v1301_v55 = vrot.slane %v1299_v42, 4  ;;  %903 = vst [vmem:[#allocation2 + $0x20] sm:$0x1] %v902_v46 }
  0x49   : > { %v1305_v56 = vshll.u32 %v1059_v45, 16  ;;  %v604_v58 = vor.u32 %v602_v49, %v601_v48  ;;  %v605_v59 = vrot.slane %v601_v48, 4  ;;  %v610_v61 = vshll.u32 %v6506_v38, 16 }
  0x4a   : > { %v609_v60 = vrot.slane %v607_v50, 7  ;;  %v1298_v2 = vsel %vm7662_vm3, %v1293_v53, %v1297_v54  ;;  %v1302_v4 = vor.u32 %v1301_v55, %v1297_v54  ;;  %7056 = vmatpush3.bf16.msra.mxu0 %v7425_v0  ;;  %v366_v47 = vadd.f32 %v7656_v23, %v328_v10  ;;  %v7424_v54 = vld [vmem:[%s10214_s1 + $0x28] sm:$0xff]  }
  0x4b   : > { %v1307_v5 = vrot.slane %v1305_v56, 5  ;;  %v905_v14 = vsel %vm7705_vm10, %v604_v58, %v904_v57  ;;  %7057 = vmatprep.subr.bf16.mxu0 %v7427_v51  ;;  %v6608_v9 = vunpack.c.h.bf16 %v7758_v20  ;;  %v329_v21 = vmul.f32 %v6607_v44, %v7647_v18 }
  0x4c   : > { %v612_v13 = vor.u32 %v610_v61, %v609_v60  ;;  %v614_v63 = vrot.slane %v609_v60, 4  ;;  %v1303_v17 = vrot.slane %v1302_v4, 4  ;;  %906 = vst [vmem:[#allocation2 + $0x24] sm:$0xf] %v905_v14  ;;  %v397_v6 = vmax.f32 %v365_v15, 0.0  ;;  %v7426_v14 = vld [vmem:[%s10214_s1 + $0x20] sm:$0xff]  }
  0x4d   : > { %v1006_v19 = vld [vmem:[#allocation2 + $0x18] sm:$0xf]  ;;  %v6579_v27 = vunpack.c.l.bf16 %v7801_v12  ;;  %v398_v0 = vmax.f32 %v366_v47, 0.0  ;;  %v330_v55 = vmul.f32 %v6608_v9, %v7647_v18  ;;  %v367_v56 = vadd.f32 %v7656_v23, %v329_v21  ;;  %v6712_v9 = vld [vmem:[%s7638_s6 + $0x20] sm:$0xff]  }
  0x4e   : > { %v613_v24 = vsel %vm7698_vm9, %v605_v59, %v612_v13  ;;  %v909_v26 = vsel %vm7690_vm8, %v614_v63, %v908_v1  ;;  %v1308_v29 = vsel %vm7662_vm3, %v1303_v17, %v1307_v5  ;;  %v1007_v30 = vld [vmem:[#allocation2 + $0x1c] sm:$0xf]  ;;  %v1118_v20 = vshrl.u32 %v1006_v19, 16  ;;  %7058 = vmatpush3.bf16.msra.mxu0 %v7427_v51  ;;  %v953_v61 = vld [vmem:[#allocation2 + $0x78] sm:$0xf]  ;;  %v7435_v21 = vld [vmem:[%s10214_s1 + $0x80] sm:$0xff]  }
  0x4f   : > { %v1121_v44 = vshll.u32 %v1006_v19, 16  ;;  %907 = vst [vmem:[#allocation2 + $0x28] sm:$0xf] %v613_v24  ;;  %910 = vst [vmem:[#allocation2 + $0x2c] sm:$0x1] %v909_v26  ;;  %v6210_v31 = vcombine.low %v1298_v2, %v1308_v29  ;;  %v1127_v34 = vshll.u32 %v1007_v30, 16  ;;  %v6519_v36 = vpack.c.bf16 %v397_v6, %v397_v6  ;;  %7059 = vmatprep.subr.bf16.mxu0 %v7429_v16 }
  0x50   : > { %v1052_v32 = vld [vmem:[#allocation2 + $0x20] sm:$0x1]  ;;  %v1131_v35 = vshrl.u32 %v1007_v30, 16  ;;  %v1120_v33 = vrot.slane %v1118_v20, 4  ;;  %v6520_v39 = vpack.c.bf16 %v398_v0, %v398_v0  ;;  %v368_v63 = vadd.f32 %v7656_v23, %v330_v55 }
  0x51   : > { %v1123_v37 = vrot.slane %v1121_v44, 5  ;;  %v1137_v38 = vshll.u32 %v1052_v32, 16  ;;  %6988 = vmatmul.mubr.bf16.vlgmr.msra.gmra.mxu1 %v6210_v31  ;;  %v1129_v40 = vrot.slane %v1127_v34, 5  ;;  %v718_v42 = vshrl.u32 %v6519_v36, 16  ;;  %v957_v13 = vld [vmem:[#allocation2 + $0x80] sm:$0x1] }
  0x52   : > { %v1133_v41 = vrot.slane %v1131_v35, 4  ;;  %v721_v43 = vshll.u32 %v6519_v36, 16  ;;  %7004 = vmatpush3.bf16.msra.mxu1 %v7712_v25  ;;  %v726_v48 = vshrl.u32 %v6520_v39, 16  ;;  %v729_v49 = vshll.u32 %v6520_v39, 16  ;;  %7060 = vmatpush3.bf16.msra.mxu0 %v7429_v16  ;;  %v7433_v25 = vld [vmem:[%s10214_s1 + $0x88] sm:$0xff]   ;;  %v7428_v32 = vld [vmem:[%s10214_s1 + $0x18] sm:$0xff]  }
  0x53   : > { %v1124_v45 = vor.u32 %v1123_v37, %v1120_v33  ;;  %v1139_v46 = vrot.slane %v1137_v38, 5  ;;  %7005 = vmatprep.subr.bf16.mxu1 %v7422_v22  ;;  %v1008_v51 = vld [vmem:[#allocation2 + $0x24] sm:$0xf]  ;;  %v720_v53 = vrot.slane %v718_v42, 7  ;;  %7061 = vmatprep.subr.bf16.mxu0 %v7431_v8  ;;  %v399_v36 = vmax.f32 %v367_v56, 0.0  ;;  %v7439_v37 = vld [vmem:[%s10214_s1 + $0x138] sm:$0xff]  }
  0x54   : > { %v1134_v50 = vor.u32 %v1133_v41, %v1129_v40  ;;  %v1142_v58 = vshrl.u32 %v1008_v51, 16  ;;  %v1145_v59 = vshll.u32 %v1008_v51, 16  ;;  %v728_v60 = vrot.slane %v726_v48, 7 }
  0x55   : > { %v1125_v57 = vrot.slane %v1124_v45, 4  ;;  %v723_v5 = vor.u32 %v721_v43, %v720_v53  ;;  %v724_v10 = vrot.slane %v720_v53, 4  ;;  %v400_v33 = vmax.f32 %v368_v63, 0.0  ;;  %v7871_v53 = vld [vmem:[%s7638_s6 + $0x58] sm:$0xff]  }
  0x56   : > { %v1135_v1 = vrot.slane %v1134_v50, 4  ;;  %v1009_v2 = vld [vmem:[#allocation2 + $0x28] sm:$0xf]  ;;  %v1053_v4 = vld [vmem:[#allocation2 + $0x2c] sm:$0x1]  ;;  %7006 = vmatpush3.bf16.msra.mxu1 %v7422_v22  ;;  %v1144_v16 = vrot.slane %v1142_v58, 4  ;;  %7062 = vmatpush3.bf16.msra.mxu0 %v7431_v8  ;;  %v731_v6 = vor.u32 %v729_v49, %v728_v60  ;;  %v6580_v39 = vunpack.c.h.bf16 %v7801_v12 }
  0x57   : > { %v1130_v15 = vsel %vm7662_vm3, %v1125_v57, %v1129_v40  ;;  %v1147_v17 = vrot.slane %v1145_v59, 5  ;;  %v1151_v47 = vshll.u32 %v1009_v2, 16  ;;  %v1155_v24 = vshrl.u32 %v1009_v2, 16  ;;  %7007 = vmatprep.subr.bf16.mxu1 %v7424_v54  ;;  %7063 = vmatprep.subr.bf16.mxu0 %v7433_v25  ;;  %v7430_v59 = vld [vmem:[%s10214_s1 + $0x10] sm:$0xff]   ;;  %v960_v2 = vld [vmem:[#allocation2 + $0x84] sm:$0xf] }
  0x58   : > { %v1140_v19 = vsel %vm7662_vm3, %v1135_v1, %v1139_v46  ;;  %v1161_v26 = vshll.u32 %v1053_v4, 16  ;;  %v733_v20 = vrot.slane %v728_v60, 4  ;;  %v732_v8 = vsel %vm7698_vm9, %v724_v10, %v731_v6 }
  0x59   : > { %v6203_v22 = vcombine.low %v1130_v15, %v1140_v19  ;;  %v1148_v29 = vor.u32 %v1147_v17, %v1144_v16  ;;  %v1153_v30 = vrot.slane %v1151_v47, 5  ;;  %v1157_v44 = vrot.slane %v1155_v24, 4  ;;  %956 = vst [vmem:[#allocation2 + $0x7c] sm:$0xf] %v732_v8 }
  0x5a   : > { %v1163_v0 = vrot.slane %v1161_v26, 5  ;;  %v954_v31 = vsel %vm7705_vm10, %v723_v5, %v953_v61  ;;  %v958_v35 = vsel %vm7690_vm8, %v733_v20, %v957_v13  ;;  %7008 = vmatpush3.bf16.msra.mxu1 %v7424_v54  ;;  %v315_v40 = vmul.f32 %v6579_v27, %v7647_v18  ;;  %7064 = vmatpush3.bf16.msra.mxu0 %v7433_v25 }
  0x5b   : > { %6975 = vmatprep.mubr.bf16.mxu0 %v6203_v22  ;;  %v1149_v34 = vrot.slane %v1148_v29, 4  ;;  %955 = vst [vmem:[#allocation2 + $0x78] sm:$0xf] %v954_v31  ;;  %v1158_v38 = vor.u32 %v1157_v44, %v1153_v30  ;;  %959 = vst [vmem:[#allocation2 + $0x80] sm:$0x1] %v958_v35  ;;  %7009 = vmatprep.subr.bf16.mxu1 %v7426_v14  ;;  %v6583_v41 = vunpack.c.l.bf16 %v6712_v9  ;;  %v6584_v46 = vunpack.c.h.bf16 %v6712_v9  ;;  %v7432_v22 = vld [vmem:[%s10214_s1 + $0x8] sm:$0xff]  }
  0x5c   : > { %v6521_v43 = vpack.c.bf16 %v399_v36, %v399_v36  ;;  %v6522_v45 = vpack.c.bf16 %v400_v33, %v400_v33  ;;  %7065 = vmatprep.subr.bf16.mxu0 %v7435_v21  ;;  %v316_v49 = vmul.f32 %v6580_v39, %v7647_v18  ;;  %v353_v50 = vadd.f32 %v7656_v23, %v315_v40  ;;  %v7434_v40 = vld [vmem:[%s10214_s1] sm:$0xff]  }
  0x5d   : > { %v1154_v42 = vsel %vm7662_vm3, %v1149_v34, %v1153_v30  ;;  %v1159_v48 = vrot.slane %v1158_v38, 4  ;;  %v317_v51 = vmul.f32 %v6583_v41, %v7647_v18  ;;  %v318_v58 = vmul.f32 %v6584_v46, %v7647_v18 }
  0x5e   : > { %v735_v12 = vshrl.u32 %v6521_v43, 16  ;;  %v738_v27 = vshll.u32 %v6521_v43, 16  ;;  %v743_v54 = vshrl.u32 %v6522_v45, 16  ;;  %v746_v55 = vshll.u32 %v6522_v45, 16  ;;  %7010 = vmatpush3.bf16.msra.mxu1 %v7426_v14  ;;  %7066 = vmatpush3.bf16.msra.mxu0 %v7435_v21  ;;  %v964_v21 = vld [vmem:[#allocation2 + $0x8c] sm:$0x1] }
  0x5f   : > { %v1164_v56 = vsel %vm7662_vm3, %v1159_v48, %v1163_v0  ;;  %v354_v25 = vadd.f32 %v7656_v23, %v316_v49  ;;  %v385_v57 = vmax.f32 %v353_v50, 0.0  ;;  %7011 = vmatprep.subr.bf16.mxu1 %v7428_v32  ;;  %v355_v4 = vadd.f32 %v7656_v23, %v317_v51  ;;  %7147 = vmatprep.subr.bf16.mxu0 %v7439_v37  ;;  %v911_v48 = vld [vmem:[#allocation2 + $0x30] sm:$0xf] }
  0x60   : > { %v6204_v60 = vcombine.low %v1154_v42, %v1164_v56  ;;  %v737_v61 = vrot.slane %v735_v12, 7  ;;  %v745_v1 = vrot.slane %v743_v54, 7  ;;  %v1023_v10 = vld [vmem:[#allocation2 + $0x7c] sm:$0xf]  ;;  %v356_v14 = vadd.f32 %v7656_v23, %v318_v58  ;;  %v915_v56 = vld [vmem:[#allocation2 + $0x38] sm:$0x1] }
  0x61   : > { %v386_v13 = vmax.f32 %v354_v25, 0.0  ;;  %v6507_v63 = vpack.c.bf16 %v385_v57, %v385_v57  ;;  %v6611_v18 = vunpack.c.l.bf16 %v7871_v53  ;;  %v1319_v47 = vshll.u32 %v1023_v10, 16 }
  0x62   : > { %v1022_v5 = vld [vmem:[#allocation2 + $0x78] sm:$0xf]  ;;  %6976 = vmatmul.mubr.bf16.gmra.mxu0 %v6204_v60  ;;  %v1060_v15 = vld [vmem:[#allocation2 + $0x80] sm:$0x1]  ;;  %v1323_v9 = vshrl.u32 %v1023_v10, 16  ;;  %7012 = vmatpush3.bf16.msra.mxu1 %v7428_v32  ;;  %v740_v24 = vor.u32 %v738_v27, %v737_v61  ;;  %v741_v26 = vrot.slane %v737_v61, 4  ;;  %v748_v6 = vor.u32 %v746_v55, %v745_v1 }
  0x63   : > { %v1310_v16 = vshrl.u32 %v1022_v5, 16  ;;  %v1313_v17 = vshll.u32 %v1022_v5, 16  ;;  %v1329_v19 = vshll.u32 %v1060_v15, 16  ;;  %7013 = vmatprep.subr.bf16.mxu1 %v7430_v59  ;;  %v1321_v30 = vrot.slane %v1319_v47, 5  ;;  %v7437_v60 = vld [vmem:[%s10214_s1 + $0xf8] sm:$0xff]  }
  0x64   : > { %v1325_v20 = vrot.slane %v1323_v9, 4  ;;  %v749_v0 = vsel %vm7698_vm9, %v741_v26, %v748_v6  ;;  %v750_v8 = vrot.slane %v745_v1, 4  ;;  %v961_v31 = vsel %vm7705_vm10, %v740_v24, %v960_v2  ;;  %v7908_v5 = vld [vmem:[%s10215_s2] ss:$0 sm:$0xff] }
  0x65   : > { %v1312_v23 = vrot.slane %v1310_v16, 4  ;;  %v1315_v29 = vrot.slane %v1313_v17, 5  ;;  %v1331_v44 = vrot.slane %v1329_v19, 5  ;;  %962 = vst [vmem:[#allocation2 + $0x84] sm:$0xf] %v961_v31  ;;  %v6508_v35 = vpack.c.bf16 %v386_v13, %v386_v13 }
  0x66   : > { %v1326_v34 = vor.u32 %v1325_v20, %v1321_v30  ;;  %963 = vst [vmem:[#allocation2 + $0x88] sm:$0xf] %v749_v0  ;;  %v616_v36 = vshrl.u32 %v6507_v63, 16  ;;  %7014 = vmatpush3.bf16.msra.mxu1 %v7430_v59  ;;  %v965_v33 = vsel %vm7690_vm8, %v750_v8, %v964_v21  ;;  %v619_v37 = vshll.u32 %v6507_v63, 16  ;;  %v7926_v31 = vld [vmem:[%s10216_s3] ss:$0 sm:$0xff] }
  0x67   : > { %v1316_v32 = vor.u32 %v1315_v29, %v1312_v23  ;;  %v387_v38 = vmax.f32 %v355_v4, 0.0  ;;  %v388_v39 = vmax.f32 %v356_v14, 0.0  ;;  %7015 = vmatprep.subr.bf16.mxu1 %v7432_v22  ;;  %966 = vst [vmem:[#allocation2 + $0x8c] sm:$0x1] %v965_v33  ;;  %v624_v45 = vshrl.u32 %v6508_v35, 16 }
  0x68   : > { %v1327_v42 = vrot.slane %v1326_v34, 4  ;;  %v618_v43 = vrot.slane %v616_v36, 7  ;;  %v627_v46 = vshll.u32 %v6508_v35, 16  ;;  %v6612_v51 = vunpack.c.h.bf16 %v7871_v53  ;;  %v918_v4 = vld [vmem:[#allocation2 + $0x3c] sm:$0xf] }
  0x69   : > { %v1317_v41 = vrot.slane %v1316_v32, 4  ;;  %v6509_v49 = vpack.c.bf16 %v387_v38, %v387_v38  ;;  %v6510_v50 = vpack.c.bf16 %v388_v39, %v388_v39  ;;  %v626_v57 = vrot.slane %v624_v45, 7  ;;  %v922_v36 = vld [vmem:[#allocation2 + $0x44] sm:$0x1] }
  0x6a   : > { %v1332_v27 = vsel %vm7662_vm3, %v1327_v42, %v1331_v44  ;;  %v621_v54 = vor.u32 %v619_v37, %v618_v43  ;;  %v622_v55 = vrot.slane %v618_v43, 4  ;;  %7016 = vmatpush3.bf16.msra.mxu1 %v7432_v22  ;;  %v331_v10 = vmul.f32 %v7908_v5, %v6611_v18  ;;  %v7919_v22 = vld [vmem:[%s7638_s6 + $0x60] sm:$0xff]  }
  0x6b   : > { %v1322_v12 = vsel %vm7662_vm3, %v1317_v41, %v1321_v30  ;;  %v633_v58 = vshrl.u32 %v6509_v49, 16  ;;  %v636_v59 = vshll.u32 %v6509_v49, 16  ;;  %7017 = vmatprep.subr.bf16.mxu1 %v7434_v40  ;;  %v641_v1 = vshrl.u32 %v6510_v50, 16 }
  0x6c   : > { %v6211_v25 = vcombine.low %v1322_v12, %v1332_v27  ;;  %v912_v61 = vsel %vm7705_vm10, %v621_v54, %v911_v48  ;;  %v644_v2 = vshll.u32 %v6510_v50, 16  ;;  %v1024_v13 = vld [vmem:[#allocation2 + $0x84] sm:$0xf]  ;;  %v629_v14 = vor.u32 %v627_v46, %v626_v57 }
  0x6d   : > { %v1025_v63 = vld [vmem:[#allocation2 + $0x88] sm:$0xf]  ;;  %v631_v15 = vrot.slane %v626_v57, 4  ;;  %913 = vst [vmem:[#allocation2 + $0x30] sm:$0xf] %v912_v61  ;;  %v635_v16 = vrot.slane %v633_v58, 7  ;;  %v332_v17 = vmul.f32 %v7908_v5, %v6612_v51  ;;  %v369_v32 = vadd.f32 %v7926_v31, %v331_v10 }
  0x6e   : > { %6991 = vmatprep.mubr.bf16.mxu1 %v6211_v25  ;;  %v1334_v47 = vshrl.u32 %v1024_v13, 16  ;;  %v1337_v9 = vshll.u32 %v1024_v13, 16  ;;  %v1343_v21 = vshll.u32 %v1025_v63, 16  ;;  %v1347_v19 = vshrl.u32 %v1025_v63, 16  ;;  %7018 = vmatpush3.bf16.msra.mxu1 %v7434_v40  ;;  %v1061_v24 = vld [vmem:[#allocation2 + $0x8c] sm:$0x1] }
  0x6f   : > { %v630_v53 = vsel %vm7698_vm9, %v622_v55, %v629_v14  ;;  %v916_v18 = vsel %vm7690_vm8, %v631_v15, %v915_v56  ;;  %v638_v26 = vor.u32 %v636_v59, %v635_v16  ;;  %v639_v6 = vrot.slane %v635_v16, 4  ;;  %7099 = vmatprep.subr.bf16.mxu1 %v7437_v60 }
  0x70   : > { %v1336_v23 = vrot.slane %v1334_v47, 4  ;;  %v1339_v29 = vrot.slane %v1337_v9, 5  ;;  %v1345_v30 = vrot.slane %v1343_v21, 5  ;;  %v1349_v20 = vrot.slane %v1347_v19, 4  ;;  %914 = vst [vmem:[#allocation2 + $0x34] sm:$0xf] %v630_v53 }
  0x71   : > { %917 = vst [vmem:[#allocation2 + $0x38] sm:$0x1] %v916_v18  ;;  %v1353_v44 = vshll.u32 %v1061_v24, 16  ;;  %v643_v0 = vrot.slane %v641_v1, 7  ;;  %v919_v8 = vsel %vm7705_vm10, %v638_v26, %v918_v4  ;;  %v370_v33 = vadd.f32 %v7926_v31, %v332_v17  ;;  %v967_v26 = vld [vmem:[#allocation2 + $0x90] sm:$0xf] }
  0x72   : > { %v1340_v34 = vor.u32 %v1339_v29, %v1336_v23  ;;  %v1350_v35 = vor.u32 %v1349_v20, %v1345_v30  ;;  %920 = vst [vmem:[#allocation2 + $0x3c] sm:$0xf] %v919_v8  ;;  %v6615_v37 = vunpack.c.l.bf16 %v7919_v22  ;;  %v401_v41 = vmax.f32 %v369_v32, 0.0  ;;  %v971_v23 = vld [vmem:[#allocation2 + $0x98] sm:$0x1] }
  0x73   : > { %v1355_v38 = vrot.slane %v1353_v44, 5  ;;  %v646_v39 = vor.u32 %v644_v2, %v643_v0  ;;  %v648_v40 = vrot.slane %v643_v0, 4  ;;  %v402_v46 = vmax.f32 %v370_v33, 0.0 }
  0x74   : > { %v1341_v42 = vrot.slane %v1340_v34, 4  ;;  %v1351_v43 = vrot.slane %v1350_v35, 4  ;;  %v7931_v45 = vld [vmem:[#allocation2 + $0x30] sm:$0xf]  ;;  %v6616_v48 = vunpack.c.h.bf16 %v7919_v22  ;;  %v6523_v55 = vpack.c.bf16 %v401_v41, %v401_v41 }
  0x75   : > { %v1166_v49 = vshrl.u32 %v7931_v45, 16  ;;  %v1169_v50 = vshll.u32 %v7931_v45, 16  ;;  %v647_v51 = vsel %vm7698_vm9, %v639_v6, %v646_v39  ;;  %v923_v12 = vsel %vm7690_vm8, %v648_v40, %v922_v36 }
  0x76   : > { %v1346_v27 = vsel %vm7662_vm3, %v1341_v42, %v1345_v30  ;;  %v1356_v54 = vsel %vm7662_vm3, %v1351_v43, %v1355_v38  ;;  %921 = vst [vmem:[#allocation2 + $0x40] sm:$0xf] %v647_v51  ;;  %924 = vst [vmem:[#allocation2 + $0x44] sm:$0x1] %v923_v12  ;;  %v6524_v56 = vpack.c.bf16 %v402_v46, %v402_v46  ;;  %v752_v10 = vshrl.u32 %v6523_v55, 16  ;;  %v6713_v42 = vld [vmem:[%s7638_s6 + $0x28] sm:$0xff]  }
  0x77   : > { %v6212_v25 = vcombine.low %v1346_v27, %v1356_v54  ;;  %v7944_v57 = vld [vmem:[#allocation2 + $0x34] sm:$0xf]  ;;  %v1168_v59 = vrot.slane %v1166_v49, 4  ;;  %v1171_v60 = vrot.slane %v1169_v50, 5  ;;  %v333_v61 = vmul.f32 %v7908_v5, %v6615_v37 }
  0x78   : > { %v7946_v58 = vld [vmem:[#allocation2 + $0x38] sm:$0x1]  ;;  %v1175_v1 = vshll.u32 %v7944_v57, 16  ;;  %v1179_v2 = vshrl.u32 %v7944_v57, 16  ;;  %v755_v14 = vshll.u32 %v6523_v55, 16  ;;  %v760_v15 = vshrl.u32 %v6524_v56, 16 }
  0x79   : > { %v1185_v4 = vshll.u32 %v7946_v58, 16  ;;  %6992 = vmatmul.mubr.bf16.gmra.mxu1 %v6212_v25  ;;  %v1172_v13 = vor.u32 %v1171_v60, %v1168_v59  ;;  %v7952_v63 = vld [vmem:[#allocation2 + $0x3c] sm:$0xf]  ;;  %v763_v16 = vshll.u32 %v6524_v56, 16  ;;  %v754_v53 = vrot.slane %v752_v10, 7  ;;  %v6714_v50 = vld [vmem:[%s7638_s6 + $0x30] sm:$0xff]  }
  0x7a   : > { %v1177_v17 = vrot.slane %v1175_v1, 5  ;;  %v1181_v47 = vrot.slane %v1179_v2, 4  ;;  %v1190_v21 = vshrl.u32 %v7952_v63, 16  ;;  %v1193_v24 = vshll.u32 %v7952_v63, 16  ;;  %v7979_v60 = vld [vmem:[%s7638_s6 + $0x68] sm:$0xff]  }
  0x7b   : > { %v1187_v9 = vrot.slane %v1185_v4, 5  ;;  %v1173_v19 = vrot.slane %v1172_v13, 4  ;;  %v762_v18 = vrot.slane %v760_v15, 7  ;;  %v334_v29 = vmul.f32 %v7908_v5, %v6616_v48 }
  0x7c   : > { %v1182_v6 = vor.u32 %v1181_v47, %v1177_v17  ;;  %v1192_v22 = vrot.slane %v1190_v21, 4  ;;  %v371_v30 = vadd.f32 %v7926_v31, %v333_v61  ;;  %v1195_v8 = vrot.slane %v1193_v24, 5 }
  0x7d   : > { %v1178_v20 = vsel %vm7662_vm3, %v1173_v19, %v1177_v17  ;;  %v7960_v44 = vld [vmem:[#allocation2 + $0x40] sm:$0xf]  ;;  %v7962_v0 = vld [vmem:[#allocation2 + $0x44] sm:$0x1]  ;;  %v757_v32 = vor.u32 %v755_v14, %v754_v53  ;;  %v758_v34 = vrot.slane %v754_v53, 4  ;;  %v765_v39 = vor.u32 %v763_v16, %v762_v18 }
  0x7e   : > { %v1183_v35 = vrot.slane %v1182_v6, 4  ;;  %v1199_v36 = vshll.u32 %v7960_v44, 16  ;;  %v1203_v33 = vshrl.u32 %v7960_v44, 16  ;;  %v1209_v37 = vshll.u32 %v7962_v0, 16 }
  0x7f   : > { %v1196_v38 = vor.u32 %v1195_v8, %v1192_v22  ;;  %v767_v40 = vrot.slane %v762_v18, 4  ;;  %v968_v41 = vsel %vm7705_vm10, %v757_v32, %v967_v26  ;;  %v766_v27 = vsel %vm7698_vm9, %v758_v34, %v765_v39 }
  0x80   : > { %v1188_v43 = vsel %vm7662_vm3, %v1183_v35, %v1187_v9  ;;  %v1201_v46 = vrot.slane %v1199_v36, 5  ;;  %v1205_v48 = vrot.slane %v1203_v33, 4  ;;  %v1211_v49 = vrot.slane %v1209_v37, 5  ;;  %969 = vst [vmem:[#allocation2 + $0x90] sm:$0xf] %v968_v41 }
  0x81   : > { %v6205_v51 = vcombine.low %v1178_v20, %v1188_v43  ;;  %v1197_v12 = vrot.slane %v1196_v38, 4  ;;  %v972_v54 = vsel %vm7690_vm8, %v767_v40, %v971_v23  ;;  %970 = vst [vmem:[#allocation2 + $0x94] sm:$0xf] %v766_v27  ;;  %v372_v56 = vadd.f32 %v7926_v31, %v334_v29  ;;  %v978_v27 = vld [vmem:[#allocation2 + $0xa4] sm:$0x1] }
  0x82   : > { %v1206_v55 = vor.u32 %v1205_v48, %v1201_v46  ;;  %973 = vst [vmem:[#allocation2 + $0x98] sm:$0x1] %v972_v54  ;;  %v403_v25 = vmax.f32 %v371_v30, 0.0  ;;  %v6587_v59 = vunpack.c.l.bf16 %v6713_v42  ;;  %v6588_v1 = vunpack.c.h.bf16 %v6713_v42  ;;  %v974_v42 = vld [vmem:[#allocation2 + $0x9c] sm:$0xf] }
  0x83   : > { %6979 = vmatprep.mubr.bf16.mxu0 %v6205_v51  ;;  %v1202_v61 = vsel %vm7662_vm3, %v1197_v12, %v1201_v46  ;;  %v6591_v2 = vunpack.c.l.bf16 %v6714_v50  ;;  %v6592_v4 = vunpack.c.h.bf16 %v6714_v50  ;;  %v404_v13 = vmax.f32 %v372_v56, 0.0 }
  0x84   : > { %v1207_v10 = vrot.slane %v1206_v55, 4  ;;  %v6525_v14 = vpack.c.bf16 %v403_v25, %v403_v25  ;;  %v319_v15 = vmul.f32 %v7908_v5, %v6587_v59  ;;  %v320_v16 = vmul.f32 %v7908_v5, %v6588_v1 }
  0x85   : > { %v321_v17 = vmul.f32 %v7908_v5, %v6591_v2  ;;  %v322_v47 = vmul.f32 %v7908_v5, %v6592_v4  ;;  %v6619_v9 = vunpack.c.l.bf16 %v7979_v60  ;;  %v6526_v19 = vpack.c.bf16 %v404_v13, %v404_v13 }
  0x86   : > { %v1212_v21 = vsel %vm7662_vm3, %v1207_v10, %v1211_v49  ;;  %v769_v24 = vshrl.u32 %v6525_v14, 16  ;;  %v772_v53 = vshll.u32 %v6525_v14, 16  ;;  %v357_v6 = vadd.f32 %v7926_v31, %v319_v15 }
  0x87   : > { %v6206_v18 = vcombine.low %v1202_v61, %v1212_v21  ;;  %v7990_v26 = vld [vmem:[#allocation2 + $0x90] sm:$0xf]  ;;  %v358_v22 = vadd.f32 %v7926_v31, %v320_v16  ;;  %v359_v23 = vadd.f32 %v7926_v31, %v321_v17  ;;  %v777_v8 = vshrl.u32 %v6526_v19, 16 }
  0x88   : > { %v1358_v29 = vshrl.u32 %v7990_v26, 16  ;;  %v1361_v30 = vshll.u32 %v7990_v26, 16  ;;  %v771_v20 = vrot.slane %v769_v24, 7  ;;  %v7997_v32 = vld [vmem:[#allocation2 + $0x94] sm:$0xf]  ;;  %v780_v35 = vshll.u32 %v6526_v19, 16 }
  0x89   : > { %6980 = vmatmul.mubr.bf16.gmra.mxu0 %v6206_v18  ;;  %v7999_v34 = vld [vmem:[#allocation2 + $0x98] sm:$0x1]  ;;  %v389_v36 = vmax.f32 %v357_v6, 0.0  ;;  %v360_v33 = vadd.f32 %v7926_v31, %v322_v47  ;;  %v6620_v37 = vunpack.c.h.bf16 %v7979_v60  ;;  %v1367_v40 = vshll.u32 %v7997_v32, 16 }
  0x8a   : > { %v1360_v38 = vrot.slane %v1358_v29, 4  ;;  %v1363_v39 = vrot.slane %v1361_v30, 5  ;;  %v1371_v41 = vshrl.u32 %v7997_v32, 16  ;;  %v1377_v43 = vshll.u32 %v7999_v34, 16 }
  0x8b   : > { %v774_v46 = vor.u32 %v772_v53, %v771_v20  ;;  %v775_v48 = vrot.slane %v771_v20, 4  ;;  %v779_v49 = vrot.slane %v777_v8, 7  ;;  %v1369_v51 = vrot.slane %v1367_v40, 5  ;;  %v925_v20 = vld [vmem:[#allocation2 + $0x48] sm:$0xf] }
  0x8c   : > { %v1364_v50 = vor.u32 %v1363_v39, %v1360_v38  ;;  %v1373_v12 = vrot.slane %v1371_v41, 4  ;;  %v390_v54 = vmax.f32 %v358_v22, 0.0  ;;  %v1379_v55 = vrot.slane %v1377_v43, 5  ;;  %v929_v38 = vld [vmem:[#allocation2 + $0x50] sm:$0x1] }
  0x8d   : > { %v782_v56 = vor.u32 %v780_v35, %v779_v49  ;;  %v784_v25 = vrot.slane %v779_v49, 4  ;;  %v975_v59 = vsel %vm7705_vm10, %v774_v46, %v974_v42  ;;  %v6511_v1 = vpack.c.bf16 %v389_v36, %v389_v36 }
  0x8e   : > { %v1365_v60 = vrot.slane %v1364_v50, 4  ;;  %v1374_v61 = vor.u32 %v1373_v12, %v1369_v51  ;;  %976 = vst [vmem:[#allocation2 + $0x9c] sm:$0xf] %v975_v59  ;;  %v6512_v2 = vpack.c.bf16 %v390_v54, %v390_v54  ;;  %v391_v13 = vmax.f32 %v359_v23, 0.0 }
  0x8f   : > { %v783_v4 = vsel %vm7698_vm9, %v775_v48, %v782_v56  ;;  %v979_v10 = vsel %vm7690_vm8, %v784_v25, %v978_v27  ;;  %v392_v14 = vmax.f32 %v360_v33, 0.0  ;;  %v650_v17 = vshrl.u32 %v6511_v1, 16  ;;  %v932_v48 = vld [vmem:[#allocation2 + $0x54] sm:$0xf] }
  0x90   : > { %v1370_v15 = vsel %vm7662_vm3, %v1365_v60, %v1369_v51  ;;  %v1375_v16 = vrot.slane %v1374_v61, 4  ;;  %977 = vst [vmem:[#allocation2 + $0xa0] sm:$0xf] %v783_v4  ;;  %980 = vst [vmem:[#allocation2 + $0xa4] sm:$0x1] %v979_v10  ;;  %v653_v47 = vshll.u32 %v6511_v1, 16  ;;  %v6513_v24 = vpack.c.bf16 %v391_v13, %v391_v13 }
  0x91   : > { %v658_v21 = vshrl.u32 %v6512_v2, 16  ;;  %v661_v19 = vshll.u32 %v6512_v2, 16  ;;  %v6514_v53 = vpack.c.bf16 %v392_v14, %v392_v14  ;;  %v652_v6 = vrot.slane %v650_v17, 7  ;;  %v936_v2 = vld [vmem:[#allocation2 + $0x5c] sm:$0x1] }
  0x92   : > { %v1380_v18 = vsel %vm7662_vm3, %v1375_v16, %v1379_v55  ;;  %v335_v22 = vmul.f32 %v7908_v5, %v6619_v9  ;;  %v336_v23 = vmul.f32 %v7908_v5, %v6620_v37  ;;  %v667_v8 = vshrl.u32 %v6513_v24, 16 }
  0x93   : > { %v6213_v29 = vcombine.low %v1370_v15, %v1380_v18  ;;  %v660_v30 = vrot.slane %v658_v21, 7  ;;  %v670_v35 = vshll.u32 %v6513_v24, 16  ;;  %v655_v36 = vor.u32 %v653_v47, %v652_v6  ;;  %v6722_v15 = vld [vmem:[%s7638_s6 + $0x70] sm:$0xff]  }
  0x94   : > { %v656_v33 = vrot.slane %v652_v6, 4  ;;  %v675_v39 = vshrl.u32 %v6514_v53, 16  ;;  %v678_v40 = vshll.u32 %v6514_v53, 16  ;;  %v669_v46 = vrot.slane %v667_v8, 7 }
  0x95   : > { %6995 = vmatprep.mubr.bf16.mxu1 %v6213_v29  ;;  %v8018_v41 = vld [vmem:[#allocation2 + $0x9c] sm:$0xf]  ;;  %v663_v42 = vor.u32 %v661_v19, %v660_v30  ;;  %v665_v43 = vrot.slane %v660_v30, 4  ;;  %v373_v9 = vadd.f32 %v7926_v31, %v335_v22  ;;  %v926_v50 = vsel %vm7705_vm10, %v655_v36, %v925_v20  ;;  %v8044_v20 = vld [vmem:[#allocation2 + $0x14] sm:$0x1] }
  0x96   : > { %v1382_v37 = vshrl.u32 %v8018_v41, 16  ;;  %v1385_v49 = vshll.u32 %v8018_v41, 16  ;;  %v677_v51 = vrot.slane %v675_v39, 7  ;;  %927 = vst [vmem:[#allocation2 + $0x48] sm:$0xf] %v926_v50  ;;  %v672_v56 = vor.u32 %v670_v35, %v669_v46 }
  0x97   : > { %v8025_v12 = vld [vmem:[#allocation2 + $0xa0] sm:$0xf]  ;;  %v8027_v27 = vld [vmem:[#allocation2 + $0xa4] sm:$0x1]  ;;  %v664_v54 = vsel %vm7698_vm9, %v656_v33, %v663_v42  ;;  %v930_v55 = vsel %vm7690_vm8, %v665_v43, %v929_v38  ;;  %v673_v25 = vrot.slane %v669_v46, 4  ;;  %v374_v21 = vadd.f32 %v7926_v31, %v336_v23  ;;  %v7455_v23 = vld [vmem:[%s10214_s1 + $0x118] sm:$0xff]  }
  0x98   : > { %v1384_v59 = vrot.slane %v1382_v37, 4  ;;  %v1387_v60 = vrot.slane %v1385_v49, 5  ;;  %v1391_v61 = vshll.u32 %v8025_v12, 16  ;;  %v1395_v1 = vshrl.u32 %v8025_v12, 16  ;;  %928 = vst [vmem:[#allocation2 + $0x4c] sm:$0xf] %v664_v54 }
  0x99   : > { %931 = vst [vmem:[#allocation2 + $0x50] sm:$0x1] %v930_v55  ;;  %v1401_v4 = vshll.u32 %v8027_v27, 16  ;;  %v680_v10 = vor.u32 %v678_v40, %v677_v51  ;;  %v682_v13 = vrot.slane %v677_v51, 4  ;;  %v933_v14 = vsel %vm7705_vm10, %v672_v56, %v932_v48  ;;  %v8047_v35 = vld [vmem:[#allocation2 + $0x68] sm:$0x1] }
  0x9a   : > { %v1388_v16 = vor.u32 %v1387_v60, %v1384_v59  ;;  %v1393_v17 = vrot.slane %v1391_v61, 5  ;;  %v1397_v47 = vrot.slane %v1395_v1, 4  ;;  %934 = vst [vmem:[#allocation2 + $0x54] sm:$0xf] %v933_v14  ;;  %v405_v18 = vmax.f32 %v373_v9, 0.0 }
  0x9b   : > { %v1403_v19 = vrot.slane %v1401_v4, 5  ;;  %v681_v24 = vsel %vm7698_vm9, %v673_v25, %v680_v10  ;;  %v937_v53 = vsel %vm7690_vm8, %v682_v13, %v936_v2  ;;  %v406_v29 = vmax.f32 %v374_v21, 0.0  ;;  %v8064_v50 = vld [vmem:[#allocation2] sm:$0xf]  ;;  %v8066_v51 = vld [vmem:[#allocation2 + $0x4] sm:$0xf] }
  0x9c   : > { %v1389_v6 = vrot.slane %v1388_v16, 4  ;;  %v1398_v22 = vor.u32 %v1397_v47, %v1393_v17  ;;  %935 = vst [vmem:[#allocation2 + $0x58] sm:$0xf] %v681_v24  ;;  %938 = vst [vmem:[#allocation2 + $0x5c] sm:$0x1] %v937_v53  ;;  %v6623_v30 = vunpack.c.l.bf16 %v6722_v15  ;;  %v2110_v8 = vrot.slane %v8044_v20, 5 }
  0x9d   : > { %v6527_v36 = vpack.c.bf16 %v405_v18, %v405_v18  ;;  %v6624_v33 = vunpack.c.h.bf16 %v6722_v15  ;;  %v8052_v40 = vld [vmem:[#allocation2 + $0x48] sm:$0xf]  ;;  %v8054_v42 = vpack.c.bf16 %v406_v29, %v406_v29  ;;  %vm2095_vm11 = vcmask 1042432  }
  0x9e   : > { %v1394_v38 = vsel %vm7662_vm3, %v1389_v6, %v1393_v17  ;;  %v1399_v39 = vrot.slane %v1398_v22, 4  ;;  %v337_v43 = vmul.f32 %v7908_v5, %v6623_v30  ;;  %v1214_v9 = vshrl.u32 %v8052_v40, 16 }
  0x9f   : > { %v8057_v46 = vld [vmem:[#allocation2 + $0x4c] sm:$0xf]  ;;  %v1217_v37 = vshll.u32 %v8052_v40, 16  ;;  %v338_v49 = vmul.f32 %v7908_v5, %v6624_v33  ;;  %vm2096_vm12 = vcmask 1046532   ;;  %v786_v2 = vshrl.u32 %v6527_v36, 16 }
  0xa0   : > { %v8059_v48 = vld [vmem:[#allocation2 + $0x50] sm:$0x1]  ;;  %v1404_v55 = vsel %vm7662_vm3, %v1399_v39, %v1403_v19  ;;  %v1223_v56 = vshll.u32 %v8057_v46, 16  ;;  %v1227_v25 = vshrl.u32 %v8057_v46, 16  ;;  %v1216_v5 = vrot.slane %v1214_v9, 4  ;;  %vm8098_vm13 = vmor %vm2095_vm11, %vm2096_vm12 }
  0xa1   : > { %v1233_v59 = vshll.u32 %v8059_v48, 16  ;;  %v6214_v60 = vcombine.low %v1394_v38, %v1404_v55  ;;  %v1219_v61 = vrot.slane %v1217_v37, 5  ;;  %v8075_v1 = vld [vmem:[#allocation2 + $0x54] sm:$0xf]  ;;  %v788_v21 = vrot.slane %v786_v2, 7 }
  0xa2   : > { %v1225_v4 = vrot.slane %v1223_v56, 5  ;;  %v1229_v10 = vrot.slane %v1227_v25, 4  ;;  %v1238_v14 = vshrl.u32 %v8075_v1, 16  ;;  %v1241_v47 = vshll.u32 %v8075_v1, 16  ;;  %v981_v38 = vld [vmem:[#allocation2 + $0xa8] sm:$0xf] }
  0xa3   : > { %v1235_v13 = vrot.slane %v1233_v59, 5  ;;  %6996 = vmatmul.mubr.bf16.gmra.mxu1 %v6214_v60  ;;  %v1220_v15 = vor.u32 %v1219_v61, %v1216_v5  ;;  %v8078_v16 = vld [vmem:[#allocation2 + $0x58] sm:$0xf]  ;;  %v8080_v17 = vld [vmem:[#allocation2 + $0x5c] sm:$0x1]  ;;  %v375_v19 = vadd.f32 %v7926_v31, %v337_v43  ;;  %v789_v33 = vshll.u32 %v6527_v36, 16 }
  0xa4   : > { %v1230_v24 = vor.u32 %v1229_v10, %v1225_v4  ;;  %v1240_v53 = vrot.slane %v1238_v14, 4  ;;  %v1247_v18 = vshll.u32 %v8078_v16, 16  ;;  %v1251_v6 = vshrl.u32 %v8078_v16, 16  ;;  %v2047_v60 = vld [vmem:[#allocation2] sm:$0xe] }
  0xa5   : > { %v1221_v22 = vrot.slane %v1220_v15, 4  ;;  %v1243_v29 = vrot.slane %v1241_v47, 5  ;;  %v1257_v30 = vshll.u32 %v8080_v17, 16  ;;  %v792_v55 = vrot.slane %v788_v21, 4  ;;  %v2048_v10 = vld [vmem:[#allocation2 + $0xc] sm:$0xe] }
  0xa6   : > { %v1231_v39 = vrot.slane %v1230_v24, 4  ;;  %v1249_v9 = vrot.slane %v1247_v18, 5  ;;  %v1253_v37 = vrot.slane %v1251_v6, 4  ;;  %v791_v59 = vor.u32 %v789_v33, %v788_v21  ;;  %v985_v6 = vld [vmem:[#allocation2 + $0xb0] sm:$0x1] }
  0xa7   : > { %v1226_v56 = vsel %vm7662_vm3, %v1221_v22, %v1225_v4  ;;  %v1244_v43 = vor.u32 %v1243_v29, %v1240_v53  ;;  %v1259_v25 = vrot.slane %v1257_v30, 5  ;;  %v794_v2 = vshrl.u32 %v8054_v42, 16 }
  0xa8   : > { %v1236_v5 = vsel %vm7662_vm3, %v1231_v39, %v1235_v13  ;;  %v1254_v61 = vor.u32 %v1253_v37, %v1249_v9  ;;  %v797_v36 = vshll.u32 %v8054_v42, 16  ;;  %v982_v47 = vsel %vm7705_vm10, %v791_v59, %v981_v38 }
  0xa9   : > { %v6207_v14 = vcombine.low %v1226_v56, %v1236_v5  ;;  %v1245_v15 = vrot.slane %v1244_v43, 4  ;;  %v376_v4 = vadd.f32 %v7926_v31, %v338_v49  ;;  %v796_v53 = vrot.slane %v794_v2, 7  ;;  %983 = vst [vmem:[#allocation2 + $0xa8] sm:$0xf] %v982_v47  ;;  %v2049_v43 = vld [vmem:[#allocation2 + $0x18] sm:$0xe] }
  0xaa   : > { %v1255_v24 = vrot.slane %v1254_v61, 4  ;;  %v407_v21 = vmax.f32 %v375_v19, 0.0  ;;  %v10241_v13 = vmov 0  ;;  %v6249_v18 = vrot.slane %v2047_v60, 9  ;;  %v8120_v47 = vld [vmem:[#allocation2 + $0xc] sm:$0xf] }
  0xab   : > { %v10242_v13 = vsel %vm8098_vm13, 4294967295, %v10241_v13  ;;  %6983 = vmatprep.mubr.bf16.mxu0 %v6207_v14  ;;  %v1250_v42 = vsel %vm7662_vm3, %v1245_v15, %v1249_v9  ;;  %v408_v22 = vmax.f32 %v376_v4, 0.0  ;;  %v2100_v29 = vrot.slane %v8066_v51, 5  ;;  %v988_v14 = vld [vmem:[#allocation2 + $0xb4] sm:$0xf] }
  0xac   : > { %10243 = vst [vmem:[#allocation6_spill] sm:$0xff] %v10242_v13  ;;  %v6250_v31 = vrot.slane %v2048_v10, 9  ;;  %v1260_v49 = vsel %vm7662_vm3, %v1255_v24, %v1259_v25  ;;  %v799_v19 = vor.u32 %v797_v36, %v796_v53  ;;  %v801_v30 = vrot.slane %v796_v53, 4  ;;  %v8117_v36 = vld [vmem:[#allocation2 + $0x10] sm:$0xf] }
  0xad   : > { %v6529_v33 = vpack.c.bf16 %v407_v21, %v407_v21  ;;  %v6208_v38 = vcombine.low %v1250_v42, %v1260_v49  ;;  %v6530_v39 = vpack.c.bf16 %v408_v22, %v408_v22  ;;  %v2101_v37 = vsel %vm8098_vm13, %v6249_v18, %v2100_v29  ;;  %v8128_v18 = vld [vmem:[#allocation2 + $0x1c] sm:$0xf] }
  0xae   : > { %v2102_v56 = vrot.slane %v2100_v29, 4  ;;  %v800_v9 = vsel %vm7698_vm9, %v792_v55, %v799_v19  ;;  %v986_v59 = vsel %vm7690_vm8, %v801_v30, %v985_v6  ;;  %v2107_v10 = vrot.slane %v8117_v36, 5  ;;  %v992_v19 = vld [vmem:[#allocation2 + $0xbc] sm:$0x1] }
  0xaf   : > { %v803_v60 = vshrl.u32 %v6529_v33, 16  ;;  %v806_v5 = vshll.u32 %v6529_v33, 16  ;;  %6984 = vmatmul.mubr.bf16.gmra.mxu0 %v6208_v38  ;;  %984 = vst [vmem:[#allocation2 + $0xac] sm:$0xf] %v800_v9  ;;  %987 = vst [vmem:[#allocation2 + $0xb0] sm:$0x1] %v986_v59 }
  0xb0   : > { %v811_v25 = vshrl.u32 %v6530_v39, 16  ;;  %v814_v61 = vshll.u32 %v6530_v39, 16  ;;  %v2104_v2 = vsel %vm8098_vm13, %v2102_v56, %v2103_v52  ;;  %v6251_v24 = vrot.slane %v2049_v43, 9  ;;  %v8124_v53 = vld [vmem:[#allocation2 + $0xa8] sm:$0xf] }
  0xb1   : > { %v805_v55 = vrot.slane %v803_v60, 7  ;;  %v6265_v15 = vcombine.low %v2101_v37, %v2104_v2  ;;  %v2108_v7 = vsel %vm8098_vm13, %v6250_v31, %v2107_v10  ;;  %v2109_v52 = vrot.slane %v2107_v10, 4  ;;  %v2050_v39 = vld [vmem:[#allocation2 + $0x24] sm:$0xe] }
  0xb2   : > { %v813_v21 = vrot.slane %v811_v25, 7  ;;  %v2114_v42 = vrot.slane %v8128_v18, 5  ;;  %v1406_v6 = vshrl.u32 %v8124_v53, 16  ;;  %v1409_v22 = vshll.u32 %v8124_v53, 16  ;;  %v7443_v25 = vld [vmem:[%s10214_s1 + $0x130] sm:$0xff]  }
  0xb3   : > { %v808_v29 = vor.u32 %v806_v5, %v805_v55  ;;  %v809_v49 = vrot.slane %v805_v55, 4  ;;  %7067 = vmatprep.mubr.bf16.mxu0 %v6265_v15  ;;  %v2111_v31 = vsel %vm8098_vm13, %v2109_v52, %v2110_v8  ;;  %v7541_v5 = vld [vmem:[#allocation2 + $0x20] sm:$0x1]  ;;  %v8152_v55 = vld [vmem:[#allocation2 + $0x18] sm:$0xf]  ;;  %v6252_v15 = vrot.slane %v2050_v39, 9 }
  0xb4   : > { %v816_v30 = vor.u32 %v814_v61, %v813_v21  ;;  %v818_v33 = vrot.slane %v813_v21, 4  ;;  %v2115_v38 = vsel %vm8098_vm13, %v6251_v24, %v2114_v42  ;;  %v1408_v37 = vrot.slane %v1406_v6, 4  ;;  %v8156_v24 = vld [vmem:[#allocation2 + $0x28] sm:$0xf] }
  0xb5   : > { %v1411_v56 = vrot.slane %v1409_v22, 5  ;;  %v989_v43 = vsel %vm7705_vm10, %v808_v29, %v988_v14  ;;  %v6266_v9 = vcombine.low %v2108_v7, %v2111_v31  ;;  %v2116_v60 = vrot.slane %v2114_v42, 4  ;;  %v2051_v22 = vld [vmem:[#allocation2 + $0x30] sm:$0xe]  ;;  %v7447_v31 = vld [vmem:[%s10214_s1 + $0x128] sm:$0xff]  }
  0xb6   : > { %v817_v59 = vsel %vm7698_vm9, %v809_v49, %v816_v30  ;;  %990 = vst [vmem:[#allocation2 + $0xb4] sm:$0xf] %v989_v43  ;;  %v993_v20 = vsel %vm7690_vm8, %v818_v33, %v992_v19  ;;  %v2117_v8 = vrot.slane %v7541_v5, 5  ;;  %v8148_v61 = vld [vmem:[#allocation2 + $0xac] sm:$0xf]  ;;  %v2121_v21 = vrot.slane %v8156_v24, 5 }
  0xb7   : > { %v8150_v2 = vld [vmem:[#allocation2 + $0xb0] sm:$0x1]  ;;  %v1412_v10 = vor.u32 %v1411_v56, %v1408_v37  ;;  %991 = vst [vmem:[#allocation2 + $0xb8] sm:$0xf] %v817_v59  ;;  %994 = vst [vmem:[#allocation2 + $0xbc] sm:$0x1] %v993_v20  ;;  %7068 = vmatmul.mubr.bf16.vlgmr.msra.gmra.mxu0 %v6266_v9 }
  0xb8   : > { %v1415_v7 = vshll.u32 %v8148_v61, 16  ;;  %v1419_v52 = vshrl.u32 %v8148_v61, 16  ;;  %v1425_v42 = vshll.u32 %v8150_v2, 16  ;;  %v2118_v6 = vsel %vm8098_vm13, %v2116_v60, %v2117_v8  ;;  %v7544_v49 = vld [vmem:[%s10214_s1 + $0x138] sm:$0xff]   ;;  %v7545_v43 = vld [vmem:[#allocation2 + $0x2c] sm:$0x1] }
  0xb9   : > { %v1413_v29 = vrot.slane %v1412_v10, 4  ;;  %7148 = vmatpush3.bf16.msra.mxu0 %v7544_v49  ;;  %v6267_v19 = vcombine.low %v2115_v38, %v2118_v6  ;;  %v2122_v30 = vsel %vm8098_vm13, %v6252_v15, %v2121_v21  ;;  %v2123_v33 = vrot.slane %v2121_v21, 4  ;;  %v2052_v59 = vld [vmem:[#allocation2 + $0x3c] sm:$0xe]  ;;  %v8172_v20 = vld [vmem:[#allocation2 + $0x24] sm:$0xf] }
  0xba   : > { %v1417_v39 = vrot.slane %v1415_v7, 5  ;;  %v1421_v37 = vrot.slane %v1419_v52, 4  ;;  %v1427_v56 = vrot.slane %v1425_v42, 5  ;;  %v2124_v9 = vrot.slane %v7545_v43, 5  ;;  %7149 = vmatprep.subr.bf16.mxu0 %v7443_v25 }
  0xbb   : > { %7071 = vmatprep.mubr.bf16.mxu0 %v6267_v19  ;;  %v6253_v60 = vrot.slane %v2051_v22, 9  ;;  %v2128_v5 = vrot.slane %v7944_v57, 5  ;;  %v2131_v8 = vrot.slane %v7946_v58, 5  ;;  %v6254_v49 = vrot.slane %v2052_v59, 9  ;;  %v7451_v58 = vld [vmem:[%s10214_s1 + $0x120] sm:$0xff]  }
  0xbc   : > { %v1418_v10 = vsel %vm7662_vm3, %v1413_v29, %v1417_v39  ;;  %v1422_v15 = vor.u32 %v1421_v37, %v1417_v39  ;;  %v2125_v21 = vsel %vm8098_vm13, %v2123_v33, %v2124_v9  ;;  %v2135_v7 = vrot.slane %v7960_v44, 5 }
  0xbd   : > { %v8184_v52 = vld [vmem:[#allocation2 + $0xb4] sm:$0xf]  ;;  %v6268_v42 = vcombine.low %v2122_v30, %v2125_v21  ;;  %7150 = vmatpush3.bf16.msra.mxu0 %v7443_v25  ;;  %v2129_v6 = vsel %vm8098_vm13, %v6253_v60, %v2128_v5  ;;  %v2130_v22 = vrot.slane %v2128_v5, 4  ;;  %v2053_v25 = vld [vmem:[#allocation2 + $0x48] sm:$0xe] }
  0xbe   : > { %v1423_v29 = vrot.slane %v1422_v15, 4  ;;  %v8191_v19 = vld [vmem:[#allocation2 + $0xb8] sm:$0xf]  ;;  %v8193_v33 = vld [vmem:[#allocation2 + $0xbc] sm:$0x1]  ;;  %v1430_v39 = vshrl.u32 %v8184_v52, 16  ;;  %7151 = vmatprep.subr.bf16.mxu0 %v7447_v31 }
  0xbf   : > { %v1433_v43 = vshll.u32 %v8184_v52, 16  ;;  %v1439_v9 = vshll.u32 %v8191_v19, 16  ;;  %v1443_v59 = vshrl.u32 %v8191_v19, 16  ;;  %v1449_v60 = vshll.u32 %v8193_v33, 16  ;;  %v2054_v5 = vld [vmem:[#allocation2 + $0x54] sm:$0xe]  ;;  %7072 = vmatmul.mubr.bf16.gmra.mxu0 %v6268_v42 }
  0xc0   : > { %v1428_v15 = vsel %vm7662_vm3, %v1423_v29, %v1427_v56  ;;  %v1432_v21 = vrot.slane %v1430_v39, 4  ;;  %v2132_v30 = vsel %vm8098_vm13, %v2130_v22, %v2131_v8  ;;  %v2136_v56 = vsel %vm8098_vm13, %v6254_v49, %v2135_v7 }
  0xc1   : > { %v6215_v37 = vcombine.low %v1418_v10, %v1428_v15  ;;  %v1435_v38 = vrot.slane %v1433_v43, 5  ;;  %v1441_v14 = vrot.slane %v1439_v9, 5  ;;  %v1445_v4 = vrot.slane %v1443_v59, 4  ;;  %7152 = vmatpush3.bf16.msra.mxu0 %v7447_v31 }
  0xc2   : > { %v1451_v54 = vrot.slane %v1449_v60, 5  ;;  %v6269_v62 = vcombine.low %v2129_v6, %v2132_v30  ;;  %v2137_v42 = vrot.slane %v2135_v7, 4  ;;  %7153 = vmatprep.subr.bf16.mxu0 %v7451_v58  ;;  %v2138_v10 = vrot.slane %v7962_v0, 5  ;;  %v2055_v6 = vld [vmem:[#allocation2 + $0x60] sm:$0xe] }
  0xc3   : > { %6999 = vmatprep.mubr.bf16.mxu1 %v6215_v37  ;;  %v1436_v8 = vor.u32 %v1435_v38, %v1432_v21  ;;  %v1446_v22 = vor.u32 %v1445_v4, %v1441_v14  ;;  %v6255_v29 = vrot.slane %v2053_v25, 9  ;;  %v2142_v31 = vrot.slane %v8057_v46, 5  ;;  %v2056_v4 = vld [vmem:[#allocation2 + $0x6c] sm:$0xe]  ;;  %v7459_v25 = vld [vmem:[%s10214_s1 + $0x110] sm:$0xff]  }
  0xc4   : > { %7075 = vmatprep.mubr.bf16.mxu0 %v6269_v62  ;;  %v2145_v39 = vrot.slane %v8059_v48, 5  ;;  %v6256_v43 = vrot.slane %v2054_v5, 9  ;;  %v2149_v9 = vrot.slane %v8078_v16, 5  ;;  %v2139_v7 = vsel %vm8098_vm13, %v2137_v42, %v2138_v10  ;;  %v2057_v5 = vld [vmem:[#allocation2 + $0x78] sm:$0xe] }
  0xc5   : > { %v1437_v30 = vrot.slane %v1436_v8, 4  ;;  %v1447_v59 = vrot.slane %v1446_v22, 4  ;;  %v2152_v38 = vrot.slane %v8080_v17, 5  ;;  %7154 = vmatpush3.bf16.msra.mxu0 %v7451_v58  ;;  %v6270_v0 = vcombine.low %v2136_v56, %v2139_v7  ;;  %v8238_v42 = vld [vmem:[#allocation2 + $0x64] sm:$0xf] }
  0xc6   : > { %v2143_v62 = vsel %vm8098_vm13, %v6255_v29, %v2142_v31  ;;  %v2144_v49 = vrot.slane %v2142_v31, 4  ;;  %v8225_v48 = vsel %vm8098_vm13, %v6256_v43, %v2149_v9  ;;  %7155 = vmatprep.subr.bf16.mxu0 %v7455_v23  ;;  %v2151_v58 = vrot.slane %v2149_v9, 4  ;;  %v2058_v31 = vld [vmem:[#allocation2 + $0x84] sm:$0xe]  ;;  %v2059_v7 = vld [vmem:[#allocation2 + $0x90] sm:$0xe] }
  0xc7   : > { %v1442_v37 = vsel %vm7662_vm3, %v1437_v30, %v1441_v14  ;;  %v1452_v17 = vsel %vm7662_vm3, %v1447_v59, %v1451_v54  ;;  %7076 = vmatmul.mubr.bf16.gmra.mxu0 %v6270_v0  ;;  %v6257_v56 = vrot.slane %v2055_v6, 9  ;;  %v2156_v8 = vrot.slane %v8238_v42, 5  ;;  %v8243_v54 = vld [vmem:[#allocation2 + $0x60] sm:$0xf]  ;;  %v8253_v30 = vld [vmem:[#allocation2 + $0x70] sm:$0xf] }
  0xc8   : > { %v6216_v15 = vcombine.low %v1442_v37, %v1452_v17  ;;  %v2146_v21 = vsel %vm8098_vm13, %v2144_v49, %v2145_v39  ;;  %v2153_v14 = vsel %vm8098_vm13, %v2151_v58, %v2152_v38  ;;  %v6258_v29 = vrot.slane %v2056_v4, 9  ;;  %v7463_v39 = vld [vmem:[%s10214_s1 + $0x108] sm:$0xff]   ;;  %v7550_v38 = vld [vmem:[#allocation2 + $0x74] sm:$0x1] }
  0xc9   : > { %v6271_v22 = vcombine.low %v2143_v62, %v2146_v21  ;;  %7156 = vmatpush3.bf16.msra.mxu0 %v7455_v23  ;;  %v6272_v43 = vcombine.low %v8225_v48, %v2153_v14  ;;  %v2157_v9 = vsel %vm8098_vm13, %v6257_v56, %v2156_v8  ;;  %v2158_v6 = vrot.slane %v2156_v8, 4  ;;  %v8259_v0 = vld [vmem:[#allocation2 + $0x6c] sm:$0xf]  ;;  %v8263_v48 = vld [vmem:[#allocation2 + $0x7c] sm:$0xf] }
  0xca   : > { %7000 = vmatmul.mubr.bf16.gmra.mxu1 %v6216_v15  ;;  %v2163_v59 = vrot.slane %v8253_v30, 5  ;;  %7157 = vmatprep.subr.bf16.mxu0 %v7459_v25  ;;  %v10244_v23 = vcombine.low %v8064_v50, %v8066_v51  ;;  %v2166_v4 = vrot.slane %v7550_v38, 5  ;;  %v6259_v49 = vrot.slane %v2057_v5, 9  ;;  %v7553_v15 = vld [vmem:[#allocation2 + $0x80] sm:$0x1] }
  0xcb   : > { %7079 = vmatprep.mubr.bf16.mxu0 %v6271_v22  ;;  %v2170_v37 = vrot.slane %v8263_v48, 5  ;;  %v10245_v17 = vrot.slane %v8047_v35, 5  ;;  %v2173_v21 = vrot.slane %v7553_v15, 5  ;;  %v2060_v56 = vld [vmem:[#allocation2 + $0x9c] sm:$0xe]  ;;  %v2205_v35 = vrot.slane %v8191_v19, 5 }
  0xcc   : > { %7019 = vmatprep.mubr.bf16.mxu1 %v10244_v23  ;;  %v8272_v50 = vsel %vm8098_vm13, %v6258_v29, %v2163_v59  ;;  %v2165_v51 = vrot.slane %v2163_v59, 4  ;;  %v8278_v14 = vld [vmem:[#allocation2 + $0x78] sm:$0xf]  ;;  %v8286_v59 = vld [vmem:[#allocation2 + $0x88] sm:$0xf] }
  0xcd   : > { %v2160_v58 = vsel %vm8098_vm13, %v2158_v6, %v10245_v17  ;;  %v8276_v5 = vsel %vm8098_vm13, %v6259_v49, %v2170_v37  ;;  %v2172_v22 = vrot.slane %v2170_v37, 4  ;;  %7158 = vmatpush3.bf16.msra.mxu0 %v7459_v25  ;;  %v6260_v6 = vrot.slane %v2058_v31, 9  ;;  %v7556_v23 = vld [vmem:[#allocation2 + $0x8c] sm:$0x1]  ;;  %v7467_v49 = vld [vmem:[%s10214_s1 + $0x100] sm:$0xff]   ;;  %v7441_v25 = vld [vmem:[%s10214_s1 + $0xf0] sm:$0xff]  }
  0xce   : > { %v6273_v8 = vcombine.low %v2157_v9, %v2160_v58  ;;  %v8284_v29 = vsel %vm8098_vm13, %v2165_v51, %v2166_v4  ;;  %v2177_v9 = vrot.slane %v8286_v59, 5  ;;  %v2180_v38 = vrot.slane %v7556_v23, 5  ;;  %7159 = vmatprep.subr.bf16.mxu0 %v7463_v39  ;;  %v8301_v37 = vld [vmem:[#allocation2 + $0x84] sm:$0xf]  ;;  %v2061_v51 = vld [vmem:[#allocation2 + $0xa8] sm:$0xe] }
  0xcf   : > { %v6274_v4 = vcombine.low %v8272_v50, %v8284_v29  ;;  %v8299_v31 = vsel %vm8098_vm13, %v2172_v22, %v2173_v21  ;;  %v6261_v58 = vrot.slane %v2059_v7, 9  ;;  %7080 = vmatmul.mubr.bf16.gmra.mxu0 %v6272_v43  ;;  %v2184_v29 = vrot.slane %v7997_v32, 5  ;;  %v2062_v21 = vld [vmem:[#allocation2 + $0xb4] sm:$0xe]  ;;  %v8366_v17 = vld [vmem:[#allocation2 + $0x14] sm:$0x1] }
  0xd0   : > { %v6275_v15 = vcombine.low %v8276_v5, %v8299_v31  ;;  %v8309_v23 = vsel %vm8098_vm13, %v6260_v6, %v2177_v9  ;;  %v2179_v50 = vrot.slane %v2177_v9, 4  ;;  %7083 = vmatprep.mubr.bf16.mxu0 %v6273_v8  ;;  %v2187_v22 = vrot.slane %v7999_v34, 5  ;;  %v8319_v5 = vld [vmem:[%s10214_s1 + $0x1b8] sm:$0xff]  }
  0xd1   : > { %v6262_v7 = vrot.slane %v2060_v56, 9  ;;  %v2191_v43 = vrot.slane %v8025_v12, 5  ;;  %7160 = vmatpush3.bf16.msra.mxu0 %v7463_v39  ;;  %v10246_v6 = vcombine.low %v8120_v47, %v8117_v36  ;;  %v8330_v34 = vsel %vm8098_vm13, %v6261_v58, %v2184_v29  ;;  %v7558_v9 = vld [vmem:[%s10214_s1 + $0xf8] sm:$0xff]   ;;  %v2916_v58 = vld [vmem:[#allocation2 + $0xc] sm:$0xf] }
  0xd2   : > { %v8326_v8 = vsel %vm8098_vm13, %v2179_v50, %v2180_v38  ;;  %v2186_v56 = vrot.slane %v2184_v29, 4  ;;  %v2194_v39 = vrot.slane %v8027_v27, 5  ;;  %7161 = vmatprep.subr.bf16.mxu0 %v7467_v49  ;;  %v10247_v36 = vcombine.low %v8152_v55, %v8128_v18  ;;  %v8347_v50 = vld [vmem:[#allocation2 + $0x10] sm:$0xf]  ;;  %v7445_v18 = vld [vmem:[%s10214_s1 + $0xe8] sm:$0xff]  }
  0xd3   : > { %7020 = vmatmul.mubr.bf16.vlgmr.msra.gmra.mxu1 %v10246_v6  ;;  %v8343_v38 = vsel %vm8098_vm13, %v6262_v7, %v2191_v43  ;;  %v2193_v31 = vrot.slane %v2191_v43, 4  ;;  %v6263_v29 = vrot.slane %v2061_v51, 9  ;;  %v2198_v7 = vrot.slane %v8148_v61, 5  ;;  %v8382_v62 = vld [vmem:[#allocation2 + $0x1c] sm:$0xf] }
  0xd4   : > { %7100 = vmatpush3.bf16.msra.mxu1 %v7558_v9  ;;  %7023 = vmatprep.mubr.bf16.mxu1 %v10247_v36  ;;  %v8354_v55 = vsel %vm8098_vm13, %v2186_v56, %v2187_v22  ;;  %v2201_v43 = vrot.slane %v8150_v2, 5  ;;  %v6264_v27 = vrot.slane %v2062_v21, 9  ;;  %v2919_v22 = vld [vmem:[#allocation2 + $0x18] sm:$0xf]  ;;  %v2208_v21 = vrot.slane %v8193_v33, 5  ;;  %10248 = vst [vmem:[#allocation7_spill] sm:$0xff] %v8382_v62 }
  0xd5   : > { %7101 = vmatprep.subr.bf16.mxu1 %v7441_v25  ;;  %v8362_v9 = vsel %vm8098_vm13, %v2193_v31, %v2194_v39  ;;  %7162 = vmatpush3.bf16.msra.mxu0 %v7467_v49  ;;  %v8372_v2 = vsel %vm8098_vm13, %v6263_v29, %v2198_v7  ;;  %v2200_v56 = vrot.slane %v2198_v7, 4  ;;  %v7449_v49 = vld [vmem:[%s10214_s1 + $0xe0] sm:$0xff]   ;;  %v2965_v31 = vshrl.u32 %v2916_v58, 16 }
  0xd6   : > { %7243 = vmatprep.subr.bf16.mxu0 %v8319_v5  ;;  %v2968_v36 = vshll.u32 %v2916_v58, 16  ;;  %v2207_v7 = vrot.slane %v2205_v35, 4  ;;  %v2974_v33 = vshll.u32 %v8347_v50, 16  ;;  %v2978_v60 = vshrl.u32 %v8347_v50, 16  ;;  %v2922_v51 = vld [vmem:[#allocation2 + $0x24] sm:$0xf] }
  0xd7   : > { %7084 = vmatmul.mubr.bf16.gmra.mxu0 %v6274_v4  ;;  %v8386_v29 = vsel %vm8098_vm13, %v2200_v56, %v2201_v43  ;;  %v2967_v58 = vrot.slane %v2965_v31, 4  ;;  %v10249_v4 = vcombine.low %v8172_v20, %v8156_v24  ;;  %v2984_v43 = vshll.u32 %v8366_v17, 16  ;;  %v8407_v56 = vld [vmem:[#allocation2 + $0x20] sm:$0x1] }
  0xd8   : > { %7102 = vmatpush3.bf16.msra.mxu1 %v7441_v25  ;;  %v8390_v25 = vsel %vm8098_vm13, %v6264_v27, %v2205_v35  ;;  %7087 = vmatprep.mubr.bf16.mxu0 %v6275_v15  ;;  %v2970_v10 = vrot.slane %v2968_v36, 5  ;;  %v7453_v27 = vld [vmem:[%s10214_s1 + $0xd8] sm:$0xff]   ;;  %v8404_v35 = vsel %vm8098_vm13, %v2207_v7, %v2208_v21  ;;  %v2976_v15 = vrot.slane %v2974_v33, 5  ;;  %v8414_v21 = vld [vmem:[#allocation2 + $0x28] sm:$0xf] }
  0xd9   : > { %7103 = vmatprep.subr.bf16.mxu1 %v7445_v18  ;;  %v2989_v36 = vshrl.u32 %v2919_v22, 16  ;;  %v10250_v31 = vcombine.low %v7931_v45, %v7944_v57  ;;  %v2992_v39 = vshll.u32 %v2919_v22, 16  ;;  %v2986_v7 = vrot.slane %v2984_v43, 5 }
  0xda   : > { %v2971_v20 = vor.u32 %v2970_v10, %v2967_v58  ;;  %v2998_v6 = vshll.u32 %v8382_v62, 16  ;;  %v3002_v47 = vshrl.u32 %v8382_v62, 16  ;;  %v8419_v10 = vld [vmem:[#allocation2 + $0x2c] sm:$0x1]  ;;  %v3016_v22 = vshll.u32 %v2922_v51, 16 }
  0xdb   : > { %7024 = vmatmul.mubr.bf16.gmra.mxu1 %v10249_v4  ;;  %v2980_v4 = vrot.slane %v2978_v60, 4  ;;  %v2991_v33 = vrot.slane %v2989_v36, 4  ;;  %v2994_v57 = vrot.slane %v2992_v39, 5  ;;  %v3013_v60 = vshrl.u32 %v2922_v51, 16  ;;  %v2925_v58 = vld [vmem:[#allocation2 + $0x30] sm:$0xf] }
  0xdc   : > { %7027 = vmatprep.mubr.bf16.mxu1 %v10250_v31  ;;  %7104 = vmatpush3.bf16.msra.mxu1 %v7445_v18  ;;  %v2972_v3 = vrot.slane %v2971_v20, 4  ;;  %v3008_v18 = vshll.u32 %v8407_v56, 16  ;;  %v3000_v31 = vrot.slane %v2998_v6, 5  ;;  %v3004_v24 = vrot.slane %v3002_v47, 4  ;;  %v8423_v62 = vld [vmem:[#allocation2 + $0x34] sm:$0xf] }
  0xdd   : > { %7105 = vmatprep.subr.bf16.mxu1 %v7449_v49  ;;  %v2981_v45 = vor.u32 %v2980_v4, %v2976_v15  ;;  %v2995_v11 = vor.u32 %v2994_v57, %v2991_v33  ;;  %v10251_v39 = vcombine.low %v8309_v23, %v8326_v8  ;;  %v7457_v47 = vld [vmem:[%s10214_s1 + $0xd0] sm:$0xff]   ;;  %v3015_v51 = vrot.slane %v3013_v60, 4  ;;  %v8444_v60 = vld [vmem:[#allocation2 + $0x38] sm:$0x1] }
  0xde   : > { %v2977_v43 = vsel %vm7662_vm3, %v2972_v3, %v2976_v15  ;;  %v3010_v13 = vrot.slane %v3008_v18, 5  ;;  %v3005_v6 = vor.u32 %v3004_v24, %v3000_v31  ;;  %v3022_v20 = vshll.u32 %v8414_v21, 16 }
  0xdf   : > { %v2982_v36 = vrot.slane %v2981_v45, 4  ;;  %7088 = vmatmul.mubr.bf16.gmra.mxu0 %v10251_v39  ;;  %v10252_v3 = vcombine.low %v8330_v34, %v8354_v55  ;;  %v2996_v4 = vrot.slane %v2995_v11, 4  ;;  %v3026_v23 = vshrl.u32 %v8414_v21, 16  ;;  %v2928_v34 = vld [vmem:[#allocation2 + $0x3c] sm:$0xf] }
  0xe0   : > { %7106 = vmatpush3.bf16.msra.mxu1 %v7449_v49  ;;  %v3018_v49 = vrot.slane %v3016_v22, 5  ;;  %v3032_v8 = vshll.u32 %v8419_v10, 16  ;;  %v10253_v33 = vcombine.low %v7952_v63, %v7960_v44  ;;  %v3006_v45 = vrot.slane %v3005_v6, 4  ;;  %v8451_v44 = vld [vmem:[#allocation2 + $0x40] sm:$0xf] }
  0xe1   : > { %7107 = vmatprep.subr.bf16.mxu1 %v7453_v27  ;;  %7091 = vmatprep.mubr.bf16.mxu0 %v10252_v3  ;;  %v2987_v15 = vsel %vm7662_vm3, %v2982_v36, %v2986_v7  ;;  %v3024_v18 = vrot.slane %v3022_v20, 5  ;;  %v10254_v55 = vcombine.low %v8052_v40, %v8057_v46  ;;  %v3001_v11 = vsel %vm7662_vm3, %v2996_v4, %v3000_v31  ;;  %v8465_v4 = vld [vmem:[#allocation2 + $0x44] sm:$0x1] }
  0xe2   : > { %v8442_v24 = vcombine.low %v2977_v43, %v2987_v15  ;;  %v3019_v57 = vor.u32 %v3018_v49, %v3015_v51  ;;  %v3028_v7 = vrot.slane %v3026_v23, 4  ;;  %v3034_v22 = vrot.slane %v3032_v8, 5  ;;  %v7461_v43 = vld [vmem:[%s10214_s1 + $0xc8] sm:$0xff]  }
  0xe3   : > { %7028 = vmatmul.mubr.bf16.gmra.mxu1 %v10253_v33  ;;  %v3037_v63 = vshrl.u32 %v2925_v58, 16  ;;  %v3011_v36 = vsel %vm7662_vm3, %v3006_v45, %v3010_v13  ;;  %v3040_v40 = vshll.u32 %v2925_v58, 16  ;;  %v3046_v46 = vshll.u32 %v8423_v62, 16  ;;  %v2931_v13 = vld [vmem:[#allocation2 + $0x48] sm:$0xf] }
  0xe4   : > { %7031 = vmatprep.mubr.bf16.mxu1 %v10254_v55  ;;  %7108 = vmatpush3.bf16.msra.mxu1 %v7453_v27  ;;  %v3020_v39 = vrot.slane %v3019_v57, 4  ;;  %v8459_v27 = vcombine.low %v3001_v11, %v3011_v36  ;;  %v3029_v31 = vor.u32 %v3028_v7, %v3024_v18  ;;  %v3050_v51 = vshrl.u32 %v8423_v62, 16  ;;  %v8467_v45 = vld [vmem:[#allocation2 + $0x4c] sm:$0xf] }
  0xe5   : > { %7109 = vmatprep.subr.bf16.mxu1 %v7457_v47  ;;  %v3039_v6 = vrot.slane %v3037_v63, 4  ;;  %v3042_v20 = vrot.slane %v3040_v40, 5  ;;  %v3048_v3 = vrot.slane %v3046_v46, 5  ;;  %v3056_v15 = vshll.u32 %v8444_v60, 16 }
  0xe6   : > { %v3025_v49 = vsel %vm7662_vm3, %v3020_v39, %v3024_v18  ;;  %v3030_v58 = vrot.slane %v3029_v31, 4  ;;  %v3052_v23 = vrot.slane %v3050_v51, 4  ;;  %v3061_v8 = vshrl.u32 %v2928_v34, 16  ;;  %v7465_v18 = vld [vmem:[%s10214_s1 + $0xc0] sm:$0xff]   ;;  %v8487_v51 = vld [vmem:[#allocation2 + $0x50] sm:$0x1] }
  0xe7   : > { %v3064_v33 = vshll.u32 %v2928_v34, 16  ;;  %v10255_v57 = vcombine.low %v8343_v38, %v8362_v9  ;;  %v3043_v55 = vor.u32 %v3042_v20, %v3039_v6  ;;  %v3058_v11 = vrot.slane %v3056_v15, 5  ;;  %v2934_v20 = vld [vmem:[#allocation2 + $0x54] sm:$0xf]  ;;  %v8498_v15 = vld [vmem:[#allocation2 + $0x58] sm:$0xf] }
  0xe8   : > { %7110 = vmatpush3.bf16.msra.mxu1 %v7457_v47  ;;  %v3070_v7 = vshll.u32 %v8451_v44, 16  ;;  %v3074_v47 = vshrl.u32 %v8451_v44, 16  ;;  %v10256_v34 = vcombine.low %v8372_v2, %v8386_v29  ;;  %v3035_v63 = vsel %vm7662_vm3, %v3030_v58, %v3034_v22  ;;  %v8495_v29 = vld [vmem:[%s10214_s1 + $0x178] sm:$0xff]  }
  0xe9   : > { %7092 = vmatmul.mubr.bf16.gmra.mxu0 %v10255_v57  ;;  %7111 = vmatprep.subr.bf16.mxu1 %v7461_v43  ;;  %v3053_v38 = vor.u32 %v3052_v23, %v3048_v3  ;;  %v3063_v9 = vrot.slane %v3061_v8, 4  ;;  %v3066_v36 = vrot.slane %v3064_v33, 5  ;;  %v10257_v39 = vcombine.low %v8075_v1, %v8078_v16 }
  0xea   : > { %7095 = vmatprep.mubr.bf16.mxu0 %v10256_v34  ;;  %v8485_v40 = vcombine.low %v3025_v49, %v3035_v63  ;;  %v3044_v46 = vrot.slane %v3043_v55, 4  ;;  %v3072_v31 = vrot.slane %v3070_v7, 5  ;;  %v3076_v6 = vrot.slane %v3074_v47, 4  ;;  %v2937_v63 = vld [vmem:[#allocation2 + $0x60] sm:$0xf] }
  0xeb   : > { %7032 = vmatmul.mubr.bf16.gmra.mxu1 %v10257_v39  ;;  %v10258_v2 = vcombine.low %v8243_v54, %v8238_v42  ;;  %v3054_v1 = vrot.slane %v3053_v38, 4  ;;  %v3067_v16 = vor.u32 %v3066_v36, %v3063_v9  ;;  %v3080_v22 = vshll.u32 %v8465_v4, 16  ;;  %v8511_v9 = vld [vmem:[#allocation2 + $0x5c] sm:$0x1]  ;;  %v8513_v36 = vld [vmem:[#allocation2 + $0x64] sm:$0xf] }
  0xec   : > { %7112 = vmatpush3.bf16.msra.mxu1 %v7461_v43  ;;  %v3085_v49 = vshrl.u32 %v2931_v13, 16  ;;  %v3049_v58 = vsel %vm7662_vm3, %v3044_v46, %v3048_v3  ;;  %v3077_v23 = vor.u32 %v3076_v6, %v3072_v31  ;;  %v3088_v42 = vshll.u32 %v2931_v13, 16 }
  0xed   : > { %7035 = vmatprep.mubr.bf16.mxu1 %v10258_v2  ;;  %7113 = vmatprep.subr.bf16.mxu1 %v7465_v18  ;;  %v3094_v54 = vshll.u32 %v8467_v45, 16  ;;  %v3059_v43 = vsel %vm7662_vm3, %v3054_v1, %v3058_v11  ;;  %v3068_v8 = vrot.slane %v3067_v16, 4  ;;  %v3082_v33 = vrot.slane %v3080_v22, 5 }
  0xee   : > { %v3087_v57 = vrot.slane %v3085_v49, 4  ;;  %v8505_v55 = vcombine.low %v3049_v58, %v3059_v43  ;;  %v3078_v7 = vrot.slane %v3077_v23, 4  ;;  %v3090_v47 = vrot.slane %v3088_v42, 5  ;;  %v8529_v42 = vld [vmem:[#allocation2 + $0x68] sm:$0x1] }
  0xef   : > { %v3096_v34 = vrot.slane %v3094_v54, 5  ;;  %v3073_v3 = vsel %vm7662_vm3, %v3068_v8, %v3072_v31  ;;  %v3098_v13 = vshrl.u32 %v8467_v45, 16  ;;  %v3104_v38 = vshll.u32 %v8487_v51, 16 }
  0xf0   : > { %7114 = vmatpush3.bf16.msra.mxu1 %v7465_v18  ;;  %v3109_v11 = vshrl.u32 %v2934_v20, 16  ;;  %v10259_v39 = vcombine.low %v8390_v25, %v8404_v35  ;;  %v3083_v18 = vsel %vm7662_vm3, %v3078_v7, %v3082_v33  ;;  %v3091_v46 = vor.u32 %v3090_v47, %v3087_v57  ;;  %v2940_v7 = vld [vmem:[#allocation2 + $0x6c] sm:$0xf] }
  0xf1   : > { %7195 = vmatprep.subr.bf16.mxu1 %v8495_v29  ;;  %v3112_v31 = vshll.u32 %v2934_v20, 16  ;;  %v3118_v6 = vshll.u32 %v8498_v15, 16  ;;  %v8523_v2 = vcombine.low %v3073_v3, %v3083_v18  ;;  %v3100_v1 = vrot.slane %v3098_v13, 4  ;;  %v8544_v18 = vld [vmem:[#allocation2 + $0x74] sm:$0x1] }
  0xf2   : > { %7096 = vmatmul.mubr.bf16.gmra.mxu0 %v10259_v39  ;;  %v3106_v16 = vrot.slane %v3104_v38, 5  ;;  %v3111_v22 = vrot.slane %v3109_v11, 4  ;;  %v10260_v25 = vcombine.low %v8259_v0, %v8253_v30  ;;  %v3092_v35 = vrot.slane %v3091_v46, 4  ;;  %v8538_v11 = vld [vmem:[#allocation2 + $0x70] sm:$0xf] }
  0xf3   : > { %7163 = vmatprep.mubr.bf16.mxu0 %v8442_v24  ;;  %v3114_v49 = vrot.slane %v3112_v31, 5  ;;  %v3120_v58 = vrot.slane %v3118_v6, 5  ;;  %v3122_v23 = vshrl.u32 %v8498_v15, 16  ;;  %v10261_v20 = vcombine.low %v8278_v14, %v8263_v48  ;;  %v7475_v48 = vld [vmem:[%s10214_s1 + $0x1b0] sm:$0xff]  }
  0xf4   : > { %7036 = vmatmul.mubr.bf16.gmra.mxu1 %v10260_v25  ;;  %v3101_v24 = vor.u32 %v3100_v1, %v3096_v34  ;;  %v3128_v54 = vshll.u32 %v8511_v9, 16  ;;  %v3133_v43 = vshrl.u32 %v2937_v63, 16  ;;  %v3136_v8 = vshll.u32 %v2937_v63, 16 }
  0xf5   : > { %7039 = vmatprep.mubr.bf16.mxu1 %v10261_v20  ;;  %v3097_v30 = vsel %vm7662_vm3, %v3092_v35, %v3096_v34  ;;  %v3115_v0 = vor.u32 %v3114_v49, %v3111_v22  ;;  %v3124_v33 = vrot.slane %v3122_v23, 4  ;;  %v3142_v57 = vshll.u32 %v8513_v36, 16  ;;  %v2943_v22 = vld [vmem:[#allocation2 + $0x78] sm:$0xf]  ;;  %v7479_v35 = vld [vmem:[%s10214_s1 + $0x1a8] sm:$0xff]  }
  0xf6   : > { %v3102_v47 = vrot.slane %v3101_v24, 4  ;;  %v3130_v3 = vrot.slane %v3128_v54, 5  ;;  %v3135_v13 = vrot.slane %v3133_v43, 4  ;;  %v3138_v38 = vrot.slane %v3136_v8, 5 }
  0xf7   : > { %v3116_v14 = vrot.slane %v3115_v0, 4  ;;  %v3125_v63 = vor.u32 %v3124_v33, %v3120_v58  ;;  %v3144_v39 = vrot.slane %v3142_v57, 5  ;;  %v3146_v34 = vshrl.u32 %v8513_v36, 16 }
  0xf8   : > { %v3107_v46 = vsel %vm7662_vm3, %v3102_v47, %v3106_v16  ;;  %v3139_v31 = vor.u32 %v3138_v38, %v3135_v13  ;;  %v3152_v6 = vshll.u32 %v8529_v42, 16  ;;  %v3157_v1 = vshrl.u32 %v2940_v7, 16  ;;  %v2946_v47 = vld [vmem:[#allocation2 + $0x84] sm:$0xf] }
  0xf9   : > { %v8550_v25 = vcombine.low %v3097_v30, %v3107_v46  ;;  %v3121_v49 = vsel %vm7662_vm3, %v3116_v14, %v3120_v58  ;;  %v3126_v23 = vrot.slane %v3125_v63, 4  ;;  %v3148_v20 = vrot.slane %v3146_v34, 4 }
  0xfa   : > { %7164 = vmatmul.mubr.bf16.vlgmr.msra.gmra.mxu0 %v8459_v27  ;;  %v3140_v16 = vrot.slane %v3139_v31, 4  ;;  %v3154_v24 = vrot.slane %v3152_v6, 5  ;;  %v3159_v54 = vrot.slane %v3157_v1, 4  ;;  %v3160_v43 = vshll.u32 %v2940_v7, 16  ;;  %v8576_v7 = vld [vmem:[#allocation2 + $0x80] sm:$0x1] }
  0xfb   : > { %7244 = vmatpush3.bf16.msra.mxu0 %v8319_v5  ;;  %7167 = vmatprep.mubr.bf16.mxu0 %v8485_v40  ;;  %v10262_v27 = vcombine.low %v8301_v37, %v8286_v59  ;;  %v3131_v8 = vsel %vm7662_vm3, %v3126_v23, %v3130_v3  ;;  %v3149_v30 = vor.u32 %v3148_v20, %v3144_v39  ;;  %v3166_v58 = vshll.u32 %v8538_v11, 16  ;;  %v8566_v5 = vld [vmem:[#allocation2 + $0x7c] sm:$0xf] }
  0xfc   : > { %7245 = vmatprep.subr.bf16.mxu0 %v7475_v48  ;;  %v3170_v0 = vshrl.u32 %v8538_v11, 16  ;;  %v10263_v40 = vcombine.low %v7990_v26, %v7997_v32  ;;  %v8571_v33 = vcombine.low %v3121_v49, %v3131_v8  ;;  %v3145_v59 = vsel %vm7662_vm3, %v3140_v16, %v3144_v39  ;;  %v7483_v26 = vld [vmem:[%s10214_s1 + $0x1a0] sm:$0xff]   ;;  %v8585_v49 = vld [vmem:[#allocation2 + $0x88] sm:$0xf] }
  0xfd   : > { %7040 = vmatmul.mubr.bf16.gmra.mxu1 %v10262_v27  ;;  %v3162_v37 = vrot.slane %v3160_v43, 5  ;;  %v3176_v57 = vshll.u32 %v8544_v18, 16  ;;  %v3150_v3 = vrot.slane %v3149_v30, 4  ;;  %v3168_v13 = vrot.slane %v3166_v58, 5 }
  0xfe   : > { %7043 = vmatprep.mubr.bf16.mxu1 %v10263_v40  ;;  %v3172_v38 = vrot.slane %v3170_v0, 4  ;;  %v3181_v14 = vshrl.u32 %v2943_v22, 16  ;;  %v3184_v34 = vshll.u32 %v2943_v22, 16  ;;  %v3190_v39 = vshll.u32 %v8566_v5, 16  ;;  %v2949_v22 = vld [vmem:[#allocation2 + $0x90] sm:$0xf] }
  0xff   : > { %7246 = vmatpush3.bf16.msra.mxu0 %v7475_v48  ;;  %v3163_v32 = vor.u32 %v3162_v37, %v3159_v54  ;;  %v3178_v63 = vrot.slane %v3176_v57, 5  ;;  %v3155_v46 = vsel %vm7662_vm3, %v3150_v3, %v3154_v24  ;;  %v3194_v1 = vshrl.u32 %v8566_v5, 16  ;;  %v8589_v54 = vld [vmem:[#allocation2 + $0x8c] sm:$0x1]  ;;  %v8605_v3 = vld [vmem:[#allocation2 + $0x94] sm:$0xf] }
 0x100   : > { %7247 = vmatprep.subr.bf16.mxu0 %v7479_v35  ;;  %v3173_v31 = vor.u32 %v3172_v38, %v3168_v13  ;;  %v3183_v6 = vrot.slane %v3181_v14, 4  ;;  %v8587_v48 = vcombine.low %v3145_v59, %v3155_v46  ;;  %v3186_v20 = vrot.slane %v3184_v34, 5  ;;  %v8612_v14 = vld [vmem:[#allocation2 + $0x98] sm:$0x1] }
 0x101   : > { %v3164_v23 = vrot.slane %v3163_v32, 4  ;;  %v3192_v16 = vrot.slane %v3190_v39, 5  ;;  %v3196_v27 = vrot.slane %v3194_v1, 4  ;;  %v3200_v24 = vshll.u32 %v8576_v7, 16  ;;  %v2952_v32 = vld [vmem:[#allocation2 + $0x9c] sm:$0xf] }
 0x102   : > { %7168 = vmatmul.mubr.bf16.gmra.mxu0 %v8505_v55  ;;  %v3174_v43 = vrot.slane %v3173_v31, 4  ;;  %v3205_v8 = vshrl.u32 %v2946_v47, 16  ;;  %v3187_v58 = vor.u32 %v3186_v20, %v3183_v6  ;;  %v3208_v0 = vshll.u32 %v2946_v47, 16  ;;  %v8619_v1 = vld [vmem:[#allocation2 + $0xa0] sm:$0xf] }
 0x103   : > { %7171 = vmatprep.mubr.bf16.mxu0 %v8523_v2  ;;  %7248 = vmatpush3.bf16.msra.mxu0 %v7479_v35  ;;  %v3169_v30 = vsel %vm7662_vm3, %v3164_v23, %v3168_v13  ;;  %v3214_v40 = vshll.u32 %v8585_v49, 16  ;;  %v10264_v59 = vcombine.low %v8018_v41, %v8025_v12  ;;  %v3197_v37 = vor.u32 %v3196_v27, %v3192_v16  ;;  %v7487_v2 = vld [vmem:[%s10214_s1 + $0x198] sm:$0xff]  }
 0x104   : > { %7249 = vmatprep.subr.bf16.mxu0 %v7483_v26  ;;  %v3179_v55 = vsel %vm7662_vm3, %v3174_v43, %v3178_v63  ;;  %v3202_v57 = vrot.slane %v3200_v24, 5  ;;  %v3207_v35 = vrot.slane %v3205_v8, 4  ;;  %v10265_v47 = vcombine.low %v8124_v53, %v8148_v61  ;;  %v7468_v24 = vld [vmem:[#allocation2 + $0xc] sm:$0xff]  }
 0x105   : > { %7044 = vmatmul.mubr.bf16.gmra.mxu1 %v10264_v59  ;;  %v8610_v13 = vcombine.low %v3169_v30, %v3179_v55  ;;  %v3188_v41 = vrot.slane %v3187_v58, 4  ;;  %v3210_v12 = vrot.slane %v3208_v0, 5  ;;  %v3216_v38 = vrot.slane %v3214_v40, 5 }
 0x106   : > { %7047 = vmatprep.mubr.bf16.mxu1 %v10265_v47  ;;  %v3198_v63 = vrot.slane %v3197_v37, 4  ;;  %v3218_v34 = vshrl.u32 %v8585_v49, 16  ;;  %v3224_v39 = vshll.u32 %v8589_v54, 16  ;;  %v3229_v46 = vshrl.u32 %v2949_v22, 16 }
 0x107   : > { %7250 = vmatpush3.bf16.msra.mxu0 %v7483_v26  ;;  %v3193_v31 = vsel %vm7662_vm3, %v3188_v41, %v3192_v16  ;;  %v3211_v53 = vor.u32 %v3210_v12, %v3207_v35  ;;  %v3232_v61 = vshll.u32 %v2949_v22, 16  ;;  %v3238_v6 = vshll.u32 %v8605_v3, 16  ;;  %v7491_v26 = vld [vmem:[%s10214_s1 + $0x190] sm:$0xff]   ;;  %v2955_v41 = vld [vmem:[#allocation2 + $0xa8] sm:$0xf] }
 0x108   : > { %v3203_v23 = vsel %vm7662_vm3, %v3198_v63, %v3202_v57  ;;  %7251 = vmatprep.subr.bf16.mxu0 %v7487_v2  ;;  %v3220_v20 = vrot.slane %v3218_v34, 4  ;;  %v3226_v43 = vrot.slane %v3224_v39, 5  ;;  %v3231_v27 = vrot.slane %v3229_v46, 4  ;;  %v8634_v57 = vld [vmem:[#allocation2 + $0xa4] sm:$0x1] }
 0x109   : > { %v8626_v8 = vcombine.low %v3193_v31, %v3203_v23  ;;  %v3212_v16 = vrot.slane %v3211_v53, 4  ;;  %v3234_v22 = vrot.slane %v3232_v61, 5  ;;  %v3240_v30 = vrot.slane %v3238_v6, 5  ;;  %v8647_v53 = vld [vmem:[#allocation2 + $0xac] sm:$0xf] }
 0x10a   : > { %7172 = vmatmul.mubr.bf16.gmra.mxu0 %v8550_v25  ;;  %v3221_v58 = vor.u32 %v3220_v20, %v3216_v38  ;;  %v3242_v0 = vshrl.u32 %v8605_v3, 16  ;;  %v3248_v40 = vshll.u32 %v8612_v14, 16  ;;  %v3253_v59 = vshrl.u32 %v2952_v32, 16 }
 0x10b   : > { %7175 = vmatprep.mubr.bf16.mxu0 %v8571_v33  ;;  %7252 = vmatpush3.bf16.msra.mxu0 %v7487_v2  ;;  %v3217_v55 = vsel %vm7662_vm3, %v3212_v16, %v3216_v38  ;;  %v3235_v37 = vor.u32 %v3234_v22, %v3231_v27  ;;  %v3256_v35 = vshll.u32 %v2952_v32, 16  ;;  %v3262_v47 = vshll.u32 %v8619_v1, 16  ;;  %v7495_v2 = vld [vmem:[%s10214_s1 + $0x188] sm:$0xff]   ;;  %v2958_v16 = vld [vmem:[#allocation2 + $0xb4] sm:$0xf]  ;;  %v7470_v22 = vld [vmem:[#allocation2 + $0x18] sm:$0xff]  }
 0x10c   : > { %v10266_v25 = vcombine.low %v8184_v52, %v8191_v19  ;;  %v3222_v12 = vrot.slane %v3221_v58, 4  ;;  %v3244_v63 = vrot.slane %v3242_v0, 4  ;;  %v3250_v34 = vrot.slane %v3248_v40, 5  ;;  %7253 = vmatprep.subr.bf16.mxu0 %v7491_v26 }
 0x10d   : > { %v3255_v33 = vrot.slane %v3253_v59, 4  ;;  %v3236_v38 = vrot.slane %v3235_v37, 4  ;;  %v3258_v39 = vrot.slane %v3256_v35, 5  ;;  %v3264_v32 = vrot.slane %v3262_v47, 5  ;;  %v7499_v59 = vld [vmem:[%s10214_s1 + $0x180] sm:$0xff]   ;;  %v7473_v47 = vld [vmem:[%s10214_s1 + $0x170] sm:$0xff]  }
 0x10e   : > { %7048 = vmatmul.mubr.bf16.gmra.mxu1 %v10266_v25  ;;  %v3266_v46 = vshrl.u32 %v8619_v1, 16  ;;  %v3227_v31 = vsel %vm7662_vm3, %v3222_v12, %v3226_v43  ;;  %v3245_v52 = vor.u32 %v3244_v63, %v3240_v30  ;;  %v3272_v19 = vshll.u32 %v8634_v57, 16  ;;  %v8667_v63 = vld [vmem:[#allocation2 + $0xb8] sm:$0xf] }
 0x10f   : > { %7115 = vmatprep.mubr.bf16.mxu1 %v7468_v24  ;;  %v3277_v61 = vshrl.u32 %v2955_v41, 16  ;;  %v8649_v6 = vcombine.low %v3217_v55, %v3227_v31  ;;  %v3241_v23 = vsel %vm7662_vm3, %v3236_v38, %v3240_v30  ;;  %7254 = vmatpush3.bf16.msra.mxu0 %v7491_v26  ;;  %v3259_v20 = vor.u32 %v3258_v39, %v3255_v33  ;;  %v8653_v24 = vld [vmem:[#allocation2 + $0xb0] sm:$0x1]  ;;  %v7472_v55 = vld [vmem:[#allocation2 + $0x24] sm:$0xff]  }
 0x110   : > { %v3268_v27 = vrot.slane %v3266_v46, 4  ;;  %v3246_v58 = vrot.slane %v3245_v52, 4  ;;  %v3274_v43 = vrot.slane %v3272_v19, 5  ;;  %v3280_v40 = vshll.u32 %v2955_v41, 16  ;;  %7255 = vmatprep.subr.bf16.mxu0 %v7495_v2 }
 0x111   : > { %v3279_v0 = vrot.slane %v3277_v61, 4  ;;  %v3260_v37 = vrot.slane %v3259_v20, 4  ;;  %v3286_v26 = vshll.u32 %v8647_v53, 16  ;;  %v3290_v30 = vshrl.u32 %v8647_v53, 16  ;;  %v6723_v20 = vld [vmem:[%s7638_s6 + $0x78] sm:$0xff]  }
 0x112   : > { %v3269_v35 = vor.u32 %v3268_v27, %v3264_v32  ;;  %7176 = vmatmul.mubr.bf16.gmra.mxu0 %v8587_v48  ;;  %v3251_v41 = vsel %vm7662_vm3, %v3246_v58, %v3250_v34  ;;  %v3282_v25 = vrot.slane %v3280_v40, 5  ;;  %v3296_v12 = vshll.u32 %v8653_v24, 16  ;;  %v8674_v48 = vld [vmem:[#allocation2 + $0xbc] sm:$0x1] }
 0x113   : > { %v3301_v33 = vshrl.u32 %v2958_v16, 16  ;;  %7179 = vmatprep.mubr.bf16.mxu0 %v8610_v13  ;;  %v8670_v38 = vcombine.low %v3241_v23, %v3251_v41  ;;  %v3265_v39 = vsel %vm7662_vm3, %v3260_v37, %v3264_v32  ;;  %v3288_v31 = vrot.slane %v3286_v26, 5  ;;  %7256 = vmatpush3.bf16.msra.mxu0 %v7495_v2  ;;  %v8680_v13 = vld [vmem:[%s10214_s1 + $0x238] sm:$0xff]   ;;  %v7474_v26 = vld [vmem:[#allocation2 + $0x30] sm:$0xff]  }
 0x114   : > { %v3270_v46 = vrot.slane %v3269_v35, 4  ;;  %v3283_v34 = vor.u32 %v3282_v25, %v3279_v0  ;;  %v3292_v52 = vrot.slane %v3290_v30, 4  ;;  %v3298_v19 = vrot.slane %v3296_v12, 5  ;;  %7257 = vmatprep.subr.bf16.mxu0 %v7499_v59 }
 0x115   : > { %v3303_v61 = vrot.slane %v3301_v33, 4  ;;  %v3304_v32 = vshll.u32 %v2958_v16, 16  ;;  %v3310_v23 = vshll.u32 %v8667_v63, 16  ;;  %v3314_v27 = vshrl.u32 %v8667_v63, 16  ;;  %v7476_v33 = vld [vmem:[#allocation2 + $0x3c] sm:$0xff]  }
 0x116   : > { %7116 = vmatmul.mubr.bf16.vlgmr.msra.gmra.mxu1 %v7470_v22  ;;  %v3275_v2 = vsel %vm7662_vm3, %v3270_v46, %v3274_v43  ;;  %v7477_v22 = vld [vmem:[%s10214_s1 + $0x168] sm:$0xff]   ;;  %v3284_v0 = vrot.slane %v3283_v34, 4  ;;  %v3293_v40 = vor.u32 %v3292_v52, %v3288_v31  ;;  %v6627_v16 = vunpack.c.l.bf16 %v6723_v20  ;;  %v7559_v34 = vld [vmem:[%s10215_s2] ss:$0 sm:$0xff] }
 0x117   : > { %7196 = vmatpush3.bf16.msra.mxu1 %v8495_v29  ;;  %7119 = vmatprep.mubr.bf16.mxu1 %v7472_v55  ;;  %v8690_v58 = vcombine.low %v3265_v39, %v3275_v2  ;;  %v3320_v29 = vshll.u32 %v8674_v48, 16  ;;  %v3669_v55 = vld [vmem:[#allocation2 + $0xc] sm:$0xe]  ;;  %v3306_v37 = vrot.slane %v3304_v32, 5  ;;  %v3312_v35 = vrot.slane %v3310_v23, 5 }
 0x118   : > { %7197 = vmatprep.subr.bf16.mxu1 %v7473_v47  ;;  %v3316_v43 = vrot.slane %v3314_v27, 4  ;;  %7258 = vmatpush3.bf16.msra.mxu0 %v7499_v59  ;;  %v3289_v30 = vsel %vm7662_vm3, %v3284_v0, %v3288_v31  ;;  %v3294_v41 = vrot.slane %v3293_v40, 4  ;;  %v6628_v12 = vunpack.c.h.bf16 %v6723_v20  ;;  %v3670_v59 = vld [vmem:[#allocation2 + $0x18] sm:$0xe]  ;;  %v7481_v31 = vld [vmem:[%s10214_s1 + $0x160] sm:$0xff]  }
 0x119   : > { %v3322_v25 = vrot.slane %v3320_v29, 5  ;;  %7339 = vmatprep.subr.bf16.mxu0 %v8680_v13  ;;  %v3307_v39 = vor.u32 %v3306_v37, %v3303_v61  ;;  %v339_v52 = vmul.f32 %v7559_v34, %v6627_v16  ;;  %v6337_v2 = vrot.slane %v3669_v55, 9  ;;  %v7560_v40 = vld [vmem:[%s10216_s3] ss:$0 sm:$0xff]  ;;  %v10268_v16 = vld [vmem:[#allocation7_spill] sm:$0xff] }
 0x11a   : > { %v3317_v46 = vor.u32 %v3316_v43, %v3312_v35  ;;  %7180 = vmatmul.mubr.bf16.gmra.mxu0 %v8626_v8  ;;  %v340_v20 = vmul.f32 %v7559_v34, %v6628_v12  ;;  %v3735_v61 = vrot.slane %v8347_v50, 5  ;;  %v3738_v32 = vrot.slane %v8366_v17, 5 }
 0x11b   : > { %7198 = vmatpush3.bf16.msra.mxu1 %v7473_v47  ;;  %v3299_v47 = vsel %vm7662_vm3, %v3294_v41, %v3298_v19  ;;  %7183 = vmatprep.mubr.bf16.mxu0 %v8649_v6  ;;  %v3308_v27 = vrot.slane %v3307_v39, 4  ;;  %v377_v29 = vadd.f32 %v7560_v40, %v339_v52  ;;  %v6338_v37 = vrot.slane %v3670_v59, 9  ;;  %v3671_v41 = vld [vmem:[#allocation2 + $0x24] sm:$0xe] }
 0x11c   : > { %7199 = vmatprep.subr.bf16.mxu1 %v7477_v22  ;;  %v8708_v23 = vcombine.low %v3289_v30, %v3299_v47  ;;  %v3318_v0 = vrot.slane %v3317_v46, 4  ;;  %v378_v8 = vadd.f32 %v7560_v40, %v340_v20  ;;  %v8715_v19 = vsel %vm8098_vm13, %v6337_v2, %v3735_v61  ;;  %v7478_v2 = vld [vmem:[#allocation2 + $0x48] sm:$0xff]  }
 0x11d   : > { %v3737_v50 = vrot.slane %v3735_v61, 4  ;;  %v3313_v17 = vsel %vm7662_vm3, %v3308_v27, %v3312_v35  ;;  %v409_v43 = vmax.f32 %v377_v29, 0.0  ;;  %v3742_v30 = vrot.slane %v10268_v16, 5  ;;  %v3673_v29 = vld [vmem:[#allocation2 + $0x3c] sm:$0xe] }
 0x11e   : > { %7120 = vmatmul.mubr.bf16.gmra.mxu1 %v7474_v26  ;;  %v3323_v6 = vsel %vm7662_vm3, %v3318_v0, %v3322_v25  ;;  %v7485_v26 = vld [vmem:[%s10214_s1 + $0x158] sm:$0xff]   ;;  %v410_v39 = vmax.f32 %v378_v8, 0.0  ;;  %v3745_v35 = vrot.slane %v8407_v56, 5  ;;  %v6339_v47 = vrot.slane %v3671_v41, 9  ;;  %v7489_v8 = vld [vmem:[%s10214_s1 + $0x150] sm:$0xff]  }
 0x11f   : > { %7123 = vmatprep.mubr.bf16.mxu1 %v7476_v33  ;;  %7200 = vmatpush3.bf16.msra.mxu1 %v7477_v22  ;;  %v8725_v12 = vcombine.low %v3313_v17, %v3323_v6  ;;  %v8729_v22 = vsel %vm8098_vm13, %v3737_v50, %v3738_v32  ;;  %v3672_v33 = vld [vmem:[#allocation2 + $0x30] sm:$0xe]  ;;  %v6531_v25 = vpack.c.bf16 %v409_v43, %v409_v43  ;;  %v3744_v52 = vrot.slane %v3742_v30, 4  ;;  %v7480_v32 = vld [vmem:[#allocation2 + $0x54] sm:$0xff]   ;;  %v995_v17 = vld [vmem:[#allocation2 + $0xc0] sm:$0xf] }
 0x120   : > { %7201 = vmatprep.subr.bf16.mxu1 %v7481_v31  ;;  %v6353_v46 = vcombine.low %v8715_v19, %v8729_v22  ;;  %v8736_v34 = vsel %vm8098_vm13, %v6338_v37, %v3742_v30  ;;  %v6532_v59 = vpack.c.bf16 %v410_v39, %v410_v39  ;;  %v3749_v20 = vrot.slane %v8414_v21, 5  ;;  %v7506_v19 = vld [vmem:[%s10214_s1 + $0x1f0] sm:$0xff]   ;;  %v7512_v22 = vld [vmem:[#allocation2 + $0x60] sm:$0xff]  }
 0x121   : > { %v3752_v61 = vrot.slane %v8419_v10, 5  ;;  %v820_v56 = vshrl.u32 %v6531_v25, 16  ;;  %v823_v27 = vshll.u32 %v6531_v25, 16  ;;  %v8742_v0 = vsel %vm8098_vm13, %v3744_v52, %v3745_v35  ;;  %v3674_v35 = vld [vmem:[#allocation2 + $0x48] sm:$0xe] }
 0x122   : > { %v6340_v40 = vrot.slane %v3672_v33, 9  ;;  %7184 = vmatmul.mubr.bf16.gmra.mxu0 %v8670_v38  ;;  %v828_v21 = vshrl.u32 %v6532_v59, 16  ;;  %v831_v50 = vshll.u32 %v6532_v59, 16  ;;  %v6354_v10 = vcombine.low %v8736_v34, %v8742_v0  ;;  %v3675_v59 = vld [vmem:[#allocation2 + $0x54] sm:$0xe]  ;;  %v7510_v0 = vld [vmem:[%s10214_s1 + $0x1e8] sm:$0xff]  }
 0x123   : > { %7202 = vmatpush3.bf16.msra.mxu1 %v7481_v31  ;;  %v8752_v31 = vsel %vm8098_vm13, %v6339_v47, %v3749_v20  ;;  %7187 = vmatprep.mubr.bf16.mxu0 %v8690_v58  ;;  %v822_v37 = vrot.slane %v820_v56, 7  ;;  %v3751_v6 = vrot.slane %v3749_v20, 4  ;;  %v3756_v38 = vrot.slane %v8423_v62, 5  ;;  %v999_v58 = vld [vmem:[#allocation2 + $0xc8] sm:$0x1] }
 0x124   : > { %7203 = vmatprep.subr.bf16.mxu1 %v7485_v26  ;;  %v3759_v43 = vrot.slane %v8444_v60, 5  ;;  %v830_v16 = vrot.slane %v828_v21, 7  ;;  %v6341_v30 = vrot.slane %v3673_v29, 9  ;;  %v3763_v41 = vrot.slane %v8451_v44, 5  ;;  %v7493_v60 = vld [vmem:[%s10214_s1 + $0x148] sm:$0xff]  }
 0x125   : > { %v3766_v39 = vrot.slane %v8465_v4, 5  ;;  %v825_v33 = vor.u32 %v823_v27, %v822_v37  ;;  %v826_v25 = vrot.slane %v822_v37, 4  ;;  %v8761_v52 = vsel %vm8098_vm13, %v3751_v6, %v3752_v61  ;;  %v7482_v27 = vld [vmem:[#allocation2 + $0x60] sm:$0xff]   ;;  %v4558_v34 = vld [vmem:[#allocation2 + $0x30] sm:$0xf] }
 0x126   : > { %7124 = vmatmul.mubr.bf16.gmra.mxu1 %v7478_v2  ;;  %v8765_v62 = vsel %vm8098_vm13, %v6340_v40, %v3756_v38  ;;  %v833_v44 = vor.u32 %v831_v50, %v830_v16  ;;  %v835_v4 = vrot.slane %v830_v16, 4  ;;  %v3758_v2 = vrot.slane %v3756_v38, 4  ;;  %v3676_v6 = vld [vmem:[#allocation2 + $0x60] sm:$0xe]  ;;  %v7484_v38 = vld [vmem:[#allocation2 + $0x6c] sm:$0xff]   ;;  %v7486_v40 = vld [vmem:[#allocation2 + $0x78] sm:$0xff]  }
 0x127   : > { %7127 = vmatprep.mubr.bf16.mxu1 %v7480_v32  ;;  %7204 = vmatpush3.bf16.msra.mxu1 %v7485_v26  ;;  %v6355_v26 = vcombine.low %v8752_v31, %v8761_v52  ;;  %v996_v20 = vsel %vm7705_vm10, %v825_v33, %v995_v17  ;;  %v8776_v61 = vsel %vm8098_vm13, %v6341_v30, %v3763_v41  ;;  %v3765_v32 = vrot.slane %v3763_v41, 4  ;;  %v3677_v33 = vld [vmem:[#allocation2 + $0x6c] sm:$0xe] }
 0x128   : > { %7205 = vmatprep.subr.bf16.mxu1 %v7489_v8  ;;  %v6342_v56 = vrot.slane %v3674_v35, 9  ;;  %v834_v29 = vsel %vm7698_vm9, %v826_v25, %v833_v44  ;;  %997 = vst [vmem:[#allocation2 + $0xc0] sm:$0xf] %v996_v20  ;;  %v1000_v50 = vsel %vm7690_vm8, %v835_v4, %v999_v58  ;;  %v8784_v37 = vsel %vm8098_vm13, %v3758_v2, %v3759_v43  ;;  %v3678_v4 = vld [vmem:[#allocation2 + $0x78] sm:$0xe] }
 0x129   : > { %v3770_v17 = vrot.slane %v8467_v45, 5  ;;  %998 = vst [vmem:[#allocation2 + $0xc4] sm:$0xf] %v834_v29  ;;  %1001 = vst [vmem:[#allocation2 + $0xc8] sm:$0x1] %v1000_v50  ;;  %v8791_v30 = vsel %vm8098_vm13, %v3765_v32, %v3766_v39  ;;  %v3773_v41 = vrot.slane %v8487_v51, 5 }
 0x12a   : > { %v6343_v35 = vrot.slane %v3675_v59, 9  ;;  %7188 = vmatmul.mubr.bf16.gmra.mxu0 %v8708_v23  ;;  %v7497_v45 = vld [vmem:[%s10214_s1 + $0x140] sm:$0xff]   ;;  %v3777_v25 = vrot.slane %v8498_v15, 5  ;;  %v3780_v51 = vrot.slane %v8511_v9, 5  ;;  %v6344_v23 = vrot.slane %v3676_v6, 9  ;;  %v8827_v20 = vld [vmem:[%s10214_s1 + $0x1f8] sm:$0xff]  }
 0x12b   : > { %7206 = vmatpush3.bf16.msra.mxu1 %v7489_v8  ;;  %v8802_v43 = vsel %vm8098_vm13, %v6342_v56, %v3770_v17  ;;  %v3772_v39 = vrot.slane %v3770_v17, 4  ;;  %7191 = vmatprep.mubr.bf16.mxu0 %v8725_v12  ;;  %v3784_v58 = vrot.slane %v8513_v36, 5  ;;  %v3787_v44 = vrot.slane %v8529_v42, 5  ;;  %v3679_v6 = vld [vmem:[#allocation2 + $0x84] sm:$0xe] }
 0x12c   : > { %7207 = vmatprep.subr.bf16.mxu1 %v7493_v60  ;;  %v8815_v59 = vsel %vm8098_vm13, %v6343_v35, %v3777_v25  ;;  %v3779_v15 = vrot.slane %v3777_v25, 4  ;;  %v6345_v47 = vrot.slane %v3677_v33, 9  ;;  %v3791_v12 = vrot.slane %v8538_v11, 5  ;;  %v7488_v25 = vld [vmem:[#allocation2 + $0x84] sm:$0xff]  }
 0x12d   : > { %v8811_v2 = vsel %vm8098_vm13, %v3772_v39, %v3773_v41  ;;  %v8821_v36 = vsel %vm8098_vm13, %v6344_v23, %v3784_v58  ;;  %v3786_v42 = vrot.slane %v3784_v58, 4  ;;  %v6346_v56 = vrot.slane %v3678_v4, 9  ;;  %v3680_v39 = vld [vmem:[#allocation2 + $0x90] sm:$0xe] }
 0x12e   : > { %7128 = vmatmul.mubr.bf16.gmra.mxu1 %v7482_v27  ;;  %v8831_v32 = vsel %vm8098_vm13, %v3779_v15, %v3780_v51  ;;  %v3798_v27 = vrot.slane %v8566_v5, 5  ;;  %v8843_v50 = vsel %vm8098_vm13, %v6345_v47, %v3791_v12  ;;  %v3793_v17 = vrot.slane %v3791_v12, 4  ;;  %v8990_v47 = vld [vmem:[#allocation2 + $0x2c] sm:$0x1] }
 0x12f   : > { %7131 = vmatprep.mubr.bf16.mxu1 %v7484_v38  ;;  %7208 = vmatpush3.bf16.msra.mxu1 %v7493_v60  ;;  %v3794_v60 = vrot.slane %v8544_v18, 5  ;;  %v2961_v29 = vld [vmem:[#allocation2 + $0xc0] sm:$0xf]  ;;  %v8839_v21 = vsel %vm8098_vm13, %v3786_v42, %v3787_v44  ;;  %v3801_v35 = vrot.slane %v8576_v7, 5  ;;  %v3805_v9 = vrot.slane %v8585_v49, 5 }
 0x130   : > { %7209 = vmatprep.subr.bf16.mxu1 %v7497_v45  ;;  %v8845_v38 = vld [vmem:[#allocation2 + $0xc4] sm:$0xf]  ;;  %v8847_v18 = vld [vmem:[#allocation2 + $0xc8] sm:$0x1]  ;;  %v3325_v5 = vshrl.u32 %v2961_v29, 16  ;;  %v3328_v41 = vshll.u32 %v2961_v29, 16  ;;  %v8853_v33 = vsel %vm8098_vm13, %v6346_v56, %v3798_v27 }
 0x131   : > { %v3334_v51 = vshll.u32 %v8845_v38, 16  ;;  %v3338_v23 = vshrl.u32 %v8845_v38, 16  ;;  %v3344_v58 = vshll.u32 %v8847_v18, 16  ;;  %v8860_v44 = vsel %vm8098_vm13, %v3793_v17, %v3794_v60 }
 0x132   : > { %v3327_v4 = vrot.slane %v3325_v5, 4  ;;  %v3330_v15 = vrot.slane %v3328_v41, 5  ;;  %v3800_v42 = vrot.slane %v3798_v27, 4  ;;  %v3808_v60 = vrot.slane %v8589_v54, 5  ;;  %v7490_v54 = vld [vmem:[#allocation2 + $0x90] sm:$0xff]  }
 0x133   : > { %7210 = vmatpush3.bf16.msra.mxu1 %v7497_v45  ;;  %v3336_v12 = vrot.slane %v3334_v51, 5  ;;  %v3340_v56 = vrot.slane %v3338_v23, 4  ;;  %v3346_v29 = vrot.slane %v3344_v58, 5  ;;  %v6347_v45 = vrot.slane %v3679_v6, 9  ;;  %v3681_v51 = vld [vmem:[#allocation2 + $0x9c] sm:$0xe] }
 0x134   : > { %7291 = vmatprep.subr.bf16.mxu1 %v8827_v20  ;;  %v3331_v11 = vor.u32 %v3330_v15, %v3327_v4  ;;  %v8870_v5 = vsel %vm8098_vm13, %v3800_v42, %v3801_v35  ;;  %v6348_v41 = vrot.slane %v3680_v39, 9  ;;  %v3812_v27 = vrot.slane %v8605_v3, 5  ;;  %v3683_v15 = vld [vmem:[#allocation2 + $0xb4] sm:$0xe]  ;;  %v7492_v42 = vld [vmem:[#allocation2 + $0x9c] sm:$0xff]  }
 0x135   : > { %v3341_v17 = vor.u32 %v3340_v56, %v3336_v12  ;;  %v3807_v49 = vrot.slane %v3805_v9, 4  ;;  %v3815_v39 = vrot.slane %v8612_v14, 5  ;;  %v6349_v58 = vrot.slane %v3681_v51, 9 }
 0x136   : > { %7132 = vmatmul.mubr.bf16.gmra.mxu1 %v7486_v40  ;;  %v3332_v23 = vrot.slane %v3331_v11, 4  ;;  %v8877_v40 = vsel %vm8098_vm13, %v6347_v45, %v3805_v9  ;;  %v3814_v35 = vrot.slane %v3812_v27, 4  ;;  %v3819_v4 = vrot.slane %v8619_v1, 5  ;;  %v3682_v9 = vld [vmem:[#allocation2 + $0xa8] sm:$0xe]  ;;  %v7500_v45 = vld [vmem:[#allocation2 + $0x18] sm:$0xff]  }
 0x137   : > { %7135 = vmatprep.mubr.bf16.mxu1 %v7488_v25  ;;  %v3342_v6 = vrot.slane %v3341_v17, 4  ;;  %v8881_v25 = vsel %vm8098_vm13, %v6348_v41, %v3812_v27  ;;  %v8888_v11 = vsel %vm8098_vm13, %v3807_v49, %v3808_v60  ;;  %v3822_v60 = vrot.slane %v8634_v57, 5  ;;  %v3684_v17 = vld [vmem:[#allocation2 + $0xc0] sm:$0xe]  ;;  %v5306_v1 = vld [vmem:[#allocation2 + $0x24] sm:$0xe] }
 0x138   : > { %v3337_v3 = vsel %vm7662_vm3, %v3332_v23, %v3336_v12  ;;  %v8897_v12 = vsel %vm8098_vm13, %v3814_v35, %v3815_v39  ;;  %v8904_v27 = vsel %vm8098_vm13, %v6349_v58, %v3819_v4  ;;  %v6350_v51 = vrot.slane %v3682_v9, 9  ;;  %v4555_v58 = vld [vmem:[#allocation2 + $0x24] sm:$0xf] }
 0x139   : > { %v3347_v56 = vsel %vm7662_vm3, %v3342_v6, %v3346_v29  ;;  %v3821_v29 = vrot.slane %v3819_v4, 4  ;;  %v3826_v23 = vrot.slane %v8647_v53, 5  ;;  %v3829_v49 = vrot.slane %v8653_v24, 5 }
 0x13a   : > { %v6328_v41 = vcombine.low %v3337_v3, %v3347_v56  ;;  %v6351_v6 = vrot.slane %v3683_v15, 9  ;;  %v3833_v35 = vrot.slane %v8667_v63, 5  ;;  %v3836_v39 = vrot.slane %v8674_v48, 5  ;;  %v7494_v56 = vld [vmem:[#allocation2 + $0xa8] sm:$0xff]  }
 0x13b   : > { %v8910_v57 = vsel %vm8098_vm13, %v3821_v29, %v3822_v60  ;;  %v6352_v3 = vrot.slane %v3684_v17, 9  ;;  %v8918_v53 = vsel %vm8098_vm13, %v6350_v51, %v3826_v23  ;;  %v3828_v24 = vrot.slane %v3826_v23, 4  ;;  %v7496_v17 = vld [vmem:[#allocation2 + $0xb4] sm:$0xff]   ;;  %v8949_v23 = vpop.f32.mrf.mxu0 }
 0x13c   : > { %7192 = vmatmul.mubr.bf16.gmra.mxu0 %v6328_v41  ;;  %v8923_v4 = vsel %vm8098_vm13, %v6351_v6, %v3833_v35  ;;  %v3835_v63 = vrot.slane %v3833_v35, 4  ;;  %v3843_v48 = vrot.slane %v8847_v18, 5  ;;  %v7504_v29 = vld [vmem:[#allocation2 + $0x30] sm:$0xff]   ;;  %10276 = vst [vmem:[#allocation3_spill] sm:$0xff] %v8949_v23  ;;  %v7511_v6 = vld [vmem:[%s10214_s1 + $0x228] sm:$0xff]  }
 0x13d   : > { %7259 = vmatprep.mubr.bf16.mxu0 %v7500_v45  ;;  %10272 = vst [vmem:[#allocation6_spill] sm:$0xff] %v8923_v4  ;;  %v8928_v9 = vsel %vm8098_vm13, %v3828_v24, %v3829_v49  ;;  %v7501_v45 = vld [vmem:[#allocation2 + $0x24] sm:$0xff]   ;;  %v7507_v51 = vld [vmem:[%s10214_s1 + $0x230] sm:$0xff]   ;;  %v8957_v35 = vpop.f32.mrf.mxu0 }
 0x13e   : > { %7136 = vmatmul.mubr.bf16.gmra.mxu1 %v7490_v54  ;;  %v3840_v54 = vrot.slane %v8845_v38, 5  ;;  %v8938_v60 = vsel %vm8098_vm13, %v3835_v63, %v3836_v39  ;;  %10277 = vst [vmem:[#allocation8_spill] sm:$0xff] %v8957_v35  ;;  %v7498_v39 = vld [vmem:[#allocation2 + $0xc0] sm:$0xff]   ;;  %v7508_v24 = vld [vmem:[#allocation2 + $0x48] sm:$0xff]  }
 0x13f   : > { %7139 = vmatprep.mubr.bf16.mxu1 %v7492_v42  ;;  %10274 = vst [vmem:[#allocation5_spill] sm:$0xff] %v8938_v60  ;;  %v7515_v63 = vld [vmem:[%s10214_s1 + $0x220] sm:$0xff]  }
 0x140   : > { %v8932_v15 = vsel %vm8098_vm13, %v6352_v3, %v3840_v54  ;;  %v3842_v42 = vrot.slane %v3840_v54, 4  ;;  %v7505_v3 = vld [vmem:[#allocation2 + $0x3c] sm:$0xff]   ;;  %v8959_v54 = vpop.f32.mrf.mxu0 }
 0x141   : > { %10273 = vst [vmem:[#allocation7_spill] sm:$0xff] %v8932_v15  ;;  %10278 = vst [vmem:[#allocation9_spill] sm:$0xff] %v8959_v54 }
 0x142   : > { %v8944_v41 = vsel %vm8098_vm13, %v3842_v42, %v3843_v48  ;;  %v4553_v48 = vld [vmem:[#allocation2 + $0x1c] sm:$0xf]  ;;  %v4552_v42 = vld [vmem:[#allocation2 + $0x18] sm:$0xf] }
 0x143   : > { %10275 = vst [vmem:[#allocation4_spill] sm:$0xff] %v8944_v41  ;;  %v4610_v38 = vshll.u32 %v4553_v48, 16 }
 0x144   : > { %7260 = vmatmul.mubr.bf16.vlgmr.msra.gmra.mxu0 %v7501_v45  ;;  %v5371_v45 = vrot.slane %v4553_v48, 5 }
 0x145   : > { %7340 = vmatpush3.bf16.msra.mxu0 %v8680_v13  ;;  %7263 = vmatprep.mubr.bf16.mxu0 %v7504_v29  ;;  %v8967_v13 = vpop.f32.mrf.mxu0  ;;  %v8972_v29 = vld [vmem:[#allocation2 + $0x20] sm:$0x1] }
 0x146   : > { %7140 = vmatmul.mubr.bf16.gmra.mxu1 %v7494_v56  ;;  %7341 = vmatprep.subr.bf16.mxu0 %v7507_v51  ;;  %10279 = vst [vmem:[#allocation10_spill] sm:$0xff] %v8967_v13  ;;  %v7519_v56 = vld [vmem:[%s10214_s1 + $0x218] sm:$0xff]   ;;  %v5373_v49 = vrot.slane %v5371_v45, 4  ;;  %v5374_v18 = vrot.slane %v8972_v29, 5 }
 0x147   : > { %7143 = vmatprep.mubr.bf16.mxu1 %v7496_v17  ;;  %v7509_v17 = vld [vmem:[#allocation2 + $0x54] sm:$0xff]   ;;  %v4561_v13 = vld [vmem:[#allocation2 + $0x3c] sm:$0xf] }
 0x148   : > { %v9003_v52 = vsel %vm8098_vm13, %v5373_v49, %v5374_v18  ;;  %v4652_v18 = vshll.u32 %v4558_v34, 16 }
 0x149   : > { %7342 = vmatpush3.bf16.msra.mxu0 %v7507_v51  ;;  %v5305_v51 = vld [vmem:[#allocation2 + $0x18] sm:$0xe] }
 0x14a   : > { %7343 = vmatprep.subr.bf16.mxu0 %v7511_v6 }
 0x14c   : > { %7264 = vmatmul.mubr.bf16.gmra.mxu0 %v7505_v3  ;;  %v4604_v3 = vshll.u32 %v4552_v42, 16 }
 0x14d   : > { %7267 = vmatprep.mubr.bf16.mxu0 %v7508_v24  ;;  %7344 = vmatpush3.bf16.msra.mxu0 %v7511_v6  ;;  %v4556_v6 = vld [vmem:[#allocation2 + $0x28] sm:$0xf]  ;;  %v6425_v24 = vrot.slane %v5305_v51, 9 }
 0x14e   : > { %7144 = vmatmul.mubr.bf16.gmra.mxu1 %v7498_v39  ;;  %7345 = vmatprep.subr.bf16.mxu0 %v7515_v63  ;;  %v4601_v39 = vshrl.u32 %v4552_v42, 16  ;;  %v7523_v42 = vld [vmem:[%s10214_s1 + $0x210] sm:$0xff]   ;;  %v5378_v14 = vrot.slane %v4556_v6, 5  ;;  %v4606_v7 = vrot.slane %v4604_v3, 5  ;;  %v4638_v8 = vshrl.u32 %v4556_v6, 16 }
 0x14f   : > { %7211 = vmatprep.mubr.bf16.mxu1 %v6353_v46  ;;  %v8977_v46 = vpop.f32.mrf.mxu0  ;;  %v8999_v31 = vsel %vm8098_vm13, %v6425_v24, %v5371_v45  ;;  %v7513_v3 = vld [vmem:[#allocation2 + $0x6c] sm:$0xff]   ;;  %v7516_v45 = vld [vmem:[#allocation2 + $0x78] sm:$0xff]   ;;  %v9011_v24 = vld [vmem:[#allocation2 + $0x34] sm:$0xf] }
 0x150   : > { %10280 = vst [vmem:[#allocation11_spill] sm:$0xff] %v8977_v46  ;;  %v4603_v51 = vrot.slane %v4601_v39, 4  ;;  %v6426_v39 = vrot.slane %v5306_v1, 9  ;;  %v5380_v16 = vrot.slane %v5378_v14, 4  ;;  %v4640_v46 = vrot.slane %v4638_v8, 4  ;;  %v9030_v8 = vpop.f32.mrf.mxu1 }
 0x151   : > { %7346 = vmatpush3.bf16.msra.mxu0 %v7515_v63  ;;  %v4614_v63 = vshrl.u32 %v4553_v48, 16  ;;  %v4625_v48 = vshrl.u32 %v4555_v58, 16  ;;  %10284 = vst [vmem:[#allocation14_spill] sm:$0xff] %v9030_v8 }
 0x152   : > { %7347 = vmatprep.subr.bf16.mxu0 %v7519_v56 }
 0x153   : > { %v4627_v1 = vrot.slane %v4625_v48, 4  ;;  %v10283_v48 = vcombine.low %v8765_v62, %v8784_v37  ;;  %v9045_v62 = vld [vmem:[#allocation2 + $0x40] sm:$0xf]  ;;  %v10286_v37 = vcombine.low %v8776_v61, %v8791_v30  ;;  %v4644_v30 = vshll.u32 %v8990_v47, 16 }
 0x154   : > { %7268 = vmatmul.mubr.bf16.gmra.mxu0 %v7509_v17  ;;  %v4628_v17 = vshll.u32 %v4555_v58, 16  ;;  %v5381_v58 = vrot.slane %v8990_v47, 5 }
 0x155   : > { %7271 = vmatprep.mubr.bf16.mxu0 %v7512_v22  ;;  %7348 = vmatpush3.bf16.msra.mxu0 %v7519_v56  ;;  %v4616_v22 = vrot.slane %v4614_v63, 4  ;;  %v7514_v56 = vld [vmem:[%s10214_s1 + $0x1e0] sm:$0xff]  }
 0x156   : > { %7212 = vmatmul.mubr.bf16.vlgmr.msra.gmra.mxu1 %v6354_v10  ;;  %v8995_v10 = vpop.f32.mrf.mxu0  ;;  %7349 = vmatprep.subr.bf16.mxu0 %v7523_v42  ;;  %v4630_v49 = vrot.slane %v4628_v17, 5 }
 0x157   : > { %7292 = vmatpush3.bf16.msra.mxu1 %v8827_v20  ;;  %7215 = vmatprep.mubr.bf16.mxu1 %v6355_v26  ;;  %10281 = vst [vmem:[#allocation12_spill] sm:$0xff] %v8995_v10  ;;  %v4634_v20 = vshll.u32 %v4556_v6, 16  ;;  %v9005_v26 = vrot.slane %v4610_v38, 5  ;;  %v4649_v10 = vshrl.u32 %v4558_v34, 16  ;;  %v4607_v6 = vor.u32 %v4606_v7, %v4603_v51 }
 0x158   : > { %7293 = vmatprep.subr.bf16.mxu1 %v7506_v19  ;;  %v9013_v38 = vpop.f32.mrf.mxu0  ;;  %v4620_v51 = vshll.u32 %v8972_v29, 16  ;;  %v9025_v34 = vsel %vm8098_vm13, %v6426_v39, %v5378_v14  ;;  %v9040_v29 = vsel %vm8098_vm13, %v5380_v16, %v5381_v58  ;;  %v5307_v39 = vld [vmem:[#allocation2 + $0x30] sm:$0xe]  ;;  %v4676_v7 = vshll.u32 %v4561_v13, 16  ;;  %v7518_v16 = vld [vmem:[%s10214_s1 + $0x1d8] sm:$0xff]  }
 0x159   : > { %10282 = vst [vmem:[#allocation13_spill] sm:$0xff] %v9013_v38  ;;  %v9015_v63 = vrot.slane %v4634_v20, 5  ;;  %7350 = vmatpush3.bf16.msra.mxu0 %v7523_v42  ;;  %v9035_v42 = vld [vmem:[%s10214_s1 + $0x200] sm:$0xff]   ;;  %v4617_v17 = vor.u32 %v4616_v22, %v9005_v26  ;;  %10285 = vst [vmem:[#allocation15_spill] sm:$0xff] %v9040_v29  ;;  %v9042_v14 = vrot.slane %v4649_v10, 4  ;;  %v4658_v20 = vshll.u32 %v9011_v24, 16  ;;  %v9065_v38 = vpop.f32.mrf.mxu1 }
 0x15a   : > { %v4673_v22 = vshrl.u32 %v4561_v13, 16  ;;  %v9054_v10 = vpop.f32.mrf.mxu0  ;;  %v9056_v58 = vrot.slane %v4607_v6, 4  ;;  %v4631_v8 = vor.u32 %v4630_v49, %v4627_v1  ;;  %v5385_v13 = vrot.slane %v9011_v24, 5  ;;  %10288 = vst [vmem:[#allocation17_spill] sm:$0xff] %v9065_v38  ;;  %v4560_v1 = vld [vmem:[#allocation2 + $0x38] sm:$0x1] }
 0x15b   : > { %7294 = vmatpush3.bf16.msra.mxu1 %v7506_v19  ;;  %v7527_v19 = vld [vmem:[%s10214_s1 + $0x208] sm:$0xff]   ;;  %10287 = vst [vmem:[#allocation16_spill] sm:$0xff] %v9054_v10  ;;  %v4641_v61 = vor.u32 %v4640_v46, %v9015_v63  ;;  %v9067_v6 = vrot.slane %v4617_v17, 4  ;;  %v6427_v47 = vrot.slane %v5307_v39, 9  ;;  %v9071_v49 = vrot.slane %v4658_v20, 5  ;;  %v7522_v17 = vld [vmem:[%s10214_s1 + $0x1d0] sm:$0xff]   ;;  %v9095_v23 = vpop.f32.mrf.mxu1 }
 0x15c   : > { %7295 = vmatprep.subr.bf16.mxu1 %v7510_v0  ;;  %7272 = vmatmul.mubr.bf16.gmra.mxu0 %v7513_v3  ;;  %v4654_v3 = vrot.slane %v4652_v18, 5  ;;  %v4686_v18 = vshrl.u32 %v9045_v62, 16  ;;  %v5308_v10 = vld [vmem:[#allocation2 + $0x3c] sm:$0xe]  ;;  %v4675_v54 = vrot.slane %v4673_v22, 4  ;;  %v4678_v35 = vrot.slane %v4676_v7, 5  ;;  %v9078_v46 = vpop.f32.mrf.mxu0 }
 0x15d   : > { %7275 = vmatprep.mubr.bf16.mxu0 %v7516_v45  ;;  %7351 = vmatprep.subr.bf16.mxu0 %v7527_v19  ;;  %v4682_v45 = vshll.u32 %v9045_v62, 16  ;;  %10289 = vst [vmem:[#allocation18_spill] sm:$0xff] %v9078_v46  ;;  %v9084_v20 = vrot.slane %v4631_v8, 4  ;;  %v9088_v39 = vrot.slane %v4644_v30, 5  ;;  %v5387_v7 = vrot.slane %v5385_v13, 4  ;;  %10291 = vst [vmem:[#allocation19_spill] sm:$0xff] %v9095_v23 }
 0x15e   : > { %7216 = vmatmul.mubr.bf16.gmra.mxu1 %v10283_v48  ;;  %v4662_v48 = vshrl.u32 %v9011_v24, 16  ;;  %7352 = vmatpush3.bf16.msra.mxu0 %v7527_v19  ;;  %v4655_v24 = vor.u32 %v4654_v3, %v9042_v14  ;;  %v7520_v19 = vld [vmem:[#allocation2 + $0x90] sm:$0xff]   ;;  %v9086_v14 = vrot.slane %v4641_v61, 4  ;;  %v5388_v3 = vrot.slane %v4560_v1, 5  ;;  %v4564_v38 = vld [vmem:[#allocation2 + $0x48] sm:$0xf] }
 0x15f   : > { %7219 = vmatprep.mubr.bf16.mxu1 %v10286_v37  ;;  %7296 = vmatpush3.bf16.msra.mxu1 %v7510_v0  ;;  %v9060_v0 = vrot.slane %v4620_v51, 5  ;;  %v7517_v37 = vld [vmem:[#allocation2 + $0x84] sm:$0xff]   ;;  %v4688_v22 = vrot.slane %v4686_v18, 4  ;;  %v10290_v46 = vcombine.low %v8802_v43, %v8811_v2  ;;  %v4668_v61 = vshll.u32 %v4560_v1, 16 }
 0x160   : > { %7297 = vmatprep.subr.bf16.mxu1 %v7514_v56  ;;  %7353 = vmatprep.subr.bf16.mxu0 %v9035_v42  ;;  %v4664_v51 = vrot.slane %v4662_v48, 4  ;;  %v9090_v48 = vrot.slane %v4682_v45, 5  ;;  %v9101_v30 = vld [vmem:[#allocation2 + $0x44] sm:$0x1]  ;;  %v5392_v45 = vrot.slane %v9045_v62, 5  ;;  %v10292_v18 = vcombine.low %v8815_v59, %v8831_v32  ;;  %v7526_v43 = vld [vmem:[%s10214_s1 + $0x1c8] sm:$0xff]   ;;  %v9117_v62 = vpop.f32.mrf.mxu0 }
 0x161   : > { %v9112_v2 = vsel %vm8098_vm13, %v6427_v47, %v5385_v13  ;;  %10293 = vst [vmem:[#allocation20_spill] sm:$0xff] %v9117_v62  ;;  %v5309_v13 = vld [vmem:[#allocation2 + $0x48] sm:$0xe]  ;;  %v4697_v1 = vshrl.u32 %v4564_v38, 16  ;;  %v4700_v47 = vshll.u32 %v4564_v38, 16  ;;  %v7521_v59 = vld [vmem:[#allocation2 + $0x9c] sm:$0xff]  }
 0x162   : > { %7354 = vmatpush3.bf16.msra.mxu0 %v9035_v42  ;;  %v4670_v32 = vrot.slane %v4668_v61, 5  ;;  %v5394_v42 = vrot.slane %v5392_v45, 4  ;;  %v5395_v8 = vrot.slane %v9101_v30, 5  ;;  %v6429_v62 = vrot.slane %v5309_v13, 9  ;;  %v4567_v61 = vld [vmem:[#allocation2 + $0x54] sm:$0xf]  ;;  %v9149_v41 = vpop.f32.mrf.mxu0 }
 0x163   : > { %7298 = vmatpush3.bf16.msra.mxu1 %v7514_v56  ;;  %v6428_v56 = vrot.slane %v5308_v10, 9  ;;  %v4679_v10 = vor.u32 %v4678_v35, %v4675_v54  ;;  %v9130_v35 = vsel %vm8098_vm13, %v5387_v7, %v5388_v3  ;;  %v4689_v54 = vor.u32 %v4688_v22, %v9090_v48  ;;  %v9143_v7 = vld [vmem:[#allocation2 + $0x50] sm:$0x1]  ;;  %v7524_v3 = vld [vmem:[#allocation2 + $0xa8] sm:$0xff]  }
 0x164   : > { %7299 = vmatprep.subr.bf16.mxu1 %v7518_v16  ;;  %7276 = vmatmul.mubr.bf16.gmra.mxu0 %v7517_v37  ;;  %v9114_v37 = vrot.slane %v4655_v24, 4  ;;  %v4692_v24 = vshll.u32 %v9101_v30, 16  ;;  %v4721_v13 = vshrl.u32 %v4567_v61, 16 }
 0x165   : > { %7279 = vmatprep.mubr.bf16.mxu0 %v7520_v19  ;;  %v9134_v19 = vld [vmem:[#allocation2 + $0x58] sm:$0xf]  ;;  %v9140_v38 = vsel %vm8098_vm13, %v6428_v56, %v5392_v45  ;;  %v4699_v56 = vrot.slane %v4697_v1, 4  ;;  %v4702_v45 = vrot.slane %v4700_v47, 5  ;;  %v4690_v60 = vrot.slane %v4689_v54, 4 }
 0x166   : > { %7220 = vmatmul.mubr.bf16.gmra.mxu1 %v10290_v46  ;;  %v4665_v46 = vor.u32 %v4664_v51, %v9071_v49  ;;  %v4661_v22 = vsel %vm7662_vm3, %v9114_v37, %v9071_v49  ;;  %v4694_v4 = vrot.slane %v4692_v24, 5  ;;  %v5402_v49 = vrot.slane %v9143_v7, 5 }
 0x167   : > { %7223 = vmatprep.mubr.bf16.mxu1 %v10292_v18  ;;  %7300 = vmatpush3.bf16.msra.mxu1 %v7518_v16  ;;  %v4565_v16 = vld [vmem:[#allocation2 + $0x4c] sm:$0xf]  ;;  %v9136_v18 = vpop.f32.mrf.mxu1  ;;  %v10295_v37 = vcombine.low %v8821_v36, %v8839_v21  ;;  %v4724_v1 = vshll.u32 %v4567_v61, 16  ;;  %v4734_v47 = vshrl.u32 %v9134_v19, 16  ;;  %v10297_v54 = vcombine.low %v8843_v50, %v8860_v44 }
 0x168   : > { %7301 = vmatprep.subr.bf16.mxu1 %v7522_v17  ;;  %v5399_v51 = vrot.slane %v4565_v16, 5  ;;  %10294 = vst [vmem:[#allocation21_spill] sm:$0xff] %v9136_v18  ;;  %v4666_v23 = vrot.slane %v4665_v46, 4  ;;  %v4680_v18 = vrot.slane %v4679_v10, 4  ;;  %v4706_v15 = vshll.u32 %v4565_v16, 16 }
 0x169   : > { %v4710_v30 = vshrl.u32 %v4565_v16, 16  ;;  %v9158_v46 = vpop.f32.mrf.mxu1  ;;  %v5310_v10 = vld [vmem:[#allocation2 + $0x54] sm:$0xe]  ;;  %v4730_v16 = vshll.u32 %v9134_v19, 16  ;;  %v9169_v36 = vsel %vm8098_vm13, %v5394_v42, %v5395_v8  ;;  %v4703_v44 = vor.u32 %v4702_v45, %v4699_v56  ;;  %v9191_v42 = vld [vmem:[#allocation2 + $0x5c] sm:$0x1] }
 0x16a   : > { %v5401_v29 = vrot.slane %v5399_v51, 4  ;;  %10296 = vst [vmem:[#allocation22_spill] sm:$0xff] %v9158_v46  ;;  %v4671_v24 = vsel %vm7662_vm3, %v4666_v23, %v4670_v32  ;;  %v9173_v21 = vsel %vm8098_vm13, %v6429_v62, %v5399_v51  ;;  %v4685_v50 = vsel %vm7662_vm3, %v4680_v18, %v9090_v48  ;;  %v7525_v23 = vld [vmem:[#allocation2 + $0xb4] sm:$0xff]   ;;  %v7528_v45 = vld [vmem:[#allocation2 + $0xc0] sm:$0xff]  }
 0x16b   : > { %7302 = vmatpush3.bf16.msra.mxu1 %v7522_v17  ;;  %v7530_v17 = vld [vmem:[%s10214_s1 + $0x1c0] sm:$0xff]   ;;  %v4712_v61 = vrot.slane %v4710_v30, 4  ;;  %v4695_v8 = vsel %vm7662_vm3, %v4690_v60, %v4694_v4  ;;  %v6430_v32 = vrot.slane %v5310_v10, 9  ;;  %v9189_v51 = vpop.f32.mrf.mxu1  ;;  %v4723_v48 = vrot.slane %v4721_v13, 4 }
 0x16c   : > { %7303 = vmatprep.subr.bf16.mxu1 %v7526_v43  ;;  %7280 = vmatmul.mubr.bf16.gmra.mxu0 %v7521_v59  ;;  %v9175_v59 = vpop.f32.mrf.mxu0  ;;  %v9186_v62 = vsel %vm8098_vm13, %v5401_v29, %v5402_v49  ;;  %10298 = vst [vmem:[#allocation23_spill] sm:$0xff] %v9189_v51  ;;  %v9193_v18 = vrot.slane %v4730_v16, 5  ;;  %v4736_v56 = vrot.slane %v4734_v47, 4  ;;  %v10299_v4 = vsel %vm7662_vm3, %v9067_v6, %v9060_v0 }
 0x16d   : > { %7283 = vmatprep.mubr.bf16.mxu0 %v7524_v3  ;;  %v9180_v3 = vrot.slane %v4706_v15, 5  ;;  %v4726_v15 = vrot.slane %v4724_v1, 5  ;;  %v10300_v60 = vsel %vm7662_vm3, %v9056_v58, %v9005_v26  ;;  %v10302_v30 = vsel %vm7662_vm3, %v9084_v20, %v9015_v63  ;;  %v4570_v63 = vld [vmem:[#allocation2 + $0x60] sm:$0xf]  ;;  %v9241_v1 = vpop.f32.mrf.mxu1 }
 0x16e   : > { %7224 = vmatmul.mubr.bf16.gmra.mxu1 %v10295_v37  ;;  %v9205_v29 = vcombine.low %v10300_v60, %v10299_v4  ;;  %v5406_v6 = vrot.slane %v9134_v19, 5  ;;  %v9224_v58 = vcombine.low %v4661_v22, %v4671_v24  ;;  %v9231_v20 = vcombine.low %v4685_v50, %v4695_v8  ;;  %10305 = vst [vmem:[#allocation25_spill] sm:$0xff] %v9241_v1 }
 0x16f   : > { %7227 = vmatprep.mubr.bf16.mxu1 %v10297_v54  ;;  %7304 = vmatpush3.bf16.msra.mxu1 %v7526_v43  ;;  %v4716_v43 = vshll.u32 %v9143_v7, 16  ;;  %v10301_v7 = vsel %vm7662_vm3, %v9086_v14, %v9088_v39  ;;  %v9222_v26 = vpop.f32.mrf.mxu0  ;;  %v9228_v39 = vrot.slane %v4703_v44, 4  ;;  %v4713_v37 = vor.u32 %v4712_v61, %v9180_v3  ;;  %v9251_v44 = vld [vmem:[#allocation2 + $0x70] sm:$0xf]  ;;  %v4573_v61 = vld [vmem:[#allocation2 + $0x6c] sm:$0xf] }
 0x170   : > { %7305 = vmatprep.subr.bf16.mxu1 %v7530_v17  ;;  %v9217_v49 = vcombine.low %v10302_v30, %v10301_v7  ;;  %10303 = vst [vmem:[#allocation24_spill] sm:$0xff] %v9222_v26  ;;  %v5409_v19 = vrot.slane %v9191_v42, 5  ;;  %v10304_v22 = vcombine.low %v8853_v33, %v8870_v5  ;;  %v9247_v47 = vsel %vm8098_vm13, %v6430_v32, %v5406_v6  ;;  %v9264_v30 = vpop.f32.mrf.mxu1 }
 0x171   : > { %v9235_v13 = vrot.slane %v4716_v43, 5  ;;  %v9243_v16 = vpop.f32.mrf.mxu0  ;;  %v4727_v54 = vor.u32 %v4726_v15, %v4723_v48  ;;  %v4737_v24 = vor.u32 %v4736_v56, %v9193_v18  ;;  %v4740_v50 = vshll.u32 %v9191_v42, 16  ;;  %v4572_v15 = vld [vmem:[#allocation2 + $0x68] sm:$0x1]  ;;  %10309 = vst [vmem:[#allocation28_spill] sm:$0xff] %v9264_v30 }
 0x172   : > { %10306 = vst [vmem:[#allocation26_spill] sm:$0xff] %v9243_v16  ;;  %v10307_v33 = vcombine.low %v8877_v40, %v8888_v11  ;;  %v5408_v5 = vrot.slane %v5406_v6, 4  ;;  %v4745_v43 = vshrl.u32 %v4570_v63, 16  ;;  %v4748_v4 = vshll.u32 %v4570_v63, 16  ;;  %v7529_v6 = vld [vmem:[#allocation2 + $0xcc] sm:$0xff]  }
 0x173   : > { %7306 = vmatpush3.bf16.msra.mxu1 %v7530_v17  ;;  %v4571_v17 = vld [vmem:[#allocation2 + $0x64] sm:$0xf]  ;;  %v9256_v32 = vpop.f32.mrf.mxu0  ;;  %v4709_v42 = vsel %vm7662_vm3, %v9228_v39, %v9180_v3  ;;  %v4714_v48 = vrot.slane %v4713_v37, 4  ;;  %v4769_v7 = vshrl.u32 %v4573_v61, 16  ;;  %v4772_v40 = vshll.u32 %v4573_v61, 16 }
 0x174   : > { %7284 = vmatmul.mubr.bf16.gmra.mxu0 %v7525_v23  ;;  %v5311_v23 = vld [vmem:[#allocation2 + $0x60] sm:$0xe]  ;;  %v5413_v8 = vrot.slane %v4571_v17, 5  ;;  %10308 = vst [vmem:[#allocation27_spill] sm:$0xff] %v9256_v32  ;;  %v4754_v56 = vshll.u32 %v4571_v17, 16  ;;  %v4758_v60 = vshrl.u32 %v4571_v17, 16  ;;  %v9275_v30 = vsel %vm8098_vm13, %v5408_v5, %v5409_v19 }
 0x175   : > { %7287 = vmatprep.mubr.bf16.mxu0 %v7528_v45  ;;  %v4778_v11 = vshll.u32 %v9251_v44, 16  ;;  %v4782_v45 = vshrl.u32 %v9251_v44, 16  ;;  %v9266_v63 = vpop.f32.mrf.mxu0  ;;  %v4742_v10 = vrot.slane %v4740_v50, 5  ;;  %v6431_v14 = vrot.slane %v5311_v23, 9  ;;  %v9279_v50 = vld [vmem:[#allocation2 + $0x74] sm:$0x1] }
 0x176   : > { %7228 = vmatmul.mubr.bf16.gmra.mxu1 %v10304_v22  ;;  %10310 = vst [vmem:[#allocation29_spill] sm:$0xff] %v9266_v63  ;;  %v4728_v22 = vrot.slane %v4727_v54, 4  ;;  %v5415_v3 = vrot.slane %v5413_v8, 4  ;;  %v5416_v39 = vrot.slane %v4572_v15, 5  ;;  %v4747_v37 = vrot.slane %v4745_v43, 4 }
 0x177   : > { %7231 = vmatprep.mubr.bf16.mxu1 %v10307_v33  ;;  %v4738_v33 = vrot.slane %v4737_v24, 4  ;;  %v4750_v0 = vrot.slane %v4748_v4, 5  ;;  %v9268_v17 = vpop.f32.mrf.mxu0  ;;  %v4719_v61 = vsel %vm7662_vm3, %v4714_v48, %v9235_v13  ;;  %v9277_v1 = vrot.slane %v4754_v56, 5  ;;  %v5312_v24 = vld [vmem:[#allocation2 + $0x6c] sm:$0xe]  ;;  %v9286_v13 = vpop.f32.mrf.mxu1 }
 0x178   : > { %v4760_v54 = vrot.slane %v4758_v60, 4  ;;  %v4771_v23 = vrot.slane %v4769_v7, 4  ;;  %v4774_v51 = vrot.slane %v4772_v40, 5  ;;  %v9281_v43 = vrot.slane %v4778_v11, 5  ;;  %10312 = vst [vmem:[#allocation30_spill] sm:$0xff] %v9286_v13 }
 0x179   : > { %v4784_v4 = vrot.slane %v4782_v45, 4  ;;  %v10311_v46 = vcombine.low %v8881_v25, %v8897_v12  ;;  %v9288_v19 = vpop.f32.mrf.mxu0  ;;  %v4733_v5 = vsel %vm7662_vm3, %v4728_v22, %v9193_v18  ;;  %v4743_v48 = vsel %vm7662_vm3, %v4738_v33, %v4742_v10  ;;  %v4576_v10 = vld [vmem:[#allocation2 + $0x78] sm:$0xf] }
 0x17a   : > { %v9297_v56 = vsel %vm8098_vm13, %v6431_v14, %v5413_v8  ;;  %v10313_v25 = vcombine.low %v8904_v27, %v8910_v57  ;;  %v10314_v12 = vcombine.low %v8999_v31, %v9003_v52  ;;  %v4751_v18 = vor.u32 %v4750_v0, %v4747_v37  ;;  %v5313_v45 = vld [vmem:[#allocation2 + $0x78] sm:$0xe]  ;;  %v9327_v37 = vld [vmem:[#allocation2 + $0x88] sm:$0xf] }
 0x17b   : > { %v4764_v60 = vshll.u32 %v4572_v15, 16  ;;  %v6432_v7 = vrot.slane %v5312_v24, 9  ;;  %v9309_v40 = vpop.f32.mrf.mxu0  ;;  %v4761_v27 = vor.u32 %v4760_v54, %v9277_v1  ;;  %v5420_v57 = vrot.slane %v9251_v44, 5  ;;  %v4577_v15 = vld [vmem:[#allocation2 + $0x7c] sm:$0xf] }
 0x17c   : > { %7288 = vmatmul.mubr.bf16.gmra.mxu0 %v7529_v6  ;;  %v4788_v31 = vshll.u32 %v9279_v50, 16  ;;  %v9316_v52 = vcombine.low %v4709_v42, %v4719_v61  ;;  %v9318_v8 = vcombine.low %v4733_v5, %v4743_v48  ;;  %v4775_v11 = vor.u32 %v4774_v51, %v4771_v23  ;;  %v9321_v6 = vpop.f32.mrf.mxu1  ;;  %v4578_v24 = vld [vmem:[#allocation2 + $0x80] sm:$0x1] }
 0x17d   : > { %7355 = vmatprep.mubr.bf16.mxu0 %v10314_v12  ;;  %v4785_v0 = vor.u32 %v4784_v4, %v9281_v43  ;;  %10315 = vst [vmem:[#allocation31_spill] sm:$0xff] %v9321_v6  ;;  %v9323_v22 = vpop.f32.mrf.mxu0  ;;  %v4793_v44 = vshrl.u32 %v4576_v10, 16  ;;  %v4752_v42 = vrot.slane %v4751_v18, 4  ;;  %v4766_v61 = vrot.slane %v4764_v60, 5  ;;  %v4579_v12 = vld [vmem:[#allocation2 + $0x84] sm:$0xf] }
 0x17e   : > { %7232 = vmatmul.mubr.bf16.gmra.mxu1 %v10311_v46  ;;  %v9307_v46 = vsel %vm8098_vm13, %v5415_v3, %v5416_v39  ;;  %v5427_v3 = vrot.slane %v4577_v15, 5  ;;  %v4796_v39 = vshll.u32 %v4576_v10, 16  ;;  %v9331_v51 = vsel %vm8098_vm13, %v6432_v7, %v5420_v57  ;;  %v9339_v60 = vpop.f32.mrf.mxu1 }
 0x17f   : > { %7235 = vmatprep.mubr.bf16.mxu1 %v10313_v25  ;;  %v5423_v54 = vrot.slane %v9279_v50, 5  ;;  %v9334_v23 = vpop.f32.mrf.mxu0  ;;  %v4762_v4 = vrot.slane %v4761_v27, 4  ;;  %v5422_v5 = vrot.slane %v5420_v57, 4  ;;  %v4790_v48 = vrot.slane %v4788_v31, 5  ;;  %10317 = vst [vmem:[#allocation32_spill] sm:$0xff] %v9339_v60  ;;  %v10318_v50 = vld [vmem:[#allocation15_spill] sm:$0xff] }
 0x180   : > { %v6433_v25 = vrot.slane %v5313_v45, 9  ;;  %v4776_v33 = vrot.slane %v4775_v11, 4  ;;  %v4786_v10 = vrot.slane %v4785_v0, 4  ;;  %v4802_v14 = vshll.u32 %v4577_v15, 16  ;;  %v10320_v11 = vld [vmem:[#allocation6_spill] sm:$0xff]  ;;  %v10321_v0 = vld [vmem:[#allocation5_spill] sm:$0xff] }
 0x181   : > { %v4806_v6 = vshrl.u32 %v4577_v15, 16  ;;  %v10316_v18 = vcombine.low %v8918_v53, %v8928_v9  ;;  %v10319_v7 = vcombine.low %v9025_v34, %v10318_v50  ;;  %v9344_v13 = vpop.f32.mrf.mxu0  ;;  %v5429_v27 = vrot.slane %v5427_v3, 4 }
 0x182   : > { %v5430_v57 = vrot.slane %v4578_v24, 5  ;;  %v4795_v31 = vrot.slane %v4793_v44, 4  ;;  %v4798_v45 = vrot.slane %v4796_v39, 5  ;;  %v10322_v63 = vcombine.low %v10320_v11, %v10321_v0 }
 0x183   : > { %v10323_v53 = vcombine.low %v9112_v2, %v9130_v35  ;;  %v4817_v9 = vshrl.u32 %v4579_v12, 16  ;;  %v4820_v15 = vshll.u32 %v4579_v12, 16  ;;  %v4830_v34 = vshrl.u32 %v9327_v37, 16  ;;  %v9354_v50 = vpop.f32.mrf.mxu0 }
 0x184   : > { %7356 = vmatmul.mubr.bf16.vlgmr.msra.gmra.mxu0 %v10319_v7  ;;  %v4757_v44 = vsel %vm7662_vm3, %v4752_v42, %v9277_v1  ;;  %v4767_v39 = vsel %vm7662_vm3, %v4762_v4, %v4766_v61  ;;  %v9367_v2 = vsel %vm8098_vm13, %v6433_v25, %v5427_v3  ;;  %v4781_v35 = vsel %vm7662_vm3, %v4776_v33, %v9281_v43  ;;  %v4582_v42 = vld [vmem:[#allocation2 + $0x90] sm:$0xf]  ;;  %v9376_v61 = vpop.f32.mrf.mxu1  ;;  %v5314_v25 = vld [vmem:[#allocation2 + $0x84] sm:$0xe]  ;;  %v4581_v33 = vld [vmem:[#allocation2 + $0x8c] sm:$0x1] }
 0x185   : > { %7359 = vmatprep.mubr.bf16.mxu0 %v10323_v53  ;;  %v4791_v12 = vsel %vm7662_vm3, %v4786_v10, %v4790_v48  ;;  %v9374_v7 = vrot.slane %v4802_v14, 5  ;;  %v4808_v1 = vrot.slane %v4806_v6, 4  ;;  %10324 = vst [vmem:[#allocation15_spill] sm:$0xff] %v9376_v61  ;;  %v9378_v4 = vpop.f32.mrf.mxu0  ;;  %v4799_v3 = vor.u32 %v4798_v45, %v4795_v31 }
 0x186   : > { %7236 = vmatmul.mubr.bf16.gmra.mxu1 %v10316_v18  ;;  %v4826_v18 = vshll.u32 %v9327_v37, 16  ;;  %v5434_v43 = vrot.slane %v9327_v37, 5  ;;  %v4819_v11 = vrot.slane %v4817_v9, 4  ;;  %v4822_v48 = vrot.slane %v4820_v15, 5  ;;  %v9398_v9 = vld [vmem:[#allocation2 + $0x94] sm:$0xf] }
 0x187   : > { %7239 = vmatprep.mubr.bf16.mxu1 %v10322_v63  ;;  %v9363_v63 = vsel %vm8098_vm13, %v5422_v5, %v5423_v54  ;;  %v9382_v54 = vsel %vm8098_vm13, %v5429_v27, %v5430_v57  ;;  %v4812_v5 = vshll.u32 %v4578_v24, 16  ;;  %v4832_v6 = vrot.slane %v4830_v34, 4  ;;  %v9387_v10 = vpop.f32.mrf.mxu0  ;;  %v10328_v34 = vld [vmem:[#allocation4_spill] sm:$0xff]  ;;  %v4585_v37 = vld [vmem:[#allocation2 + $0x9c] sm:$0xf] }
 0x188   : > { %v9385_v14 = vrot.slane %v4826_v18, 5  ;;  %v9389_v0 = vcombine.low %v4757_v44, %v4767_v39  ;;  %v4841_v27 = vshrl.u32 %v4582_v42, 16  ;;  %v4844_v57 = vshll.u32 %v4582_v42, 16  ;;  %v10327_v18 = vld [vmem:[#allocation7_spill] sm:$0xff] }
 0x189   : > { %v9393_v31 = vcombine.low %v4781_v35, %v4791_v12  ;;  %v4809_v24 = vor.u32 %v4808_v1, %v9374_v7  ;;  %v6434_v45 = vrot.slane %v5314_v25, 9  ;;  %v10329_v44 = vcombine.low %v10327_v18, %v10328_v34  ;;  %v9408_v35 = vpop.f32.mrf.mxu0 }
 0x18a   : > { %v9400_v15 = vpop.f32.mrf.mxu1  ;;  %v10330_v39 = vcombine.low %v9140_v38, %v9169_v36  ;;  %v9410_v12 = vrot.slane %v4799_v3, 4  ;;  %v9412_v42 = vrot.slane %v4812_v5, 5  ;;  %v5436_v1 = vrot.slane %v5434_v43, 4  ;;  %v5315_v36 = vld [vmem:[#allocation2 + $0x90] sm:$0xe] }
 0x18b   : > { %10325 = vst [vmem:[#allocation6_spill] sm:$0xff] %v9393_v31  ;;  %10326 = vst [vmem:[#allocation5_spill] sm:$0xff] %v9400_v15  ;;  %v5437_v25 = vrot.slane %v4581_v33, 5  ;;  %v10331_v53 = vcombine.low %v9173_v21, %v9186_v62  ;;  %v4823_v18 = vor.u32 %v4822_v48, %v4819_v11  ;;  %v4833_v34 = vor.u32 %v4832_v6, %v9385_v14  ;;  %v9420_v3 = vld [vmem:[#allocation2 + $0xa0] sm:$0xf] }
 0x18c   : > { %7360 = vmatmul.mubr.bf16.gmra.mxu0 %v10330_v39  ;;  %v4836_v38 = vshll.u32 %v4581_v33, 16  ;;  %v9422_v5 = vpop.f32.mrf.mxu1  ;;  %v9424_v39 = vpop.f32.mrf.mxu0  ;;  %v9426_v15 = vld [vmem:[#allocation2 + $0x98] sm:$0x1]  ;;  %v4846_v61 = vrot.slane %v4844_v57, 5  ;;  %v4850_v21 = vshll.u32 %v9398_v9, 16  ;;  %v4854_v62 = vshrl.u32 %v9398_v9, 16 }
 0x18d   : > { %7363 = vmatprep.mubr.bf16.mxu0 %v10331_v53  ;;  %10332 = vst [vmem:[#allocation7_spill] sm:$0xff] %v9422_v5  ;;  %v4810_v11 = vrot.slane %v4809_v24, 4  ;;  %v9432_v33 = vsel %vm8098_vm13, %v6434_v45, %v5434_v43  ;;  %v4865_v48 = vshrl.u32 %v4585_v37, 16  ;;  %v4868_v6 = vshll.u32 %v4585_v37, 16 }
 0x18e   : > { %7240 = vmatmul.mubr.bf16.gmra.mxu1 %v10329_v44  ;;  %v5441_v44 = vrot.slane %v9398_v9, 5  ;;  %v9434_v53 = vpop.f32.mrf.mxu1  ;;  %v9436_v5 = vpop.f32.mrf.mxu0  ;;  %v9440_v60 = vsel %vm8098_vm13, %v5436_v1, %v5437_v25  ;;  %v4874_v57 = vshll.u32 %v9420_v3, 16  ;;  %v4878_v9 = vshrl.u32 %v9420_v3, 16 }
 0x18f   : > { %7307 = vmatprep.mubr.bf16.mxu1 %v9205_v29  ;;  %v4843_v29 = vrot.slane %v4841_v27, 4  ;;  %10333 = vst [vmem:[#allocation4_spill] sm:$0xff] %v9434_v53  ;;  %10334 = vst [vmem:[#allocation33_spill] sm:$0xff] %v9436_v5  ;;  %v6435_v27 = vrot.slane %v5315_v36, 9  ;;  %v4824_v24 = vrot.slane %v4823_v18, 4  ;;  %v4834_v32 = vrot.slane %v4833_v34, 4 }
 0x190   : > { %v4838_v16 = vrot.slane %v4836_v38, 5  ;;  %v5444_v43 = vrot.slane %v9426_v15, 5  ;;  %v9445_v45 = vpop.f32.mrf.mxu1  ;;  %v9447_v37 = vpop.f32.mrf.mxu0  ;;  %v5443_v53 = vrot.slane %v5441_v44, 4  ;;  %v9449_v26 = vrot.slane %v4850_v21, 5  ;;  %v5316_v36 = vld [vmem:[#allocation2 + $0x9c] sm:$0xe] }
 0x191   : > { %10335 = vst [vmem:[#allocation34_spill] sm:$0xff] %v9445_v45  ;;  %v4847_v5 = vor.u32 %v4846_v61, %v4843_v29  ;;  %v4856_v1 = vrot.slane %v4854_v62, 4  ;;  %v4805_v25 = vsel %vm7662_vm3, %v9410_v12, %v9374_v7  ;;  %v5448_v18 = vrot.slane %v9420_v3, 5  ;;  %v4587_v12 = vld [vmem:[#allocation2 + $0xa4] sm:$0x1] }
 0x192   : > { %v4867_v34 = vrot.slane %v4865_v48, 4  ;;  %v4870_v38 = vrot.slane %v4868_v6, 5  ;;  %v10336_v45 = vcombine.low %v9247_v47, %v9275_v30  ;;  %v9460_v61 = vpop.f32.mrf.mxu0  ;;  %v4815_v29 = vsel %vm7662_vm3, %v4810_v11, %v9412_v42  ;;  %v4588_v6 = vld [vmem:[#allocation2 + $0xa8] sm:$0xf] }
 0x193   : > { %v7021_v31 = vpop.f32.mrf.mxu1  ;;  %v9467_v3 = vrot.slane %v4874_v57, 5  ;;  %v4880_v21 = vrot.slane %v4878_v9, 4  ;;  %v4829_v47 = vsel %vm7662_vm3, %v4824_v24, %v9385_v14  ;;  %v4839_v30 = vsel %vm7662_vm3, %v4834_v32, %v4838_v16 }
 0x194   : > { %7364 = vmatmul.mubr.bf16.gmra.mxu0 %v10336_v45  ;;  %v9480_v42 = vsel %vm8098_vm13, %v6435_v27, %v5441_v44  ;;  %v4860_v62 = vshll.u32 %v9426_v15, 16  ;;  %v9483_v48 = vpop.f32.mrf.mxu0  ;;  %v6436_v14 = vrot.slane %v5316_v36, 9  ;;  %v5450_v16 = vrot.slane %v5448_v18, 4  ;;  %v4589_v27 = vld [vmem:[#allocation2 + $0xac] sm:$0xf] }
 0x195   : > { %v1920_v11 = vpop.f32.mrf.mxu1  ;;  %10338 = vst [vmem:[#allocation35_spill] sm:$0xff] %v9483_v48  ;;  %v5451_v32 = vrot.slane %v4587_v12, 5  ;;  %v4871_v57 = vor.u32 %v4870_v38, %v4867_v34  ;;  %v4884_v44 = vshll.u32 %v4587_v12, 16  ;;  %v9494_v24 = vcombine.low %v4805_v25, %v4815_v29  ;;  %v10341_v12 = vld [vmem:[#allocation3_spill] sm:$0xff] }
 0x196   : > { %7308 = vmatmul.mubr.bf16.vlgmr.msra.gmra.mxu1 %v9217_v49  ;;  %v10337_v49 = vcombine.low %v9297_v56, %v9307_v46  ;;  %v9489_v56 = vrot.slane %v4847_v5, 4  ;;  %v4857_v46 = vor.u32 %v4856_v1, %v9449_v26  ;;  %v9492_v15 = vpop.f32.mrf.mxu0  ;;  %v9496_v45 = vcombine.low %v4829_v47, %v4839_v30  ;;  %v5317_v5 = vld [vmem:[#allocation2 + $0xa8] sm:$0xe] }
 0x197   : > { %7311 = vmatprep.mubr.bf16.mxu1 %v9224_v58  ;;  %v9487_v58 = vsel %vm8098_vm13, %v5443_v53, %v5444_v43  ;;  %v7022_v9 = vpop.f32.mrf.mxu1  ;;  %10339 = vst [vmem:[#allocation36_spill] sm:$0xff] %v9492_v15  ;;  %v4881_v53 = vor.u32 %v4880_v21, %v9467_v3  ;;  %v5455_v43 = vrot.slane %v4589_v27, 5  ;;  %v9501_v36 = vrot.slane %v4860_v62, 5 }
 0x198   : > { %7367 = vmatprep.mubr.bf16.mxu0 %v10337_v49  ;;  %10340 = vst [vmem:[#allocation37_spill] sm:$0xff] %v9496_v45  ;;  %v9503_v49 = vld [vmem:[#allocation2 + $0xb0] sm:$0x1]  ;;  %v4889_v34 = vshrl.u32 %v4588_v6, 16  ;;  %v4892_v38 = vshll.u32 %v4588_v6, 16  ;;  %v1929_v7 = vadd.f32 %v7021_v31, %v10341_v12  ;;  %v9506_v25 = vpop.f32.mrf.mxu0  ;;  %v4853_v29 = vsel %vm7662_vm3, %v9489_v56, %v9449_v26 }
 0x199   : > { %v1923_v15 = vpop.f32.mrf.mxu1  ;;  %10342 = vst [vmem:[#allocation3_spill] sm:$0xff] %v9506_v25  ;;  %v4858_v21 = vrot.slane %v4857_v46, 4  ;;  %v9514_v47 = vsel %vm8098_vm13, %v6436_v14, %v5448_v18  ;;  %v9518_v30 = vsel %vm8098_vm13, %v5450_v16, %v5451_v32  ;;  %v4872_v62 = vrot.slane %v4871_v57, 4  ;;  %v10345_v25 = vld [vmem:[#allocation8_spill] sm:$0xff]  ;;  %v10346_v32 = vld [vmem:[#allocation9_spill] sm:$0xff] }
 0x19a   : > { %v4886_v6 = vrot.slane %v4884_v44, 5  ;;  %v6437_v31 = vrot.slane %v5317_v5, 9  ;;  %v10343_v1 = vcombine.low %v9331_v51, %v9363_v63  ;;  %v9524_v26 = vpop.f32.mrf.mxu0  ;;  %v4882_v56 = vrot.slane %v4881_v53, 4  ;;  %v10348_v63 = vld [vmem:[#allocation10_spill] sm:$0xff] }
 0x19b   : > { %v7025_v12 = vpop.f32.mrf.mxu1  ;;  %10344 = vst [vmem:[#allocation38_spill] sm:$0xff] %v9524_v26  ;;  %v5457_v46 = vrot.slane %v5455_v43, 4  ;;  %v5458_v18 = vrot.slane %v9503_v49, 5  ;;  %v4898_v14 = vshll.u32 %v4589_v27, 16  ;;  %v1921_v16 = vadd.f32 %v1920_v11, %v10345_v25 }
 0x19c   : > { %7368 = vmatmul.mubr.bf16.gmra.mxu0 %v10343_v1  ;;  %v1932_v57 = vadd.f32 %v7022_v9, %v10346_v32  ;;  %v4891_v44 = vrot.slane %v4889_v34, 4  ;;  %v4894_v51 = vrot.slane %v4892_v38, 5  ;;  %v1924_v5 = vadd.f32 %v1923_v15, %v10348_v63  ;;  %v10349_v1 = vld [vmem:[#allocation11_spill] sm:$0xff]  ;;  %v9535_v45 = vpop.f32.mrf.mxu0  ;;  %v10350_v9 = vld [vmem:[#allocation12_spill] sm:$0xff]  ;;  %v5318_v38 = vld [vmem:[#allocation2 + $0xb4] sm:$0xe] }
 0x19d   : > { %v1945_v53 = vadd.f32 %v7025_v12, %v10349_v1  ;;  %v1936_v26 = vpop.f32.mrf.mxu1  ;;  %v4902_v48 = vshrl.u32 %v4589_v27, 16  ;;  %v9538_v11 = vadd.f32 %v9268_v17, %v1929_v7  ;;  %v4887_v17 = vsel %vm7662_vm3, %v4882_v56, %v4886_v6  ;;  %v9571_v56 = vld [vmem:[#allocation2 + $0xb8] sm:$0xf] }
 0x19e   : > { %7312 = vmatmul.mubr.bf16.gmra.mxu1 %v9231_v20  ;;  %v10347_v20 = vcombine.low %v9367_v2, %v9382_v54  ;;  %v1937_v25 = vadd.f32 %v1936_v26, %v10350_v9  ;;  %v4877_v2 = vsel %vm7662_vm3, %v4872_v62, %v9467_v3  ;;  %v9549_v54 = vsel %vm8098_vm13, %v6437_v31, %v5455_v43  ;;  %v9551_v34 = vpop.f32.mrf.mxu0  ;;  %v10351_v3 = vld [vmem:[#allocation13_spill] sm:$0xff] }
 0x19f   : > { %7315 = vmatprep.mubr.bf16.mxu1 %v9316_v52  ;;  %v4863_v52 = vsel %vm7662_vm3, %v4858_v21, %v9501_v36  ;;  %v7026_v15 = vpop.f32.mrf.mxu1  ;;  %v9557_v7 = vsel %vm8098_vm13, %v5457_v46, %v5458_v18  ;;  %v9559_v27 = vrot.slane %v4898_v14, 5  ;;  %v4908_v36 = vshll.u32 %v9503_v49, 16 }
 0x1a0   : > { %7371 = vmatprep.mubr.bf16.mxu0 %v10347_v20  ;;  %v1948_v21 = vadd.f32 %v7026_v15, %v10351_v3  ;;  %v4895_v62 = vor.u32 %v4894_v51, %v4891_v44  ;;  %v9564_v43 = vadd.f32 %v9288_v19, %v1921_v16  ;;  %v9567_v31 = vadd.f32 %v9309_v40, %v1932_v57  ;;  %v9569_v6 = vpop.f32.mrf.mxu0  ;;  %v10352_v19 = vld [vmem:[#allocation16_spill] sm:$0xff]  ;;  %v9585_v16 = vld [vmem:[#allocation2 + $0xbc] sm:$0x1]  ;;  %v10354_v51 = vld [vmem:[#allocation18_spill] sm:$0xff] }
 0x1a1   : > { %v1939_v12 = vpop.f32.mrf.mxu1  ;;  %v4904_v26 = vrot.slane %v4902_v48, 4  ;;  %v9574_v46 = vadd.f32 %v9323_v22, %v1924_v5  ;;  %v9577_v49 = vadd.f32 %v9334_v23, %v1945_v53  ;;  %v9580_v18 = vadd.f32 %v9344_v13, %v1937_v25  ;;  %v4591_v48 = vld [vmem:[#allocation2 + $0xb4] sm:$0xf]  ;;  %v4594_v15 = vld [vmem:[#allocation2 + $0xc0] sm:$0xf] }
 0x1a2   : > { %v1940_v14 = vadd.f32 %v1939_v12, %v10352_v19  ;;  %v6452_v40 = vcombine.low %v9514_v47, %v9518_v30  ;;  %v6438_v32 = vrot.slane %v5318_v38, 9  ;;  %v9588_v57 = vadd.f32 %v9354_v50, %v1948_v21  ;;  %v9598_v44 = vpop.f32.mrf.mxu0  ;;  %v9603_v50 = vld [vmem:[#allocation2 + $0xc4] sm:$0xf] }
 0x1a3   : > { %v7029_v22 = vpop.f32.mrf.mxu1  ;;  %v10353_v23 = vcombine.low %v9432_v33, %v9440_v60  ;;  %v9594_v13 = vcombine.low %v4853_v29, %v4863_v52  ;;  %v9596_v20 = vcombine.low %v4877_v2, %v4887_v17  ;;  %v6453_v47 = vcombine.low %v9549_v54, %v9557_v7  ;;  %v5319_v33 = vld [vmem:[#allocation2 + $0xc0] sm:$0xe] }
 0x1a4   : > { %v5462_v30 = vrot.slane %v9571_v56, 5  ;;  %v1961_v63 = vadd.f32 %v7029_v22, %v10354_v51  ;;  %v9610_v60 = vrot.slane %v4908_v36, 5  ;;  %v5469_v29 = vrot.slane %v9603_v50, 5  ;;  %v9616_v53 = vpop.f32.mrf.mxu0 }
 0x1a5   : > { %7372 = vmatmul.mubr.bf16.gmra.mxu0 %v10353_v23  ;;  %v9614_v5 = vadd.f32 %v9378_v4, %v1940_v14  ;;  %v1952_v1 = vpop.f32.mrf.mxu1  ;;  %v9618_v9 = vrot.slane %v4895_v62, 4  ;;  %v4905_v25 = vor.u32 %v4904_v26, %v9559_v27  ;;  %v4913_v52 = vshrl.u32 %v4591_v48, 16 }
 0x1a6   : > { %7316 = vmatmul.mubr.bf16.gmra.mxu1 %v9318_v8  ;;  %v10355_v8 = vcombine.low %v9480_v42, %v9487_v58  ;;  %v9622_v42 = vld [vmem:[#allocation2 + $0xc8] sm:$0x1]  ;;  %v10356_v58 = vld [vmem:[#allocation20_spill] sm:$0xff]  ;;  %v9627_v54 = vsel %vm8098_vm13, %v6438_v32, %v5462_v30  ;;  %v4916_v4 = vshll.u32 %v4591_v48, 16  ;;  %v9630_v17 = vadd.f32 %v9387_v10, %v1961_v63  ;;  %v9632_v36 = vpop.f32.mrf.mxu0  ;;  %v10363_v48 = vld [vmem:[#allocation27_spill] sm:$0xff] }
 0x1a7   : > { %7319 = vmatprep.mubr.bf16.mxu1 %v9389_v0  ;;  %v5465_v0 = vrot.slane %v9585_v16, 5  ;;  %v1953_v2 = vadd.f32 %v1952_v1, %v10356_v58  ;;  %v7030_v7 = vpop.f32.mrf.mxu1  ;;  %v5464_v38 = vrot.slane %v5462_v30, 4  ;;  %v4922_v3 = vshll.u32 %v9571_v56, 16  ;;  %v9666_v58 = vld [vmem:[#allocation2 + $0xd0] sm:$0xf] }
 0x1a8   : > { %7375 = vmatprep.mubr.bf16.mxu0 %v10355_v8  ;;  %v4926_v21 = vshrl.u32 %v9571_v56, 16  ;;  %v6439_v62 = vrot.slane %v5319_v33, 9  ;;  %v1964_v12 = vadd.f32 %v7030_v7, %v9149_v41  ;;  %v5471_v26 = vrot.slane %v5469_v29, 4  ;;  %v10358_v8 = vld [vmem:[#allocation6_spill] sm:$0xff] }
 0x1a9   : > { %v5472_v19 = vrot.slane %v9622_v42, 5  ;;  %v9639_v14 = vadd.f32 %v9408_v35, %v1953_v2  ;;  %v1955_v32 = vpop.f32.mrf.mxu1  ;;  %v9641_v10 = vpop.f32.mrf.mxu0  ;;  %v9647_v22 = vrot.slane %v4905_v25, 4  ;;  %v4937_v56 = vshrl.u32 %v4594_v15, 16 }
 0x1aa   : > { %v4940_v23 = vshll.u32 %v4594_v15, 16  ;;  %v1956_v41 = vadd.f32 %v1955_v32, %v9175_v59  ;;  %v9650_v30 = vrot.slane %v4913_v52, 4  ;;  %v9652_v51 = vrot.slane %v4916_v4, 5  ;;  %v10360_v15 = vld [vmem:[#allocation33_spill] sm:$0xff] }
 0x1ab   : > { %v9655_v35 = vadd.f32 %v9424_v39, %v1964_v12  ;;  %v7033_v63 = vpop.f32.mrf.mxu1  ;;  %v5466_v33 = vsel %vm8098_vm13, %v5464_v38, %v5465_v0  ;;  %v9660_v1 = vpop.f32.mrf.mxu0  ;;  %v5470_v25 = vsel %vm8098_vm13, %v6439_v62, %v5469_v29  ;;  %v4946_v59 = vshll.u32 %v9603_v50, 16  ;;  %v10359_v39 = vld [vmem:[#allocation24_spill] sm:$0xff]  ;;  %v5320_v0 = vld [vmem:[#allocation2 + $0xcc] sm:$0xe] }
 0x1ac   : > { %v4950_v52 = vshrl.u32 %v9603_v50, 16  ;;  %v1977_v2 = vadd.f32 %v7033_v63, %v10359_v39  ;;  %v5476_v4 = vrot.slane %v9666_v58, 5  ;;  %v9674_v7 = vadd.f32 %v10360_v15, %v1956_v41  ;;  %v9680_v63 = vld [vmem:[#allocation2 + $0xd4] sm:$0x1] }
 0x1ad   : > { %10357 = vst [vmem:[#allocation8_spill] sm:$0xff] %v9655_v35  ;;  %7376 = vmatmul.mubr.bf16.gmra.mxu0 %v6452_v40  ;;  %v5473_v40 = vsel %vm8098_vm13, %v5471_v26, %v5472_v19  ;;  %v1968_v29 = vpop.f32.mrf.mxu1  ;;  %v9676_v38 = vrot.slane %v4922_v3, 5  ;;  %v4928_v50 = vrot.slane %v4926_v21, 4  ;;  %v9678_v62 = vpop.f32.mrf.mxu0  ;;  %v4939_v12 = vrot.slane %v4937_v56, 4 }
 0x1ae   : > { %7320 = vmatmul.mubr.bf16.gmra.mxu1 %v10358_v8  ;;  %7379 = vmatprep.mubr.bf16.mxu0 %v6453_v47  ;;  %10361 = vst [vmem:[#allocation9_spill] sm:$0xff] %v9674_v7  ;;  %v4942_v32 = vrot.slane %v4940_v23, 5  ;;  %v6454_v26 = vcombine.low %v9627_v54, %v5466_v33  ;;  %v4932_v19 = vshll.u32 %v9585_v16, 16  ;;  %v9686_v8 = vadd.f32 %v9447_v37, %v1977_v2  ;;  %v4597_v23 = vld [vmem:[#allocation2 + $0xcc] sm:$0xf] }
 0x1af   : > { %7323 = vmatprep.mubr.bf16.mxu1 %v9494_v24  ;;  %v10362_v24 = vld [vmem:[#allocation26_spill] sm:$0xff]  ;;  %v7034_v41 = vpop.f32.mrf.mxu1  ;;  %v9688_v39 = vpop.f32.mrf.mxu0  ;;  %v6455_v3 = vcombine.low %v5470_v25, %v5473_v40  ;;  %v9690_v21 = vrot.slane %v4946_v59, 5  ;;  %v4952_v15 = vrot.slane %v4950_v52, 4  ;;  %v6440_v56 = vrot.slane %v5320_v0, 9  ;;  %v10364_v52 = vld [vmem:[#allocation29_spill] sm:$0xff]  ;;  %v10365_v0 = vld [vmem:[#allocation35_spill] sm:$0xff] }
 0x1b0   : > { %v1969_v47 = vadd.f32 %v1968_v29, %v10362_v24  ;;  %v1980_v7 = vadd.f32 %v7034_v41, %v10363_v48  ;;  %v5478_v35 = vrot.slane %v5476_v4, 4  ;;  %v5479_v29 = vrot.slane %v9680_v63, 5  ;;  %v10367_v41 = vld [vmem:[#allocation37_spill] sm:$0xff] }
 0x1b1   : > { %v1971_v16 = vpop.f32.mrf.mxu1  ;;  %v4911_v37 = vsel %vm7662_vm3, %v9647_v22, %v9610_v60  ;;  %v4919_v33 = vor.u32 %v9652_v51, %v9650_v30  ;;  %v4929_v25 = vor.u32 %v4928_v50, %v9676_v38  ;;  %v4943_v48 = vor.u32 %v4942_v32, %v4939_v12  ;;  %v10368_v12 = vld [vmem:[#allocation14_spill] sm:$0xff] }
 0x1b2   : > { %v9695_v54 = vadd.f32 %v9460_v61, %v1969_v47  ;;  %v9704_v59 = vpop.f32.mrf.mxu0  ;;  %v1972_v2 = vadd.f32 %v1971_v16, %v10364_v52  ;;  %v4956_v40 = vshll.u32 %v9622_v42, 16  ;;  %v4961_v61 = vshrl.u32 %v4597_v23, 16 }
 0x1b3   : > { %v9709_v24 = vadd.f32 %v10365_v0, %v1980_v7  ;;  %v4953_v60 = vor.u32 %v4952_v15, %v9690_v21  ;;  %v5477_v22 = vsel %vm8098_vm13, %v6440_v56, %v5476_v4  ;;  %v4964_v30 = vshll.u32 %v4597_v23, 16 }
 0x1b4   : > { %v7037_v47 = vpop.f32.mrf.mxu1  ;;  %v4970_v51 = vshll.u32 %v9666_v58, 16  ;;  %v9716_v50 = vpop.f32.mrf.mxu0  ;;  %v5480_v7 = vsel %vm8098_vm13, %v5478_v35, %v5479_v29  ;;  %v4974_v32 = vshrl.u32 %v9666_v58, 16  ;;  %v10371_v4 = vsel %vm7662_vm3, %v9618_v9, %v9559_v27  ;;  %v10373_v58 = vld [vmem:[#allocation3_spill] sm:$0xff] }
 0x1b5   : > { %10366 = vst [vmem:[#allocation10_spill] sm:$0xff] %v9709_v24  ;;  %7380 = vmatmul.mubr.bf16.gmra.mxu0 %v6454_v26  ;;  %v1993_v42 = vadd.f32 %v7037_v47, %v10368_v12  ;;  %v10369_v26 = vld [vmem:[#allocation36_spill] sm:$0xff]  ;;  %v6413_v56 = vcombine.low %v10371_v4, %v4911_v37  ;;  %v4920_v23 = vrot.slane %v4919_v33, 4  ;;  %v4930_v52 = vrot.slane %v4929_v25, 4  ;;  %v10374_v27 = vld [vmem:[#allocation19_spill] sm:$0xff]  ;;  %v10375_v33 = vld [vmem:[#allocation38_spill] sm:$0xff] }
 0x1b6   : > { %7324 = vmatmul.mubr.bf16.gmra.mxu1 %v10367_v41  ;;  %7383 = vmatprep.mubr.bf16.mxu0 %v6455_v3  ;;  %v9724_v15 = vadd.f32 %v10369_v26, %v1972_v2  ;;  %v1984_v16 = vpop.f32.mrf.mxu1  ;;  %v4934_v0 = vrot.slane %v4932_v19, 5  ;;  %v10372_v3 = vld [vmem:[#allocation17_spill] sm:$0xff]  ;;  %v4944_v35 = vrot.slane %v4943_v48, 4  ;;  %v4958_v29 = vrot.slane %v4956_v40, 5 }
 0x1b7   : > { %7327 = vmatprep.mubr.bf16.mxu1 %v9594_v13  ;;  %v9731_v13 = vpop.f32.mrf.mxu0  ;;  %v1985_v55 = vadd.f32 %v1984_v16, %v10372_v3  ;;  %v9735_v47 = vadd.f32 %v10373_v58, %v1993_v42  ;;  %v4954_v41 = vrot.slane %v4953_v60, 4  ;;  %v6456_v12 = vcombine.low %v5477_v22, %v5480_v7  ;;  %v10376_v40 = vld [vmem:[#allocation21_spill] sm:$0xff] }
 0x1b8   : > { %10370 = vst [vmem:[#allocation11_spill] sm:$0xff] %v9724_v15  ;;  %v7038_v2 = vpop.f32.mrf.mxu1  ;;  %v4963_v26 = vrot.slane %v4961_v61, 4  ;;  %v4966_v15 = vrot.slane %v4964_v30, 5  ;;  %v4972_v37 = vrot.slane %v4970_v51, 5  ;;  %v4976_v19 = vrot.slane %v4974_v32, 4 }
 0x1b9   : > { %v9737_v24 = vpop.f32.mrf.mxu0  ;;  %v1996_v9 = vadd.f32 %v7038_v2, %v10374_v27  ;;  %v9741_v25 = vadd.f32 %v10375_v33, %v1985_v55  ;;  %v4925_v60 = vsel %vm7662_vm3, %v4920_v23, %v9676_v38  ;;  %v4935_v30 = vsel %vm7662_vm3, %v4930_v52, %v4934_v0 }
 0x1ba   : > { %v1987_v16 = vpop.f32.mrf.mxu1  ;;  %v4949_v51 = vsel %vm7662_vm3, %v4944_v35, %v9690_v21  ;;  %v4959_v7 = vsel %vm7662_vm3, %v4954_v41, %v4958_v29  ;;  %v4980_v32 = vshll.u32 %v9680_v63, 16  ;;  %v4967_v23 = vor.u32 %v4966_v15, %v4963_v26  ;;  %v10378_v21 = vld [vmem:[#allocation23_spill] sm:$0xff] }
 0x1bb   : > { %v9743_v48 = vpop.f32.mrf.mxu0  ;;  %v1988_v42 = vadd.f32 %v1987_v16, %v10376_v40  ;;  %v9750_v61 = vadd.f32 %v9535_v45, %v1996_v9  ;;  %v10377_v45 = vld [vmem:[#allocation22_spill] sm:$0xff]  ;;  %v6414_v63 = vcombine.low %v4925_v60, %v4935_v30  ;;  %v6415_v58 = vcombine.low %v4949_v51, %v4959_v7 }
 0x1bc   : > { %v4982_v2 = vrot.slane %v4980_v32, 5 }
 0x1bd   : > { %v7041_v22 = vpop.f32.mrf.mxu1  ;;  %7384 = vmatmul.mubr.bf16.gmra.mxu0 %v6456_v12  ;;  %v9761_v38 = vpop.f32.mrf.mxu0  ;;  %v9765_v3 = vadd.f32 %v9551_v34, %v1988_v42  ;;  %v4968_v12 = vrot.slane %v4967_v23, 4  ;;  %v10381_v42 = vld [vmem:[#allocation30_spill] sm:$0xff] }
 0x1be   : > { %7328 = vmatmul.mubr.bf16.gmra.mxu1 %v9596_v20  ;;  %v2009_v4 = vadd.f32 %v7041_v22, %v10377_v45  ;;  %v4977_v20 = vor.u32 %v4976_v19, %v4972_v37  ;;  %v10380_v19 = vld [vmem:[#allocation28_spill] sm:$0xff] }
 0x1bf   : > { %7331 = vmatprep.mubr.bf16.mxu1 %v6413_v56  ;;  %v2000_v52 = vpop.f32.mrf.mxu1  ;;  %v9767_v0 = vpop.f32.mrf.mxu0  ;;  %v10379_v56 = vld [vmem:[#allocation25_spill] sm:$0xff]  ;;  %v4973_v22 = vsel %vm7662_vm3, %v4968_v12, %v4972_v37 }
 0x1c0   : > { %v2001_v55 = vadd.f32 %v2000_v52, %v10378_v21  ;;  %v9771_v35 = vadd.f32 %v9569_v6, %v2009_v4  ;;  %v4978_v26 = vrot.slane %v4977_v20, 4  ;;  %v10383_v52 = vld [vmem:[#allocation32_spill] sm:$0xff] }
 0x1c1   : > { %v7042_v29 = vpop.f32.mrf.mxu1  ;;  %v9773_v41 = vpop.f32.mrf.mxu0 }
 0x1c2   : > { %v2012_v15 = vadd.f32 %v7042_v29, %v10379_v56  ;;  %v9777_v34 = vadd.f32 %v9598_v44, %v2001_v55  ;;  %v4983_v44 = vsel %vm7662_vm3, %v4978_v26, %v4982_v2  ;;  %v10384_v29 = vld [vmem:[#allocation15_spill] sm:$0xff] }
 0x1c3   : > { %v2003_v27 = vpop.f32.mrf.mxu1  ;;  %v9779_v9 = vpop.f32.mrf.mxu0  ;;  %v6416_v23 = vcombine.low %v4973_v22, %v4983_v44 }
 0x1c4   : > { %v2004_v33 = vadd.f32 %v2003_v27, %v10380_v19  ;;  %v9783_v6 = vadd.f32 %v9616_v53, %v2012_v15  ;;  %v10382_v53 = vld [vmem:[#allocation31_spill] sm:$0xff] }
 0x1c5   : > { %v7045_v16 = vpop.f32.mrf.mxu1  ;;  %v9785_v40 = vpop.f32.mrf.mxu0  ;;  %v10386_v27 = vld [vmem:[#allocation7_spill] sm:$0xff] }
 0x1c6   : > { %7332 = vmatmul.mubr.bf16.gmra.mxu1 %v6414_v63  ;;  %v2025_v60 = vadd.f32 %v7045_v16, %v10381_v42  ;;  %v9793_v30 = vadd.f32 %v9632_v36, %v2004_v33  ;;  %v10387_v42 = vld [vmem:[#allocation4_spill] sm:$0xff] }
 0x1c7   : > { %7335 = vmatprep.mubr.bf16.mxu1 %v6415_v58  ;;  %v2016_v51 = vpop.f32.mrf.mxu1  ;;  %v7170_v7 = vpop.f32.mrf.mxu0 }
 0x1c8   : > { %v2017_v32 = vadd.f32 %v2016_v51, %v10382_v53  ;;  %v9797_v45 = vadd.f32 %v9641_v10, %v2025_v60  ;;  %v10385_v10 = vld [vmem:[#allocation5_spill] sm:$0xff]  ;;  %v10388_v51 = vld [vmem:[#allocation34_spill] sm:$0xff] }
 0x1c9   : > { %v7046_v4 = vpop.f32.mrf.mxu1  ;;  %v3529_v20 = vpop.f32.mrf.mxu0 }
 0x1ca   : > { %v2028_v21 = vadd.f32 %v7046_v4, %v10383_v52  ;;  %v9801_v37 = vadd.f32 %v9660_v1, %v2017_v32 }
 0x1cb   : > { %v2019_v28 = vpop.f32.mrf.mxu1  ;;  %v7173_v55 = vpop.f32.mrf.mxu0 }
 0x1cc   : > { %v2020_v36 = vadd.f32 %v2019_v28, %v10384_v29  ;;  %v9805_v63 = vadd.f32 %v9678_v62, %v2028_v21 }
 0x1cd   : > { %v3542_v2 = vpop.f32.mrf.mxu0 }
 0x1ce   : > { %v7049_v58 = vpop.f32.mrf.mxu1  ;;  %7336 = vmatmul.mubr.bf16.gmra.mxu1 %v6416_v23  ;;  %v9809_v15 = vadd.f32 %v9688_v39, %v2020_v36 }
 0x1cf   : > { %v2041_v56 = vadd.f32 %v7049_v58, %v10385_v10  ;;  %v7174_v26 = vpop.f32.mrf.mxu0 }
 0x1d0   : > { %v2032_v12 = vpop.f32.mrf.mxu1 }
 0x1d1   : > { %v2033_v1 = vadd.f32 %v2032_v12, %v10386_v27  ;;  %v9813_v19 = vadd.f32 %v9704_v59, %v2041_v56  ;;  %v3545_v16 = vpop.f32.mrf.mxu0 }
 0x1d2   : > { %v7050_v33 = vpop.f32.mrf.mxu1 }
 0x1d3   : > { %v2044_v62 = vadd.f32 %v7050_v33, %v10387_v42  ;;  %v9817_v60 = vadd.f32 %v9716_v50, %v2033_v1  ;;  %v7177_v44 = vpop.f32.mrf.mxu0 }
 0x1d4   : > { %v2035_v22 = vpop.f32.mrf.mxu1 }
 0x1d5   : > { %v2036_v53 = vadd.f32 %v2035_v22, %v10388_v51  ;;  %v9821_v39 = vadd.f32 %v9731_v13, %v2044_v62  ;;  %v3558_v4 = vpop.f32.mrf.mxu0 }
 0x1d6   : > { %v7117_v32 = vpop.f32.mrf.mxu1 }
 0x1d7   : > { %v2886_v23 = vadd.f32 %v7117_v32, %v9538_v11  ;;  %v9825_v59 = vadd.f32 %v9737_v24, %v2036_v53  ;;  %v7178_v21 = vpop.f32.mrf.mxu0 }
 0x1d8   : > { %v2757_v52 = vpop.f32.mrf.mxu1 }
 0x1d9   : > { %v2884_v28 = vadd.f32 %v2757_v52, %v9564_v43  ;;  %v9829_v50 = vadd.f32 %v9743_v48, %v2886_v23  ;;  %v3561_v36 = vpop.f32.mrf.mxu0 }
 0x1da   : > { %v7118_v29 = vpop.f32.mrf.mxu1 }
 0x1db   : > { %v2887_v58 = vadd.f32 %v7118_v29, %v9567_v31  ;;  %v9833_v13 = vadd.f32 %v9761_v38, %v2884_v28  ;;  %v7181_v56 = vpop.f32.mrf.mxu0 }
 0x1dc   : > { %v2760_v10 = vpop.f32.mrf.mxu1 }
 0x1dd   : > { %v2885_v11 = vadd.f32 %v2760_v10, %v9574_v46  ;;  %v9837_v24 = vadd.f32 %v9767_v0, %v2887_v58  ;;  %v3574_v27 = vpop.f32.mrf.mxu0  ;;  %v10389_v58 = vld [vmem:[#allocation8_spill] sm:$0xff] }
 0x1de   : > { %v7121_v12 = vpop.f32.mrf.mxu1 }
 0x1df   : > { %v2890_v43 = vadd.f32 %v7121_v12, %v9577_v49  ;;  %v9841_v48 = vadd.f32 %v9773_v41, %v2885_v11  ;;  %v7182_v33 = vpop.f32.mrf.mxu0 }
 0x1e0   : > { %v2773_v1 = vpop.f32.mrf.mxu1 }
 0x1e1   : > { %v2888_v31 = vadd.f32 %v2773_v1, %v9580_v18  ;;  %v9845_v38 = vadd.f32 %v9779_v9, %v2890_v43  ;;  %v3577_v62 = vpop.f32.mrf.mxu0 }
 0x1e2   : > { %v7122_v42 = vpop.f32.mrf.mxu1 }
 0x1e3   : > { %v2891_v46 = vadd.f32 %v7122_v42, %v9588_v57  ;;  %v9849_v0 = vadd.f32 %v9785_v40, %v2888_v31  ;;  %v7185_v51 = vpop.f32.mrf.mxu0 }
 0x1e4   : > { %v2776_v22 = vpop.f32.mrf.mxu1 }
 0x1e5   : > { %v2889_v49 = vadd.f32 %v2776_v22, %v9614_v5  ;;  %v9852_v41 = vadd.f32 %v7170_v7, %v2891_v46  ;;  %v3590_v32 = vpop.f32.mrf.mxu0  ;;  %v10390_v7 = vld [vmem:[#allocation9_spill] sm:$0xff] }
 0x1e6   : > { %v7125_v53 = vpop.f32.mrf.mxu1 }
 0x1e7   : > { %v2894_v18 = vadd.f32 %v7125_v53, %v9630_v17  ;;  %v9855_v23 = vadd.f32 %v3529_v20, %v2889_v49  ;;  %v7186_v52 = vpop.f32.mrf.mxu0 }
 0x1e8   : > { %v2789_v9 = vpop.f32.mrf.mxu1 }
 0x1e9   : > { %v2892_v28 = vadd.f32 %v2789_v9, %v9639_v14  ;;  %v9858_v57 = vadd.f32 %v7173_v55, %v2894_v18  ;;  %v3593_v29 = vpop.f32.mrf.mxu0 }
 0x1ea   : > { %v7126_v40 = vpop.f32.mrf.mxu1 }
 0x1eb   : > { %v2895_v10 = vadd.f32 %v7126_v40, %v10389_v58  ;;  %v9861_v11 = vadd.f32 %v3542_v2, %v2892_v28  ;;  %v7189_v20 = vpop.f32.mrf.mxu0  ;;  %v10391_v2 = vld [vmem:[#allocation10_spill] sm:$0xff] }
 0x1ec   : > { %v2792_v5 = vpop.f32.mrf.mxu1 }
 0x1ed   : > { %v2893_v12 = vadd.f32 %v2792_v5, %v10390_v7  ;;  %v9864_v43 = vadd.f32 %v7174_v26, %v2895_v10  ;;  %v3606_v22 = vpop.f32.mrf.mxu0  ;;  %v10392_v26 = vld [vmem:[#allocation11_spill] sm:$0xff] }
 0x1ee   : > { %v7129_v17 = vpop.f32.mrf.mxu1 }
 0x1ef   : > { %v2898_v1 = vadd.f32 %v7129_v17, %v9686_v8  ;;  %v9867_v31 = vadd.f32 %v3545_v16, %v2893_v12  ;;  %v7190_v8 = vpop.f32.mrf.mxu0 }
 0x1f0   : > { %v2805_v14 = vpop.f32.mrf.mxu1 }
 0x1f1   : > { %v2896_v55 = vadd.f32 %v2805_v14, %v9695_v54  ;;  %v9870_v42 = vadd.f32 %v7177_v44, %v2898_v1  ;;  %v3609_v7 = vpop.f32.mrf.mxu0 }
 0x1f2   : > { %v7130_v46 = vpop.f32.mrf.mxu1 }
 0x1f3   : > { %v2899_v49 = vadd.f32 %v7130_v46, %v10391_v2  ;;  %v9873_v53 = vadd.f32 %v3558_v4, %v2896_v55 }
 0x1f4   : > { %v2808_v18 = vpop.f32.mrf.mxu1 }
 0x1f5   : > { %v2897_v9 = vadd.f32 %v2808_v18, %v10392_v26  ;;  %v9876_v28 = vadd.f32 %v7178_v21, %v2899_v49 }
 0x1f6   : > { %v7133_v40 = vpop.f32.mrf.mxu1 }
 0x1f7   : > { %v2902_v16 = vadd.f32 %v7133_v40, %v9735_v47  ;;  %v9879_v58 = vadd.f32 %v3561_v36, %v2897_v9 }
 0x1f8   : > { %v2821_v54 = vpop.f32.mrf.mxu1 }
 0x1f9   : > { %v2900_v44 = vadd.f32 %v2821_v54, %v9741_v25  ;;  %v9882_v10 = vadd.f32 %v7181_v56, %v2902_v16 }
 0x1fa   : > { %v7134_v5 = vpop.f32.mrf.mxu1 }
 0x1fb   : > { %v2903_v4 = vadd.f32 %v7134_v5, %v9750_v61  ;;  %v9885_v12 = vadd.f32 %v3574_v27, %v2900_v44 }
 0x1fc   : > { %v2824_v17 = vpop.f32.mrf.mxu1  ;;  %v7193_v47 = vpop.f32.mrf.mxu0 }
 0x1fd   : > { %v2901_v21 = vadd.f32 %v2824_v17, %v9765_v3  ;;  %v9888_v1 = vadd.f32 %v7182_v33, %v2903_v4 }
 0x1fe   : > { %v7137_v14 = vpop.f32.mrf.mxu1  ;;  %v3622_v56 = vpop.f32.mrf.mxu0 }
 0x1ff   : > { %v2906_v36 = vadd.f32 %v7137_v14, %v9771_v35  ;;  %v9891_v55 = vadd.f32 %v3577_v62, %v2901_v21 }
 0x200   : > { %v2837_v25 = vpop.f32.mrf.mxu1  ;;  %v7194_v27 = vpop.f32.mrf.mxu0 }
 0x201   : > { %v2904_v46 = vadd.f32 %v2837_v25, %v9777_v34  ;;  %v9894_v2 = vadd.f32 %v7185_v51, %v2906_v36 }
 0x202   : > { %v7138_v61 = vpop.f32.mrf.mxu1  ;;  %v3625_v33 = vpop.f32.mrf.mxu0 }
 0x203   : > { %v2907_v49 = vadd.f32 %v7138_v61, %v9783_v6  ;;  %v9897_v18 = vadd.f32 %v3590_v32, %v2904_v46 }
 0x204   : > { %v2840_v3 = vpop.f32.mrf.mxu1  ;;  %v7261_v62 = vpop.f32.mrf.mxu0 }
 0x205   : > { %10393 = vst [vmem:[#allocation12_spill] sm:$0xff] %v9897_v18  ;;  %v2905_v26 = vadd.f32 %v2840_v3, %v9793_v30  ;;  %v9900_v9 = vadd.f32 %v7186_v52, %v2907_v49 }
 0x206   : > { %v7141_v35 = vpop.f32.mrf.mxu1  ;;  %v4393_v51 = vpop.f32.mrf.mxu0 }
 0x207   : > { %10394 = vst [vmem:[#allocation13_spill] sm:$0xff] %v9900_v9  ;;  %v2910_v40 = vadd.f32 %v7141_v35, %v9797_v45  ;;  %v9903_v16 = vadd.f32 %v3593_v29, %v2905_v26 }
 0x208   : > { %v2853_v34 = vpop.f32.mrf.mxu1  ;;  %v9908_v32 = vpop.f32.mrf.mxu0 }
 0x209   : > { %10395 = vst [vmem:[#allocation16_spill] sm:$0xff] %v9903_v16  ;;  %v2908_v54 = vadd.f32 %v2853_v34, %v9801_v37  ;;  %v9906_v44 = vadd.f32 %v7189_v20, %v2910_v40 }
 0x20a   : > { %v7142_v6 = vpop.f32.mrf.mxu1  ;;  %v9913_v4 = vpop.f32.mrf.mxu0 }
 0x20b   : > { %v2911_v5 = vadd.f32 %v7142_v6, %v9805_v63  ;;  %v9911_v30 = vadd.f32 %v3606_v22, %v2908_v54 }
 0x20c   : > { %v2856_v52 = vpop.f32.mrf.mxu1  ;;  %v7265_v21 = vpop.f32.mrf.mxu0 }
 0x20d   : > { %10396 = vst [vmem:[#allocation18_spill] sm:$0xff] %v9911_v30  ;;  %v2909_v45 = vadd.f32 %v2856_v52, %v9809_v15  ;;  %v9916_v29 = vadd.f32 %v7190_v8, %v2911_v5 }
 0x20e   : > { %v7145_v17 = vpop.f32.mrf.mxu1  ;;  %v9921_v36 = vpop.f32.mrf.mxu0 }
 0x20f   : > { %10397 = vst [vmem:[#allocation20_spill] sm:$0xff] %v9916_v29  ;;  %v2914_v37 = vadd.f32 %v7145_v17, %v9813_v19  ;;  %v9919_v20 = vadd.f32 %v3609_v7, %v2909_v45 }
 0x210   : > { %v2869_v14 = vpop.f32.mrf.mxu1  ;;  %v9926_v46 = vpop.f32.mrf.mxu0 }
 0x211   : > { %10398 = vst [vmem:[#allocation6_spill] sm:$0xff] %v9919_v20  ;;  %v2912_v63 = vadd.f32 %v2869_v14, %v9817_v60  ;;  %v9924_v22 = vadd.f32 %v7193_v47, %v2914_v37 }
 0x212   : > { %v7146_v25 = vpop.f32.mrf.mxu1  ;;  %v9931_v49 = vpop.f32.mrf.mxu0 }
 0x213   : > { %v2915_v15 = vadd.f32 %v7146_v25, %v9821_v39  ;;  %v9929_v8 = vadd.f32 %v3622_v56, %v2912_v63 }
 0x214   : > { %v2872_v61 = vpop.f32.mrf.mxu1  ;;  %v7269_v26 = vpop.f32.mrf.mxu0 }
 0x215   : > { %10399 = vst [vmem:[#allocation24_spill] sm:$0xff] %v9929_v8  ;;  %v2913_v19 = vadd.f32 %v2872_v61, %v9825_v59  ;;  %v9934_v7 = vadd.f32 %v7194_v27, %v2915_v15 }
 0x216   : > { %v7213_v3 = vpop.f32.mrf.mxu1  ;;  %v9939_v40 = vpop.f32.mrf.mxu0 }
 0x217   : > { %10400 = vst [vmem:[#allocation33_spill] sm:$0xff] %v9934_v7  ;;  %v4136_v60 = vadd.f32 %v7213_v3, %v9829_v50  ;;  %v9937_v47 = vadd.f32 %v3625_v33, %v2913_v19 }
 0x218   : > { %v4007_v35 = vpop.f32.mrf.mxu1  ;;  %v9946_v54 = vpop.f32.mrf.mxu0 }
 0x219   : > { %10401 = vst [vmem:[#allocation26_spill] sm:$0xff] %v9937_v47  ;;  %v4134_v39 = vadd.f32 %v4007_v35, %v9833_v13  ;;  %v9942_v56 = vadd.f32 %v7261_v62, %v4136_v60 }
 0x21a   : > { %v9944_v34 = vpop.f32.mrf.mxu1  ;;  %v9952_v6 = vpop.f32.mrf.mxu0 }
 0x21b   : > { %v9948_v59 = vadd.f32 %v4393_v51, %v4134_v39 }
 0x21c   : > { %v9950_v27 = vpop.f32.mrf.mxu1  ;;  %v7273_v33 = vpop.f32.mrf.mxu0 }
 0x21e   : > { %v7217_v50 = vpop.f32.mrf.mxu1  ;;  %v9957_v45 = vpop.f32.mrf.mxu0 }
 0x21f   : > { %v4140_v5 = vadd.f32 %v7217_v50, %v9845_v38 }
 0x220   : > { %v9955_v52 = vpop.f32.mrf.mxu1  ;;  %v9963_v17 = vpop.f32.mrf.mxu0 }
 0x221   : > { %v9959_v13 = vadd.f32 %v7265_v21, %v4140_v5 }
 0x222   : > { %v9961_v62 = vpop.f32.mrf.mxu1  ;;  %v9967_v37 = vpop.f32.mrf.mxu0 }
 0x224   : > { %v9965_v51 = vpop.f32.mrf.mxu1  ;;  %v7277_v63 = vpop.f32.mrf.mxu0 }
 0x226   : > { %v7221_v14 = vpop.f32.mrf.mxu1  ;;  %v9972_v38 = vpop.f32.mrf.mxu0 }
 0x227   : > { %v4144_v25 = vadd.f32 %v7221_v14, %v9858_v57  ;;  %10402 = vst [vmem:[#allocation27_spill] sm:$0xff] %v9972_v38 }
 0x228   : > { %v9970_v15 = vpop.f32.mrf.mxu1  ;;  %v9978_v19 = vpop.f32.mrf.mxu0 }
 0x229   : > { %v9974_v61 = vadd.f32 %v7269_v26, %v4144_v25  ;;  %10403 = vst [vmem:[#allocation29_spill] sm:$0xff] %v9978_v19 }
 0x22a   : > { %v9976_v21 = vpop.f32.mrf.mxu1  ;;  %v9982_v60 = vpop.f32.mrf.mxu0 }
 0x22b   : > { %10404 = vst [vmem:[#allocation35_spill] sm:$0xff] %v9982_v60 }
 0x22c   : > { %v9980_v3 = vpop.f32.mrf.mxu1  ;;  %v7281_v39 = vpop.f32.mrf.mxu0 }
 0x22e   : > { %v7225_v35 = vpop.f32.mrf.mxu1  ;;  %v9987_v57 = vpop.f32.mrf.mxu0 }
 0x22f   : > { %v4148_v50 = vadd.f32 %v7225_v35, %v9870_v42  ;;  %10405 = vst [vmem:[#allocation37_spill] sm:$0xff] %v9987_v57 }
 0x230   : > { %v9985_v5 = vpop.f32.mrf.mxu1  ;;  %v9993_v25 = vpop.f32.mrf.mxu0 }
 0x231   : > { %v9989_v14 = vadd.f32 %v7273_v33, %v4148_v50  ;;  %10406 = vst [vmem:[#allocation14_spill] sm:$0xff] %v9993_v25 }
 0x232   : > { %v9991_v26 = vpop.f32.mrf.mxu1  ;;  %v9997_v7 = vpop.f32.mrf.mxu0 }
 0x233   : > { %10407 = vst [vmem:[#allocation36_spill] sm:$0xff] %v9997_v7 }
 0x234   : > { %v9995_v47 = vpop.f32.mrf.mxu1  ;;  %v7285_v20 = vpop.f32.mrf.mxu0 }
 0x236   : > { %v7229_v8 = vpop.f32.mrf.mxu1  ;;  %v10002_v42 = vpop.f32.mrf.mxu0 }
 0x237   : > { %v4152_v29 = vadd.f32 %v7229_v8, %v9882_v10  ;;  %10408 = vst [vmem:[#allocation17_spill] sm:$0xff] %v10002_v42 }
 0x238   : > { %v10000_v30 = vpop.f32.mrf.mxu1  ;;  %v10008_v50 = vpop.f32.mrf.mxu0 }
 0x239   : > { %v10004_v35 = vadd.f32 %v7277_v63, %v4152_v29  ;;  %10410 = vst [vmem:[#allocation19_spill] sm:$0xff] %v10008_v50 }
 0x23a   : > { %v10006_v33 = vpop.f32.mrf.mxu1  ;;  %v10012_v25 = vpop.f32.mrf.mxu0 }
 0x23b   : > { %10409 = vst [vmem:[#allocation3_spill] sm:$0xff] %v10004_v35  ;;  %10412 = vst [vmem:[#allocation21_spill] sm:$0xff] %v10012_v25 }
 0x23c   : > { %v10010_v57 = vpop.f32.mrf.mxu1  ;;  %v7289_v7 = vpop.f32.mrf.mxu0 }
 0x23d   : > { %10411 = vst [vmem:[#allocation38_spill] sm:$0xff] %v10010_v57 }
 0x23e   : > { %v7233_v16 = vpop.f32.mrf.mxu1  ;;  %v10017_v10 = vpop.f32.mrf.mxu0 }
 0x23f   : > { %v4156_v60 = vadd.f32 %v7233_v16, %v9894_v2  ;;  %10414 = vst [vmem:[#allocation23_spill] sm:$0xff] %v10017_v10 }
 0x240   : > { %v10015_v9 = vpop.f32.mrf.mxu1  ;;  %v10023_v63 = vpop.f32.mrf.mxu0 }
 0x241   : > { %10413 = vst [vmem:[#allocation22_spill] sm:$0xff] %v10015_v9  ;;  %v10019_v8 = vadd.f32 %v7281_v39, %v4156_v60  ;;  %10417 = vst [vmem:[#allocation30_spill] sm:$0xff] %v10023_v63 }
 0x242   : > { %v10021_v29 = vpop.f32.mrf.mxu1  ;;  %v10027_v50 = vpop.f32.mrf.mxu0 }
 0x243   : > { %10415 = vst [vmem:[#allocation25_spill] sm:$0xff] %v10019_v8  ;;  %10416 = vst [vmem:[#allocation28_spill] sm:$0xff] %v10021_v29 }
 0x244   : > { %v10025_v42 = vpop.f32.mrf.mxu1  ;;  %10419 = vst [vmem:[#allocation32_spill] sm:$0xff] %v10027_v50  ;;  %v7357_v25 = vpop.f32.mrf.mxu0 }
 0x245   : > { %10418 = vst [vmem:[#allocation31_spill] sm:$0xff] %v10025_v42 }
 0x246   : > { %v7237_v18 = vpop.f32.mrf.mxu1  ;;  %v5643_v2 = vpop.f32.mrf.mxu0 }
 0x247   : > { %v4160_v35 = vadd.f32 %v7237_v18, %v9906_v44 }
 0x248   : > { %v10030_v19 = vpop.f32.mrf.mxu1  ;;  %v7358_v60 = vpop.f32.mrf.mxu0 }
 0x249   : > { %10420 = vst [vmem:[#allocation15_spill] sm:$0xff] %v10030_v19  ;;  %v10032_v16 = vadd.f32 %v7285_v20, %v4160_v35  ;;  %v4138_v19 = vadd.f32 %v9955_v52, %v9849_v0 }
 0x24a   : > { %v10034_v10 = vpop.f32.mrf.mxu1  ;;  %v5646_v8 = vpop.f32.mrf.mxu0 }
 0x24b   : > { %10421 = vst [vmem:[#allocation5_spill] sm:$0xff] %v10032_v16  ;;  %10422 = vst [vmem:[#allocation7_spill] sm:$0xff] %v10034_v10  ;;  %v4137_v16 = vadd.f32 %v9944_v34, %v9837_v24 }
 0x24c   : > { %v10036_v39 = vpop.f32.mrf.mxu1  ;;  %v7361_v29 = vpop.f32.mrf.mxu0 }
 0x24d   : > { %10423 = vst [vmem:[#allocation4_spill] sm:$0xff] %v10036_v39 }
 0x24e   : > { %v7241_v63 = vpop.f32.mrf.mxu1  ;;  %v5659_v9 = vpop.f32.mrf.mxu0 }
 0x24f   : > { %v4164_v42 = vadd.f32 %v7241_v63, %v9924_v22  ;;  %v4135_v22 = vadd.f32 %v9950_v27, %v9841_v48  ;;  %v4141_v48 = vadd.f32 %v9961_v62, %v9852_v41 }
 0x250   : > { %v10039_v50 = vpop.f32.mrf.mxu1  ;;  %v7362_v44 = vpop.f32.mrf.mxu0 }
 0x251   : > { %10424 = vst [vmem:[#allocation34_spill] sm:$0xff] %v10039_v50  ;;  %v10041_v38 = vadd.f32 %v7289_v7, %v4164_v42  ;;  %v4521_v34 = vadd.f32 %v9913_v4, %v4135_v22  ;;  %v4142_v22 = vadd.f32 %v9970_v15, %v9861_v11 }
 0x252   : > { %v10043_v18 = vpop.f32.mrf.mxu1  ;;  %v10047_v35 = vpop.f32.mrf.mxu0 }
 0x253   : > { %10425 = vst [vmem:[#allocation8_spill] sm:$0xff] %v10041_v38  ;;  %10426 = vst [vmem:[#allocation9_spill] sm:$0xff] %v10043_v18  ;;  %v4523_v38 = vadd.f32 %v9908_v32, %v4137_v16  ;;  %v4139_v32 = vadd.f32 %v9965_v51, %v9855_v23  ;;  %v4527_v23 = vadd.f32 %v9926_v46, %v4141_v48 }
 0x254   : > { %v10045_v20 = vpop.f32.mrf.mxu1  ;;  %v10051_v10 = vpop.f32.mrf.mxu0 }
 0x255   : > { %10427 = vst [vmem:[#allocation10_spill] sm:$0xff] %v10045_v20 }
 0x256   : > { %v7309_v39 = vpop.f32.mrf.mxu1  ;;  %v10055_v50 = vpop.f32.mrf.mxu0 }
 0x257   : > { %v5275_v7 = vadd.f32 %v7309_v39, %v9942_v56 }
 0x258   : > { %v5146_v63 = vpop.f32.mrf.mxu1  ;;  %v10060_v18 = vpop.f32.mrf.mxu0 }
 0x259   : > { %v5273_v42 = vadd.f32 %v5146_v63, %v9948_v59  ;;  %v5772_v56 = vadd.f32 %v7357_v25, %v5275_v7 }
 0x25a   : > { %v7310_v20 = vpop.f32.mrf.mxu1  ;;  %v10067_v57 = vpop.f32.mrf.mxu0 }
 0x25b   : > { %v5276_v24 = vadd.f32 %v7310_v20, %v4523_v38  ;;  %v5770_v39 = vadd.f32 %v5643_v2, %v5273_v42  ;;  %v4524_v38 = vadd.f32 %v9921_v36, %v4138_v19  ;;  %v6001_v36 = vmul.f32 %v5772_v56, %v5772_v56 }
 0x25c   : > { %v5149_v27 = vpop.f32.mrf.mxu1  ;;  %v10078_v4 = vpop.f32.mrf.mxu0 }
 0x25d   : > { %v5773_v59 = vadd.f32 %v7358_v60, %v5276_v24  ;;  %v5274_v63 = vadd.f32 %v5149_v27, %v4521_v34  ;;  %v5999_v2 = vmul.f32 %v5770_v39, %v5770_v39  ;;  %v4145_v34 = vadd.f32 %v9976_v21, %v9864_v43 }
 0x25e   : > { %v7313_v0 = vpop.f32.mrf.mxu1  ;;  %v10083_v51 = vpop.f32.mrf.mxu0 }
 0x25f   : > { %v6637_v41 = vpack.c.bf16 %v5773_v59, %v5772_v56  ;;  %v5771_v52 = vadd.f32 %v5646_v8, %v5274_v63  ;;  %v5279_v62 = vadd.f32 %v7313_v0, %v9959_v13  ;;  %v4525_v13 = vadd.f32 %v9931_v49, %v4139_v32 }
 0x260   : > { %v5162_v25 = vpop.f32.mrf.mxu1  ;;  %v10089_v42 = vpop.f32.mrf.mxu0  ;;  %v6002_v48 = vmul.f32 %v5773_v59, %v5773_v59 }
 0x261   : > { %6724 = vst [vmem:[%s10076_s11 + $0x8] sm:$0xff] %v6637_v41   ;;  %v6632_v16 = vpack.c.bf16 %v5771_v52, %v5770_v39  ;;  %v5962_v60 = vadd.f32 %v5771_v52, %v5770_v39  ;;  %v6000_v20 = vmul.f32 %v5771_v52, %v5771_v52  ;;  %v5277_v7 = vadd.f32 %v5162_v25, %v4524_v38 }
 0x262   : > { %v7314_v8 = vpop.f32.mrf.mxu1  ;;  %v5776_v27 = vadd.f32 %v7361_v29, %v5279_v62  ;;  %v10094_v0 = vpop.f32.mrf.mxu0  ;;  %v4143_v41 = vadd.f32 %v9980_v3, %v9867_v31  ;;  %v4528_v52 = vadd.f32 %v9939_v40, %v4142_v22  ;;  %v4531_v3 = vadd.f32 %v9946_v54, %v4145_v34 }
 0x263   : > { %6633 = vst [vmem:[%s10076_s11] sm:$0xff] %v6632_v16   ;;  %v5963_v19 = vadd.f32 %v5962_v60, %v5772_v56  ;;  %v6031_v46 = vadd.f32 %v6000_v20, %v5999_v2  ;;  %v5280_v24 = vadd.f32 %v7314_v8, %v4527_v23  ;;  %v5774_v39 = vadd.f32 %v5659_v9, %v5277_v7 }
 0x264   : > { %v5165_v63 = vpop.f32.mrf.mxu1  ;;  %v4149_v22 = vadd.f32 %v9991_v26, %v9876_v28  ;;  %v4529_v8 = vadd.f32 %v9952_v6, %v4143_v41 }
 0x265   : > { %v6032_v11 = vadd.f32 %v6031_v46, %v6001_v36  ;;  %v5964_v15 = vadd.f32 %v5963_v19, %v5773_v59  ;;  %v5777_v49 = vadd.f32 %v7362_v44, %v5280_v24  ;;  %v5278_v32 = vadd.f32 %v5165_v63, %v4525_v13  ;;  %v10099_v38 = vpop.f32.mrf.mxu0 }
 0x266   : > { %v7317_v56 = vpop.f32.mrf.mxu1  ;;  %v6003_v21 = vmul.f32 %v5774_v39, %v5774_v39  ;;  %v6005_v13 = vmul.f32 %v5776_v27, %v5776_v27 }
 0x267   : > { %v5965_v43 = vadd.f32 %v5964_v15, %v5774_v39  ;;  %v6033_v29 = vadd.f32 %v6032_v11, %v6002_v48  ;;  %v6647_v9 = vpack.c.bf16 %v5777_v49, %v5776_v27  ;;  %v5775_v62 = vadd.f32 %v10047_v35, %v5278_v32  ;;  %v10102_v23 = vpop.f32.mrf.mxu0 }
 0x268   : > { %v5178_v25 = vpop.f32.mrf.mxu1  ;;  %v5283_v59 = vadd.f32 %v7317_v56, %v9974_v61  ;;  %v4146_v35 = vadd.f32 %v9985_v5, %v9873_v53  ;;  %v6006_v5 = vmul.f32 %v5777_v49, %v5777_v49  ;;  %v4535_v32 = vadd.f32 %v9963_v17, %v4149_v22 }
 0x269   : > { %v6034_v44 = vadd.f32 %v6033_v29, %v6003_v21  ;;  %6726 = vst [vmem:[%s10076_s11 + $0x18] sm:$0xff] %v6647_v9   ;;  %v5281_v31 = vadd.f32 %v5178_v25, %v4528_v52  ;;  %v6642_v40 = vpack.c.bf16 %v5775_v62, %v5774_v39  ;;  %v5966_v2 = vadd.f32 %v5965_v43, %v5775_v62  ;;  %v10107_v20 = vpop.f32.mrf.mxu0 }
 0x26a   : > { %v6004_v16 = vmul.f32 %v5775_v62, %v5775_v62  ;;  %v7318_v60 = vpop.f32.mrf.mxu1  ;;  %v5780_v24 = vadd.f32 %v10051_v10, %v5283_v59  ;;  %v4532_v63 = vadd.f32 %v9957_v45, %v4146_v35  ;;  %v4150_v45 = vadd.f32 %v10000_v30, %v9885_v12 }
 0x26b   : > { %v5284_v7 = vadd.f32 %v7318_v60, %v4531_v3  ;;  %6725 = vst [vmem:[%s10076_s11 + $0x10] sm:$0xff] %v6642_v40   ;;  %v5967_v61 = vadd.f32 %v5966_v2, %v5776_v27  ;;  %v5778_v54 = vadd.f32 %v10055_v50, %v5281_v31  ;;  %v10116_v46 = vpop.f32.mrf.mxu0  ;;  %v4147_v27 = vadd.f32 %v9995_v47, %v9879_v58 }
 0x26c   : > { %v6035_v36 = vadd.f32 %v6034_v44, %v6004_v16  ;;  %v5181_v19 = vpop.f32.mrf.mxu1  ;;  %v4153_v29 = vadd.f32 %v10006_v33, %v9888_v1  ;;  %v6009_v62 = vmul.f32 %v5780_v24, %v5780_v24 }
 0x26d   : > { %v5781_v34 = vadd.f32 %v10060_v18, %v5284_v7  ;;  %v5282_v53 = vadd.f32 %v5181_v19, %v4529_v8  ;;  %v5968_v26 = vadd.f32 %v5967_v61, %v5777_v49  ;;  %v10120_v6 = vpop.f32.mrf.mxu0  ;;  %v6007_v10 = vmul.f32 %v5778_v54, %v5778_v54  ;;  %v10431_v19 = vld [vmem:[#allocation3_spill] sm:$0xff] }
 0x26e   : > { %v6036_v28 = vadd.f32 %v6035_v36, %v6005_v13  ;;  %v7321_v48 = vpop.f32.mrf.mxu1  ;;  %v4533_v9 = vadd.f32 %v9967_v37, %v4147_v27  ;;  %v10428_v37 = vld [vmem:[#allocation38_spill] sm:$0xff]  ;;  %v10430_v13 = vld [vmem:[#allocation29_spill] sm:$0xff] }
 0x26f   : > { %v6657_v39 = vpack.c.bf16 %v5781_v34, %v5780_v24  ;;  %v5779_v50 = vadd.f32 %v10067_v57, %v5282_v53  ;;  %v5969_v11 = vadd.f32 %v5968_v26, %v5778_v54  ;;  %v10127_v41 = vpop.f32.mrf.mxu0  ;;  %v5287_v52 = vadd.f32 %v7321_v48, %v9989_v14  ;;  %v10433_v26 = vld [vmem:[#allocation22_spill] sm:$0xff]  ;;  %v10434_v27 = vld [vmem:[#allocation13_spill] sm:$0xff] }
 0x270   : > { %v6037_v18 = vadd.f32 %v6036_v28, %v6006_v5  ;;  %v5194_v15 = vpop.f32.mrf.mxu1  ;;  %v6010_v12 = vmul.f32 %v5781_v34, %v5781_v34  ;;  %v4151_v16 = vadd.f32 %v10428_v37, %v9891_v55  ;;  %v4539_v61 = vadd.f32 %v10430_v13, %v4153_v29 }
 0x271   : > { %6728 = vst [vmem:[%s10076_s11 + $0x28] sm:$0xff] %v6657_v39   ;;  %v6652_v49 = vpack.c.bf16 %v5779_v50, %v5778_v54  ;;  %v6008_v56 = vmul.f32 %v5779_v50, %v5779_v50  ;;  %v5285_v58 = vadd.f32 %v5194_v15, %v4532_v63  ;;  %v5970_v43 = vadd.f32 %v5969_v11, %v5779_v50  ;;  %v10131_v21 = vpop.f32.mrf.mxu0  ;;  %v10435_v39 = vld [vmem:[#allocation28_spill] sm:$0xff]  ;;  %v10436_v11 = vld [vmem:[#allocation35_spill] sm:$0xff] }
 0x272   : > { %v6038_v47 = vadd.f32 %v6037_v18, %v6007_v10  ;;  %v7322_v57 = vpop.f32.mrf.mxu1  ;;  %v5784_v31 = vadd.f32 %v10078_v4, %v5287_v52  ;;  %v4157_v50 = vadd.f32 %v10435_v39, %v10434_v27  ;;  %v4537_v10 = vadd.f32 %v10436_v11, %v4151_v16  ;;  %v10447_v11 = vld [vmem:[#allocation6_spill] sm:$0xff] }
 0x273   : > { %6727 = vst [vmem:[%s10076_s11 + $0x20] sm:$0xff] %v6652_v49   ;;  %v5288_v17 = vadd.f32 %v7322_v57, %v4535_v32  ;;  %v5971_v25 = vadd.f32 %v5970_v43, %v5780_v24  ;;  %v5782_v14 = vadd.f32 %v10083_v51, %v5285_v58  ;;  %v10142_v33 = vpop.f32.mrf.mxu0  ;;  %v10429_v51 = vld [vmem:[#allocation27_spill] sm:$0xff] }
 0x274   : > { %v6039_v44 = vadd.f32 %v6038_v47, %v6008_v56  ;;  %v5197_v59 = vpop.f32.mrf.mxu1  ;;  %v4536_v22 = vadd.f32 %v10429_v51, %v4150_v45  ;;  %v6013_v18 = vmul.f32 %v5784_v31, %v5784_v31 }
 0x275   : > { %v5785_v3 = vadd.f32 %v10089_v42, %v5288_v17  ;;  %v5286_v40 = vadd.f32 %v5197_v59, %v4533_v9  ;;  %v5972_v2 = vadd.f32 %v5971_v25, %v5781_v34  ;;  %v6011_v4 = vmul.f32 %v5782_v14, %v5782_v14  ;;  %v10151_v28 = vpop.f32.mrf.mxu0  ;;  %v10437_v9 = vld [vmem:[#allocation16_spill] sm:$0xff] }
 0x276   : > { %v6040_v30 = vadd.f32 %v6039_v44, %v6009_v62  ;;  %v7325_v1 = vpop.f32.mrf.mxu1  ;;  %v10438_v62 = vld [vmem:[#allocation31_spill] sm:$0xff] }
 0x277   : > { %v6667_v60 = vpack.c.bf16 %v5785_v3, %v5784_v31  ;;  %v5783_v35 = vadd.f32 %v10094_v0, %v5286_v40  ;;  %v5973_v7 = vadd.f32 %v5972_v2, %v5782_v14  ;;  %v5291_v24 = vadd.f32 %v7325_v1, %v10431_v19  ;;  %v10432_v0 = vld [vmem:[#allocation12_spill] sm:$0xff]  ;;  %v10162_v17 = vpop.f32.mrf.mxu0  ;;  %v10441_v1 = vld [vmem:[#allocation25_spill] sm:$0xff] }
 0x278   : > { %v6041_v42 = vadd.f32 %v6040_v30, %v6010_v12  ;;  %v5210_v8 = vpop.f32.mrf.mxu1  ;;  %v4154_v48 = vadd.f32 %v10433_v26, %v10432_v0  ;;  %v6014_v43 = vmul.f32 %v5785_v3, %v5785_v3  ;;  %v4155_v25 = vadd.f32 %v10438_v62, %v10437_v9  ;;  %v10440_v12 = vld [vmem:[#allocation14_spill] sm:$0xff] }
 0x279   : > { %6730 = vst [vmem:[%s10076_s11 + $0x38] sm:$0xff] %v6667_v60   ;;  %v6662_v36 = vpack.c.bf16 %v5783_v35, %v5782_v14  ;;  %v6012_v54 = vmul.f32 %v5783_v35, %v5783_v35  ;;  %v5289_v34 = vadd.f32 %v5210_v8, %v4536_v22  ;;  %v5974_v55 = vadd.f32 %v5973_v7, %v5783_v35  ;;  %v7382_v22 = vpop.f32.mrf.mxu0  ;;  %v10443_v7 = vld [vmem:[#allocation15_spill] sm:$0xff] }
 0x27a   : > { %v6042_v53 = vadd.f32 %v6041_v42, %v6011_v4  ;;  %v7326_v5 = vpop.f32.mrf.mxu1  ;;  %v5788_v52 = vadd.f32 %v10099_v38, %v5291_v24  ;;  %v4543_v30 = vadd.f32 %v10440_v12, %v4157_v50  ;;  %v10444_v42 = vld [vmem:[#allocation20_spill] sm:$0xff]  ;;  %v10445_v8 = vld [vmem:[#allocation7_spill] sm:$0xff]  ;;  %v10456_v12 = vld [vmem:[#allocation21_spill] sm:$0xff] }
 0x27b   : > { %6729 = vst [vmem:[%s10076_s11 + $0x30] sm:$0xff] %v6662_v36   ;;  %v5292_v63 = vadd.f32 %v7326_v5, %v4539_v61  ;;  %v5975_v15 = vadd.f32 %v5974_v55, %v5784_v31  ;;  %v5786_v49 = vadd.f32 %v10102_v23, %v5289_v34  ;;  %v10439_v23 = vld [vmem:[#allocation37_spill] sm:$0xff]  ;;  %v4161_v13 = vadd.f32 %v10445_v8, %v10444_v42  ;;  %v10446_v36 = vld [vmem:[#allocation36_spill] sm:$0xff] }
 0x27c   : > { %v6043_v32 = vadd.f32 %v6042_v53, %v6012_v54  ;;  %v5213_v56 = vpop.f32.mrf.mxu1  ;;  %v4540_v59 = vadd.f32 %v10439_v23, %v4154_v48  ;;  %v4541_v54 = vadd.f32 %v10446_v36, %v4155_v25  ;;  %v6017_v19 = vmul.f32 %v5788_v52, %v5788_v52  ;;  %v10453_v23 = vld [vmem:[#allocation34_spill] sm:$0xff] }
 0x27d   : > { %v5789_v58 = vadd.f32 %v10107_v20, %v5292_v63  ;;  %v5290_v47 = vadd.f32 %v5213_v56, %v4537_v10  ;;  %v5976_v45 = vadd.f32 %v5975_v15, %v5785_v3  ;;  %v6015_v38 = vmul.f32 %v5786_v49, %v5786_v49  ;;  %v5742_v63 = vpop.f32.mrf.mxu0  ;;  %v10448_v10 = vld [vmem:[#allocation4_spill] sm:$0xff] }
 0x27e   : > { %v6044_v57 = vadd.f32 %v6043_v32, %v6013_v18  ;;  %v7329_v29 = vpop.f32.mrf.mxu1  ;;  %v4159_v18 = vadd.f32 %v10448_v10, %v10447_v11 }
 0x27f   : > { %v6677_v44 = vpack.c.bf16 %v5789_v58, %v5788_v52  ;;  %v5787_v14 = vadd.f32 %v10116_v46, %v5290_v47  ;;  %v5977_v31 = vadd.f32 %v5976_v45, %v5786_v49  ;;  %v5295_v37 = vadd.f32 %v7329_v29, %v10441_v1  ;;  %v10442_v46 = vld [vmem:[#allocation18_spill] sm:$0xff]  ;;  %v10450_v47 = vld [vmem:[#allocation19_spill] sm:$0xff]  ;;  %v10451_v45 = vld [vmem:[#allocation5_spill] sm:$0xff] }
 0x280   : > { %v6045_v20 = vadd.f32 %v6044_v57, %v6014_v43  ;;  %v5226_v40 = vpop.f32.mrf.mxu1  ;;  %v4158_v4 = vadd.f32 %v10443_v7, %v10442_v46  ;;  %v6018_v48 = vmul.f32 %v5789_v58, %v5789_v58  ;;  %v4547_v43 = vadd.f32 %v10450_v47, %v4161_v13  ;;  %v10457_v13 = vld [vmem:[#allocation26_spill] sm:$0xff] }
 0x281   : > { %6732 = vst [vmem:[%s10076_s11 + $0x48] sm:$0xff] %v6677_v44   ;;  %v6672_v3 = vpack.c.bf16 %v5787_v14, %v5786_v49  ;;  %v6016_v2 = vmul.f32 %v5787_v14, %v5787_v14  ;;  %v5293_v16 = vadd.f32 %v5226_v40, %v4540_v59  ;;  %v5978_v35 = vadd.f32 %v5977_v31, %v5787_v14  ;;  %v10449_v49 = vld [vmem:[#allocation17_spill] sm:$0xff]  ;;  %v7385_v14 = vpop.f32.mrf.mxu0 }
 0x282   : > { %v6046_v60 = vadd.f32 %v6045_v20, %v6015_v38  ;;  %v7330_v51 = vpop.f32.mrf.mxu1  ;;  %v5792_v5 = vadd.f32 %v10120_v6, %v5295_v37  ;;  %v10454_v31 = vld [vmem:[#allocation33_spill] sm:$0xff] }
 0x283   : > { %6731 = vst [vmem:[%s10076_s11 + $0x40] sm:$0xff] %v6672_v3   ;;  %v5296_v61 = vadd.f32 %v7330_v51, %v4543_v30  ;;  %v5979_v24 = vadd.f32 %v5978_v35, %v5788_v52  ;;  %v5790_v53 = vadd.f32 %v10127_v41, %v5293_v16  ;;  %v4544_v41 = vadd.f32 %v10449_v49, %v4158_v4  ;;  %v10455_v38 = vld [vmem:[#allocation9_spill] sm:$0xff]  ;;  %v5755_v8 = vpop.f32.mrf.mxu0 }
 0x284   : > { %v6047_v34 = vadd.f32 %v6046_v60, %v6016_v2  ;;  %v5229_v55 = vpop.f32.mrf.mxu1  ;;  %v4165_v20 = vadd.f32 %v10455_v38, %v10454_v31  ;;  %v4545_v30 = vadd.f32 %v10456_v12, %v4159_v18  ;;  %v6021_v3 = vmul.f32 %v5792_v5, %v5792_v5 }
 0x285   : > { %v5793_v0 = vadd.f32 %v10131_v21, %v5296_v61  ;;  %v5294_v26 = vadd.f32 %v5229_v55, %v4541_v54  ;;  %v5980_v39 = vadd.f32 %v5979_v24, %v5789_v58  ;;  %v6019_v6 = vmul.f32 %v5790_v53, %v5790_v53  ;;  %v10458_v61 = vld [vmem:[#allocation10_spill] sm:$0xff]  ;;  %v10459_v24 = vld [vmem:[#allocation23_spill] sm:$0xff]  ;;  %v7386_v10 = vpop.f32.mrf.mxu0 }
 0x286   : > { %v6048_v27 = vadd.f32 %v6047_v34, %v6017_v19  ;;  %v7333_v50 = vpop.f32.mrf.mxu1  ;;  %v4163_v36 = vadd.f32 %v10458_v61, %v10457_v13 }
 0x287   : > { %v6687_v15 = vpack.c.bf16 %v5793_v0, %v5792_v5  ;;  %v5791_v32 = vadd.f32 %v10142_v33, %v5294_v26  ;;  %v5981_v56 = vadd.f32 %v5980_v39, %v5790_v53  ;;  %v5299_v29 = vadd.f32 %v7333_v50, %v10451_v45  ;;  %v10452_v33 = vld [vmem:[#allocation24_spill] sm:$0xff] }
 0x288   : > { %v6049_v52 = vadd.f32 %v6048_v27, %v6018_v48  ;;  %v5242_v21 = vpop.f32.mrf.mxu1  ;;  %v4162_v59 = vadd.f32 %v10453_v23, %v10452_v33  ;;  %v6022_v46 = vmul.f32 %v5793_v0, %v5793_v0 }
 0x289   : > { %6734 = vst [vmem:[%s10076_s11 + $0x58] sm:$0xff] %v6687_v15   ;;  %v6682_v57 = vpack.c.bf16 %v5791_v32, %v5790_v53  ;;  %v6020_v58 = vmul.f32 %v5791_v32, %v5791_v32  ;;  %v5297_v9 = vadd.f32 %v5242_v21, %v4544_v41  ;;  %v5982_v25 = vadd.f32 %v5981_v56, %v5791_v32  ;;  %v10462_v15 = vld [vmem:[#allocation32_spill] sm:$0xff] }
 0x28a   : > { %v6050_v62 = vadd.f32 %v6049_v52, %v6019_v6  ;;  %v7334_v44 = vpop.f32.mrf.mxu1  ;;  %v5796_v60 = vadd.f32 %v10151_v28, %v5299_v29  ;;  %v4548_v34 = vadd.f32 %v10459_v24, %v4162_v59  ;;  %v4549_v32 = vadd.f32 %v10462_v15, %v4163_v36  ;;  %v5758_v29 = vpop.f32.mrf.mxu0 }
 0x28b   : > { %6733 = vst [vmem:[%s10076_s11 + $0x50] sm:$0xff] %v6682_v57   ;;  %v5300_v40 = vadd.f32 %v7334_v44, %v4547_v43  ;;  %v5983_v2 = vadd.f32 %v5982_v25, %v5792_v5  ;;  %v5794_v37 = vadd.f32 %v10162_v17, %v5297_v9 }
 0x28c   : > { %v6051_v1 = vadd.f32 %v6050_v62, %v6020_v58  ;;  %v5245_v16 = vpop.f32.mrf.mxu1  ;;  %v6025_v49 = vmul.f32 %v5796_v60, %v5796_v60 }
 0x28d   : > { %v5797_v35 = vadd.f32 %v7382_v22, %v5300_v40  ;;  %v5298_v51 = vadd.f32 %v5245_v16, %v4545_v30  ;;  %v5984_v4 = vadd.f32 %v5983_v2, %v5793_v0  ;;  %v6023_v53 = vmul.f32 %v5794_v37, %v5794_v37  ;;  %v10460_v22 = vld [vmem:[#allocation30_spill] sm:$0xff]  ;;  %v10461_v0 = vld [vmem:[#allocation8_spill] sm:$0xff] }
 0x28e   : > { %v6052_v7 = vadd.f32 %v6051_v1, %v6021_v3  ;;  %v7337_v42 = vpop.f32.mrf.mxu1  ;;  %v4551_v5 = vadd.f32 %v10460_v22, %v4165_v20 }
 0x28f   : > { %v6697_v54 = vpack.c.bf16 %v5797_v35, %v5796_v60  ;;  %v5795_v19 = vadd.f32 %v5742_v63, %v5298_v51  ;;  %v5985_v17 = vadd.f32 %v5984_v4, %v5794_v37  ;;  %v5303_v27 = vadd.f32 %v7337_v42, %v10461_v0 }
 0x290   : > { %v6053_v55 = vadd.f32 %v6052_v7, %v6022_v46  ;;  %v5258_v28 = vpop.f32.mrf.mxu1  ;;  %v6026_v57 = vmul.f32 %v5797_v35, %v5797_v35 }
 0x291   : > { %6736 = vst [vmem:[%s10076_s11 + $0x68] sm:$0xff] %v6697_v54   ;;  %v6692_v26 = vpack.c.bf16 %v5795_v19, %v5794_v37  ;;  %v6024_v48 = vmul.f32 %v5795_v19, %v5795_v19  ;;  %v5301_v39 = vadd.f32 %v5258_v28, %v4548_v34  ;;  %v5986_v11 = vadd.f32 %v5985_v17, %v5795_v19 }
 0x292   : > { %v6054_v50 = vadd.f32 %v6053_v55, %v6023_v53  ;;  %v7338_v18 = vpop.f32.mrf.mxu1  ;;  %v5800_v21 = vadd.f32 %v7385_v14, %v5303_v27 }
 0x293   : > { %6735 = vst [vmem:[%s10076_s11 + $0x60] sm:$0xff] %v6692_v26   ;;  %v5304_v63 = vadd.f32 %v7338_v18, %v4551_v5  ;;  %v5987_v41 = vadd.f32 %v5986_v11, %v5796_v60  ;;  %v5798_v6 = vadd.f32 %v5755_v8, %v5301_v39 }
 0x294   : > { %v6055_v56 = vadd.f32 %v6054_v50, %v6024_v48  ;;  %v5261_v52 = vpop.f32.mrf.mxu1  ;;  %v6029_v20 = vmul.f32 %v5800_v21, %v5800_v21 }
 0x295   : > { %v5801_v47 = vadd.f32 %v7386_v10, %v5304_v63  ;;  %v5302_v43 = vadd.f32 %v5261_v52, %v4549_v32  ;;  %v5988_v45 = vadd.f32 %v5987_v41, %v5797_v35  ;;  %v6027_v44 = vmul.f32 %v5798_v6, %v5798_v6 }
 0x296   : > { %v6056_v58 = vadd.f32 %v6055_v56, %v6025_v49 }
 0x297   : > { %v6707_v9 = vpack.c.bf16 %v5801_v47, %v5800_v21  ;;  %v5799_v62 = vadd.f32 %v5758_v29, %v5302_v43  ;;  %v5989_v25 = vadd.f32 %v5988_v45, %v5798_v6  ;;  %v6030_v12 = vmul.f32 %v5801_v47, %v5801_v47 }
 0x298   : > { %v6057_v33 = vadd.f32 %v6056_v58, %v6026_v57 }
 0x299   : > { %6738 = vst [vmem:[%s10076_s11 + $0x78] sm:$0xff] %v6707_v9   ;;  %v6702_v23 = vpack.c.bf16 %v5799_v62, %v5798_v6  ;;  %v6028_v59 = vmul.f32 %v5799_v62, %v5799_v62  ;;  %v5990_v38 = vadd.f32 %v5989_v25, %v5799_v62 }
 0x29a   : > { %v6058_v31 = vadd.f32 %v6057_v33, %v6027_v44 }
 0x29b   : > { %6737 = vst [vmem:[%s10076_s11 + $0x70] sm:$0xff] %v6702_v23   ;;  %v5991_v14 = vadd.f32 %v5990_v38, %v5800_v21 }
 0x29c   : > { %v6059_v40 = vadd.f32 %v6058_v31, %v6028_v59 }
 0x29d   : > { %v5992_v30 = vadd.f32 %v5991_v14, %v5801_v47 }
 0x29e   : > { %v6060_v3 = vadd.f32 %v6059_v40, %v6029_v20 }
 0x29f   : > { %v5993_v2 = vrot.slane %v5992_v30, 4 }
 0x2a0   : > { %v6061_v1 = vadd.f32 %v6060_v3, %v6030_v12 }
 0x2a1   : > { %v5994_v37 = vadd.f32 %v5993_v2, %v5992_v30 }
 0x2a2   : > { %v6062_v16 = vrot.slane %v6061_v1, 4 }
 0x2a3   : > { %v5995_v60 = vrot.slane %v5994_v37, 2 }
 0x2a4   : > { %v6063_v35 = vadd.f32 %v6062_v16, %v6061_v1 }
 0x2a5   : > { %v5996_v51 = vadd.f32 %v5995_v60, %v5994_v37 }
 0x2a6   : > { %v6064_v46 = vrot.slane %v6063_v35, 2 }
 0x2a7   : > { %v5997_v7 = vrot.slane %v5996_v51, 1 }
 0x2a8   : > { %v6065_v4 = vadd.f32 %v6064_v46, %v6063_v35 }
 0x2a9   : > { %v5998_v8 = vadd.f32 %v5997_v7, %v5996_v51 }
 0x2aa   : > { %v6066_v42 = vrot.slane %v6065_v4, 1 }
 0x2ac   : > { %v6067_v13 = vadd.f32 %v6066_v42, %v6065_v4 }
 0x2ae   : > { %v6069_v61 = vsel %vm892_vm5, %v5998_v8, %v6067_v13 }
 0x2af   : > { %6070 = vst [vmem:[%s235_s14] sm:$0x3] %v6069_v61 }
 0x2b0 PF: > { %s16_s18 = sadd.s32 1, %s7567_s18  }
 0x2b1   : > { %p13_p4 = scmp.ge.s32.totalorder %s16_s18, 4  }
 0x2b3   :  { %15 = sbr.rel (!%p13_p4) target bundleno = 1 (0x1), region = 80 }

</bundles_post_ra>
